<compile_context>
chip_gen: v7x
topology: tpu7x:2x2x1
jax: 0.10.0
libtpu: 0.0.40
codegen_flags: <defaults>
</compile_context>

<pallas_src>
import math

import jax
import jax.numpy as jnp
from jax.experimental import pallas as pl
from jax.experimental.pallas import tpu as pltpu


TN1 = 768      # fc1 weight column-tile width (1536 / 768 = 2 grid steps)
N7_PAD = 128   # fc7 out_features padded from 10 to one full lane tile


# ----------------------------------------------------------------------------
# Fused kernel: fc1(+BN+ReLU) streamed & fused into fc2 accumulation, then
# fc2 epilogue -> fc3(+BN+ReLU) -> fc7 on the last grid step.
# ----------------------------------------------------------------------------
def _mlp_fused_kernel(x_ref, w1q_ref, s1_ref, b1_ref,
                      w2q_ref, s2_ref, b2_ref,
                      w3_ref, b3_ref, w7_ref, b7_ref,
                      o_ref, acc2_ref):
    j = pl.program_id(0)

    @pl.when(j == 0)
    def _():
        acc2_ref[...] = jnp.zeros_like(acc2_ref)

    # fc1 (+ folded BN) + ReLU for this column tile of W1.  Int8 weights are
    # up-cast to bf16 (exact for |q| <= 127); the per-column dequant scale is
    # applied after the f32 accumulation, together with the folded bias.
    w1_tile = w1q_ref[...].astype(jnp.bfloat16)
    h1_tile = jnp.dot(x_ref[...], w1_tile, preferred_element_type=jnp.float32)
    h1_tile = jnp.maximum(h1_tile * s1_ref[...] + b1_ref[...], 0.0)
    h1_tile = h1_tile.astype(jnp.bfloat16)

    # ... immediately contracted against the matching row tile of W2.  The
    # per-output-column scale s2 distributes over the K-sum, so it is applied
    # once in the tail epilogue instead of per tile.
    w2_tile = w2q_ref[...].astype(jnp.bfloat16)
    acc2_ref[...] += jnp.dot(h1_tile, w2_tile,
                             preferred_element_type=jnp.float32)

    # Tail: finish fc2 (dequant scale + bias + ReLU), then fc3 and fc7.
    @pl.when(j == pl.num_programs(0) - 1)
    def _():
        h2 = jnp.maximum(acc2_ref[...] * s2_ref[...] + b2_ref[...], 0.0)
        h2 = h2.astype(jnp.bfloat16)
        h3 = jnp.dot(h2, w3_ref[...], preferred_element_type=jnp.float32)
        h3 = jnp.maximum(h3 + b3_ref[...], 0.0).astype(jnp.bfloat16)
        out = jnp.dot(h3, w7_ref[...], preferred_element_type=jnp.float32)
        o_ref[...] = (out + b7_ref[...]).astype(o_ref.dtype)


def mlp_fused_call(x, w1q, s1, b1, w2q, s2, b2, w3, b3, w7, b7):
    """x: (Bp, 3072) bf16; W1/W2 int8 (in,out) + f32 scales; W3/W7 bf16."""
    Bp, K1 = x.shape
    N1 = w1q.shape[1]
    N2 = w2q.shape[1]
    N3 = w3.shape[1]
    N7 = w7.shape[1]
    assert N1 % TN1 == 0

    return pl.pallas_call(
        _mlp_fused_kernel,
        out_shape=jax.ShapeDtypeStruct((Bp, N7), jnp.float32),
        grid_spec=pltpu.PrefetchScalarGridSpec(
            num_scalar_prefetch=0,
            grid=(N1 // TN1,),
            in_specs=[
                pl.BlockSpec((Bp, K1), lambda j: (0, 0)),    # x         (resident)
                pl.BlockSpec((K1, TN1), lambda j: (0, j)),   # W1q tile  (streamed)
                pl.BlockSpec((1, TN1), lambda j: (0, j)),    # s1 tile   (streamed)
                pl.BlockSpec((1, TN1), lambda j: (0, j)),    # b1 tile   (streamed)
                pl.BlockSpec((TN1, N2), lambda j: (j, 0)),   # W2q tile  (streamed)
                pl.BlockSpec((1, N2), lambda j: (0, 0)),     # s2        (resident)
                pl.BlockSpec((1, N2), lambda j: (0, 0)),     # b2        (resident)
                pl.BlockSpec((N2, N3), lambda j: (0, 0)),    # W3        (resident)
                pl.BlockSpec((1, N3), lambda j: (0, 0)),     # b3        (resident)
                pl.BlockSpec((N3, N7), lambda j: (0, 0)),    # W7        (resident)
                pl.BlockSpec((1, N7), lambda j: (0, 0)),     # b7        (resident)
            ],
            out_specs=pl.BlockSpec((Bp, N7), lambda j: (0, 0)),
            scratch_shapes=[pltpu.VMEM((Bp, N2), jnp.float32)],  # fc2 accumulator
        ),
        compiler_params=pltpu.CompilerParams(
            # The W1/W2-tile axis carries the fc2 accumulation -> sequential.
            dimension_semantics=("arbitrary",),
            # Working set ~12 MiB (int8 streams + in-kernel bf16 dequant
            # copies, double-buffered); safe on v7x's 64 MiB physical VMEM
            # as well as v5e/v6e (128 MiB).
            vmem_limit_bytes=32 << 20,
        ),
    )(x, w1q, s1, b1, w2q, s2, b2, w3, b3, w7, b7)


# ----------------------------------------------------------------------------
# Parameter construction (deterministic, PyTorch-style init, BN folded,
# streamed weights quantized to int8 with per-output-channel scales).
# ----------------------------------------------------------------------------
def _init_linear(key, in_f, out_f):
    """nn.Linear default init: U(-1/sqrt(in_f), 1/sqrt(in_f)) for W and b."""
    kw, kb = jax.random.split(key)
    bound = 1.0 / math.sqrt(in_f)
    # stored as (in_f, out_f) = PyTorch weight.T
    w = jax.random.uniform(kw, (in_f, out_f), jnp.float32, -bound, bound)
    b = jax.random.uniform(kb, (out_f,), jnp.float32, -bound, bound)
    return w, b


def _quantize_per_col(w):
    """Symmetric per-output-channel int8 quantization. Returns (q, scale)."""
    amax = jnp.max(jnp.abs(w), axis=0, keepdims=True)           # (1, out)
    scale = jnp.where(amax > 0.0, amax / 127.0, 1.0)
    q = jnp.clip(jnp.round(w / scale), -127, 127).astype(jnp.int8)
    return q, scale.astype(jnp.float32)


def make_params(key, eps=1e-5):
    """[(W1q,s1,b1), (W2q,s2,b2), (W3,b3), (W7,b7)]; BN folded, fc7 padded."""
    dims = [(3 * 32 * 32, 1536), (1536, 768), (768, 384), (384, 10)]
    keys = jax.random.split(key, len(dims))
    params = []
    for i, ((k_in, k_out), kk) in enumerate(zip(dims, keys)):
        w, b = _init_linear(kk, k_in, k_out)
        if i < 3:
            # BatchNorm1d defaults: gamma=1, beta=0, running_mean=0, running_var=1.
            gamma = jnp.ones((k_out,), jnp.float32)
            beta = jnp.zeros((k_out,), jnp.float32)
            mean = jnp.zeros((k_out,), jnp.float32)
            var = jnp.ones((k_out,), jnp.float32)
            bn_scale = gamma / jnp.sqrt(var + eps)
            w = w * bn_scale[None, :]                  # fold BN scale into W
            b = (b - mean) * bn_scale + beta           # fold BN shift into bias
        else:
            # fc7: pad output features 10 -> 128 for lane-dense stores.
            w = jnp.pad(w, ((0, 0), (0, N7_PAD - k_out)))
            b = jnp.pad(b, (0, N7_PAD - k_out))
        b = b.reshape(1, -1).astype(jnp.float32)
        if i < 2:
            # Streamed weights (W1, W2): int8 + per-output-channel f32 scale.
            wq, s = _quantize_per_col(w)
            params.append((wq, s, b))
        else:
            # Small resident weights stay bf16.
            params.append((w.astype(jnp.bfloat16), b))
    return params


# ----------------------------------------------------------------------------
# Forward pass (jitted: flatten / pad / cast fuse around one kernel launch)
# ----------------------------------------------------------------------------
@jax.jit
def mlp_forward(x_nchw, params):
    B = x_nchw.shape[0]
    x = x_nchw.reshape(B, -1)                      # torch.nn.Flatten (row-major)
    Bp = max(16, -(-B // 16) * 16)                 # pad batch to bf16 sublane pack
    if Bp != B:
        x = jnp.pad(x, ((0, Bp - B), (0, 0)))
    x = x.astype(jnp.bfloat16)
    (w1q, s1, b1), (w2q, s2, b2), (w3, b3), (w7, b7) = params
    out = mlp_fused_call(x, w1q, s1, b1, w2q, s2, b2, w3, b3, w7, b7)
    # Dropout(p=0.2) layers are identity in eval mode.
    return out[:B, :10]


def mlp_reference(x_nchw, params):
    """Pure-JAX reference with the same int8-weight / bf16-activation math."""
    B = x_nchw.shape[0]
    x = x_nchw.reshape(B, -1).astype(jnp.bfloat16)
    (w1q, s1, b1), (w2q, s2, b2), (w3, b3), (w7, b7) = params
    h = jnp.dot(x, w1q.astype(jnp.bfloat16), preferred_element_type=jnp.float32)
    h = jnp.maximum(h * s1 + b1, 0.0).astype(jnp.bfloat16)
    h = jnp.dot(h, w2q.astype(jnp.bfloat16), preferred_element_type=jnp.float32)
    h = jnp.maximum(h * s2 + b2, 0.0).astype(jnp.bfloat16)
    h = jnp.dot(h, w3, preferred_element_type=jnp.float32)
    h = jnp.maximum(h + b3, 0.0).astype(jnp.bfloat16)
    out = jnp.dot(h, w7, preferred_element_type=jnp.float32) + b7
    return out[:, :10]


if __name__ == "__main__":
    key = jax.random.PRNGKey(0)
    k_x, k_p = jax.random.split(key)

    # Small batch; spatial dims fixed by fc1's 3*32*32 input requirement.
    x = jax.random.normal(k_x, (8, 3, 32, 32), dtype=jnp.float32)
    params = make_params(k_p)

    out = mlp_forward(x, params)
    out = jax.block_until_ready(out)
    assert out.shape == (8, 10), out.shape
    assert out.dtype == jnp.float32
    assert bool(jnp.all(jnp.isfinite(out)))

    ref = mlp_reference(x, params)
    assert bool(jnp.allclose(out, ref, rtol=5e-2, atol=5e-2)), (
        float(jnp.max(jnp.abs(out - ref))))
    print("KERNEL_OK")
</pallas_src>

<mosaic_0001>
module attributes {stable_mosaic.version = 11 : i64} {
  func.func @_mlp_fused_kernel(%arg0: i32, %arg1: memref<16x3072xbf16, #tpu.memory_space<vmem>>, %arg2: memref<3072x768xi8, #tpu.memory_space<vmem>>, %arg3: memref<1x768xf32, #tpu.memory_space<vmem>>, %arg4: memref<1x768xf32, #tpu.memory_space<vmem>>, %arg5: memref<768x768xi8, #tpu.memory_space<vmem>>, %arg6: memref<1x768xf32, #tpu.memory_space<vmem>>, %arg7: memref<1x768xf32, #tpu.memory_space<vmem>>, %arg8: memref<768x384xbf16, #tpu.memory_space<vmem>>, %arg9: memref<1x384xf32, #tpu.memory_space<vmem>>, %arg10: memref<384x128xbf16, #tpu.memory_space<vmem>>, %arg11: memref<1x128xf32, #tpu.memory_space<vmem>>, %arg12: memref<16x128xf32, #tpu.memory_space<vmem>>, %arg13: memref<16x768xf32, #tpu.memory_space<vmem>>) attributes {dimension_semantics = [#tpu.dimension_semantics<arbitrary>], iteration_bounds = array<i64: 2>, scalar_prefetch = 0 : i64, scratch_operands = 1 : i64, tpu.core_type = #tpu.core_type<tc>, window_params = [{pipeline_mode = #tpu.pipeline_mode<synchronous>, transform_indices = @transform_0, window_bounds = array<i64: 16, 3072>}, {transform_indices = @transform_1, window_bounds = array<i64: 3072, 768>}, {transform_indices = @transform_2, window_bounds = array<i64: 1, 768>}, {transform_indices = @transform_3, window_bounds = array<i64: 1, 768>}, {transform_indices = @transform_4, window_bounds = array<i64: 768, 768>}, {pipeline_mode = #tpu.pipeline_mode<synchronous>, transform_indices = @transform_5, window_bounds = array<i64: 1, 768>}, {pipeline_mode = #tpu.pipeline_mode<synchronous>, transform_indices = @transform_6, window_bounds = array<i64: 1, 768>}, {pipeline_mode = #tpu.pipeline_mode<synchronous>, transform_indices = @transform_7, window_bounds = array<i64: 768, 384>}, {pipeline_mode = #tpu.pipeline_mode<synchronous>, transform_indices = @transform_8, window_bounds = array<i64: 1, 384>}, {pipeline_mode = #tpu.pipeline_mode<synchronous>, transform_indices = @transform_9, window_bounds = array<i64: 384, 128>}, {pipeline_mode = #tpu.pipeline_mode<synchronous>, transform_indices = @transform_10, window_bounds = array<i64: 1, 128>}, {pipeline_mode = #tpu.pipeline_mode<synchronous>, transform_indices = @transform_11, window_bounds = array<i64: 16, 128>}]} {
    %c0_i32 = arith.constant 0 : i32
    %0 = arith.cmpi eq, %arg0, %c0_i32 : i32
    %1 = arith.extui %0 : i1 to i32
    %c0_i32_0 = arith.constant 0 : i32
    %2 = arith.cmpi ne, %1, %c0_i32_0 : i32
    scf.if %2 {
      %cst_17 = arith.constant 0.000000e+00 : f32
      %25 = vector.broadcast %cst_17 : f32 to vector<16x768xf32>
      %c0_18 = arith.constant 0 : index
      %c0_19 = arith.constant 0 : index
      %26 = vector.load %arg13[%c0_18, %c0_19] : memref<16x768xf32, #tpu.memory_space<vmem>>, vector<16x768xf32>
      tpu.vector_store %arg13[%c0_18, %c0_19], %25 {strides = array<i32>} : memref<16x768xf32, #tpu.memory_space<vmem>>, vector<16x768xf32>,
    } else {
    }
    %c0 = arith.constant 0 : index
    %c0_1 = arith.constant 0 : index
    %3 = vector.load %arg2[%c0, %c0_1] : memref<3072x768xi8, #tpu.memory_space<vmem>>, vector<3072x768xi8>
    %4 = arith.sitofp %3 : vector<3072x768xi8> to vector<3072x768xbf16>
    %c0_2 = arith.constant 0 : index
    %c0_3 = arith.constant 0 : index
    %5 = vector.load %arg1[%c0_2, %c0_3] : memref<16x3072xbf16, #tpu.memory_space<vmem>>, vector<16x3072xbf16>
    %cst = arith.constant dense<0.000000e+00> : vector<16x768xf32>
    %6 = tpu.matmul %5, %4, %cst {dimension_numbers = #tpu.dot_dimension_numbers<[1], [0], [0], [1], [0, 0, 1, 1], [], []>} : vector<16x3072xbf16>, vector<3072x768xbf16>, vector<16x768xf32> -> vector<16x768xf32>
    %c0_4 = arith.constant 0 : index
    %c0_5 = arith.constant 0 : index
    %7 = vector.load %arg3[%c0_4, %c0_5] : memref<1x768xf32, #tpu.memory_space<vmem>>, vector<1x768xf32>
    %8 = vector.broadcast %7 : vector<1x768xf32> to vector<16x768xf32>
    %9 = arith.mulf %6, %8 : vector<16x768xf32>
    %c0_6 = arith.constant 0 : index
    %c0_7 = arith.constant 0 : index
    %10 = vector.load %arg4[%c0_6, %c0_7] : memref<1x768xf32, #tpu.memory_space<vmem>>, vector<1x768xf32>
    %11 = vector.broadcast %10 : vector<1x768xf32> to vector<16x768xf32>
    %12 = arith.addf %9, %11 : vector<16x768xf32>
    %cst_8 = arith.constant 0.000000e+00 : f32
    %13 = vector.broadcast %cst_8 : f32 to vector<16x768xf32>
    %14 = arith.maximumf %12, %13 : vector<16x768xf32>
    %15 = arith.truncf %14 : vector<16x768xf32> to vector<16x768xbf16>
    %c0_9 = arith.constant 0 : index
    %c0_10 = arith.constant 0 : index
    %16 = vector.load %arg5[%c0_9, %c0_10] : memref<768x768xi8, #tpu.memory_space<vmem>>, vector<768x768xi8>
    %17 = arith.sitofp %16 : vector<768x768xi8> to vector<768x768xbf16>
    %c0_11 = arith.constant 0 : index
    %c0_12 = arith.constant 0 : index
    %18 = vector.load %arg13[%c0_11, %c0_12] : memref<16x768xf32, #tpu.memory_space<vmem>>, vector<16x768xf32>
    %cst_13 = arith.constant dense<0.000000e+00> : vector<16x768xf32>
    %19 = tpu.matmul %15, %17, %cst_13 {dimension_numbers = #tpu.dot_dimension_numbers<[1], [0], [0], [1], [0, 0, 1, 1], [], []>} : vector<16x768xbf16>, vector<768x768xbf16>, vector<16x768xf32> -> vector<16x768xf32>
    %20 = arith.addf %18, %19 : vector<16x768xf32>
    %c0_14 = arith.constant 0 : index
    %c0_15 = arith.constant 0 : index
    %21 = vector.load %arg13[%c0_14, %c0_15] : memref<16x768xf32, #tpu.memory_space<vmem>>, vector<16x768xf32>
    tpu.vector_store %arg13[%c0_14, %c0_15], %20 {strides = array<i32>} : memref<16x768xf32, #tpu.memory_space<vmem>>, vector<16x768xf32>,
    %c1_i32 = arith.constant 1 : i32
    %22 = arith.cmpi eq, %arg0, %c1_i32 : i32
    %23 = arith.extui %22 : i1 to i32
    %c0_i32_16 = arith.constant 0 : i32
    %24 = arith.cmpi ne, %23, %c0_i32_16 : i32
    scf.if %24 {
      %c0_17 = arith.constant 0 : index
      %c0_18 = arith.constant 0 : index
      %25 = vector.load %arg13[%c0_17, %c0_18] : memref<16x768xf32, #tpu.memory_space<vmem>>, vector<16x768xf32>
      %c0_19 = arith.constant 0 : index
      %c0_20 = arith.constant 0 : index
      %26 = vector.load %arg6[%c0_19, %c0_20] : memref<1x768xf32, #tpu.memory_space<vmem>>, vector<1x768xf32>
      %27 = vector.broadcast %26 : vector<1x768xf32> to vector<16x768xf32>
      %28 = arith.mulf %25, %27 : vector<16x768xf32>
      %c0_21 = arith.constant 0 : index
      %c0_22 = arith.constant 0 : index
      %29 = vector.load %arg7[%c0_21, %c0_22] : memref<1x768xf32, #tpu.memory_space<vmem>>, vector<1x768xf32>
      %30 = vector.broadcast %29 : vector<1x768xf32> to vector<16x768xf32>
      %31 = arith.addf %28, %30 : vector<16x768xf32>
      %cst_23 = arith.constant 0.000000e+00 : f32
      %32 = vector.broadcast %cst_23 : f32 to vector<16x768xf32>
      %33 = arith.maximumf %31, %32 : vector<16x768xf32>
      %34 = arith.truncf %33 : vector<16x768xf32> to vector<16x768xbf16>
      %c0_24 = arith.constant 0 : index
      %c0_25 = arith.constant 0 : index
      %35 = vector.load %arg8[%c0_24, %c0_25] : memref<768x384xbf16, #tpu.memory_space<vmem>>, vector<768x384xbf16>
      %cst_26 = arith.constant dense<0.000000e+00> : vector<16x384xf32>
      %36 = tpu.matmul %34, %35, %cst_26 {dimension_numbers = #tpu.dot_dimension_numbers<[1], [0], [0], [1], [0, 0, 1, 1], [], []>} : vector<16x768xbf16>, vector<768x384xbf16>, vector<16x384xf32> -> vector<16x384xf32>
      %c0_27 = arith.constant 0 : index
      %c0_28 = arith.constant 0 : index
      %37 = vector.load %arg9[%c0_27, %c0_28] : memref<1x384xf32, #tpu.memory_space<vmem>>, vector<1x384xf32>
      %38 = vector.broadcast %37 : vector<1x384xf32> to vector<16x384xf32>
      %39 = arith.addf %36, %38 : vector<16x384xf32>
      %cst_29 = arith.constant 0.000000e+00 : f32
      %40 = vector.broadcast %cst_29 : f32 to vector<16x384xf32>
      %41 = arith.maximumf %39, %40 : vector<16x384xf32>
      %42 = arith.truncf %41 : vector<16x384xf32> to vector<16x384xbf16>
      %c0_30 = arith.constant 0 : index
      %c0_31 = arith.constant 0 : index
      %43 = vector.load %arg10[%c0_30, %c0_31] : memref<384x128xbf16, #tpu.memory_space<vmem>>, vector<384x128xbf16>
      %cst_32 = arith.constant dense<0.000000e+00> : vector<16x128xf32>
      %44 = tpu.matmul %42, %43, %cst_32 {dimension_numbers = #tpu.dot_dimension_numbers<[1], [0], [0], [1], [0, 0, 1, 1], [], []>} : vector<16x384xbf16>, vector<384x128xbf16>, vector<16x128xf32> -> vector<16x128xf32>
      %c0_33 = arith.constant 0 : index
      %c0_34 = arith.constant 0 : index
      %45 = vector.load %arg11[%c0_33, %c0_34] : memref<1x128xf32, #tpu.memory_space<vmem>>, vector<1x128xf32>
      %46 = vector.broadcast %45 : vector<1x128xf32> to vector<16x128xf32>
      %47 = arith.addf %44, %46 : vector<16x128xf32>
      %c0_35 = arith.constant 0 : index
      %c0_36 = arith.constant 0 : index
      %48 = vector.load %arg12[%c0_35, %c0_36] : memref<16x128xf32, #tpu.memory_space<vmem>>, vector<16x128xf32>
      tpu.vector_store %arg12[%c0_35, %c0_36], %47 {strides = array<i32>} : memref<16x128xf32, #tpu.memory_space<vmem>>, vector<16x128xf32>,
    } else {
    }
    return
  }
  func.func @transform_0(%arg0: i32) -> (i32, i32) {
    %c0_i32 = arith.constant 0 : i32
    %c0_i32_0 = arith.constant 0 : i32
    %c0_i32_1 = arith.constant 0 : i32
    return %c0_i32, %c0_i32_0 : i32, i32
  }
  func.func @transform_1(%arg0: i32) -> (i32, i32) {
    %c0_i32 = arith.constant 0 : i32
    %c0_i32_0 = arith.constant 0 : i32
    return %c0_i32, %arg0 : i32, i32
  }
  func.func @transform_2(%arg0: i32) -> (i32, i32) {
    %c0_i32 = arith.constant 0 : i32
    %c0_i32_0 = arith.constant 0 : i32
    return %c0_i32, %arg0 : i32, i32
  }
  func.func @transform_3(%arg0: i32) -> (i32, i32) {
    %c0_i32 = arith.constant 0 : i32
    %c0_i32_0 = arith.constant 0 : i32
    return %c0_i32, %arg0 : i32, i32
  }
  func.func @transform_4(%arg0: i32) -> (i32, i32) {
    %c0_i32 = arith.constant 0 : i32
    %c0_i32_0 = arith.constant 0 : i32
    return %arg0, %c0_i32 : i32, i32
  }
  func.func @transform_5(%arg0: i32) -> (i32, i32) {
    %c0_i32 = arith.constant 0 : i32
    %c0_i32_0 = arith.constant 0 : i32
    %c0_i32_1 = arith.constant 0 : i32
    return %c0_i32, %c0_i32_0 : i32, i32
  }
  func.func @transform_6(%arg0: i32) -> (i32, i32) {
    %c0_i32 = arith.constant 0 : i32
    %c0_i32_0 = arith.constant 0 : i32
    %c0_i32_1 = arith.constant 0 : i32
    return %c0_i32, %c0_i32_0 : i32, i32
  }
  func.func @transform_7(%arg0: i32) -> (i32, i32) {
    %c0_i32 = arith.constant 0 : i32
    %c0_i32_0 = arith.constant 0 : i32
    %c0_i32_1 = arith.constant 0 : i32
    return %c0_i32, %c0_i32_0 : i32, i32
  }
  func.func @transform_8(%arg0: i32) -> (i32, i32) {
    %c0_i32 = arith.constant 0 : i32
    %c0_i32_0 = arith.constant 0 : i32
    %c0_i32_1 = arith.constant 0 : i32
    return %c0_i32, %c0_i32_0 : i32, i32
  }
  func.func @transform_9(%arg0: i32) -> (i32, i32) {
    %c0_i32 = arith.constant 0 : i32
    %c0_i32_0 = arith.constant 0 : i32
    %c0_i32_1 = arith.constant 0 : i32
    return %c0_i32, %c0_i32_0 : i32, i32
  }
  func.func @transform_10(%arg0: i32) -> (i32, i32) {
    %c0_i32 = arith.constant 0 : i32
    %c0_i32_0 = arith.constant 0 : i32
    %c0_i32_1 = arith.constant 0 : i32
    return %c0_i32, %c0_i32_0 : i32, i32
  }
  func.func @transform_11(%arg0: i32) -> (i32, i32) {
    %c0_i32 = arith.constant 0 : i32
    %c0_i32_0 = arith.constant 0 : i32
    %c0_i32_1 = arith.constant 0 : i32
    return %c0_i32, %c0_i32_0 : i32, i32
  }
}

</mosaic_0001>

<bundles_post_ra>
// kernel: mlp_forward.1
= control target key start
LH: loop header
LB: loop body
LE: loop exit
PB: predicated region body
PF: predicated region fallthrough
CT: control target
= control target key end

     0   :  { %s9642_s0 = inlined_call_operand.vmem [shape: bf16[16,3072], index: 0, kind: input, shape index: {}]   ;;  %s9643_s1 = inlined_call_operand.hbm [shape: s8[3072,1536], index: 1, kind: input, shape index: {}]   ;;  %s9644_s2 = inlined_call_operand.hbm [shape: f32[1,1536], index: 2, kind: input, shape index: {}]   ;;  %s9645_s3 = inlined_call_operand.hbm [shape: f32[1,1536], index: 3, kind: input, shape index: {}]   ;;  %s9646_s4 = inlined_call_operand.hbm [shape: s8[1536,768], index: 4, kind: input, shape index: {}]   ;;  %s9647_s5 = inlined_call_operand.hbm [shape: f32[1,768], index: 5, kind: input, shape index: {}]   ;;  %s9648_s6 = inlined_call_operand.hbm [shape: f32[1,768], index: 6, kind: input, shape index: {}]   ;;  %s9649_s7 = inlined_call_operand.hbm [shape: bf16[768,384], index: 7, kind: input, shape index: {}]   ;;  %s9650_s8 = inlined_call_operand.hbm [shape: f32[1,384], index: 8, kind: input, shape index: {}]   ;;  %s9651_s9 = inlined_call_operand.hbm [shape: bf16[384,128], index: 9, kind: input, shape index: {}]   ;;  %s9652_s10 = inlined_call_operand.hbm [shape: f32[1,128], index: 10, kind: input, shape index: {}]   ;;  %s9653_s11 = inlined_call_operand.vmem [shape: f32[16,128], index: 11, kind: output, shape index: {}]  }
   0x1   :  { %9674 = sst [smem:[#allocation30_spill]] %s9642_s0 }
   0x2   :  { %9675 = sst [smem:[#allocation31_spill]] %s9644_s2 }
   0x3   :  { %9676 = sst [smem:[#allocation32_spill]] %s9647_s5 }
   0x4   :  { %9677 = sst [smem:[#allocation33_spill]] %s9648_s6 }
   0x5   :  { %9678 = sst [smem:[#allocation34_spill]] %s9649_s7 }
   0x6   :  { %9679 = sst [smem:[#allocation35_spill]] %s9650_s8 }
   0x7   :  { %9680 = sst [smem:[#allocation36_spill]] %s9653_s11 }
   0x8   :  { %16 = vsyncpa [#allocation4], 0 }
   0x9   :  { %18 = vsyncpa [#allocation4 + $0x1], 0 }
   0xa   :  { %19 = vsyncpa [#allocation6], 0 }
   0xb   :  { %21 = vsyncpa [#allocation6 + $0x1], 0 }
   0xc   :  { %22 = vsyncpa [#allocation9], 0 }
   0xd   :  { %24 = vsyncpa [#allocation9 + $0x1], 0 }
   0xe   :  { %25 = vsyncpa [#allocation12], 0 }
   0xf   :  { %26 = vsyncpa [#allocation15], 0 }
  0x10   :  { %27 = vsyncpa [#allocation18], 0  ;;  %s8077_s17 = smov 0   ;;  %s8079_s18 = smov 0  }
  0x11   :  { %s8081_s19 = smov 0   ;;  %s8083_s20 = smov 0  }
  0x12 LB: > { %9681 = sst [smem:[#allocation26_spill]] %s7991_s19  ;;  %s7997_s21 = smov [#allocation10]   ;;  %s7995_s20 = sphi %s8083_s20, %s9721_s20   ;;  %s7991_s19 = sphi %s8081_s19, %s9723_s19   ;;  %s7987_s18 = sphi %s8079_s18, %s9725_s18   ;;  %s7983_s17 = sphi %s8077_s17, %s9724_s17  }
  0x13   : > { %s326_s22 = sshll.u32 %s7997_s21, 4  ;;  %s8098_s23 = sadd.s32 4294967295, %s7995_s20   ;;  %s327_s22 = int_to_ptr.vmem [resolvable:$true] %s326_s22 }
  0x14   : > { %9682 = sst [smem:[#allocation27_spill]] %s8098_s23  ;;  %p6793_p0 = scmp.ge.s32.totalorder %s7995_s20, 1 }
  0x15   : > { %p9654_p1 = scmp.eq.s32.totalorder %s8098_s23, 0  ;;  %p310_p2 = scmp.lt.s32.totalorder %s7995_s20, 3 }
  0x16   : > { %s7998_s25 = smov [#allocation11]   ;;  %s7999_s28 = smov [#allocation14]  }
  0x17   : > { %p8104_p4 = pnand %p6793_p0, %p310_p2  ;;  %s337_s26 = sshll.u32 %s7998_s25, 4  ;;  %s8110_s26 = int_to_ptr.vmem [resolvable:$true] %s337_s26 }
  0x18   : > { %s361_s29 = sshll.u32 %s7999_s28, 4  ;;  %s9685_s5 = sld [smem:[#allocation32_spill]]  ;;  %s8118_s29 = int_to_ptr.vmem [resolvable:$true] %s361_s29 }
  0x19   : > { %s9683_s24 = scalar_select %p8104_p4, 1, 0 }
  0x1a   : > { %p7337_p5 = pneg %p8104_p4 }
  0x1c   : > { %p8114_p6 = pnand %p7337_p5, %p9654_p1 }
  0x1e   : > { %s9684_s27 = scalar_select %p8114_p6, 1, 0 }
  0x1f   : > { %s7649_s13 = scalar_lea.hbm %s9685_s5, 96  ;;  %p8128_p8 = pneg %p8114_p6 }
  0x20   : > { %p7650_p7 = scmp.ne.s32.totalorder %s9685_s5, %s7649_s13  ;;  %p7656_p11 = scmp.lt.u32.totalorder %s7649_s13, %s9685_s5 }
  0x21   : > { %s9686_s16 = scalar_select %p8128_p8, 1, 0 }
  0x22   : > { %p7652_p9 = pnand %p8128_p8, %p7650_p7 }
  0x24   : > { %p7653_p10 = pneg %p7652_p9 }
  0x26   : > { %p7658_p12 = pnand %p7656_p11, %p7653_p10 }
  0x28   : > { %7661 = shalt.err (!%p7658_p12)
}
  0x29   : > { %s7662_s28 = scalar_lea.vmem %s327_s22, 96  ;;  %p7670_p5 = scmp.lt.s32.totalorder %s327_s22, %s327_s22 }
  0x2a   : > { %p7663_p13 = scmp.ne.s32.totalorder %s327_s22, %s7662_s28  ;;  %p7671_p3 = scmp.lt.s32.totalorder %s7662_s28, %s7662_s28 }
  0x2c   : > { %p7665_p0 = pnand %p7663_p13, %p8128_p8  ;;  %p7672_p1 = por %p7671_p3, %p7670_p5 }
  0x2e   : > { %p7666_p2 = pneg %p7665_p0 }
  0x30   : > { %p7673_p4 = pnand %p7672_p1, %p7666_p2 }
  0x32   : > { %7676 = shalt.err (!%p7673_p4)
}
  0x33   : > { %7340 = dma.hbm_to_vmem [thread:$0]  (!%p8114_p6), %s9685_s5, 96, %s327_s22, [#allocation9]  }
  0x34   : > { %s9687_s6 = sld [smem:[#allocation33_spill]] }
  0x3a   : > { %s7677_s15 = scalar_lea.hbm %s9687_s6, 96 }
  0x3b   : > { %p7678_p7 = scmp.ne.s32.totalorder %s9687_s6, %s7677_s15  ;;  %p7684_p1 = scmp.lt.u32.totalorder %s7677_s15, %s9687_s6 }
  0x3d   : > { %p7680_p9 = pnand %p7678_p7, %p8128_p8 }
  0x3f   : > { %p7681_p3 = pneg %p7680_p9 }
  0x41   : > { %p7686_p4 = pnand %p7684_p1, %p7681_p3 }
  0x43   : > { %7689 = shalt.err (!%p7686_p4)
}
  0x44   : > { %s7690_s22 = scalar_lea.vmem %s8110_s26, 96  ;;  %p7698_p13 = scmp.lt.s32.totalorder %s8110_s26, %s8110_s26 }
  0x45   : > { %p7691_p10 = scmp.ne.s32.totalorder %s8110_s26, %s7690_s22  ;;  %p7699_p0 = scmp.lt.s32.totalorder %s7690_s22, %s7690_s22 }
  0x47   : > { %p7693_p11 = pnand %p7691_p10, %p8128_p8  ;;  %p7700_p2 = por %p7699_p0, %p7698_p13 }
  0x49   : > { %p7694_p12 = pneg %p7693_p11 }
  0x4b   : > { %p7701_p5 = pnand %p7700_p2, %p7694_p12 }
  0x4d   : > { %7704 = shalt.err (!%p7701_p5)
}
  0x4e   : > { %7343 = dma.hbm_to_vmem [thread:$0]  (!%p8114_p6), %s9687_s6, 96, %s8110_s26, [#allocation12]  }
  0x4f   : > { %s9688_s8 = sld [smem:[#allocation35_spill]] }
  0x55   : > { %s7705_s14 = scalar_lea.hbm %s9688_s8, 48 }
  0x56   : > { %p7706_p7 = scmp.ne.s32.totalorder %s9688_s8, %s7705_s14  ;;  %p7712_p1 = scmp.lt.u32.totalorder %s7705_s14, %s9688_s8 }
  0x58   : > { %p7708_p9 = pnand %p7706_p7, %p8128_p8 }
  0x5a   : > { %p7709_p3 = pneg %p7708_p9 }
  0x5c   : > { %p7714_p4 = pnand %p7712_p1, %p7709_p3 }
  0x5e   : > { %7717 = shalt.err (!%p7714_p4)
}
  0x5f   : > { %s7718_s26 = scalar_lea.vmem %s8118_s29, 48  ;;  %s7725_s22 = scalar_lea.vmem %s8118_s29, 64 }
  0x60   : > { %p7719_p10 = scmp.ne.s32.totalorder %s8118_s29, %s7718_s26  ;;  %p7726_p13 = scmp.lt.s32.totalorder %s8118_s29, %s8118_s29 }
  0x61   : > { %p7727_p0 = scmp.lt.s32.totalorder %s7725_s22, %s7718_s26 }
  0x62   : > { %p7721_p11 = pnand %p7719_p10, %p8128_p8 }
  0x63   : > { %p7728_p2 = por %p7727_p0, %p7726_p13 }
  0x64   : > { %p7722_p12 = pneg %p7721_p11 }
  0x66   : > { %p7729_p5 = pnand %p7728_p2, %p7722_p12 }
  0x68   : > { %7732 = shalt.err (!%p7729_p5)
}
  0x69   : > { %7349 = dma.hbm_to_vmem [thread:$0]  (!%p8114_p6), %s9688_s8, 48, %s8118_s29, [#allocation15]  }
  0x6a   : > { %s8192_s12 = sadd.s32 1, %s7995_s20   ;;  %s61_s13 = sadd.s32 1, %s7991_s19 }
  0x6b   : > { %9689 = sst [smem:[#allocation28_spill]] %s8192_s12  ;;  %s58_s14 = ssub.s32 %s7995_s20, %s8192_s12 }
  0x6c   : > { %p68_p7 = scmp.ne.s32.totalorder %s7991_s19, %s7987_s18  ;;  %p59_p9 = scmp.eq.s32.totalorder %s58_s14, 0 }
  0x6d   : > { %p69_p3 = scmp.eq.s32.totalorder %s7995_s20, 0  ;;  %p74_p1 = scmp.ne.s32.totalorder %s7987_s18, %s7983_s17 }
  0x6e   : > { %p7375_p4 = scmp.lt.s32.totalorder %s7995_s20, 2  ;;  %p9691_p11 = scmp.eq.s32.totalorder %s8098_s23, 0 }
  0x6f   : > { %s8204_s15 = scalar_select %p59_p9, %s7991_s19, %s61_s13  }
  0x70   : > { %p70_p10 = por %p69_p3, %p68_p7  ;;  %p8208_p12 = por %p9691_p11, %p74_p1 }
  0x71   : > { %9690 = sst [smem:[#allocation29_spill]] %s8204_s15  ;;  %s8213_s29 = sand.u32 1, %s7991_s19  }
  0x72   : > { %s9692_s21 = scalar_select %p8208_p12, 1, 0 }
  0x73   : > { %p8216_p13 = pnand %p7375_p4, %p70_p10  ;;  %s9657_s17 = smul.u32 6, %s8213_s29 }
  0x74   : > { %s9658_s26 = smul.u32 96, %s7995_s20  ;;  %s9694_s2 = sld [smem:[#allocation31_spill]] }
  0x75   : > { %s9693_s28 = scalar_select %p8216_p13, 1, 0 }
  0x76   : > { %s421_s13 = scalar_lea.vmem [#allocation5], %s9657_s17  ;;  %s8000_s25 = smov [#allocation13]  }
  0x77   : > { %s429_s14 = sshll.u32 %s421_s13, 4  ;;  %s8233_s5 = sshll.u32 %s8000_s25, 4  ;;  %s8231_s14 = int_to_ptr.vmem [resolvable:$true] %s429_s14  ;;  %s348_s5 = int_to_ptr.vmem [resolvable:$true] %s8233_s5 }
  0x78   : > { %s9695_s6 = sand.u32 1, %s7995_s20   ;;  %p8243_p2 = pneg %p8216_p13 }
  0x79   : > { %s8237_s8 = scalar_lea.sflag [#allocation6], %s9695_s6 }
  0x7a   : > { %s8227_s30 = scalar_lea.hbm %s9694_s2, %s9658_s26  ;;  %s7738_s17 = scalar_lea.hbm %s9694_s2, 192 }
  0x7b   : > { %s7733_s15 = scalar_lea.hbm %s8227_s30, 96  ;;  %p7739_p9 = scmp.lt.u32.totalorder %s8227_s30, %s9694_s2 }
  0x7c   : > { %p7734_p0 = scmp.ne.s32.totalorder %s8227_s30, %s7733_s15  ;;  %p7740_p3 = scmp.lt.u32.totalorder %s7738_s17, %s7733_s15 }
  0x7d   : > { %s9696_s22 = scalar_select %p8243_p2, 1, 0 }
  0x7e   : > { %p7736_p5 = pnand %p8243_p2, %p7734_p0  ;;  %p7741_p1 = por %p7740_p3, %p7739_p9 }
  0x7f   : > { %p7742_p4 = scmp.lt.u32.totalorder %s7733_s15, %s8227_s30 }
  0x80   : > { %p7737_p7 = pneg %p7736_p5 }
  0x81   : > { %p7743_p10 = por %p7742_p4, %p7741_p1 }
  0x83   : > { %p7744_p11 = pnand %p7743_p10, %p7737_p7 }
  0x85   : > { %7747 = shalt.err (!%p7744_p11)
}
  0x86   : > { %s7748_s6 = scalar_lea.vmem %s8231_s14, 96  ;;  %s8001_s11 = smov [#allocation5]  }
  0x87   : > { %p7749_p0 = scmp.ne.s32.totalorder %s8231_s14, %s7748_s6  ;;  %s7753_s13 = sshll.u32 %s8001_s11, 4  ;;  %s7754_s13 = int_to_ptr.vmem [resolvable:$false] %s7753_s13 }
  0x88   : > { %s7755_s26 = scalar_lea.vmem %s7754_s13, 192  ;;  %p7756_p6 = scmp.lt.s32.totalorder %s8231_s14, %s7754_s13 }
  0x89   : > { %p7751_p5 = pnand %p7749_p0, %p8243_p2  ;;  %p7757_p8 = scmp.lt.s32.totalorder %s7755_s26, %s7748_s6 }
  0x8b   : > { %p7752_p12 = pneg %p7751_p5  ;;  %p7758_p9 = por %p7757_p8, %p7756_p6 }
  0x8d   : > { %p7759_p3 = pnand %p7758_p9, %p7752_p12 }
  0x8f   : > { %7762 = shalt.err (!%p7759_p3)
}
  0x90   : > { %7362 = dma.hbm_to_vmem [thread:$0]  (!%p8216_p13), %s8227_s30, 96, %s8231_s14, %s8237_s8  }
  0x91   : > { %s9697_s7 = sld [smem:[#allocation34_spill]]  ;;  %p9698_p6 = scmp.ne.s32.totalorder %s9686_s16, 0 }
  0x97   : > { %s7763_s25 = scalar_lea.hbm %s9697_s7, 18432 }
  0x98   : > { %p7764_p7 = scmp.ne.s32.totalorder %s9697_s7, %s7763_s25  ;;  %p7770_p1 = scmp.lt.u32.totalorder %s7763_s25, %s9697_s7 }
  0x9a   : > { %p7766_p8 = pnand %p7764_p7, %p9698_p6 }
  0x9c   : > { %p7767_p12 = pneg %p7766_p8 }
  0x9e   : > { %p7772_p4 = pnand %p7770_p1, %p7767_p12 }
  0xa0   : > { %7775 = shalt.err (!%p7772_p4)
}
  0xa1   : > { %s7776_s26 = scalar_lea.vmem %s348_s5, 18432  ;;  %p7784_p5 = scmp.lt.s32.totalorder %s348_s5, %s348_s5 }
  0xa2   : > { %p7777_p10 = scmp.ne.s32.totalorder %s348_s5, %s7776_s26  ;;  %p7785_p9 = scmp.lt.s32.totalorder %s7776_s26, %s7776_s26 }
  0xa4   : > { %p7779_p11 = pnand %p7777_p10, %p9698_p6  ;;  %p7786_p3 = por %p7785_p9, %p7784_p5 }
  0xa6   : > { %p7780_p0 = pneg %p7779_p11 }
  0xa8   : > { %p7787_p13 = pnand %p7786_p3, %p7780_p0 }
  0xaa   : > { %7790 = shalt.err (!%p7787_p13)
}
  0xab   : > { %s8002_s2 = smov 192   ;;  %s8003_s30 = smov 12  }
  0xac   : > { %p9699_p7 = scmp.ne.s32.totalorder %s9684_s27, 0  ;;  %s8004_s17 = smov [#allocation16]  }
  0xad   : > { %s371_s25 = sshll.u32 %s8004_s17, 4  ;;  %s7791_s13 = scalar_lea.hbm %s9651_s9, 3072  ;;  %s372_s25 = int_to_ptr.vmem [resolvable:$true] %s371_s25 }
  0xae   : > { %7346 = dma.hbm_to_vmem [thread:$0]  (!%p9699_p7), %s9697_s7, 18432, %s348_s5, [#allocation12], %s8002_s2, %s8002_s2, %s8003_s30  }
  0xaf   : > { %p7792_p13 = scmp.ne.s32.totalorder %s9651_s9, %s7791_s13  ;;  %p7798_p1 = scmp.lt.u32.totalorder %s7791_s13, %s9651_s9 }
  0xb1   : > { %p7794_p8 = pnand %p7792_p13, %p9698_p6 }
  0xb3   : > { %p7795_p12 = pneg %p7794_p8 }
  0xb5   : > { %p7800_p4 = pnand %p7798_p1, %p7795_p12 }
  0xb7   : > { %7803 = shalt.err (!%p7800_p4)
}
  0xb8   : > { %s7804_s5 = scalar_lea.vmem %s372_s25, 3072  ;;  %p7812_p5 = scmp.lt.s32.totalorder %s372_s25, %s372_s25 }
  0xb9   : > { %p7805_p10 = scmp.ne.s32.totalorder %s372_s25, %s7804_s5  ;;  %p7813_p9 = scmp.lt.s32.totalorder %s7804_s5, %s7804_s5 }
  0xbb   : > { %p7807_p11 = pnand %p7805_p10, %p9698_p6  ;;  %p7814_p3 = por %p7813_p9, %p7812_p5 }
  0xbd   : > { %p7808_p0 = pneg %p7807_p11 }
  0xbf   : > { %p7815_p2 = pnand %p7814_p3, %p7808_p0 }
  0xc1   : > { %7818 = shalt.err (!%p7815_p2)
}
  0xc2   : > { %s8005_s19 = smov 64   ;;  %s8006_s0 = smov 4  }
  0xc3   : > { %7352 = dma.hbm_to_vmem [thread:$0]  (!%p9699_p7), %s9651_s9, 3072, %s372_s25, [#allocation15], %s8005_s19, %s8005_s19, %s8006_s0  }
  0xc4   : > { %s8007_s30 = smov [#allocation17]   ;;  %s7297_s15 = smul.u32 4608, %s8213_s29 }
  0xc5   : > { %s385_s14 = sshll.u32 %s8007_s30, 4  ;;  %s7009_s17 = smul.u32 768, %s7995_s20  ;;  %s386_s14 = int_to_ptr.vmem [resolvable:$true] %s385_s14 }
  0xc6   : > { %s7819_s13 = scalar_lea.hbm %s9652_s10, 16 }
  0xc7   : > { %p7820_p2 = scmp.ne.s32.totalorder %s9652_s10, %s7819_s13  ;;  %p7826_p12 = scmp.lt.u32.totalorder %s7819_s13, %s9652_s10 }
  0xc9   : > { %p7822_p13 = pnand %p7820_p2, %p9698_p6 }
  0xcb   : > { %p7823_p8 = pneg %p7822_p13 }
  0xcd   : > { %p7828_p1 = pnand %p7826_p12, %p7823_p8 }
  0xcf   : > { %7831 = shalt.err (!%p7828_p1)
}
  0xd0   : > { %s7832_s25 = scalar_lea.vmem %s386_s14, 16  ;;  %s7839_s19 = scalar_lea.vmem %s386_s14, 32 }
  0xd1   : > { %p7833_p4 = scmp.ne.s32.totalorder %s386_s14, %s7832_s25  ;;  %p7840_p0 = scmp.lt.s32.totalorder %s386_s14, %s386_s14 }
  0xd2   : > { %p7841_p5 = scmp.lt.s32.totalorder %s7839_s19, %s7832_s25 }
  0xd3   : > { %p7835_p10 = pnand %p7833_p4, %p9698_p6 }
  0xd4   : > { %p7842_p9 = por %p7841_p5, %p7840_p0 }
  0xd5   : > { %p7836_p11 = pneg %p7835_p10 }
  0xd7   : > { %p7843_p3 = pnand %p7842_p9, %p7836_p11 }
  0xd9   : > { %7846 = shalt.err (!%p7843_p3)
}
  0xda   : > { %7355 = dma.hbm_to_vmem [thread:$0]  (!%p9699_p7), %s9652_s10, 16, %s386_s14, [#allocation18]  }
  0xdb   : > { %s8327_s16 = scalar_lea.hbm %s9643_s1, %s7009_s17  ;;  %s400_s2 = scalar_lea.vmem [#allocation3], %s7297_s15 }
  0xdc   : > { %s407_s30 = sshll.u32 %s400_s2, 4  ;;  %s397_s27 = scalar_lea.sflag [#allocation4], %s8213_s29  ;;  %s8329_s30 = int_to_ptr.vmem [resolvable:$true] %s407_s30 }
  0xdd   : > { %s7847_s11 = scalar_lea.hbm %s8327_s16, 73728  ;;  %p9700_p2 = scmp.ne.s32.totalorder %s9696_s22, 0 }
  0xde   : > { %p7848_p6 = scmp.ne.s32.totalorder %s8327_s16, %s7847_s11  ;;  %s7852_s13 = scalar_lea.hbm %s9643_s1, 147456 }
  0xdf   : > { %p7853_p7 = scmp.lt.u32.totalorder %s8327_s16, %s9643_s1  ;;  %p7854_p12 = scmp.lt.u32.totalorder %s7852_s13, %s7847_s11 }
  0xe0   : > { %p7850_p13 = pnand %p7848_p6, %p9700_p2  ;;  %p7856_p4 = scmp.lt.u32.totalorder %s7847_s11, %s8327_s16 }
  0xe1   : > { %p7855_p1 = por %p7854_p12, %p7853_p7 }
  0xe2   : > { %p7851_p8 = pneg %p7850_p13 }
  0xe3   : > { %p7857_p10 = por %p7856_p4, %p7855_p1 }
  0xe5   : > { %p7858_p11 = pnand %p7857_p10, %p7851_p8 }
  0xe7   : > { %7861 = shalt.err (!%p7858_p11)
}
  0xe8   : > { %s7862_s15 = scalar_lea.vmem %s8329_s30, 73728  ;;  %s8008_s5 = smov [#allocation3]  }
  0xe9   : > { %p7863_p0 = scmp.ne.s32.totalorder %s8329_s30, %s7862_s15  ;;  %s7867_s25 = sshll.u32 %s8008_s5, 4  ;;  %s7868_s25 = int_to_ptr.vmem [resolvable:$false] %s7867_s25 }
  0xea   : > { %s7869_s19 = scalar_lea.vmem %s7868_s25, 147456  ;;  %p7870_p3 = scmp.lt.s32.totalorder %s8329_s30, %s7868_s25 }
  0xeb   : > { %p7865_p5 = pnand %p7863_p0, %p9700_p2  ;;  %p7871_p6 = scmp.lt.s32.totalorder %s7869_s19, %s7862_s15 }
  0xed   : > { %p7866_p9 = pneg %p7865_p5  ;;  %p7872_p13 = por %p7871_p6, %p7870_p3 }
  0xef   : > { %p7873_p7 = pnand %p7872_p13, %p7866_p9 }
  0xf1   : > { %7876 = shalt.err (!%p7873_p7)
}
  0xf2   : > { %s8009_s0 = smov 1536   ;;  %s8010_s12 = smov 768  }
  0xf3   : > { %s8011_s7 = smov 48   ;;  %p9701_p8 = scmp.ne.s32.totalorder %s9693_s28, 0 }
  0xf4   : > { %s9702_s23 = smul.u32 96, %s7995_s20 }
  0xf5   : > { %7359 = dma.hbm_to_vmem [thread:$0]  (!%p9701_p8), %s8327_s16, 73728, %s8329_s30, %s397_s27, %s8009_s0, %s8010_s12, %s8011_s7  }
  0xf6   : > { %s8362_s14 = scalar_lea.hbm %s9645_s3, %s9702_s23  ;;  %s9703_s6 = smul.u32 6, %s8213_s29 }
  0xf7   : > { %s7300_s26 = smul.u32 1152, %s8213_s29  ;;  %s7877_s15 = scalar_lea.hbm %s8362_s14, 96 }
  0xf8   : > { %s440_s13 = scalar_lea.vmem [#allocation7], %s9703_s6  ;;  %p7878_p12 = scmp.ne.s32.totalorder %s8362_s14, %s7877_s15 }
  0xf9   : > { %s448_s17 = sshll.u32 %s440_s13, 4  ;;  %s7882_s27 = scalar_lea.hbm %s9645_s3, 192  ;;  %s449_s17 = int_to_ptr.vmem [resolvable:$true] %s448_s17 }
  0xfa   : > { %p7880_p1 = pnand %p7878_p12, %p9700_p2  ;;  %p7883_p10 = scmp.lt.u32.totalorder %s8362_s14, %s9645_s3 }
  0xfb   : > { %p7884_p11 = scmp.lt.u32.totalorder %s7882_s27, %s7877_s15  ;;  %p7886_p5 = scmp.lt.u32.totalorder %s7877_s15, %s8362_s14 }
  0xfc   : > { %p7881_p4 = pneg %p7880_p1 }
  0xfd   : > { %p7885_p0 = por %p7884_p11, %p7883_p10 }
  0xff   : > { %p7887_p9 = por %p7886_p5, %p7885_p0 }
 0x101   : > { %p7888_p3 = pnand %p7887_p9, %p7881_p4 }
 0x103   : > { %7891 = shalt.err (!%p7888_p3)
}
 0x104   : > { %s7892_s29 = scalar_lea.vmem %s449_s17, 96  ;;  %s8012_s19 = smov [#allocation7]  }
 0x105   : > { %p7893_p6 = scmp.ne.s32.totalorder %s449_s17, %s7892_s29  ;;  %s7897_s0 = sshll.u32 %s8012_s19, 4  ;;  %s7898_s0 = int_to_ptr.vmem [resolvable:$false] %s7897_s0 }
 0x106   : > { %s7899_s23 = scalar_lea.vmem %s7898_s0, 192  ;;  %p7900_p12 = scmp.lt.s32.totalorder %s449_s17, %s7898_s0 }
 0x107   : > { %p7895_p13 = pnand %p7893_p6, %p9700_p2  ;;  %p7901_p1 = scmp.lt.s32.totalorder %s7899_s23, %s7892_s29 }
 0x109   : > { %p7896_p7 = pneg %p7895_p13  ;;  %p7902_p8 = por %p7901_p1, %p7900_p12 }
 0x10b   : > { %p7903_p10 = pnand %p7902_p8, %p7896_p7 }
 0x10d   : > { %7906 = shalt.err (!%p7903_p10)
}
 0x10e   : > { %p9704_p11 = scmp.ne.s32.totalorder %s9693_s28, 0  ;;  %s7376_s2 = smul.u32 18432, %s7995_s20 }
 0x10f   : > { %s459_s11 = scalar_lea.vmem [#allocation8], %s7300_s26  ;;  %s9705_s30 = sand.u32 1, %s7995_s20  }
 0x110   : > { %7365 = dma.hbm_to_vmem [thread:$0]  (!%p9704_p11), %s8362_s14, 96, %s449_s17, %s8237_s8  }
 0x111   : > { %s467_s6 = sshll.u32 %s459_s11, 4  ;;  %s8389_s16 = scalar_lea.hbm %s9646_s4, %s7376_s2  ;;  %s8391_s6 = int_to_ptr.vmem [resolvable:$true] %s467_s6 }
 0x112   : > { %s8395_s27 = scalar_lea.sflag [#allocation9], %s9705_s30  ;;  %s7907_s5 = scalar_lea.hbm %s8389_s16, 18432 }
 0x113   : > { %p7908_p8 = scmp.ne.s32.totalorder %s8389_s16, %s7907_s5  ;;  %s7912_s17 = scalar_lea.hbm %s9646_s4, 36864 }
 0x114   : > { %p7913_p5 = scmp.lt.u32.totalorder %s8389_s16, %s9646_s4  ;;  %p7914_p9 = scmp.lt.u32.totalorder %s7912_s17, %s7907_s5 }
 0x115   : > { %p7910_p4 = pnand %p7908_p8, %p9700_p2  ;;  %p7916_p6 = scmp.lt.u32.totalorder %s7907_s5, %s8389_s16 }
 0x116   : > { %p7915_p3 = por %p7914_p9, %p7913_p5 }
 0x117   : > { %p7911_p0 = pneg %p7910_p4 }
 0x118   : > { %p7917_p13 = por %p7916_p6, %p7915_p3 }
 0x11a   : > { %p7918_p7 = pnand %p7917_p13, %p7911_p0 }
 0x11c   : > { %7921 = shalt.err (!%p7918_p7)
}
 0x11d   : > { %s7922_s20 = scalar_lea.vmem %s8391_s6, 18432  ;;  %s8013_s29 = smov [#allocation8]  }
 0x11e   : > { %p7923_p12 = scmp.ne.s32.totalorder %s8391_s6, %s7922_s20  ;;  %s7927_s19 = sshll.u32 %s8013_s29, 4  ;;  %s7928_s19 = int_to_ptr.vmem [resolvable:$false] %s7927_s19 }
 0x11f   : > { %s7929_s0 = scalar_lea.vmem %s7928_s19, 36864  ;;  %p7930_p8 = scmp.lt.s32.totalorder %s8391_s6, %s7928_s19 }
 0x120   : > { %p7925_p1 = pnand %p7923_p12, %p9700_p2  ;;  %p7931_p4 = scmp.lt.s32.totalorder %s7929_s0, %s7922_s20 }
 0x122   : > { %p7926_p10 = pneg %p7925_p1  ;;  %p7932_p5 = por %p7931_p4, %p7930_p8 }
 0x124   : > { %p7933_p9 = pnand %p7932_p5, %p7926_p10 }
 0x126   : > { %7936 = shalt.err (!%p7933_p9)
}
 0x127   : > { %7368 = dma.hbm_to_vmem [thread:$0]  (!%p9704_p11), %s8389_s16, 18432, %s8391_s6, %s8395_s27, %s8010_s12, %s8010_s12, %s8011_s7  }
 0x128   : > { %p9706_p2 = scmp.ne.s32.totalorder %s9683_s24, 0 }
 0x129   : > { %s481_s22 = sand.u32 (!%p9706_p2), 1, %s7987_s18   ;;  %p9707_p0 = scmp.ne.s32.totalorder (!%p9706_p2), %s9692_s21, 0 }
 0x12a   : > { %479 = sbr.rel (%p9706_p2) target bundleno = 3258 (0xcba), region = 64  ;;  %s482_s2 = scalar_lea.sflag (!%p9706_p2), [#allocation4], %s481_s22 }
 0x12b   : > { %s7302_s23 = smul.u32 (!%p9706_p2), 4608, %s481_s22 }
 0x12d   : > { %s8425_s11 = scalar_lea.vmem (!%p9706_p2), [#allocation3], %s7302_s23 }
 0x131   : > { %7954 = dma.done.wait (%p9707_p0), %s482_s2, 73728  }
 0x132   : > { %7956 = vsyncadd (%p9707_p0), %s482_s2, 4294893568  ;;  %s9708_s28 = sld [smem:[#allocation27_spill]]  ;;  %s7303_s15 = smul.u32 6, %s481_s22 }
 0x134   : > { %s8432_s7 = scalar_lea.vmem [#allocation5], %s7303_s15 }
 0x138   : > { %s490_s13 = sand.u32 1, %s9708_s28  }
 0x139   : > { %s491_s12 = scalar_lea.sflag [#allocation6], %s490_s13 }
 0x13a   : > { %7958 = dma.done.wait (%p9707_p0), %s491_s12, 192  }
 0x13b   : > { %7960 = vsyncadd (%p9707_p0), %s491_s12, 4294967104  ;;  %s7304_s24 = smul.u32 1152, %s481_s22  ;;  %s8438_s6 = scalar_lea.vmem [#allocation7], %s7303_s15 }
 0x13c   : > { %s509_s16 = scalar_lea.sflag [#allocation9], %s490_s13 }
 0x13d   : > { %s8440_s30 = scalar_lea.vmem [#allocation8], %s7304_s24 }
 0x13e   : > { %7962 = dma.done.wait (%p9707_p0), %s509_s16, 18432  }
 0x13f   : > { %7964 = vsyncadd (%p9707_p0), %s509_s16, 4294948864  ;;  %p9709_p11 = scmp.eq.s32.totalorder %s9708_s28, 0 }
 0x141   : > { %7966 = dma.done.wait (%p9709_p11), [#allocation9], 96   ;;  %p9710_p3 = pmov %p9709_p11 }
 0x143   : > { %7968 = vsyncadd (%p9710_p3), [#allocation9], 4294967200  ;;  %p9711_p6 = pmov %p9710_p3 }
 0x144   : > { %p9712_p13 = pmov %p9710_p3 }
 0x145   : > { %7970 = dma.done.wait (%p9711_p6), [#allocation12], 18528  }
 0x146   : > { %7972 = vsyncadd (%p9712_p13), [#allocation12], 4294948768  ;;  %p9713_p7 = pmov %p9710_p3 }
 0x147   : > { %p9714_p12 = pmov %p9710_p3 }
 0x148   : > { %7974 = dma.done.wait (%p9713_p7), [#allocation15], 3120  }
 0x149   : > { %7976 = vsyncadd (%p9714_p12), [#allocation15], 4294964176  ;;  %p9715_p1 = pmov %p9710_p3 }
 0x14b   : > { %7978 = dma.done.wait (%p9715_p1), [#allocation18], 16   ;;  %p9716_p10 = pmov %p9715_p1 }
 0x14c   : > { %p9717_p8 = scmp.ne.s32.totalorder %s9708_s28, 0 }
 0x14d   : > { %7980 = vsyncadd (%p9716_p10), [#allocation18], 4294967280  ;;  %v8014_v0 = vmov (!%p9717_p8), 0.0  }
 0x14e   : > { %593 = sbr.rel (%p9717_p8) target bundleno = 341 (0x155), region = 108  ;;  %594 = vst [vmem:[#allocation2] sm:$0xff] (!%p9717_p8), %v8014_v0  ;;  %595 = vst [vmem:[#allocation2 + $0x8] sm:$0xff] (!%p9717_p8), %v8014_v0 }
 0x14f   : > { %596 = vst [vmem:[#allocation2 + $0x10] sm:$0xff] (!%p9717_p8), %v8014_v0  ;;  %597 = vst [vmem:[#allocation2 + $0x18] sm:$0xff] (!%p9717_p8), %v8014_v0 }
 0x150   : > { %598 = vst [vmem:[#allocation2 + $0x20] sm:$0xff] (!%p9717_p8), %v8014_v0  ;;  %599 = vst [vmem:[#allocation2 + $0x28] sm:$0xff] (!%p9717_p8), %v8014_v0 }
 0x151   : > { %600 = vst [vmem:[#allocation2 + $0x30] sm:$0xff] (!%p9717_p8), %v8014_v0  ;;  %601 = vst [vmem:[#allocation2 + $0x38] sm:$0xff] (!%p9717_p8), %v8014_v0 }
 0x152   : > { %602 = vst [vmem:[#allocation2 + $0x40] sm:$0xff] (!%p9717_p8), %v8014_v0  ;;  %603 = vst [vmem:[#allocation2 + $0x48] sm:$0xff] (!%p9717_p8), %v8014_v0 }
 0x153   : > { %604 = vst [vmem:[#allocation2 + $0x50] sm:$0xff] (!%p9717_p8), %v8014_v0  ;;  %605 = vst [vmem:[#allocation2 + $0x58] sm:$0xff] (!%p9717_p8), %v8014_v0 }
 0x155 PF: > { %v607_v1 = vld [vmem:[%s8425_s11 + $0x8] sm:$0xff]  ;;  %v606_v3 = vld [vmem:[%s8425_s11] sm:$0xff]  ;;  %v613_v11 = vld [vmem:[%s8425_s11 + $0x38] sm:$0xff]  ;;  %s9718_s5 = sld [smem:[#allocation30_spill]] }
 0x156   : > { %v655_v2 = vld [vmem:[%s8425_s11 + $0x188] sm:$0xff]  ;;  %v1183_v4 = vunpack.c.l.s8.bf16 %v607_v1  ;;  %v1189_v5 = vunpack.c.h.s8.bf16 %v607_v1  ;;  %v654_v8 = vld [vmem:[%s8425_s11 + $0x180] sm:$0xff]  ;;  %v1182_v9 = vunpack.c.l.s8.bf16 %v606_v3  ;;  %v661_v12 = vld [vmem:[%s8425_s11 + $0x1b8] sm:$0xff]  ;;  %v1188_v13 = vunpack.c.h.s8.bf16 %v606_v3 }
 0x157   : > { %v1279_v6 = vunpack.c.l.s8.bf16 %v655_v2  ;;  %v1285_v7 = vunpack.c.h.s8.bf16 %v655_v2  ;;  %v1278_v10 = vunpack.c.l.s8.bf16 %v654_v8  ;;  %v1284_v14 = vunpack.c.h.s8.bf16 %v654_v8  ;;  %v612_v17 = vld [vmem:[%s8425_s11 + $0x30] sm:$0xff]  ;;  %v619_v23 = vld [vmem:[%s8425_s11 + $0x68] sm:$0xff]  ;;  %v618_v29 = vld [vmem:[%s8425_s11 + $0x60] sm:$0xff] }
 0x158   : > { %2478 = vmatprep.subr.bf16.mxu1 %v1183_v4  ;;  %v1195_v15 = vunpack.c.l.s8.bf16 %v613_v11  ;;  %v1291_v16 = vunpack.c.l.s8.bf16 %v661_v12  ;;  %v660_v18 = vld [vmem:[%s8425_s11 + $0x1b0] sm:$0xff]  ;;  %v1194_v19 = vunpack.c.l.s8.bf16 %v612_v17  ;;  %v1201_v21 = vunpack.c.h.s8.bf16 %v613_v11  ;;  %v667_v24 = vld [vmem:[%s8425_s11 + $0x1e8] sm:$0xff]  ;;  %v666_v30 = vld [vmem:[%s8425_s11 + $0x1e0] sm:$0xff] }
 0x159   : > { %2521 = vmatprep.subr.bf16.mxu0 %v1279_v6  ;;  %2479 = vmatpush1.bf16.msra.mxu1 %v1182_v9  ;;  %v1290_v20 = vunpack.c.l.s8.bf16 %v660_v18  ;;  %v1297_v22 = vunpack.c.h.s8.bf16 %v661_v12  ;;  %v1200_v25 = vunpack.c.h.s8.bf16 %v612_v17  ;;  %v1296_v26 = vunpack.c.h.s8.bf16 %v660_v18  ;;  %v625_v41 = vld [vmem:[%s8425_s11 + $0x98] sm:$0xff]  ;;  %v624_v47 = vld [vmem:[%s8425_s11 + $0x90] sm:$0xff]  ;;  %v631_v53 = vld [vmem:[%s8425_s11 + $0xc8] sm:$0xff] }
 0x15a   : > { %2522 = vmatpush1.bf16.msra.mxu0 %v1278_v10  ;;  %2480 = vmatprep.subr.bf16.mxu1 %v1189_v5  ;;  %v1207_v27 = vunpack.c.l.s8.bf16 %v619_v23  ;;  %v1303_v28 = vunpack.c.l.s8.bf16 %v667_v24  ;;  %v1206_v35 = vunpack.c.l.s8.bf16 %v618_v29  ;;  %v1302_v36 = vunpack.c.l.s8.bf16 %v666_v30  ;;  %v673_v42 = vld [vmem:[%s8425_s11 + $0x218] sm:$0xff]  ;;  %v672_v48 = vld [vmem:[%s8425_s11 + $0x210] sm:$0xff]  ;;  %v679_v54 = vld [vmem:[%s8425_s11 + $0x248] sm:$0xff] }
 0x15b   : > { %2523 = vmatprep.subr.bf16.mxu0 %v1285_v7  ;;  %v8479_v31 = vld [vmem:[%s9718_s5] sm:$0xff]  ;;  %v8489_v33 = vld [vmem:[%s9718_s5 + $0x8] sm:$0xff]  ;;  %v1213_v37 = vunpack.c.h.s8.bf16 %v619_v23  ;;  %v1309_v38 = vunpack.c.h.s8.bf16 %v667_v24  ;;  %v1212_v43 = vunpack.c.h.s8.bf16 %v618_v29  ;;  %v1308_v44 = vunpack.c.h.s8.bf16 %v666_v30  ;;  %v637_v1 = vld [vmem:[%s8425_s11 + $0xf8] sm:$0xff] }
 0x15c   : > { %v8484_v32 = vld [vmem:[%s9718_s5 + $0x60] sm:$0xff]  ;;  %v8494_v34 = vld [vmem:[%s9718_s5 + $0x68] sm:$0xff]  ;;  %v1219_v45 = vunpack.c.l.s8.bf16 %v625_v41  ;;  %v1315_v46 = vunpack.c.l.s8.bf16 %v673_v42  ;;  %v1218_v49 = vunpack.c.l.s8.bf16 %v624_v47  ;;  %v1314_v50 = vunpack.c.l.s8.bf16 %v672_v48  ;;  %v685_v2 = vld [vmem:[%s8425_s11 + $0x278] sm:$0xff] }
 0x15d   : > { %2481 = vmatpush1.bf16.msra.mxu1 %v1188_v13  ;;  %v8498_v39 = vcombine.high %v8479_v31, %v8484_v32  ;;  %v8502_v40 = vcombine.high %v8489_v33, %v8494_v34  ;;  %v1225_v51 = vunpack.c.h.s8.bf16 %v625_v41  ;;  %v1321_v52 = vunpack.c.h.s8.bf16 %v673_v42  ;;  %v630_v59 = vld [vmem:[%s8425_s11 + $0xc0] sm:$0xff]  ;;  %v636_v7 = vld [vmem:[%s8425_s11 + $0xf0] sm:$0xff]  ;;  %v643_v13 = vld [vmem:[%s8425_s11 + $0x128] sm:$0xff] }
 0x15e   : > { %2524 = vmatpush1.bf16.msra.mxu0 %v1284_v14  ;;  %2482 = vmatprep.subr.bf16.mxu1 %v1195_v15  ;;  %v1224_v55 = vunpack.c.h.s8.bf16 %v624_v47  ;;  %v1320_v56 = vunpack.c.h.s8.bf16 %v672_v48  ;;  %v1231_v57 = vunpack.c.l.s8.bf16 %v631_v53  ;;  %v1327_v58 = vunpack.c.l.s8.bf16 %v679_v54  ;;  %v678_v60 = vld [vmem:[%s8425_s11 + $0x240] sm:$0xff]  ;;  %v684_v8 = vld [vmem:[%s8425_s11 + $0x270] sm:$0xff]  ;;  %v691_v14 = vld [vmem:[%s8425_s11 + $0x2a8] sm:$0xff] }
 0x15f   : > { %2525 = vmatprep.subr.bf16.mxu0 %v1291_v16  ;;  %2510 = vmatprep.mubr.bf16.mxu1 %v8498_v39  ;;  %v1230_v61 = vunpack.c.l.s8.bf16 %v630_v59  ;;  %v1326_v62 = vunpack.c.l.s8.bf16 %v678_v60  ;;  %v1237_v63 = vunpack.c.h.s8.bf16 %v631_v53  ;;  %v1333_v0 = vunpack.c.h.s8.bf16 %v679_v54  ;;  %v8541_v53 = vld [vmem:[%s9718_s5 + $0x10] sm:$0xff] }
 0x160   : > { %2553 = vmatprep.mubr.bf16.mxu0 %v8502_v40  ;;  %v1236_v3 = vunpack.c.h.s8.bf16 %v630_v59  ;;  %v1332_v4 = vunpack.c.h.s8.bf16 %v678_v60  ;;  %v1243_v5 = vunpack.c.l.s8.bf16 %v637_v1  ;;  %v1339_v6 = vunpack.c.l.s8.bf16 %v685_v2  ;;  %v8546_v54 = vld [vmem:[%s9718_s5 + $0x70] sm:$0xff] }
 0x161   : > { %2483 = vmatpush1.bf16.msra.mxu1 %v1194_v19  ;;  %v1242_v9 = vunpack.c.l.s8.bf16 %v636_v7  ;;  %v1338_v10 = vunpack.c.l.s8.bf16 %v684_v8  ;;  %v1249_v11 = vunpack.c.h.s8.bf16 %v637_v1  ;;  %v1345_v12 = vunpack.c.h.s8.bf16 %v685_v2  ;;  %v642_v19 = vld [vmem:[%s8425_s11 + $0x120] sm:$0xff] }
 0x162   : > { %2526 = vmatpush1.bf16.msra.mxu0 %v1290_v20  ;;  %2484 = vmatprep.subr.bf16.mxu1 %v1201_v21  ;;  %v1248_v15 = vunpack.c.h.s8.bf16 %v636_v7  ;;  %v1344_v16 = vunpack.c.h.s8.bf16 %v684_v8  ;;  %v1255_v17 = vunpack.c.l.s8.bf16 %v643_v13  ;;  %v1351_v18 = vunpack.c.l.s8.bf16 %v691_v14  ;;  %v690_v20 = vld [vmem:[%s8425_s11 + $0x2a0] sm:$0xff] }
 0x163   : > { %2527 = vmatprep.subr.bf16.mxu0 %v1297_v22  ;;  %v1254_v21 = vunpack.c.l.s8.bf16 %v642_v19  ;;  %v1350_v22 = vunpack.c.l.s8.bf16 %v690_v20  ;;  %v1261_v23 = vunpack.c.h.s8.bf16 %v643_v13  ;;  %v1357_v24 = vunpack.c.h.s8.bf16 %v691_v14 }
 0x165   : > { %2485 = vmatpush1.bf16.msra.mxu1 %v1200_v25  ;;  %v649_v25 = vld [vmem:[%s8425_s11 + $0x158] sm:$0xff] }
 0x166   : > { %2528 = vmatpush1.bf16.msra.mxu0 %v1296_v26  ;;  %2486 = vmatprep.subr.bf16.mxu1 %v1207_v27  ;;  %v697_v26 = vld [vmem:[%s8425_s11 + $0x2d8] sm:$0xff]  ;;  %v1260_v27 = vunpack.c.h.s8.bf16 %v642_v19  ;;  %v1267_v29 = vunpack.c.l.s8.bf16 %v649_v25  ;;  %v1273_v41 = vunpack.c.h.s8.bf16 %v649_v25 }
 0x167   : > { %2529 = vmatprep.subr.bf16.mxu0 %v1303_v28  ;;  %v1356_v28 = vunpack.c.h.s8.bf16 %v690_v20  ;;  %v1363_v30 = vunpack.c.l.s8.bf16 %v697_v26  ;;  %v1369_v42 = vunpack.c.h.s8.bf16 %v697_v26 }
 0x169   : > { %2487 = vmatpush1.bf16.msra.mxu1 %v1206_v35  ;;  %v648_v35 = vld [vmem:[%s8425_s11 + $0x150] sm:$0xff] }
 0x16a   : > { %2530 = vmatpush1.bf16.msra.mxu0 %v1302_v36  ;;  %2488 = vmatprep.subr.bf16.mxu1 %v1213_v37  ;;  %v696_v36 = vld [vmem:[%s8425_s11 + $0x2d0] sm:$0xff]  ;;  %v1266_v37 = vunpack.c.l.s8.bf16 %v648_v35 }
 0x16b   : > { %2531 = vmatprep.subr.bf16.mxu0 %v1309_v38  ;;  %v1362_v38 = vunpack.c.l.s8.bf16 %v696_v36 }
 0x16d   : > { %2489 = vmatpush1.bf16.msra.mxu1 %v1212_v43  ;;  %v703_v43 = vld [vmem:[%s8425_s11 + $0x308] sm:$0xff] }
 0x16e   : > { %2532 = vmatpush1.bf16.msra.mxu0 %v1308_v44  ;;  %2490 = vmatprep.subr.bf16.mxu1 %v1219_v45  ;;  %v609_v44 = vld [vmem:[%s8425_s11 + $0x18] sm:$0xff]  ;;  %v1272_v45 = vunpack.c.h.s8.bf16 %v648_v35  ;;  %v1375_v47 = vunpack.c.l.s8.bf16 %v703_v43 }
 0x16f   : > { %2533 = vmatprep.subr.bf16.mxu0 %v1315_v46  ;;  %v1368_v46 = vunpack.c.h.s8.bf16 %v696_v36  ;;  %v1185_v48 = vunpack.c.l.s8.bf16 %v609_v44 }
 0x171   : > { %2491 = vmatpush1.bf16.msra.mxu1 %v1218_v49  ;;  %v702_v49 = vld [vmem:[%s8425_s11 + $0x300] sm:$0xff] }
 0x172   : > { %2534 = vmatpush1.bf16.msra.mxu0 %v1314_v50  ;;  %2492 = vmatprep.subr.bf16.mxu1 %v1225_v51  ;;  %v608_v50 = vld [vmem:[%s8425_s11 + $0x10] sm:$0xff]  ;;  %v8532_v51 = vcombine.low %v8479_v31, %v8484_v32  ;;  %v1381_v31 = vunpack.c.h.s8.bf16 %v703_v43  ;;  %v1191_v32 = vunpack.c.h.s8.bf16 %v609_v44 }
 0x173   : > { %2535 = vmatprep.subr.bf16.mxu0 %v1321_v52  ;;  %v8536_v52 = vcombine.low %v8489_v33, %v8494_v34  ;;  %v709_v33 = vld [vmem:[%s8425_s11 + $0x338] sm:$0xff]  ;;  %v615_v34 = vld [vmem:[%s8425_s11 + $0x48] sm:$0xff]  ;;  %v1190_v59 = vunpack.c.h.s8.bf16 %v608_v50 }
 0x174   : > { %v1387_v60 = vunpack.c.l.s8.bf16 %v709_v33  ;;  %v1393_v2 = vunpack.c.h.s8.bf16 %v709_v33 }
 0x175   : > { %2493 = vmatpush1.bf16.msra.mxu1 %v1224_v55  ;;  %v1374_v55 = vunpack.c.l.s8.bf16 %v702_v49 }
 0x176   : > { %2536 = vmatpush1.bf16.msra.mxu0 %v1320_v56  ;;  %2494 = vmatprep.subr.bf16.mxu1 %v1231_v57  ;;  %v1184_v56 = vunpack.c.l.s8.bf16 %v608_v50  ;;  %v8552_v57 = vcombine.high %v8541_v53, %v8546_v54 }
 0x177   : > { %2537 = vmatprep.subr.bf16.mxu0 %v1327_v58  ;;  %v1380_v58 = vunpack.c.h.s8.bf16 %v702_v49 }
 0x179   : > { %2495 = vmatpush1.bf16.msra.mxu1 %v1230_v61  ;;  %v1197_v61 = vunpack.c.l.s8.bf16 %v615_v34 }
 0x17a   : > { %2538 = vmatpush1.bf16.msra.mxu0 %v1326_v62  ;;  %2496 = vmatprep.subr.bf16.mxu1 %v1237_v63  ;;  %v708_v62 = vld [vmem:[%s8425_s11 + $0x330] sm:$0xff]  ;;  %v614_v63 = vld [vmem:[%s8425_s11 + $0x40] sm:$0xff] }
 0x17b   : > { %2539 = vmatprep.subr.bf16.mxu0 %v1333_v0  ;;  %v1386_v0 = vunpack.c.l.s8.bf16 %v708_v62  ;;  %v1196_v1 = vunpack.c.l.s8.bf16 %v614_v63  ;;  %v1202_v7 = vunpack.c.h.s8.bf16 %v614_v63 }
 0x17d   : > { %2497 = vmatpush1.bf16.msra.mxu1 %v1236_v3  ;;  %v1203_v3 = vunpack.c.h.s8.bf16 %v615_v34 }
 0x17e   : > { %2540 = vmatpush1.bf16.msra.mxu0 %v1332_v4  ;;  %2498 = vmatprep.subr.bf16.mxu1 %v1243_v5  ;;  %v715_v4 = vld [vmem:[%s8425_s11 + $0x368] sm:$0xff]  ;;  %v621_v5 = vld [vmem:[%s8425_s11 + $0x78] sm:$0xff] }
 0x17f   : > { %2541 = vmatprep.subr.bf16.mxu0 %v1339_v6  ;;  %v1392_v6 = vunpack.c.h.s8.bf16 %v708_v62  ;;  %v1399_v8 = vunpack.c.l.s8.bf16 %v715_v4  ;;  %v1405_v14 = vunpack.c.h.s8.bf16 %v715_v4 }
 0x181   : > { %2499 = vmatpush1.bf16.msra.mxu1 %v1242_v9  ;;  %v1209_v9 = vunpack.c.l.s8.bf16 %v621_v5 }
 0x182   : > { %2542 = vmatpush1.bf16.msra.mxu0 %v1338_v10  ;;  %2500 = vmatprep.subr.bf16.mxu1 %v1249_v11  ;;  %v714_v10 = vld [vmem:[%s8425_s11 + $0x360] sm:$0xff]  ;;  %v620_v11 = vld [vmem:[%s8425_s11 + $0x70] sm:$0xff] }
 0x183   : > { %2543 = vmatprep.subr.bf16.mxu0 %v1345_v12  ;;  %v1398_v12 = vunpack.c.l.s8.bf16 %v714_v10  ;;  %v1208_v13 = vunpack.c.l.s8.bf16 %v620_v11  ;;  %v1214_v19 = vunpack.c.h.s8.bf16 %v620_v11 }
 0x185   : > { %2501 = vmatpush1.bf16.msra.mxu1 %v1248_v15  ;;  %v1215_v15 = vunpack.c.h.s8.bf16 %v621_v5 }
 0x186   : > { %2544 = vmatpush1.bf16.msra.mxu0 %v1344_v16  ;;  %2502 = vmatprep.subr.bf16.mxu1 %v1255_v17  ;;  %v721_v16 = vld [vmem:[%s8425_s11 + $0x398] sm:$0xff]  ;;  %v627_v17 = vld [vmem:[%s8425_s11 + $0xa8] sm:$0xff] }
 0x187   : > { %2545 = vmatprep.subr.bf16.mxu0 %v1351_v18  ;;  %v1404_v18 = vunpack.c.h.s8.bf16 %v714_v10  ;;  %v1411_v20 = vunpack.c.l.s8.bf16 %v721_v16  ;;  %v1417_v26 = vunpack.c.h.s8.bf16 %v721_v16 }
 0x189   : > { %2503 = vmatpush1.bf16.msra.mxu1 %v1254_v21  ;;  %v1221_v21 = vunpack.c.l.s8.bf16 %v627_v17 }
 0x18a   : > { %2546 = vmatpush1.bf16.msra.mxu0 %v1350_v22  ;;  %2504 = vmatprep.subr.bf16.mxu1 %v1261_v23  ;;  %v720_v22 = vld [vmem:[%s8425_s11 + $0x390] sm:$0xff]  ;;  %v626_v23 = vld [vmem:[%s8425_s11 + $0xa0] sm:$0xff] }
 0x18b   : > { %2547 = vmatprep.subr.bf16.mxu0 %v1357_v24  ;;  %v1410_v24 = vunpack.c.l.s8.bf16 %v720_v22  ;;  %v1220_v25 = vunpack.c.l.s8.bf16 %v626_v23  ;;  %v1226_v35 = vunpack.c.h.s8.bf16 %v626_v23 }
 0x18d   : > { %2505 = vmatpush1.bf16.msra.mxu1 %v1260_v27  ;;  %v1227_v27 = vunpack.c.h.s8.bf16 %v627_v17 }
 0x18e   : > { %2548 = vmatpush1.bf16.msra.mxu0 %v1356_v28  ;;  %2506 = vmatprep.subr.bf16.mxu1 %v1267_v29  ;;  %v727_v28 = vld [vmem:[%s8425_s11 + $0x3c8] sm:$0xff]  ;;  %v633_v29 = vld [vmem:[%s8425_s11 + $0xd8] sm:$0xff] }
 0x18f   : > { %2549 = vmatprep.subr.bf16.mxu0 %v1363_v30  ;;  %v1416_v30 = vunpack.c.h.s8.bf16 %v720_v22  ;;  %v1423_v36 = vunpack.c.l.s8.bf16 %v727_v28  ;;  %v1429_v44 = vunpack.c.h.s8.bf16 %v727_v28  ;;  %v8595_v28 = vld [vmem:[%s9718_s5 + $0x18] sm:$0xff] }
 0x191   : > { %2507 = vmatpush1.bf16.msra.mxu1 %v1266_v37  ;;  %v1233_v37 = vunpack.c.l.s8.bf16 %v633_v29 }
 0x192   : > { %2550 = vmatpush1.bf16.msra.mxu0 %v1362_v38  ;;  %2508 = vmatprep.subr.bf16.mxu1 %v1273_v41  ;;  %v726_v38 = vld [vmem:[%s8425_s11 + $0x3c0] sm:$0xff]  ;;  %v632_v41 = vld [vmem:[%s8425_s11 + $0xd0] sm:$0xff] }
 0x193   : > { %2551 = vmatprep.subr.bf16.mxu0 %v1369_v42  ;;  %v1422_v42 = vunpack.c.l.s8.bf16 %v726_v38  ;;  %v1232_v43 = vunpack.c.l.s8.bf16 %v632_v41  ;;  %v1238_v49 = vunpack.c.h.s8.bf16 %v632_v41 }
 0x195   : > { %2509 = vmatpush1.bf16.msra.mxu1 %v1272_v45  ;;  %v1239_v45 = vunpack.c.h.s8.bf16 %v633_v29  ;;  %v8600_v29 = vld [vmem:[%s9718_s5 + $0x78] sm:$0xff] }
 0x196   : > { %2552 = vmatpush1.bf16.msra.mxu0 %v1368_v46  ;;  %2994 = vmatprep.subr.bf16.mxu1 %v1185_v48  ;;  %v733_v46 = vld [vmem:[%s8425_s11 + $0x3f8] sm:$0xff]  ;;  %v1428_v48 = vunpack.c.h.s8.bf16 %v726_v38  ;;  %v8606_v38 = vcombine.high %v8595_v28, %v8600_v29 }
 0x197   : > { %2564 = vmatprep.subr.bf16.mxu0 %v1375_v47  ;;  %v639_v47 = vld [vmem:[%s8425_s11 + $0x108] sm:$0xff]  ;;  %v1435_v50 = vunpack.c.l.s8.bf16 %v733_v46  ;;  %v1441_v34 = vunpack.c.h.s8.bf16 %v733_v46  ;;  %v662_v46 = vld [vmem:[%s8425_s11 + $0x1c0] sm:$0xff] }
 0x198   : > { %2511 = vmatmul.mubr.bf16.vlgmr.msra.gmra.mrb[0].mxu1 %v8532_v51 }
 0x199   : > { %2554 = vmatmul.mubr.bf16.vlgmr.msra.gmra.mrb[0].mxu0 %v8536_v52  ;;  %2995 = vmatpush1.bf16.msra.mxu1 %v1184_v56  ;;  %v732_v56 = vld [vmem:[%s8425_s11 + $0x3f0] sm:$0xff] }
 0x19a   : > { %2565 = vmatpush1.bf16.msra.mxu0 %v1374_v55  ;;  %2996 = vmatprep.subr.bf16.mxu1 %v1191_v32  ;;  %v1245_v55 = vunpack.c.l.s8.bf16 %v639_v47  ;;  %v1434_v32 = vunpack.c.l.s8.bf16 %v732_v56 }
 0x19b   : > { %2566 = vmatprep.subr.bf16.mxu0 %v1381_v31  ;;  %2596 = vmatprep.mubr.bf16.mxu0 %v8552_v57  ;;  %v638_v31 = vld [vmem:[%s8425_s11 + $0x100] sm:$0xff] }
 0x19c   : > { %3026 = vmatprep.mubr.bf16.mxu1 %v8498_v39  ;;  %v1244_v33 = vunpack.c.l.s8.bf16 %v638_v31  ;;  %v1250_v62 = vunpack.c.h.s8.bf16 %v638_v31 }
 0x19d   : > { %2997 = vmatpush1.bf16.msra.mxu1 %v1190_v59  ;;  %v739_v59 = vld [vmem:[%s8425_s11 + $0x428] sm:$0xff] }
 0x19e   : > { %2567 = vmatpush1.bf16.msra.mxu0 %v1380_v58  ;;  %2998 = vmatprep.subr.bf16.mxu1 %v1197_v61  ;;  %v1251_v58 = vunpack.c.h.s8.bf16 %v639_v47  ;;  %v1440_v61 = vunpack.c.h.s8.bf16 %v732_v56  ;;  %v1447_v63 = vunpack.c.l.s8.bf16 %v739_v59  ;;  %v1453_v5 = vunpack.c.h.s8.bf16 %v739_v59  ;;  %v669_v56 = vld [vmem:[%s8425_s11 + $0x1f8] sm:$0xff]  ;;  %v668_v59 = vld [vmem:[%s8425_s11 + $0x1f0] sm:$0xff] }
 0x19f   : > { %2568 = vmatprep.subr.bf16.mxu0 %v1387_v60  ;;  %v645_v60 = vld [vmem:[%s8425_s11 + $0x138] sm:$0xff] }
 0x1a1   : > { %2999 = vmatpush1.bf16.msra.mxu1 %v1196_v1  ;;  %v738_v1 = vld [vmem:[%s8425_s11 + $0x420] sm:$0xff] }
 0x1a2   : > { %2569 = vmatpush1.bf16.msra.mxu0 %v1386_v0  ;;  %3000 = vmatprep.subr.bf16.mxu1 %v1203_v3  ;;  %v1257_v0 = vunpack.c.l.s8.bf16 %v645_v60  ;;  %v1446_v3 = vunpack.c.l.s8.bf16 %v738_v1 }
 0x1a3   : > { %2570 = vmatprep.subr.bf16.mxu0 %v1393_v2  ;;  %v644_v2 = vld [vmem:[%s8425_s11 + $0x130] sm:$0xff] }
 0x1a4   : > { %v1256_v4 = vunpack.c.l.s8.bf16 %v644_v2  ;;  %v1262_v10 = vunpack.c.h.s8.bf16 %v644_v2 }
 0x1a5   : > { %3001 = vmatpush1.bf16.msra.mxu1 %v1202_v7  ;;  %v745_v7 = vld [vmem:[%s8425_s11 + $0x458] sm:$0xff] }
 0x1a6   : > { %2571 = vmatpush1.bf16.msra.mxu0 %v1392_v6  ;;  %3002 = vmatprep.subr.bf16.mxu1 %v1209_v9  ;;  %v1263_v6 = vunpack.c.h.s8.bf16 %v645_v60  ;;  %v1452_v9 = vunpack.c.h.s8.bf16 %v738_v1  ;;  %v1459_v11 = vunpack.c.l.s8.bf16 %v745_v7  ;;  %v1465_v17 = vunpack.c.h.s8.bf16 %v745_v7  ;;  %v675_v1 = vld [vmem:[%s8425_s11 + $0x228] sm:$0xff]  ;;  %v674_v7 = vld [vmem:[%s8425_s11 + $0x220] sm:$0xff] }
 0x1a7   : > { %2572 = vmatprep.subr.bf16.mxu0 %v1399_v8  ;;  %v651_v8 = vld [vmem:[%s8425_s11 + $0x168] sm:$0xff] }
 0x1a9   : > { %3003 = vmatpush1.bf16.msra.mxu1 %v1208_v13  ;;  %v744_v13 = vld [vmem:[%s8425_s11 + $0x450] sm:$0xff] }
 0x1aa   : > { %2573 = vmatpush1.bf16.msra.mxu0 %v1398_v12  ;;  %3004 = vmatprep.subr.bf16.mxu1 %v1215_v15  ;;  %v1269_v12 = vunpack.c.l.s8.bf16 %v651_v8  ;;  %v1458_v15 = vunpack.c.l.s8.bf16 %v744_v13 }
 0x1ab   : > { %2574 = vmatprep.subr.bf16.mxu0 %v1405_v14  ;;  %v650_v14 = vld [vmem:[%s8425_s11 + $0x160] sm:$0xff] }
 0x1ac   : > { %v1268_v16 = vunpack.c.l.s8.bf16 %v650_v14  ;;  %v1274_v22 = vunpack.c.h.s8.bf16 %v650_v14 }
 0x1ad   : > { %3005 = vmatpush1.bf16.msra.mxu1 %v1214_v19  ;;  %v751_v19 = vld [vmem:[%s8425_s11 + $0x488] sm:$0xff] }
 0x1ae   : > { %2575 = vmatpush1.bf16.msra.mxu0 %v1404_v18  ;;  %3006 = vmatprep.subr.bf16.mxu1 %v1221_v21  ;;  %v1275_v18 = vunpack.c.h.s8.bf16 %v651_v8  ;;  %v1464_v21 = vunpack.c.h.s8.bf16 %v744_v13  ;;  %v1471_v23 = vunpack.c.l.s8.bf16 %v751_v19  ;;  %v681_v13 = vld [vmem:[%s8425_s11 + $0x258] sm:$0xff] }
 0x1af   : > { %2576 = vmatprep.subr.bf16.mxu0 %v1411_v20  ;;  %v657_v20 = vld [vmem:[%s8425_s11 + $0x198] sm:$0xff] }
 0x1b1   : > { %3007 = vmatpush1.bf16.msra.mxu1 %v1220_v25  ;;  %v750_v25 = vld [vmem:[%s8425_s11 + $0x480] sm:$0xff] }
 0x1b2   : > { %2577 = vmatpush1.bf16.msra.mxu0 %v1410_v24  ;;  %3008 = vmatprep.subr.bf16.mxu1 %v1227_v27  ;;  %v1281_v24 = vunpack.c.l.s8.bf16 %v657_v20  ;;  %v8590_v27 = vcombine.low %v8541_v53, %v8546_v54  ;;  %v1287_v53 = vunpack.c.h.s8.bf16 %v657_v20  ;;  %v757_v54 = vld [vmem:[%s8425_s11 + $0x4b8] sm:$0xff]  ;;  %v1476_v41 = vunpack.c.h.s8.bf16 %v750_v25 }
 0x1b3   : > { %2578 = vmatprep.subr.bf16.mxu0 %v1417_v26  ;;  %v656_v26 = vld [vmem:[%s8425_s11 + $0x190] sm:$0xff] }
 0x1b5   : > { %3009 = vmatpush1.bf16.msra.mxu1 %v1226_v35  ;;  %v1280_v35 = vunpack.c.l.s8.bf16 %v656_v26 }
 0x1b6   : > { %2579 = vmatpush1.bf16.msra.mxu0 %v1416_v30  ;;  %3010 = vmatprep.subr.bf16.mxu1 %v1233_v37  ;;  %v1470_v30 = vunpack.c.l.s8.bf16 %v750_v25  ;;  %v663_v37 = vld [vmem:[%s8425_s11 + $0x1c8] sm:$0xff] }
 0x1b7   : > { %2580 = vmatprep.subr.bf16.mxu0 %v1423_v36  ;;  %v1477_v36 = vunpack.c.h.s8.bf16 %v751_v19  ;;  %v680_v19 = vld [vmem:[%s8425_s11 + $0x250] sm:$0xff]  ;;  %v687_v25 = vld [vmem:[%s8425_s11 + $0x288] sm:$0xff] }
 0x1b9   : > { %3011 = vmatpush1.bf16.msra.mxu1 %v1232_v43  ;;  %v1483_v43 = vunpack.c.l.s8.bf16 %v757_v54 }
 0x1ba   : > { %2581 = vmatpush1.bf16.msra.mxu0 %v1422_v42  ;;  %3012 = vmatprep.subr.bf16.mxu1 %v1239_v45  ;;  %v1286_v42 = vunpack.c.h.s8.bf16 %v656_v26  ;;  %v756_v45 = vld [vmem:[%s8425_s11 + $0x4b0] sm:$0xff] }
 0x1bb   : > { %2582 = vmatprep.subr.bf16.mxu0 %v1429_v44  ;;  %v1293_v44 = vunpack.c.l.s8.bf16 %v663_v37  ;;  %v1482_v47 = vunpack.c.l.s8.bf16 %v756_v45  ;;  %v1488_v31 = vunpack.c.h.s8.bf16 %v756_v45  ;;  %v693_v45 = vld [vmem:[%s8425_s11 + $0x2b8] sm:$0xff] }
 0x1bd   : > { %3013 = vmatpush1.bf16.msra.mxu1 %v1238_v49  ;;  %v1489_v49 = vunpack.c.h.s8.bf16 %v757_v54  ;;  %v686_v54 = vld [vmem:[%s8425_s11 + $0x280] sm:$0xff] }
 0x1be   : > { %2583 = vmatpush1.bf16.msra.mxu0 %v1428_v48  ;;  %3014 = vmatprep.subr.bf16.mxu1 %v1245_v55  ;;  %v1292_v48 = vunpack.c.l.s8.bf16 %v662_v46  ;;  %v763_v55 = vld [vmem:[%s8425_s11 + $0x4e8] sm:$0xff] }
 0x1bf   : > { %2584 = vmatprep.subr.bf16.mxu0 %v1435_v50  ;;  %v1299_v50 = vunpack.c.h.s8.bf16 %v663_v37 }
 0x1c1   : > { %3015 = vmatpush1.bf16.msra.mxu1 %v1244_v33  ;;  %v1495_v33 = vunpack.c.l.s8.bf16 %v763_v55 }
 0x1c2   : > { %2585 = vmatpush1.bf16.msra.mxu0 %v1434_v32  ;;  %3016 = vmatprep.subr.bf16.mxu1 %v1251_v58  ;;  %v1298_v32 = vunpack.c.h.s8.bf16 %v662_v46  ;;  %v762_v58 = vld [vmem:[%s8425_s11 + $0x4e0] sm:$0xff] }
 0x1c3   : > { %2586 = vmatprep.subr.bf16.mxu0 %v1441_v34  ;;  %v1305_v34 = vunpack.c.l.s8.bf16 %v669_v56  ;;  %v1494_v60 = vunpack.c.l.s8.bf16 %v762_v58  ;;  %v1500_v2 = vunpack.c.h.s8.bf16 %v762_v58  ;;  %v699_v58 = vld [vmem:[%s8425_s11 + $0x2e8] sm:$0xff] }
 0x1c5   : > { %3017 = vmatpush1.bf16.msra.mxu1 %v1250_v62  ;;  %v1501_v62 = vunpack.c.h.s8.bf16 %v763_v55  ;;  %v692_v55 = vld [vmem:[%s8425_s11 + $0x2b0] sm:$0xff] }
 0x1c6   : > { %2587 = vmatpush1.bf16.msra.mxu0 %v1440_v61  ;;  %3018 = vmatprep.subr.bf16.mxu1 %v1257_v0  ;;  %v1304_v61 = vunpack.c.l.s8.bf16 %v668_v59  ;;  %v769_v0 = vld [vmem:[%s8425_s11 + $0x518] sm:$0xff] }
 0x1c7   : > { %2588 = vmatprep.subr.bf16.mxu0 %v1447_v63  ;;  %v1311_v63 = vunpack.c.h.s8.bf16 %v669_v56 }
 0x1c9   : > { %3019 = vmatpush1.bf16.msra.mxu1 %v1256_v4  ;;  %v1507_v4 = vunpack.c.l.s8.bf16 %v769_v0 }
 0x1ca   : > { %2589 = vmatpush1.bf16.msra.mxu0 %v1446_v3  ;;  %3020 = vmatprep.subr.bf16.mxu1 %v1263_v6  ;;  %v1310_v3 = vunpack.c.h.s8.bf16 %v668_v59  ;;  %v768_v6 = vld [vmem:[%s8425_s11 + $0x510] sm:$0xff] }
 0x1cb   : > { %2590 = vmatprep.subr.bf16.mxu0 %v1453_v5  ;;  %v1317_v5 = vunpack.c.l.s8.bf16 %v675_v1  ;;  %v1506_v8 = vunpack.c.l.s8.bf16 %v768_v6  ;;  %v1512_v14 = vunpack.c.h.s8.bf16 %v768_v6  ;;  %v705_v6 = vld [vmem:[%s8425_s11 + $0x318] sm:$0xff] }
 0x1cd   : > { %3021 = vmatpush1.bf16.msra.mxu1 %v1262_v10  ;;  %v1513_v10 = vunpack.c.h.s8.bf16 %v769_v0  ;;  %v698_v0 = vld [vmem:[%s8425_s11 + $0x2e0] sm:$0xff] }
 0x1ce   : > { %2591 = vmatpush1.bf16.msra.mxu0 %v1452_v9  ;;  %3022 = vmatprep.subr.bf16.mxu1 %v1269_v12  ;;  %v1316_v9 = vunpack.c.l.s8.bf16 %v674_v7  ;;  %v775_v12 = vld [vmem:[%s8425_s11 + $0x548] sm:$0xff] }
 0x1cf   : > { %2592 = vmatprep.subr.bf16.mxu0 %v1459_v11  ;;  %v1323_v11 = vunpack.c.h.s8.bf16 %v675_v1 }
 0x1d1   : > { %3023 = vmatpush1.bf16.msra.mxu1 %v1268_v16  ;;  %v1519_v16 = vunpack.c.l.s8.bf16 %v775_v12 }
 0x1d2   : > { %2593 = vmatpush1.bf16.msra.mxu0 %v1458_v15  ;;  %3024 = vmatprep.subr.bf16.mxu1 %v1275_v18  ;;  %v1322_v15 = vunpack.c.h.s8.bf16 %v674_v7  ;;  %v774_v18 = vld [vmem:[%s8425_s11 + $0x540] sm:$0xff] }
 0x1d3   : > { %2594 = vmatprep.subr.bf16.mxu0 %v1465_v17  ;;  %v1329_v17 = vunpack.c.l.s8.bf16 %v681_v13  ;;  %v1518_v20 = vunpack.c.l.s8.bf16 %v774_v18  ;;  %v1524_v26 = vunpack.c.h.s8.bf16 %v774_v18 }
 0x1d5   : > { %3025 = vmatpush1.bf16.msra.mxu1 %v1274_v22  ;;  %v1525_v22 = vunpack.c.h.s8.bf16 %v775_v12  ;;  %v704_v12 = vld [vmem:[%s8425_s11 + $0x310] sm:$0xff] }
 0x1d6   : > { %2595 = vmatpush1.bf16.msra.mxu0 %v1464_v21  ;;  %3037 = vmatprep.subr.bf16.mxu1 %v1281_v24  ;;  %v1328_v21 = vunpack.c.l.s8.bf16 %v680_v19  ;;  %v781_v24 = vld [vmem:[%s8425_s11 + $0x578] sm:$0xff] }
 0x1d7   : > { %2607 = vmatprep.subr.bf16.mxu0 %v1471_v23  ;;  %v1335_v23 = vunpack.c.h.s8.bf16 %v681_v13  ;;  %v8644_v13 = vcombine.low %v8595_v28, %v8600_v29  ;;  %v1383_v28 = vunpack.c.h.s8.bf16 %v705_v6  ;;  %v805_v29 = vld [vmem:[%s8425_s11 + $0x638] sm:$0xff] }
 0x1d8   : > { %3027 = vmatmul.mubr.bf16.vlgmr.msra.gmra.mrb[4].mxu1 %v8532_v51 }
 0x1d9   : > { %2597 = vmatmul.mubr.bf16.vlgmr.msra.gmra.mrb[0].mxu0 %v8590_v27  ;;  %3038 = vmatpush1.bf16.msra.mxu1 %v1280_v35  ;;  %v1531_v35 = vunpack.c.l.s8.bf16 %v781_v24 }
 0x1da   : > { %2608 = vmatpush1.bf16.msra.mxu0 %v1470_v30  ;;  %3039 = vmatprep.subr.bf16.mxu1 %v1287_v53  ;;  %v1334_v30 = vunpack.c.h.s8.bf16 %v680_v19  ;;  %v780_v53 = vld [vmem:[%s8425_s11 + $0x570] sm:$0xff]  ;;  %v711_v19 = vld [vmem:[%s8425_s11 + $0x348] sm:$0xff] }
 0x1db   : > { %2609 = vmatprep.subr.bf16.mxu0 %v1477_v36  ;;  %2639 = vmatprep.mubr.bf16.mxu0 %v8606_v38  ;;  %v1341_v36 = vunpack.c.l.s8.bf16 %v687_v25  ;;  %v1530_v37 = vunpack.c.l.s8.bf16 %v780_v53  ;;  %v1536_v46 = vunpack.c.h.s8.bf16 %v780_v53  ;;  %v1395_v53 = vunpack.c.h.s8.bf16 %v711_v19 }
 0x1dc   : > { %3069 = vmatprep.mubr.bf16.mxu1 %v8502_v40 }
 0x1dd   : > { %3040 = vmatpush1.bf16.msra.mxu1 %v1286_v42  ;;  %v1537_v42 = vunpack.c.h.s8.bf16 %v781_v24  ;;  %v1389_v24 = vunpack.c.l.s8.bf16 %v711_v19  ;;  %v828_v19 = vld [vmem:[%s8425_s11 + $0x6f0] sm:$0xff] }
 0x1de   : > { %2610 = vmatpush1.bf16.msra.mxu0 %v1476_v41  ;;  %3041 = vmatprep.subr.bf16.mxu1 %v1293_v44  ;;  %v1340_v41 = vunpack.c.l.s8.bf16 %v686_v54  ;;  %v787_v44 = vld [vmem:[%s8425_s11 + $0x5a8] sm:$0xff] }
 0x1df   : > { %2611 = vmatprep.subr.bf16.mxu0 %v1483_v43  ;;  %v1347_v43 = vunpack.c.h.s8.bf16 %v687_v25  ;;  %v804_v25 = vld [vmem:[%s8425_s11 + $0x630] sm:$0xff] }
 0x1e1   : > { %3042 = vmatpush1.bf16.msra.mxu1 %v1292_v48  ;;  %v1543_v48 = vunpack.c.l.s8.bf16 %v787_v44 }
 0x1e2   : > { %2612 = vmatpush1.bf16.msra.mxu0 %v1482_v47  ;;  %3043 = vmatprep.subr.bf16.mxu1 %v1299_v50  ;;  %v1346_v47 = vunpack.c.h.s8.bf16 %v686_v54  ;;  %v786_v50 = vld [vmem:[%s8425_s11 + $0x5a0] sm:$0xff]  ;;  %v811_v54 = vld [vmem:[%s8425_s11 + $0x668] sm:$0xff] }
 0x1e3   : > { %2613 = vmatprep.subr.bf16.mxu0 %v1489_v49  ;;  %v1353_v49 = vunpack.c.l.s8.bf16 %v693_v45  ;;  %v1542_v56 = vunpack.c.l.s8.bf16 %v786_v50  ;;  %v1548_v59 = vunpack.c.h.s8.bf16 %v786_v50 }
 0x1e5   : > { %3044 = vmatpush1.bf16.msra.mxu1 %v1298_v32  ;;  %v1549_v32 = vunpack.c.h.s8.bf16 %v787_v44 }
 0x1e6   : > { %2614 = vmatpush1.bf16.msra.mxu0 %v1488_v31  ;;  %3045 = vmatprep.subr.bf16.mxu1 %v1305_v34  ;;  %v1352_v31 = vunpack.c.l.s8.bf16 %v692_v55  ;;  %v793_v34 = vld [vmem:[%s8425_s11 + $0x5d8] sm:$0xff] }
 0x1e7   : > { %2615 = vmatprep.subr.bf16.mxu0 %v1495_v33  ;;  %v1359_v33 = vunpack.c.h.s8.bf16 %v693_v45  ;;  %v810_v45 = vld [vmem:[%s8425_s11 + $0x660] sm:$0xff] }
 0x1e9   : > { %3046 = vmatpush1.bf16.msra.mxu1 %v1304_v61  ;;  %v1555_v61 = vunpack.c.l.s8.bf16 %v793_v34 }
 0x1ea   : > { %2616 = vmatpush1.bf16.msra.mxu0 %v1494_v60  ;;  %3047 = vmatprep.subr.bf16.mxu1 %v1311_v63  ;;  %v1358_v60 = vunpack.c.h.s8.bf16 %v692_v55  ;;  %v792_v63 = vld [vmem:[%s8425_s11 + $0x5d0] sm:$0xff]  ;;  %v817_v55 = vld [vmem:[%s8425_s11 + $0x698] sm:$0xff] }
 0x1eb   : > { %2617 = vmatprep.subr.bf16.mxu0 %v1501_v62  ;;  %v1365_v62 = vunpack.c.l.s8.bf16 %v699_v58  ;;  %v1554_v1 = vunpack.c.l.s8.bf16 %v792_v63  ;;  %v1560_v7 = vunpack.c.h.s8.bf16 %v792_v63 }
 0x1ed   : > { %3048 = vmatpush1.bf16.msra.mxu1 %v1310_v3  ;;  %v1561_v3 = vunpack.c.h.s8.bf16 %v793_v34 }
 0x1ee   : > { %2618 = vmatpush1.bf16.msra.mxu0 %v1500_v2  ;;  %3049 = vmatprep.subr.bf16.mxu1 %v1317_v5  ;;  %v1364_v2 = vunpack.c.l.s8.bf16 %v698_v0  ;;  %v799_v5 = vld [vmem:[%s8425_s11 + $0x608] sm:$0xff] }
 0x1ef   : > { %2619 = vmatprep.subr.bf16.mxu0 %v1507_v4  ;;  %v1371_v4 = vunpack.c.h.s8.bf16 %v699_v58  ;;  %v1573_v18 = vunpack.c.h.s8.bf16 %v799_v5  ;;  %v816_v58 = vld [vmem:[%s8425_s11 + $0x690] sm:$0xff] }
 0x1f1   : > { %3050 = vmatpush1.bf16.msra.mxu1 %v1316_v9  ;;  %v1567_v9 = vunpack.c.l.s8.bf16 %v799_v5 }
 0x1f2   : > { %2620 = vmatpush1.bf16.msra.mxu0 %v1506_v8  ;;  %3051 = vmatprep.subr.bf16.mxu1 %v1323_v11  ;;  %v1370_v8 = vunpack.c.h.s8.bf16 %v698_v0  ;;  %v798_v11 = vld [vmem:[%s8425_s11 + $0x600] sm:$0xff]  ;;  %v823_v0 = vld [vmem:[%s8425_s11 + $0x6c8] sm:$0xff] }
 0x1f3   : > { %2621 = vmatprep.subr.bf16.mxu0 %v1513_v10  ;;  %v1377_v10 = vunpack.c.l.s8.bf16 %v705_v6  ;;  %v822_v6 = vld [vmem:[%s8425_s11 + $0x6c0] sm:$0xff] }
 0x1f5   : > { %3052 = vmatpush1.bf16.msra.mxu1 %v1322_v15  ;;  %v8654_v15 = vld [vmem:[%s9718_s5 + $0x80] sm:$0xff] }
 0x1f6   : > { %2622 = vmatpush1.bf16.msra.mxu0 %v1512_v14  ;;  %3053 = vmatprep.subr.bf16.mxu1 %v1329_v17  ;;  %v8649_v14 = vld [vmem:[%s9718_s5 + $0x20] sm:$0xff]  ;;  %v1376_v17 = vunpack.c.l.s8.bf16 %v704_v12 }
 0x1f7   : > { %2623 = vmatprep.subr.bf16.mxu0 %v1519_v16  ;;  %v1566_v16 = vunpack.c.l.s8.bf16 %v798_v11 }
 0x1f9   : > { %3054 = vmatpush1.bf16.msra.mxu1 %v1328_v21  ;;  %v1572_v21 = vunpack.c.h.s8.bf16 %v798_v11 }
 0x1fa   : > { %2624 = vmatpush1.bf16.msra.mxu0 %v1518_v20  ;;  %3055 = vmatprep.subr.bf16.mxu1 %v1335_v23  ;;  %v8660_v20 = vcombine.high %v8649_v14, %v8654_v15  ;;  %v1579_v23 = vunpack.c.l.s8.bf16 %v805_v29 }
 0x1fb   : > { %2625 = vmatprep.subr.bf16.mxu0 %v1525_v22  ;;  %v1382_v22 = vunpack.c.h.s8.bf16 %v704_v12  ;;  %v829_v12 = vld [vmem:[%s8425_s11 + $0x6f8] sm:$0xff] }
 0x1fd   : > { %3056 = vmatpush1.bf16.msra.mxu1 %v1334_v30  ;;  %v1578_v30 = vunpack.c.l.s8.bf16 %v804_v25 }
 0x1fe   : > { %2626 = vmatpush1.bf16.msra.mxu0 %v1524_v26  ;;  %3057 = vmatprep.subr.bf16.mxu1 %v1341_v36  ;;  %v710_v26 = vld [vmem:[%s8425_s11 + $0x340] sm:$0xff]  ;;  %v1585_v36 = vunpack.c.h.s8.bf16 %v805_v29 }
 0x1ff   : > { %2627 = vmatprep.subr.bf16.mxu0 %v1531_v35  ;;  %v1388_v35 = vunpack.c.l.s8.bf16 %v710_v26 }
 0x201   : > { %3058 = vmatpush1.bf16.msra.mxu1 %v1340_v41  ;;  %v1584_v41 = vunpack.c.h.s8.bf16 %v804_v25 }
 0x202   : > { %2628 = vmatpush1.bf16.msra.mxu0 %v1530_v37  ;;  %3059 = vmatprep.subr.bf16.mxu1 %v1347_v43  ;;  %v717_v37 = vld [vmem:[%s8425_s11 + $0x378] sm:$0xff]  ;;  %v1591_v43 = vunpack.c.l.s8.bf16 %v811_v54 }
 0x203   : > { %2629 = vmatprep.subr.bf16.mxu0 %v1537_v42  ;;  %v1394_v42 = vunpack.c.h.s8.bf16 %v710_v26  ;;  %v1401_v44 = vunpack.c.l.s8.bf16 %v717_v37  ;;  %v1407_v50 = vunpack.c.h.s8.bf16 %v717_v37  ;;  %v835_v26 = vld [vmem:[%s8425_s11 + $0x728] sm:$0xff]  ;;  %v834_v37 = vld [vmem:[%s8425_s11 + $0x720] sm:$0xff] }
 0x205   : > { %3060 = vmatpush1.bf16.msra.mxu1 %v1346_v47  ;;  %v1590_v47 = vunpack.c.l.s8.bf16 %v810_v45 }
 0x206   : > { %2630 = vmatpush1.bf16.msra.mxu0 %v1536_v46  ;;  %3061 = vmatprep.subr.bf16.mxu1 %v1353_v49  ;;  %v716_v46 = vld [vmem:[%s8425_s11 + $0x370] sm:$0xff]  ;;  %v1597_v49 = vunpack.c.h.s8.bf16 %v811_v54 }
 0x207   : > { %2631 = vmatprep.subr.bf16.mxu0 %v1543_v48  ;;  %v1400_v48 = vunpack.c.l.s8.bf16 %v716_v46 }
 0x209   : > { %3062 = vmatpush1.bf16.msra.mxu1 %v1352_v31  ;;  %v1596_v31 = vunpack.c.h.s8.bf16 %v810_v45 }
 0x20a   : > { %2632 = vmatpush1.bf16.msra.mxu0 %v1542_v56  ;;  %3063 = vmatprep.subr.bf16.mxu1 %v1359_v33  ;;  %v723_v56 = vld [vmem:[%s8425_s11 + $0x3a8] sm:$0xff]  ;;  %v1603_v33 = vunpack.c.l.s8.bf16 %v817_v55 }
 0x20b   : > { %2633 = vmatprep.subr.bf16.mxu0 %v1549_v32  ;;  %v1406_v32 = vunpack.c.h.s8.bf16 %v716_v46  ;;  %v1413_v34 = vunpack.c.l.s8.bf16 %v723_v56  ;;  %v1419_v63 = vunpack.c.h.s8.bf16 %v723_v56  ;;  %v841_v46 = vld [vmem:[%s8425_s11 + $0x758] sm:$0xff]  ;;  %v840_v56 = vld [vmem:[%s8425_s11 + $0x750] sm:$0xff] }
 0x20d   : > { %3064 = vmatpush1.bf16.msra.mxu1 %v1358_v60  ;;  %v1602_v60 = vunpack.c.l.s8.bf16 %v816_v58 }
 0x20e   : > { %2634 = vmatpush1.bf16.msra.mxu0 %v1548_v59  ;;  %3065 = vmatprep.subr.bf16.mxu1 %v1365_v62  ;;  %v722_v59 = vld [vmem:[%s8425_s11 + $0x3a0] sm:$0xff]  ;;  %v1609_v62 = vunpack.c.h.s8.bf16 %v817_v55 }
 0x20f   : > { %2635 = vmatprep.subr.bf16.mxu0 %v1555_v61  ;;  %v1412_v61 = vunpack.c.l.s8.bf16 %v722_v59 }
 0x211   : > { %3066 = vmatpush1.bf16.msra.mxu1 %v1364_v2  ;;  %v1608_v2 = vunpack.c.h.s8.bf16 %v816_v58 }
 0x212   : > { %2636 = vmatpush1.bf16.msra.mxu0 %v1554_v1  ;;  %3067 = vmatprep.subr.bf16.mxu1 %v1371_v4  ;;  %v729_v1 = vld [vmem:[%s8425_s11 + $0x3d8] sm:$0xff]  ;;  %v1615_v4 = vunpack.c.l.s8.bf16 %v823_v0 }
 0x213   : > { %2637 = vmatprep.subr.bf16.mxu0 %v1561_v3  ;;  %v1418_v3 = vunpack.c.h.s8.bf16 %v722_v59  ;;  %v1425_v5 = vunpack.c.l.s8.bf16 %v729_v1  ;;  %v1431_v11 = vunpack.c.h.s8.bf16 %v729_v1  ;;  %v847_v59 = vld [vmem:[%s8425_s11 + $0x788] sm:$0xff]  ;;  %v846_v1 = vld [vmem:[%s8425_s11 + $0x780] sm:$0xff] }
 0x215   : > { %3068 = vmatpush1.bf16.msra.mxu1 %v1370_v8  ;;  %v1614_v8 = vunpack.c.l.s8.bf16 %v822_v6 }
 0x216   : > { %2638 = vmatpush1.bf16.msra.mxu0 %v1560_v7  ;;  %3080 = vmatprep.subr.bf16.mxu1 %v1377_v10  ;;  %v728_v7 = vld [vmem:[%s8425_s11 + $0x3d0] sm:$0xff]  ;;  %v1621_v10 = vunpack.c.h.s8.bf16 %v823_v0 }
 0x217   : > { %2650 = vmatprep.subr.bf16.mxu0 %v1567_v9  ;;  %v1424_v9 = vunpack.c.l.s8.bf16 %v728_v7 }
 0x218   : > { %3070 = vmatmul.mubr.bf16.vlgmr.msra.gmra.mrb[4].mxu1 %v8536_v52 }
 0x219   : > { %2640 = vmatmul.mubr.bf16.vlgmr.msra.gmra.mrb[0].mxu0 %v8644_v13  ;;  %3081 = vmatpush1.bf16.msra.mxu1 %v1376_v17  ;;  %v1620_v17 = vunpack.c.h.s8.bf16 %v822_v6  ;;  %v1662_v6 = vunpack.c.l.s8.bf16 %v846_v1 }
 0x21a   : > { %2651 = vmatpush1.bf16.msra.mxu0 %v1566_v16  ;;  %3082 = vmatprep.subr.bf16.mxu1 %v1383_v28  ;;  %v735_v16 = vld [vmem:[%s8425_s11 + $0x408] sm:$0xff]  ;;  %v1627_v28 = vunpack.c.l.s8.bf16 %v829_v12 }
 0x21b   : > { %2652 = vmatprep.subr.bf16.mxu0 %v1573_v18  ;;  %2682 = vmatprep.mubr.bf16.mxu0 %v8660_v20  ;;  %v1430_v18 = vunpack.c.h.s8.bf16 %v728_v7  ;;  %v1437_v29 = vunpack.c.l.s8.bf16 %v735_v16  ;;  %v1443_v25 = vunpack.c.h.s8.bf16 %v735_v16 }
 0x21c   : > { %3112 = vmatprep.mubr.bf16.mxu1 %v8552_v57 }
 0x21d   : > { %3083 = vmatpush1.bf16.msra.mxu1 %v1382_v22  ;;  %v1626_v22 = vunpack.c.l.s8.bf16 %v828_v19 }
 0x21e   : > { %2653 = vmatpush1.bf16.msra.mxu0 %v1572_v21  ;;  %3084 = vmatprep.subr.bf16.mxu1 %v1389_v24  ;;  %v734_v21 = vld [vmem:[%s8425_s11 + $0x400] sm:$0xff]  ;;  %v1633_v24 = vunpack.c.h.s8.bf16 %v829_v12 }
 0x21f   : > { %2654 = vmatprep.subr.bf16.mxu0 %v1579_v23  ;;  %v1436_v23 = vunpack.c.l.s8.bf16 %v734_v21 }
 0x221   : > { %3085 = vmatpush1.bf16.msra.mxu1 %v1388_v35  ;;  %v1632_v35 = vunpack.c.h.s8.bf16 %v828_v19 }
 0x222   : > { %2655 = vmatpush1.bf16.msra.mxu0 %v1578_v30  ;;  %3086 = vmatprep.subr.bf16.mxu1 %v1395_v53  ;;  %v741_v30 = vld [vmem:[%s8425_s11 + $0x438] sm:$0xff]  ;;  %v1639_v53 = vunpack.c.l.s8.bf16 %v835_v26 }
 0x223   : > { %2656 = vmatprep.subr.bf16.mxu0 %v1585_v36  ;;  %v1442_v36 = vunpack.c.h.s8.bf16 %v734_v21  ;;  %v1449_v54 = vunpack.c.l.s8.bf16 %v741_v30  ;;  %v1455_v45 = vunpack.c.h.s8.bf16 %v741_v30 }
 0x225   : > { %3087 = vmatpush1.bf16.msra.mxu1 %v1394_v42  ;;  %v1638_v42 = vunpack.c.l.s8.bf16 %v834_v37 }
 0x226   : > { %2657 = vmatpush1.bf16.msra.mxu0 %v1584_v41  ;;  %3088 = vmatprep.subr.bf16.mxu1 %v1401_v44  ;;  %v740_v41 = vld [vmem:[%s8425_s11 + $0x430] sm:$0xff]  ;;  %v1645_v44 = vunpack.c.h.s8.bf16 %v835_v26 }
 0x227   : > { %2658 = vmatprep.subr.bf16.mxu0 %v1591_v43  ;;  %v1448_v43 = vunpack.c.l.s8.bf16 %v740_v41 }
 0x229   : > { %3089 = vmatpush1.bf16.msra.mxu1 %v1400_v48  ;;  %v1644_v48 = vunpack.c.h.s8.bf16 %v834_v37 }
 0x22a   : > { %2659 = vmatpush1.bf16.msra.mxu0 %v1590_v47  ;;  %3090 = vmatprep.subr.bf16.mxu1 %v1407_v50  ;;  %v747_v47 = vld [vmem:[%s8425_s11 + $0x468] sm:$0xff]  ;;  %v1651_v50 = vunpack.c.l.s8.bf16 %v841_v46 }
 0x22b   : > { %2660 = vmatprep.subr.bf16.mxu0 %v1597_v49  ;;  %v1454_v49 = vunpack.c.h.s8.bf16 %v740_v41  ;;  %v1461_v55 = vunpack.c.l.s8.bf16 %v747_v47  ;;  %v1467_v58 = vunpack.c.h.s8.bf16 %v747_v47 }
 0x22d   : > { %3091 = vmatpush1.bf16.msra.mxu1 %v1406_v32  ;;  %v1650_v32 = vunpack.c.l.s8.bf16 %v840_v56 }
 0x22e   : > { %2661 = vmatpush1.bf16.msra.mxu0 %v1596_v31  ;;  %3092 = vmatprep.subr.bf16.mxu1 %v1413_v34  ;;  %v746_v31 = vld [vmem:[%s8425_s11 + $0x460] sm:$0xff]  ;;  %v1657_v34 = vunpack.c.h.s8.bf16 %v841_v46 }
 0x22f   : > { %2662 = vmatprep.subr.bf16.mxu0 %v1603_v33  ;;  %v1460_v33 = vunpack.c.l.s8.bf16 %v746_v31 }
 0x231   : > { %3093 = vmatpush1.bf16.msra.mxu1 %v1412_v61  ;;  %v1656_v61 = vunpack.c.h.s8.bf16 %v840_v56 }
 0x232   : > { %2663 = vmatpush1.bf16.msra.mxu0 %v1602_v60  ;;  %3094 = vmatprep.subr.bf16.mxu1 %v1419_v63  ;;  %v753_v60 = vld [vmem:[%s8425_s11 + $0x498] sm:$0xff]  ;;  %v1663_v63 = vunpack.c.l.s8.bf16 %v847_v59 }
 0x233   : > { %2664 = vmatprep.subr.bf16.mxu0 %v1609_v62  ;;  %v1466_v62 = vunpack.c.h.s8.bf16 %v746_v31  ;;  %v1473_v0 = vunpack.c.l.s8.bf16 %v753_v60 }
 0x235   : > { %3095 = vmatpush1.bf16.msra.mxu1 %v1418_v3  ;;  %v8698_v3 = vcombine.low %v8649_v14, %v8654_v15  ;;  %v1479_v14 = vunpack.c.h.s8.bf16 %v753_v60  ;;  %v853_v15 = vld [vmem:[%s8425_s11 + $0x7b8] sm:$0xff] }
 0x236   : > { %2665 = vmatpush1.bf16.msra.mxu0 %v1608_v2  ;;  %3096 = vmatprep.subr.bf16.mxu1 %v1425_v5  ;;  %v752_v2 = vld [vmem:[%s8425_s11 + $0x490] sm:$0xff]  ;;  %v8708_v5 = vld [vmem:[%s9718_s5 + $0x88] sm:$0xff]  ;;  %v1675_v16 = vunpack.c.l.s8.bf16 %v853_v15  ;;  %v1681_v21 = vunpack.c.h.s8.bf16 %v853_v15 }
 0x237   : > { %2666 = vmatprep.subr.bf16.mxu0 %v1615_v4  ;;  %v8703_v4 = vld [vmem:[%s9718_s5 + $0x28] sm:$0xff]  ;;  %v1472_v7 = vunpack.c.l.s8.bf16 %v752_v2  ;;  %v1478_v12 = vunpack.c.h.s8.bf16 %v752_v2 }
 0x239   : > { %3097 = vmatpush1.bf16.msra.mxu1 %v1424_v9  ;;  %v759_v9 = vld [vmem:[%s8425_s11 + $0x4c8] sm:$0xff] }
 0x23a   : > { %2667 = vmatpush1.bf16.msra.mxu0 %v1614_v8  ;;  %3098 = vmatprep.subr.bf16.mxu1 %v1431_v11  ;;  %v1669_v8 = vunpack.c.h.s8.bf16 %v847_v59  ;;  %v1668_v11 = vunpack.c.h.s8.bf16 %v846_v1 }
 0x23b   : > { %2668 = vmatprep.subr.bf16.mxu0 %v1621_v10  ;;  %v8714_v10 = vcombine.high %v8703_v4, %v8708_v5 }
 0x23d   : > { %3099 = vmatpush1.bf16.msra.mxu1 %v1430_v18  ;;  %v852_v18 = vld [vmem:[%s8425_s11 + $0x7b0] sm:$0xff] }
 0x23e   : > { %2669 = vmatpush1.bf16.msra.mxu0 %v1620_v17  ;;  %3100 = vmatprep.subr.bf16.mxu1 %v1437_v29  ;;  %v1485_v17 = vunpack.c.l.s8.bf16 %v759_v9  ;;  %v1674_v29 = vunpack.c.l.s8.bf16 %v852_v18 }
 0x23f   : > { %2670 = vmatprep.subr.bf16.mxu0 %v1627_v28  ;;  %v758_v28 = vld [vmem:[%s8425_s11 + $0x4c0] sm:$0xff] }
 0x240   : > { %v1484_v19 = vunpack.c.l.s8.bf16 %v758_v28  ;;  %v1490_v26 = vunpack.c.h.s8.bf16 %v758_v28 }
 0x241   : > { %3101 = vmatpush1.bf16.msra.mxu1 %v1436_v23  ;;  %v859_v23 = vld [vmem:[%s8425_s11 + $0x7e8] sm:$0xff] }
 0x242   : > { %2671 = vmatpush1.bf16.msra.mxu0 %v1626_v22  ;;  %3102 = vmatprep.subr.bf16.mxu1 %v1443_v25  ;;  %v1491_v22 = vunpack.c.h.s8.bf16 %v759_v9  ;;  %v1680_v25 = vunpack.c.h.s8.bf16 %v852_v18  ;;  %v1687_v30 = vunpack.c.l.s8.bf16 %v859_v23  ;;  %v1693_v41 = vunpack.c.h.s8.bf16 %v859_v23 }
 0x243   : > { %2672 = vmatprep.subr.bf16.mxu0 %v1633_v24  ;;  %v765_v24 = vld [vmem:[%s8425_s11 + $0x4f8] sm:$0xff] }
 0x245   : > { %3103 = vmatpush1.bf16.msra.mxu1 %v1442_v36  ;;  %v858_v36 = vld [vmem:[%s8425_s11 + $0x7e0] sm:$0xff] }
 0x246   : > { %2673 = vmatpush1.bf16.msra.mxu0 %v1632_v35  ;;  %3104 = vmatprep.subr.bf16.mxu1 %v1449_v54  ;;  %v1497_v35 = vunpack.c.l.s8.bf16 %v765_v24  ;;  %v1686_v54 = vunpack.c.l.s8.bf16 %v858_v36 }
 0x247   : > { %2674 = vmatprep.subr.bf16.mxu0 %v1639_v53  ;;  %v764_v53 = vld [vmem:[%s8425_s11 + $0x4f0] sm:$0xff] }
 0x248   : > { %v1496_v37 = vunpack.c.l.s8.bf16 %v764_v53  ;;  %v1502_v46 = vunpack.c.h.s8.bf16 %v764_v53 }
 0x249   : > { %3105 = vmatpush1.bf16.msra.mxu1 %v1448_v43  ;;  %v865_v43 = vld [vmem:[%s8425_s11 + $0x818] sm:$0xff] }
 0x24a   : > { %2675 = vmatpush1.bf16.msra.mxu0 %v1638_v42  ;;  %3106 = vmatprep.subr.bf16.mxu1 %v1455_v45  ;;  %v1503_v42 = vunpack.c.h.s8.bf16 %v765_v24  ;;  %v1692_v45 = vunpack.c.h.s8.bf16 %v858_v36  ;;  %v1699_v47 = vunpack.c.l.s8.bf16 %v865_v43  ;;  %v1705_v31 = vunpack.c.h.s8.bf16 %v865_v43 }
 0x24b   : > { %2676 = vmatprep.subr.bf16.mxu0 %v1645_v44  ;;  %v771_v44 = vld [vmem:[%s8425_s11 + $0x528] sm:$0xff] }
 0x24d   : > { %3107 = vmatpush1.bf16.msra.mxu1 %v1454_v49  ;;  %v864_v49 = vld [vmem:[%s8425_s11 + $0x810] sm:$0xff] }
 0x24e   : > { %2677 = vmatpush1.bf16.msra.mxu0 %v1644_v48  ;;  %3108 = vmatprep.subr.bf16.mxu1 %v1461_v55  ;;  %v1509_v48 = vunpack.c.l.s8.bf16 %v771_v44  ;;  %v1698_v55 = vunpack.c.l.s8.bf16 %v864_v49 }
 0x24f   : > { %2678 = vmatprep.subr.bf16.mxu0 %v1651_v50  ;;  %v770_v50 = vld [vmem:[%s8425_s11 + $0x520] sm:$0xff] }
 0x250   : > { %v1508_v56 = vunpack.c.l.s8.bf16 %v770_v50  ;;  %v1514_v59 = vunpack.c.h.s8.bf16 %v770_v50 }
 0x251   : > { %3109 = vmatpush1.bf16.msra.mxu1 %v1460_v33  ;;  %v871_v33 = vld [vmem:[%s8425_s11 + $0x848] sm:$0xff] }
 0x252   : > { %2679 = vmatpush1.bf16.msra.mxu0 %v1650_v32  ;;  %3110 = vmatprep.subr.bf16.mxu1 %v1467_v58  ;;  %v1515_v32 = vunpack.c.h.s8.bf16 %v771_v44  ;;  %v1704_v58 = vunpack.c.h.s8.bf16 %v864_v49  ;;  %v1711_v60 = vunpack.c.l.s8.bf16 %v871_v33  ;;  %v1717_v2 = vunpack.c.h.s8.bf16 %v871_v33 }
 0x253   : > { %2680 = vmatprep.subr.bf16.mxu0 %v1657_v34  ;;  %v777_v34 = vld [vmem:[%s8425_s11 + $0x558] sm:$0xff] }
 0x255   : > { %3111 = vmatpush1.bf16.msra.mxu1 %v1466_v62  ;;  %v870_v62 = vld [vmem:[%s8425_s11 + $0x840] sm:$0xff] }
 0x256   : > { %2681 = vmatpush1.bf16.msra.mxu0 %v1656_v61  ;;  %3123 = vmatprep.subr.bf16.mxu1 %v1473_v0  ;;  %v1521_v61 = vunpack.c.l.s8.bf16 %v777_v34  ;;  %v1710_v0 = vunpack.c.l.s8.bf16 %v870_v62 }
 0x257   : > { %2693 = vmatprep.subr.bf16.mxu0 %v1663_v63  ;;  %v776_v63 = vld [vmem:[%s8425_s11 + $0x550] sm:$0xff] }
 0x258   : > { %3113 = vmatmul.mubr.bf16.vlgmr.msra.gmra.mrb[4].mxu1 %v8590_v27  ;;  %v1520_v1 = vunpack.c.l.s8.bf16 %v776_v63  ;;  %v1526_v15 = vunpack.c.h.s8.bf16 %v776_v63  ;;  %v8762_v63 = vld [vmem:[%s9718_s5 + $0x90] sm:$0xff] }
 0x259   : > { %2683 = vmatmul.mubr.bf16.vlgmr.msra.gmra.mrb[0].mxu0 %v8698_v3  ;;  %3124 = vmatpush1.bf16.msra.mxu1 %v1472_v7  ;;  %v877_v7 = vld [vmem:[%s8425_s11 + $0x878] sm:$0xff] }
 0x25a   : > { %2694 = vmatpush1.bf16.msra.mxu0 %v1662_v6  ;;  %3125 = vmatprep.subr.bf16.mxu1 %v1479_v14  ;;  %v1527_v6 = vunpack.c.h.s8.bf16 %v777_v34  ;;  %v1716_v14 = vunpack.c.h.s8.bf16 %v870_v62  ;;  %v1723_v9 = vunpack.c.l.s8.bf16 %v877_v7  ;;  %v1729_v28 = vunpack.c.h.s8.bf16 %v877_v7  ;;  %v8757_v62 = vld [vmem:[%s9718_s5 + $0x30] sm:$0xff] }
 0x25b   : > { %2695 = vmatprep.subr.bf16.mxu0 %v1669_v8  ;;  %2725 = vmatprep.mubr.bf16.mxu0 %v8714_v10  ;;  %v783_v8 = vld [vmem:[%s8425_s11 + $0x588] sm:$0xff]  ;;  %v8768_v7 = vcombine.high %v8757_v62, %v8762_v63 }
 0x25c   : > { %3155 = vmatprep.mubr.bf16.mxu1 %v8606_v38 }
 0x25d   : > { %3126 = vmatpush1.bf16.msra.mxu1 %v1478_v12  ;;  %v876_v12 = vld [vmem:[%s8425_s11 + $0x870] sm:$0xff] }
 0x25e   : > { %2696 = vmatpush1.bf16.msra.mxu0 %v1668_v11  ;;  %3127 = vmatprep.subr.bf16.mxu1 %v1485_v17  ;;  %v1533_v11 = vunpack.c.l.s8.bf16 %v783_v8  ;;  %v1722_v17 = vunpack.c.l.s8.bf16 %v876_v12 }
 0x25f   : > { %2697 = vmatprep.subr.bf16.mxu0 %v1675_v16  ;;  %v782_v16 = vld [vmem:[%s8425_s11 + $0x580] sm:$0xff] }
 0x260   : > { %v1532_v18 = vunpack.c.l.s8.bf16 %v782_v16  ;;  %v1538_v23 = vunpack.c.h.s8.bf16 %v782_v16 }
 0x261   : > { %3128 = vmatpush1.bf16.msra.mxu1 %v1484_v19  ;;  %v883_v19 = vld [vmem:[%s8425_s11 + $0x8a8] sm:$0xff] }
 0x262   : > { %2698 = vmatpush1.bf16.msra.mxu0 %v1674_v29  ;;  %3129 = vmatprep.subr.bf16.mxu1 %v1491_v22  ;;  %v1539_v29 = vunpack.c.h.s8.bf16 %v783_v8  ;;  %v1728_v22 = vunpack.c.h.s8.bf16 %v876_v12  ;;  %v1735_v24 = vunpack.c.l.s8.bf16 %v883_v19  ;;  %v1741_v53 = vunpack.c.h.s8.bf16 %v883_v19  ;;  %v806_v12 = vld [vmem:[%s8425_s11 + $0x640] sm:$0xff]  ;;  %v813_v19 = vld [vmem:[%s8425_s11 + $0x678] sm:$0xff] }
 0x263   : > { %2699 = vmatprep.subr.bf16.mxu0 %v1681_v21  ;;  %v789_v21 = vld [vmem:[%s8425_s11 + $0x5b8] sm:$0xff] }
 0x265   : > { %3130 = vmatpush1.bf16.msra.mxu1 %v1490_v26  ;;  %v882_v26 = vld [vmem:[%s8425_s11 + $0x8a0] sm:$0xff] }
 0x266   : > { %2700 = vmatpush1.bf16.msra.mxu0 %v1680_v25  ;;  %3131 = vmatprep.subr.bf16.mxu1 %v1497_v35  ;;  %v1545_v25 = vunpack.c.l.s8.bf16 %v789_v21  ;;  %v1734_v35 = vunpack.c.l.s8.bf16 %v882_v26 }
 0x267   : > { %2701 = vmatprep.subr.bf16.mxu0 %v1687_v30  ;;  %v788_v30 = vld [vmem:[%s8425_s11 + $0x5b0] sm:$0xff] }
 0x268   : > { %v1544_v36 = vunpack.c.l.s8.bf16 %v788_v30  ;;  %v1550_v43 = vunpack.c.h.s8.bf16 %v788_v30 }
 0x269   : > { %3132 = vmatpush1.bf16.msra.mxu1 %v1496_v37  ;;  %v889_v37 = vld [vmem:[%s8425_s11 + $0x8d8] sm:$0xff] }
 0x26a   : > { %2702 = vmatpush1.bf16.msra.mxu0 %v1686_v54  ;;  %3133 = vmatprep.subr.bf16.mxu1 %v1503_v42  ;;  %v1551_v54 = vunpack.c.h.s8.bf16 %v789_v21  ;;  %v1740_v42 = vunpack.c.h.s8.bf16 %v882_v26  ;;  %v1747_v44 = vunpack.c.l.s8.bf16 %v889_v37  ;;  %v1753_v50 = vunpack.c.h.s8.bf16 %v889_v37  ;;  %v812_v26 = vld [vmem:[%s8425_s11 + $0x670] sm:$0xff]  ;;  %v819_v37 = vld [vmem:[%s8425_s11 + $0x6a8] sm:$0xff] }
 0x26b   : > { %2703 = vmatprep.subr.bf16.mxu0 %v1693_v41  ;;  %v795_v41 = vld [vmem:[%s8425_s11 + $0x5e8] sm:$0xff] }
 0x26d   : > { %3134 = vmatpush1.bf16.msra.mxu1 %v1502_v46  ;;  %v888_v46 = vld [vmem:[%s8425_s11 + $0x8d0] sm:$0xff] }
 0x26e   : > { %2704 = vmatpush1.bf16.msra.mxu0 %v1692_v45  ;;  %3135 = vmatprep.subr.bf16.mxu1 %v1509_v48  ;;  %v1557_v45 = vunpack.c.l.s8.bf16 %v795_v41  ;;  %v1746_v48 = vunpack.c.l.s8.bf16 %v888_v46 }
 0x26f   : > { %2705 = vmatprep.subr.bf16.mxu0 %v1699_v47  ;;  %v794_v47 = vld [vmem:[%s8425_s11 + $0x5e0] sm:$0xff] }
 0x270   : > { %v1556_v49 = vunpack.c.l.s8.bf16 %v794_v47  ;;  %v1562_v33 = vunpack.c.h.s8.bf16 %v794_v47 }
 0x271   : > { %3136 = vmatpush1.bf16.msra.mxu1 %v1508_v56  ;;  %v895_v56 = vld [vmem:[%s8425_s11 + $0x908] sm:$0xff] }
 0x272   : > { %2706 = vmatpush1.bf16.msra.mxu0 %v1698_v55  ;;  %3137 = vmatprep.subr.bf16.mxu1 %v1515_v32  ;;  %v1563_v55 = vunpack.c.h.s8.bf16 %v795_v41  ;;  %v1752_v32 = vunpack.c.h.s8.bf16 %v888_v46  ;;  %v1759_v34 = vunpack.c.l.s8.bf16 %v895_v56  ;;  %v818_v46 = vld [vmem:[%s8425_s11 + $0x6a0] sm:$0xff] }
 0x273   : > { %2707 = vmatprep.subr.bf16.mxu0 %v1705_v31  ;;  %v801_v31 = vld [vmem:[%s8425_s11 + $0x618] sm:$0xff] }
 0x275   : > { %3138 = vmatpush1.bf16.msra.mxu1 %v1514_v59  ;;  %v894_v59 = vld [vmem:[%s8425_s11 + $0x900] sm:$0xff] }
 0x276   : > { %2708 = vmatpush1.bf16.msra.mxu0 %v1704_v58  ;;  %3139 = vmatprep.subr.bf16.mxu1 %v1521_v61  ;;  %v1569_v58 = vunpack.c.l.s8.bf16 %v801_v31  ;;  %v8752_v61 = vcombine.low %v8703_v4, %v8708_v5  ;;  %v1575_v4 = vunpack.c.h.s8.bf16 %v801_v31  ;;  %v901_v5 = vld [vmem:[%s8425_s11 + $0x938] sm:$0xff]  ;;  %v1764_v8 = vunpack.c.h.s8.bf16 %v894_v59 }
 0x277   : > { %2709 = vmatprep.subr.bf16.mxu0 %v1711_v60  ;;  %v800_v60 = vld [vmem:[%s8425_s11 + $0x610] sm:$0xff] }
 0x279   : > { %3140 = vmatpush1.bf16.msra.mxu1 %v1520_v1  ;;  %v1568_v1 = vunpack.c.l.s8.bf16 %v800_v60 }
 0x27a   : > { %2710 = vmatpush1.bf16.msra.mxu0 %v1710_v0  ;;  %3141 = vmatprep.subr.bf16.mxu1 %v1527_v6  ;;  %v1758_v0 = vunpack.c.l.s8.bf16 %v894_v59  ;;  %v807_v6 = vld [vmem:[%s8425_s11 + $0x648] sm:$0xff]  ;;  %v824_v59 = vld [vmem:[%s8425_s11 + $0x6d0] sm:$0xff] }
 0x27b   : > { %2711 = vmatprep.subr.bf16.mxu0 %v1717_v2  ;;  %v1765_v2 = vunpack.c.h.s8.bf16 %v895_v56  ;;  %v825_v56 = vld [vmem:[%s8425_s11 + $0x6d8] sm:$0xff] }
 0x27d   : > { %3142 = vmatpush1.bf16.msra.mxu1 %v1526_v15  ;;  %v1771_v15 = vunpack.c.l.s8.bf16 %v901_v5 }
 0x27e   : > { %2712 = vmatpush1.bf16.msra.mxu0 %v1716_v14  ;;  %3143 = vmatprep.subr.bf16.mxu1 %v1533_v11  ;;  %v1574_v14 = vunpack.c.h.s8.bf16 %v800_v60  ;;  %v900_v11 = vld [vmem:[%s8425_s11 + $0x930] sm:$0xff] }
 0x27f   : > { %2713 = vmatprep.subr.bf16.mxu0 %v1723_v9  ;;  %v1581_v9 = vunpack.c.l.s8.bf16 %v807_v6  ;;  %v1770_v16 = vunpack.c.l.s8.bf16 %v900_v11  ;;  %v1776_v21 = vunpack.c.h.s8.bf16 %v900_v11  ;;  %v830_v11 = vld [vmem:[%s8425_s11 + $0x700] sm:$0xff] }
 0x281   : > { %3144 = vmatpush1.bf16.msra.mxu1 %v1532_v18  ;;  %v1777_v18 = vunpack.c.h.s8.bf16 %v901_v5  ;;  %v831_v5 = vld [vmem:[%s8425_s11 + $0x708] sm:$0xff] }
 0x282   : > { %2714 = vmatpush1.bf16.msra.mxu0 %v1722_v17  ;;  %3145 = vmatprep.subr.bf16.mxu1 %v1539_v29  ;;  %v1580_v17 = vunpack.c.l.s8.bf16 %v806_v12  ;;  %v907_v29 = vld [vmem:[%s8425_s11 + $0x968] sm:$0xff] }
 0x283   : > { %2715 = vmatprep.subr.bf16.mxu0 %v1729_v28  ;;  %v1587_v28 = vunpack.c.h.s8.bf16 %v807_v6 }
 0x285   : > { %3146 = vmatpush1.bf16.msra.mxu1 %v1538_v23  ;;  %v1783_v23 = vunpack.c.l.s8.bf16 %v907_v29 }
 0x286   : > { %2716 = vmatpush1.bf16.msra.mxu0 %v1728_v22  ;;  %3147 = vmatprep.subr.bf16.mxu1 %v1545_v25  ;;  %v1586_v22 = vunpack.c.h.s8.bf16 %v806_v12  ;;  %v906_v25 = vld [vmem:[%s8425_s11 + $0x960] sm:$0xff] }
 0x287   : > { %2717 = vmatprep.subr.bf16.mxu0 %v1735_v24  ;;  %v1593_v24 = vunpack.c.l.s8.bf16 %v813_v19  ;;  %v1782_v30 = vunpack.c.l.s8.bf16 %v906_v25  ;;  %v1788_v41 = vunpack.c.h.s8.bf16 %v906_v25  ;;  %v836_v25 = vld [vmem:[%s8425_s11 + $0x730] sm:$0xff] }
 0x289   : > { %3148 = vmatpush1.bf16.msra.mxu1 %v1544_v36  ;;  %v1789_v36 = vunpack.c.h.s8.bf16 %v907_v29  ;;  %v837_v29 = vld [vmem:[%s8425_s11 + $0x738] sm:$0xff] }
 0x28a   : > { %2718 = vmatpush1.bf16.msra.mxu0 %v1734_v35  ;;  %3149 = vmatprep.subr.bf16.mxu1 %v1551_v54  ;;  %v1592_v35 = vunpack.c.l.s8.bf16 %v812_v26  ;;  %v913_v54 = vld [vmem:[%s8425_s11 + $0x998] sm:$0xff] }
 0x28b   : > { %2719 = vmatprep.subr.bf16.mxu0 %v1741_v53  ;;  %v1599_v53 = vunpack.c.h.s8.bf16 %v813_v19 }
 0x28d   : > { %3150 = vmatpush1.bf16.msra.mxu1 %v1550_v43  ;;  %v1795_v43 = vunpack.c.l.s8.bf16 %v913_v54 }
 0x28e   : > { %2720 = vmatpush1.bf16.msra.mxu0 %v1740_v42  ;;  %3151 = vmatprep.subr.bf16.mxu1 %v1557_v45  ;;  %v1598_v42 = vunpack.c.h.s8.bf16 %v812_v26  ;;  %v912_v45 = vld [vmem:[%s8425_s11 + $0x990] sm:$0xff] }
 0x28f   : > { %2721 = vmatprep.subr.bf16.mxu0 %v1747_v44  ;;  %v1605_v44 = vunpack.c.l.s8.bf16 %v819_v37  ;;  %v1794_v47 = vunpack.c.l.s8.bf16 %v912_v45  ;;  %v1800_v31 = vunpack.c.h.s8.bf16 %v912_v45  ;;  %v842_v45 = vld [vmem:[%s8425_s11 + $0x760] sm:$0xff] }
 0x291   : > { %3152 = vmatpush1.bf16.msra.mxu1 %v1556_v49  ;;  %v1801_v49 = vunpack.c.h.s8.bf16 %v913_v54  ;;  %v843_v54 = vld [vmem:[%s8425_s11 + $0x768] sm:$0xff] }
 0x292   : > { %2722 = vmatpush1.bf16.msra.mxu0 %v1746_v48  ;;  %3153 = vmatprep.subr.bf16.mxu1 %v1563_v55  ;;  %v1604_v48 = vunpack.c.l.s8.bf16 %v818_v46  ;;  %v919_v55 = vld [vmem:[%s8425_s11 + $0x9c8] sm:$0xff] }
 0x293   : > { %2723 = vmatprep.subr.bf16.mxu0 %v1753_v50  ;;  %v1611_v50 = vunpack.c.h.s8.bf16 %v819_v37 }
 0x295   : > { %3154 = vmatpush1.bf16.msra.mxu1 %v1562_v33  ;;  %v1807_v33 = vunpack.c.l.s8.bf16 %v919_v55 }
 0x296   : > { %2724 = vmatpush1.bf16.msra.mxu0 %v1752_v32  ;;  %3166 = vmatprep.subr.bf16.mxu1 %v1569_v58  ;;  %v1610_v32 = vunpack.c.h.s8.bf16 %v818_v46  ;;  %v918_v58 = vld [vmem:[%s8425_s11 + $0x9c0] sm:$0xff] }
 0x297   : > { %2736 = vmatprep.subr.bf16.mxu0 %v1759_v34  ;;  %v1617_v34 = vunpack.c.l.s8.bf16 %v825_v56  ;;  %v1806_v60 = vunpack.c.l.s8.bf16 %v918_v58  ;;  %v1812_v6 = vunpack.c.h.s8.bf16 %v918_v58  ;;  %v848_v58 = vld [vmem:[%s8425_s11 + $0x790] sm:$0xff] }
 0x298   : > { %3156 = vmatmul.mubr.bf16.vlgmr.msra.gmra.mrb[4].mxu1 %v8644_v13 }
 0x299   : > { %2726 = vmatmul.mubr.bf16.vlgmr.msra.gmra.mrb[0].mxu0 %v8752_v61  ;;  %3167 = vmatpush1.bf16.msra.mxu1 %v1568_v1  ;;  %v1813_v1 = vunpack.c.h.s8.bf16 %v919_v55  ;;  %v849_v55 = vld [vmem:[%s8425_s11 + $0x798] sm:$0xff] }
 0x29a   : > { %2737 = vmatpush1.bf16.msra.mxu0 %v1758_v0  ;;  %3168 = vmatprep.subr.bf16.mxu1 %v1575_v4  ;;  %v1616_v0 = vunpack.c.l.s8.bf16 %v824_v59  ;;  %v925_v4 = vld [vmem:[%s8425_s11 + $0x9f8] sm:$0xff] }
 0x29b   : > { %2738 = vmatprep.subr.bf16.mxu0 %v1765_v2  ;;  %2768 = vmatprep.mubr.bf16.mxu0 %v8768_v7  ;;  %v1623_v2 = vunpack.c.h.s8.bf16 %v825_v56 }
 0x29c   : > { %3198 = vmatprep.mubr.bf16.mxu1 %v8660_v20 }
 0x29d   : > { %3169 = vmatpush1.bf16.msra.mxu1 %v1574_v14  ;;  %v1819_v14 = vunpack.c.l.s8.bf16 %v925_v4 }
 0x29e   : > { %2739 = vmatpush1.bf16.msra.mxu0 %v1764_v8  ;;  %3170 = vmatprep.subr.bf16.mxu1 %v1581_v9  ;;  %v1622_v8 = vunpack.c.h.s8.bf16 %v824_v59  ;;  %v924_v9 = vld [vmem:[%s8425_s11 + $0x9f0] sm:$0xff]  ;;  %v8806_v59 = vcombine.low %v8757_v62, %v8762_v63  ;;  %v1671_v62 = vunpack.c.h.s8.bf16 %v849_v55  ;;  %v949_v63 = vld [vmem:[%s8425_s11 + $0xab8] sm:$0xff] }
 0x29f   : > { %2740 = vmatprep.subr.bf16.mxu0 %v1771_v15  ;;  %v1629_v15 = vunpack.c.l.s8.bf16 %v831_v5  ;;  %v1818_v12 = vunpack.c.l.s8.bf16 %v924_v9  ;;  %v1824_v19 = vunpack.c.h.s8.bf16 %v924_v9 }
 0x2a1   : > { %3171 = vmatpush1.bf16.msra.mxu1 %v1580_v17  ;;  %v1825_v17 = vunpack.c.h.s8.bf16 %v925_v4 }
 0x2a2   : > { %2741 = vmatpush1.bf16.msra.mxu0 %v1770_v16  ;;  %3172 = vmatprep.subr.bf16.mxu1 %v1587_v28  ;;  %v1628_v16 = vunpack.c.l.s8.bf16 %v830_v11  ;;  %v931_v28 = vld [vmem:[%s8425_s11 + $0xa28] sm:$0xff] }
 0x2a3   : > { %2742 = vmatprep.subr.bf16.mxu0 %v1777_v18  ;;  %v1635_v18 = vunpack.c.h.s8.bf16 %v831_v5  ;;  %v855_v5 = vld [vmem:[%s8425_s11 + $0x7c8] sm:$0xff] }
 0x2a4   : > { %v1677_v9 = vunpack.c.l.s8.bf16 %v855_v5 }
 0x2a5   : > { %3173 = vmatpush1.bf16.msra.mxu1 %v1586_v22  ;;  %v1831_v22 = vunpack.c.l.s8.bf16 %v931_v28 }
 0x2a6   : > { %2743 = vmatpush1.bf16.msra.mxu0 %v1776_v21  ;;  %3174 = vmatprep.subr.bf16.mxu1 %v1593_v24  ;;  %v1634_v21 = vunpack.c.h.s8.bf16 %v830_v11  ;;  %v930_v24 = vld [vmem:[%s8425_s11 + $0xa20] sm:$0xff]  ;;  %v948_v11 = vld [vmem:[%s8425_s11 + $0xab0] sm:$0xff] }
 0x2a7   : > { %2744 = vmatprep.subr.bf16.mxu0 %v1783_v23  ;;  %v1641_v23 = vunpack.c.l.s8.bf16 %v837_v29  ;;  %v1830_v26 = vunpack.c.l.s8.bf16 %v930_v24  ;;  %v1836_v37 = vunpack.c.h.s8.bf16 %v930_v24 }
 0x2a9   : > { %3175 = vmatpush1.bf16.msra.mxu1 %v1592_v35  ;;  %v1837_v35 = vunpack.c.h.s8.bf16 %v931_v28  ;;  %v1683_v28 = vunpack.c.h.s8.bf16 %v855_v5  ;;  %v973_v5 = vld [vmem:[%s8425_s11 + $0xb78] sm:$0xff] }
 0x2aa   : > { %2745 = vmatpush1.bf16.msra.mxu0 %v1782_v30  ;;  %3176 = vmatprep.subr.bf16.mxu1 %v1599_v53  ;;  %v1640_v30 = vunpack.c.l.s8.bf16 %v836_v25  ;;  %v937_v53 = vld [vmem:[%s8425_s11 + $0xa58] sm:$0xff] }
 0x2ab   : > { %2746 = vmatprep.subr.bf16.mxu0 %v1789_v36  ;;  %v1647_v36 = vunpack.c.h.s8.bf16 %v837_v29  ;;  %v955_v29 = vld [vmem:[%s8425_s11 + $0xae8] sm:$0xff] }
 0x2ad   : > { %3177 = vmatpush1.bf16.msra.mxu1 %v1598_v42  ;;  %v1843_v42 = vunpack.c.l.s8.bf16 %v937_v53 }
 0x2ae   : > { %2747 = vmatpush1.bf16.msra.mxu0 %v1788_v41  ;;  %3178 = vmatprep.subr.bf16.mxu1 %v1605_v44  ;;  %v1646_v41 = vunpack.c.h.s8.bf16 %v836_v25  ;;  %v936_v44 = vld [vmem:[%s8425_s11 + $0xa50] sm:$0xff]  ;;  %v954_v25 = vld [vmem:[%s8425_s11 + $0xae0] sm:$0xff] }
 0x2af   : > { %2748 = vmatprep.subr.bf16.mxu0 %v1795_v43  ;;  %v1653_v43 = vunpack.c.l.s8.bf16 %v843_v54  ;;  %v1842_v46 = vunpack.c.l.s8.bf16 %v936_v44  ;;  %v1848_v56 = vunpack.c.h.s8.bf16 %v936_v44 }
 0x2b1   : > { %3179 = vmatpush1.bf16.msra.mxu1 %v1604_v48  ;;  %v1849_v48 = vunpack.c.h.s8.bf16 %v937_v53 }
 0x2b2   : > { %2749 = vmatpush1.bf16.msra.mxu0 %v1794_v47  ;;  %3180 = vmatprep.subr.bf16.mxu1 %v1611_v50  ;;  %v1652_v47 = vunpack.c.l.s8.bf16 %v842_v45  ;;  %v943_v50 = vld [vmem:[%s8425_s11 + $0xa88] sm:$0xff] }
 0x2b3   : > { %2750 = vmatprep.subr.bf16.mxu0 %v1801_v49  ;;  %v1659_v49 = vunpack.c.h.s8.bf16 %v843_v54  ;;  %v1861_v4 = vunpack.c.h.s8.bf16 %v943_v50  ;;  %v961_v54 = vld [vmem:[%s8425_s11 + $0xb18] sm:$0xff] }
 0x2b5   : > { %3181 = vmatpush1.bf16.msra.mxu1 %v1610_v32  ;;  %v1855_v32 = vunpack.c.l.s8.bf16 %v943_v50 }
 0x2b6   : > { %2751 = vmatpush1.bf16.msra.mxu0 %v1800_v31  ;;  %3182 = vmatprep.subr.bf16.mxu1 %v1617_v34  ;;  %v1658_v31 = vunpack.c.h.s8.bf16 %v842_v45  ;;  %v942_v34 = vld [vmem:[%s8425_s11 + $0xa80] sm:$0xff]  ;;  %v960_v45 = vld [vmem:[%s8425_s11 + $0xb10] sm:$0xff] }
 0x2b7   : > { %2752 = vmatprep.subr.bf16.mxu0 %v1807_v33  ;;  %v1665_v33 = vunpack.c.l.s8.bf16 %v849_v55  ;;  %v967_v55 = vld [vmem:[%s8425_s11 + $0xb48] sm:$0xff] }
 0x2b9   : > { %3183 = vmatpush1.bf16.msra.mxu1 %v1616_v0  ;;  %v8816_v0 = vld [vmem:[%s9718_s5 + $0x98] sm:$0xff] }
 0x2ba   : > { %2753 = vmatpush1.bf16.msra.mxu0 %v1806_v60  ;;  %3184 = vmatprep.subr.bf16.mxu1 %v1623_v2  ;;  %v8811_v60 = vld [vmem:[%s9718_s5 + $0x38] sm:$0xff]  ;;  %v1664_v2 = vunpack.c.l.s8.bf16 %v848_v58 }
 0x2bb   : > { %2754 = vmatprep.subr.bf16.mxu0 %v1813_v1  ;;  %v1854_v1 = vunpack.c.l.s8.bf16 %v942_v34 }
 0x2bd   : > { %3185 = vmatpush1.bf16.msra.mxu1 %v1622_v8  ;;  %v1860_v8 = vunpack.c.h.s8.bf16 %v942_v34 }
 0x2be   : > { %2755 = vmatpush1.bf16.msra.mxu0 %v1812_v6  ;;  %3186 = vmatprep.subr.bf16.mxu1 %v1629_v15  ;;  %v8822_v6 = vcombine.high %v8811_v60, %v8816_v0  ;;  %v1867_v15 = vunpack.c.l.s8.bf16 %v949_v63 }
 0x2bf   : > { %2756 = vmatprep.subr.bf16.mxu0 %v1819_v14  ;;  %v1670_v14 = vunpack.c.h.s8.bf16 %v848_v58  ;;  %v966_v58 = vld [vmem:[%s8425_s11 + $0xb40] sm:$0xff] }
 0x2c1   : > { %3187 = vmatpush1.bf16.msra.mxu1 %v1628_v16  ;;  %v1866_v16 = vunpack.c.l.s8.bf16 %v948_v11 }
 0x2c2   : > { %2757 = vmatpush1.bf16.msra.mxu0 %v1818_v12  ;;  %3188 = vmatprep.subr.bf16.mxu1 %v1635_v18  ;;  %v854_v12 = vld [vmem:[%s8425_s11 + $0x7c0] sm:$0xff]  ;;  %v1873_v18 = vunpack.c.h.s8.bf16 %v949_v63 }
 0x2c3   : > { %2758 = vmatprep.subr.bf16.mxu0 %v1825_v17  ;;  %v1676_v17 = vunpack.c.l.s8.bf16 %v854_v12 }
 0x2c5   : > { %3189 = vmatpush1.bf16.msra.mxu1 %v1634_v21  ;;  %v1872_v21 = vunpack.c.h.s8.bf16 %v948_v11 }
 0x2c6   : > { %2759 = vmatpush1.bf16.msra.mxu0 %v1824_v19  ;;  %3190 = vmatprep.subr.bf16.mxu1 %v1641_v23  ;;  %v861_v19 = vld [vmem:[%s8425_s11 + $0x7f8] sm:$0xff]  ;;  %v1879_v23 = vunpack.c.l.s8.bf16 %v955_v29 }
 0x2c7   : > { %2760 = vmatprep.subr.bf16.mxu0 %v1831_v22  ;;  %v1682_v22 = vunpack.c.h.s8.bf16 %v854_v12  ;;  %v1689_v24 = vunpack.c.l.s8.bf16 %v861_v19  ;;  %v1695_v53 = vunpack.c.h.s8.bf16 %v861_v19  ;;  %v972_v12 = vld [vmem:[%s8425_s11 + $0xb70] sm:$0xff]  ;;  %v979_v19 = vld [vmem:[%s8425_s11 + $0xba8] sm:$0xff] }
 0x2c9   : > { %3191 = vmatpush1.bf16.msra.mxu1 %v1640_v30  ;;  %v1878_v30 = vunpack.c.l.s8.bf16 %v954_v25 }
 0x2ca   : > { %2761 = vmatpush1.bf16.msra.mxu0 %v1830_v26  ;;  %3192 = vmatprep.subr.bf16.mxu1 %v1647_v36  ;;  %v860_v26 = vld [vmem:[%s8425_s11 + $0x7f0] sm:$0xff]  ;;  %v1885_v36 = vunpack.c.h.s8.bf16 %v955_v29 }
 0x2cb   : > { %2762 = vmatprep.subr.bf16.mxu0 %v1837_v35  ;;  %v1688_v35 = vunpack.c.l.s8.bf16 %v860_v26 }
 0x2cd   : > { %3193 = vmatpush1.bf16.msra.mxu1 %v1646_v41  ;;  %v1884_v41 = vunpack.c.h.s8.bf16 %v954_v25 }
 0x2ce   : > { %2763 = vmatpush1.bf16.msra.mxu0 %v1836_v37  ;;  %3194 = vmatprep.subr.bf16.mxu1 %v1653_v43  ;;  %v867_v37 = vld [vmem:[%s8425_s11 + $0x828] sm:$0xff]  ;;  %v1891_v43 = vunpack.c.l.s8.bf16 %v961_v54 }
 0x2cf   : > { %2764 = vmatprep.subr.bf16.mxu0 %v1843_v42  ;;  %v1694_v42 = vunpack.c.h.s8.bf16 %v860_v26  ;;  %v1701_v44 = vunpack.c.l.s8.bf16 %v867_v37  ;;  %v1707_v50 = vunpack.c.h.s8.bf16 %v867_v37  ;;  %v978_v26 = vld [vmem:[%s8425_s11 + $0xba0] sm:$0xff]  ;;  %v985_v37 = vld [vmem:[%s8425_s11 + $0xbd8] sm:$0xff] }
 0x2d1   : > { %3195 = vmatpush1.bf16.msra.mxu1 %v1652_v47  ;;  %v1890_v47 = vunpack.c.l.s8.bf16 %v960_v45 }
 0x2d2   : > { %2765 = vmatpush1.bf16.msra.mxu0 %v1842_v46  ;;  %3196 = vmatprep.subr.bf16.mxu1 %v1659_v49  ;;  %v866_v46 = vld [vmem:[%s8425_s11 + $0x820] sm:$0xff]  ;;  %v1897_v49 = vunpack.c.h.s8.bf16 %v961_v54 }
 0x2d3   : > { %2766 = vmatprep.subr.bf16.mxu0 %v1849_v48  ;;  %v1700_v48 = vunpack.c.l.s8.bf16 %v866_v46 }
 0x2d5   : > { %3197 = vmatpush1.bf16.msra.mxu1 %v1658_v31  ;;  %v1896_v31 = vunpack.c.h.s8.bf16 %v960_v45 }
 0x2d6   : > { %2767 = vmatpush1.bf16.msra.mxu0 %v1848_v56  ;;  %3209 = vmatprep.subr.bf16.mxu1 %v1665_v33  ;;  %v873_v56 = vld [vmem:[%s8425_s11 + $0x858] sm:$0xff]  ;;  %v1903_v33 = vunpack.c.l.s8.bf16 %v967_v55 }
 0x2d7   : > { %2779 = vmatprep.subr.bf16.mxu0 %v1855_v32  ;;  %v1706_v32 = vunpack.c.h.s8.bf16 %v866_v46  ;;  %v1713_v34 = vunpack.c.l.s8.bf16 %v873_v56  ;;  %v1719_v63 = vunpack.c.h.s8.bf16 %v873_v56  ;;  %v984_v46 = vld [vmem:[%s8425_s11 + $0xbd0] sm:$0xff]  ;;  %v991_v56 = vld [vmem:[%s8425_s11 + $0xc08] sm:$0xff] }
 0x2d8   : > { %3199 = vmatmul.mubr.bf16.vlgmr.msra.gmra.mrb[4].mxu1 %v8698_v3 }
 0x2d9   : > { %2769 = vmatmul.mubr.bf16.vlgmr.msra.gmra.mrb[0].mxu0 %v8806_v59  ;;  %3210 = vmatpush1.bf16.msra.mxu1 %v1664_v2  ;;  %v1902_v2 = vunpack.c.l.s8.bf16 %v966_v58 }
 0x2da   : > { %2780 = vmatpush1.bf16.msra.mxu0 %v1854_v1  ;;  %3211 = vmatprep.subr.bf16.mxu1 %v1671_v62  ;;  %v872_v1 = vld [vmem:[%s8425_s11 + $0x850] sm:$0xff]  ;;  %v1909_v62 = vunpack.c.h.s8.bf16 %v967_v55 }
 0x2db   : > { %2781 = vmatprep.subr.bf16.mxu0 %v1861_v4  ;;  %2811 = vmatprep.mubr.bf16.mxu0 %v8822_v6  ;;  %v1712_v4 = vunpack.c.l.s8.bf16 %v872_v1 }
 0x2dc   : > { %3241 = vmatprep.mubr.bf16.mxu1 %v8714_v10 }
 0x2dd   : > { %3212 = vmatpush1.bf16.msra.mxu1 %v1670_v14  ;;  %v1908_v14 = vunpack.c.h.s8.bf16 %v966_v58 }
 0x2de   : > { %2782 = vmatpush1.bf16.msra.mxu0 %v1860_v8  ;;  %3213 = vmatprep.subr.bf16.mxu1 %v1677_v9  ;;  %v879_v8 = vld [vmem:[%s8425_s11 + $0x888] sm:$0xff]  ;;  %v1915_v9 = vunpack.c.l.s8.bf16 %v973_v5 }
 0x2df   : > { %2783 = vmatprep.subr.bf16.mxu0 %v1867_v15  ;;  %v1718_v15 = vunpack.c.h.s8.bf16 %v872_v1  ;;  %v1725_v11 = vunpack.c.l.s8.bf16 %v879_v8  ;;  %v1731_v29 = vunpack.c.h.s8.bf16 %v879_v8  ;;  %v990_v1 = vld [vmem:[%s8425_s11 + $0xc00] sm:$0xff] }
 0x2e1   : > { %3214 = vmatpush1.bf16.msra.mxu1 %v1676_v17  ;;  %v1914_v17 = vunpack.c.l.s8.bf16 %v972_v12 }
 0x2e2   : > { %2784 = vmatpush1.bf16.msra.mxu0 %v1866_v16  ;;  %3215 = vmatprep.subr.bf16.mxu1 %v1683_v28  ;;  %v878_v16 = vld [vmem:[%s8425_s11 + $0x880] sm:$0xff]  ;;  %v1921_v28 = vunpack.c.h.s8.bf16 %v973_v5  ;;  %v1950_v5 = vunpack.c.l.s8.bf16 %v990_v1 }
 0x2e3   : > { %2785 = vmatprep.subr.bf16.mxu0 %v1873_v18  ;;  %v1724_v18 = vunpack.c.l.s8.bf16 %v878_v16 }
 0x2e5   : > { %3216 = vmatpush1.bf16.msra.mxu1 %v1682_v22  ;;  %v1920_v22 = vunpack.c.h.s8.bf16 %v972_v12 }
 0x2e6   : > { %2786 = vmatpush1.bf16.msra.mxu0 %v1872_v21  ;;  %3217 = vmatprep.subr.bf16.mxu1 %v1689_v24  ;;  %v885_v21 = vld [vmem:[%s8425_s11 + $0x8b8] sm:$0xff]  ;;  %v1927_v24 = vunpack.c.l.s8.bf16 %v979_v19 }
 0x2e7   : > { %2787 = vmatprep.subr.bf16.mxu0 %v1879_v23  ;;  %v1730_v23 = vunpack.c.h.s8.bf16 %v878_v16  ;;  %v1737_v25 = vunpack.c.l.s8.bf16 %v885_v21  ;;  %v1743_v54 = vunpack.c.h.s8.bf16 %v885_v21 }
 0x2e9   : > { %3218 = vmatpush1.bf16.msra.mxu1 %v1688_v35  ;;  %v1926_v35 = vunpack.c.l.s8.bf16 %v978_v26 }
 0x2ea   : > { %2788 = vmatpush1.bf16.msra.mxu0 %v1878_v30  ;;  %3219 = vmatprep.subr.bf16.mxu1 %v1695_v53  ;;  %v884_v30 = vld [vmem:[%s8425_s11 + $0x8b0] sm:$0xff]  ;;  %v1933_v53 = vunpack.c.h.s8.bf16 %v979_v19 }
 0x2eb   : > { %2789 = vmatprep.subr.bf16.mxu0 %v1885_v36  ;;  %v1736_v36 = vunpack.c.l.s8.bf16 %v884_v30 }
 0x2ed   : > { %3220 = vmatpush1.bf16.msra.mxu1 %v1694_v42  ;;  %v1932_v42 = vunpack.c.h.s8.bf16 %v978_v26 }
 0x2ee   : > { %2790 = vmatpush1.bf16.msra.mxu0 %v1884_v41  ;;  %3221 = vmatprep.subr.bf16.mxu1 %v1701_v44  ;;  %v891_v41 = vld [vmem:[%s8425_s11 + $0x8e8] sm:$0xff]  ;;  %v1939_v44 = vunpack.c.l.s8.bf16 %v985_v37 }
 0x2ef   : > { %2791 = vmatprep.subr.bf16.mxu0 %v1891_v43  ;;  %v1742_v43 = vunpack.c.h.s8.bf16 %v884_v30  ;;  %v1749_v45 = vunpack.c.l.s8.bf16 %v891_v41  ;;  %v1755_v55 = vunpack.c.h.s8.bf16 %v891_v41 }
 0x2f1   : > { %3222 = vmatpush1.bf16.msra.mxu1 %v1700_v48  ;;  %v1938_v48 = vunpack.c.l.s8.bf16 %v984_v46 }
 0x2f2   : > { %2792 = vmatpush1.bf16.msra.mxu0 %v1890_v47  ;;  %3223 = vmatprep.subr.bf16.mxu1 %v1707_v50  ;;  %v890_v47 = vld [vmem:[%s8425_s11 + $0x8e0] sm:$0xff]  ;;  %v1945_v50 = vunpack.c.h.s8.bf16 %v985_v37 }
 0x2f3   : > { %2793 = vmatprep.subr.bf16.mxu0 %v1897_v49  ;;  %v1748_v49 = vunpack.c.l.s8.bf16 %v890_v47 }
 0x2f5   : > { %3224 = vmatpush1.bf16.msra.mxu1 %v1706_v32  ;;  %v1944_v32 = vunpack.c.h.s8.bf16 %v984_v46 }
 0x2f6   : > { %2794 = vmatpush1.bf16.msra.mxu0 %v1896_v31  ;;  %3225 = vmatprep.subr.bf16.mxu1 %v1713_v34  ;;  %v897_v31 = vld [vmem:[%s8425_s11 + $0x918] sm:$0xff]  ;;  %v1951_v34 = vunpack.c.l.s8.bf16 %v991_v56 }
 0x2f7   : > { %2795 = vmatprep.subr.bf16.mxu0 %v1903_v33  ;;  %v1754_v33 = vunpack.c.h.s8.bf16 %v890_v47  ;;  %v1761_v58 = vunpack.c.l.s8.bf16 %v897_v31 }
 0x2f9   : > { %3226 = vmatpush1.bf16.msra.mxu1 %v1712_v4  ;;  %v8860_v4 = vcombine.low %v8811_v60, %v8816_v0  ;;  %v1767_v60 = vunpack.c.h.s8.bf16 %v897_v31  ;;  %v997_v0 = vld [vmem:[%s8425_s11 + $0xc38] sm:$0xff] }
 0x2fa   : > { %2796 = vmatpush1.bf16.msra.mxu0 %v1902_v2  ;;  %3227 = vmatprep.subr.bf16.mxu1 %v1719_v63  ;;  %v896_v2 = vld [vmem:[%s8425_s11 + $0x910] sm:$0xff]  ;;  %v8870_v63 = vld [vmem:[%s9718_s5 + $0xa0] sm:$0xff]  ;;  %v1963_v16 = vunpack.c.l.s8.bf16 %v997_v0  ;;  %v1969_v21 = vunpack.c.h.s8.bf16 %v997_v0 }
 0x2fb   : > { %2797 = vmatprep.subr.bf16.mxu0 %v1909_v62  ;;  %v8865_v62 = vld [vmem:[%s9718_s5 + $0x40] sm:$0xff]  ;;  %v1760_v8 = vunpack.c.l.s8.bf16 %v896_v2  ;;  %v1766_v12 = vunpack.c.h.s8.bf16 %v896_v2 }
 0x2fd   : > { %3228 = vmatpush1.bf16.msra.mxu1 %v1718_v15  ;;  %v903_v15 = vld [vmem:[%s8425_s11 + $0x948] sm:$0xff] }
 0x2fe   : > { %2798 = vmatpush1.bf16.msra.mxu0 %v1908_v14  ;;  %3229 = vmatprep.subr.bf16.mxu1 %v1725_v11  ;;  %v1957_v14 = vunpack.c.h.s8.bf16 %v991_v56  ;;  %v1956_v11 = vunpack.c.h.s8.bf16 %v990_v1 }
 0x2ff   : > { %2799 = vmatprep.subr.bf16.mxu0 %v1915_v9  ;;  %v8876_v9 = vcombine.high %v8865_v62, %v8870_v63 }
 0x301   : > { %3230 = vmatpush1.bf16.msra.mxu1 %v1724_v18  ;;  %v996_v18 = vld [vmem:[%s8425_s11 + $0xc30] sm:$0xff] }
 0x302   : > { %2800 = vmatpush1.bf16.msra.mxu0 %v1914_v17  ;;  %3231 = vmatprep.subr.bf16.mxu1 %v1731_v29  ;;  %v1773_v17 = vunpack.c.l.s8.bf16 %v903_v15  ;;  %v1962_v29 = vunpack.c.l.s8.bf16 %v996_v18 }
 0x303   : > { %2801 = vmatprep.subr.bf16.mxu0 %v1921_v28  ;;  %v902_v28 = vld [vmem:[%s8425_s11 + $0x940] sm:$0xff] }
 0x304   : > { %v1772_v19 = vunpack.c.l.s8.bf16 %v902_v28  ;;  %v1778_v26 = vunpack.c.h.s8.bf16 %v902_v28 }
 0x305   : > { %3232 = vmatpush1.bf16.msra.mxu1 %v1730_v23  ;;  %v1003_v23 = vld [vmem:[%s8425_s11 + $0xc68] sm:$0xff] }
 0x306   : > { %2802 = vmatpush1.bf16.msra.mxu0 %v1920_v22  ;;  %3233 = vmatprep.subr.bf16.mxu1 %v1737_v25  ;;  %v1779_v22 = vunpack.c.h.s8.bf16 %v903_v15  ;;  %v1968_v25 = vunpack.c.h.s8.bf16 %v996_v18  ;;  %v1975_v30 = vunpack.c.l.s8.bf16 %v1003_v23  ;;  %v1981_v41 = vunpack.c.h.s8.bf16 %v1003_v23 }
 0x307   : > { %2803 = vmatprep.subr.bf16.mxu0 %v1927_v24  ;;  %v909_v24 = vld [vmem:[%s8425_s11 + $0x978] sm:$0xff] }
 0x309   : > { %3234 = vmatpush1.bf16.msra.mxu1 %v1736_v36  ;;  %v1002_v36 = vld [vmem:[%s8425_s11 + $0xc60] sm:$0xff] }
 0x30a   : > { %2804 = vmatpush1.bf16.msra.mxu0 %v1926_v35  ;;  %3235 = vmatprep.subr.bf16.mxu1 %v1743_v54  ;;  %v1785_v35 = vunpack.c.l.s8.bf16 %v909_v24  ;;  %v1974_v54 = vunpack.c.l.s8.bf16 %v1002_v36 }
 0x30b   : > { %2805 = vmatprep.subr.bf16.mxu0 %v1933_v53  ;;  %v908_v53 = vld [vmem:[%s8425_s11 + $0x970] sm:$0xff] }
 0x30c   : > { %v1784_v37 = vunpack.c.l.s8.bf16 %v908_v53  ;;  %v1790_v46 = vunpack.c.h.s8.bf16 %v908_v53 }
 0x30d   : > { %3236 = vmatpush1.bf16.msra.mxu1 %v1742_v43  ;;  %v1009_v43 = vld [vmem:[%s8425_s11 + $0xc98] sm:$0xff] }
 0x30e   : > { %2806 = vmatpush1.bf16.msra.mxu0 %v1932_v42  ;;  %3237 = vmatprep.subr.bf16.mxu1 %v1749_v45  ;;  %v1791_v42 = vunpack.c.h.s8.bf16 %v909_v24  ;;  %v1980_v45 = vunpack.c.h.s8.bf16 %v1002_v36  ;;  %v1987_v47 = vunpack.c.l.s8.bf16 %v1009_v43  ;;  %v1993_v31 = vunpack.c.h.s8.bf16 %v1009_v43 }
 0x30f   : > { %2807 = vmatprep.subr.bf16.mxu0 %v1939_v44  ;;  %v915_v44 = vld [vmem:[%s8425_s11 + $0x9a8] sm:$0xff] }
 0x311   : > { %3238 = vmatpush1.bf16.msra.mxu1 %v1748_v49  ;;  %v1008_v49 = vld [vmem:[%s8425_s11 + $0xc90] sm:$0xff] }
 0x312   : > { %2808 = vmatpush1.bf16.msra.mxu0 %v1938_v48  ;;  %3239 = vmatprep.subr.bf16.mxu1 %v1755_v55  ;;  %v1797_v48 = vunpack.c.l.s8.bf16 %v915_v44  ;;  %v1986_v55 = vunpack.c.l.s8.bf16 %v1008_v49 }
 0x313   : > { %2809 = vmatprep.subr.bf16.mxu0 %v1945_v50  ;;  %v914_v50 = vld [vmem:[%s8425_s11 + $0x9a0] sm:$0xff] }
 0x314   : > { %v1796_v56 = vunpack.c.l.s8.bf16 %v914_v50  ;;  %v1802_v1 = vunpack.c.h.s8.bf16 %v914_v50 }
 0x315   : > { %3240 = vmatpush1.bf16.msra.mxu1 %v1754_v33  ;;  %v1015_v33 = vld [vmem:[%s8425_s11 + $0xcc8] sm:$0xff] }
 0x316   : > { %2810 = vmatpush1.bf16.msra.mxu0 %v1944_v32  ;;  %3252 = vmatprep.subr.bf16.mxu1 %v1761_v58  ;;  %v1803_v32 = vunpack.c.h.s8.bf16 %v915_v44  ;;  %v1992_v58 = vunpack.c.h.s8.bf16 %v1008_v49  ;;  %v1999_v2 = vunpack.c.l.s8.bf16 %v1015_v33  ;;  %v2005_v15 = vunpack.c.h.s8.bf16 %v1015_v33 }
 0x317   : > { %2822 = vmatprep.subr.bf16.mxu0 %v1951_v34  ;;  %v921_v34 = vld [vmem:[%s8425_s11 + $0x9d8] sm:$0xff] }
 0x318   : > { %3242 = vmatmul.mubr.bf16.vlgmr.msra.gmra.mrb[4].mxu1 %v8752_v61 }
 0x319   : > { %2812 = vmatmul.mubr.bf16.vlgmr.msra.gmra.mrb[0].mxu0 %v8860_v4  ;;  %3253 = vmatpush1.bf16.msra.mxu1 %v1760_v8  ;;  %v1014_v8 = vld [vmem:[%s8425_s11 + $0xcc0] sm:$0xff] }
 0x31a   : > { %2823 = vmatpush1.bf16.msra.mxu0 %v1950_v5  ;;  %3254 = vmatprep.subr.bf16.mxu1 %v1767_v60  ;;  %v1809_v5 = vunpack.c.l.s8.bf16 %v921_v34  ;;  %v1998_v60 = vunpack.c.l.s8.bf16 %v1014_v8 }
 0x31b   : > { %2824 = vmatprep.subr.bf16.mxu0 %v1957_v14  ;;  %2854 = vmatprep.mubr.bf16.mxu0 %v8876_v9  ;;  %v920_v14 = vld [vmem:[%s8425_s11 + $0x9d0] sm:$0xff] }
 0x31c   : > { %3284 = vmatprep.mubr.bf16.mxu1 %v8768_v7  ;;  %v1808_v0 = vunpack.c.l.s8.bf16 %v920_v14  ;;  %v1814_v18 = vunpack.c.h.s8.bf16 %v920_v14 }
 0x31d   : > { %3255 = vmatpush1.bf16.msra.mxu1 %v1766_v12  ;;  %v1021_v12 = vld [vmem:[%s8425_s11 + $0xcf8] sm:$0xff] }
 0x31e   : > { %2825 = vmatpush1.bf16.msra.mxu0 %v1956_v11  ;;  %3256 = vmatprep.subr.bf16.mxu1 %v1773_v17  ;;  %v1815_v11 = vunpack.c.h.s8.bf16 %v921_v34  ;;  %v2004_v17 = vunpack.c.h.s8.bf16 %v1014_v8  ;;  %v2011_v28 = vunpack.c.l.s8.bf16 %v1021_v12  ;;  %v2017_v24 = vunpack.c.h.s8.bf16 %v1021_v12  ;;  %v8919_v12 = vld [vmem:[%s9718_s5 + $0x48] sm:$0xff] }
 0x31f   : > { %2826 = vmatprep.subr.bf16.mxu0 %v1963_v16  ;;  %v927_v16 = vld [vmem:[%s8425_s11 + $0xa08] sm:$0xff] }
 0x321   : > { %3257 = vmatpush1.bf16.msra.mxu1 %v1772_v19  ;;  %v1020_v19 = vld [vmem:[%s8425_s11 + $0xcf0] sm:$0xff] }
 0x322   : > { %2827 = vmatpush1.bf16.msra.mxu0 %v1962_v29  ;;  %3258 = vmatprep.subr.bf16.mxu1 %v1779_v22  ;;  %v1821_v29 = vunpack.c.l.s8.bf16 %v927_v16  ;;  %v2010_v22 = vunpack.c.l.s8.bf16 %v1020_v19 }
 0x323   : > { %2828 = vmatprep.subr.bf16.mxu0 %v1969_v21  ;;  %v926_v21 = vld [vmem:[%s8425_s11 + $0xa00] sm:$0xff] }
 0x324   : > { %v1820_v23 = vunpack.c.l.s8.bf16 %v926_v21  ;;  %v1826_v36 = vunpack.c.h.s8.bf16 %v926_v21 }
 0x325   : > { %3259 = vmatpush1.bf16.msra.mxu1 %v1778_v26  ;;  %v1027_v26 = vld [vmem:[%s8425_s11 + $0xd28] sm:$0xff] }
 0x326   : > { %2829 = vmatpush1.bf16.msra.mxu0 %v1968_v25  ;;  %3260 = vmatprep.subr.bf16.mxu1 %v1785_v35  ;;  %v1827_v25 = vunpack.c.h.s8.bf16 %v927_v16  ;;  %v2016_v35 = vunpack.c.h.s8.bf16 %v1020_v19  ;;  %v2023_v53 = vunpack.c.l.s8.bf16 %v1027_v26  ;;  %v2029_v44 = vunpack.c.h.s8.bf16 %v1027_v26  ;;  %v8924_v16 = vld [vmem:[%s9718_s5 + $0xa8] sm:$0xff]  ;;  %v950_v26 = vld [vmem:[%s8425_s11 + $0xac0] sm:$0xff] }
 0x327   : > { %2830 = vmatprep.subr.bf16.mxu0 %v1975_v30  ;;  %v933_v30 = vld [vmem:[%s8425_s11 + $0xa38] sm:$0xff]  ;;  %v8930_v19 = vcombine.high %v8919_v12, %v8924_v16 }
 0x329   : > { %3261 = vmatpush1.bf16.msra.mxu1 %v1784_v37  ;;  %v1026_v37 = vld [vmem:[%s8425_s11 + $0xd20] sm:$0xff] }
 0x32a   : > { %2831 = vmatpush1.bf16.msra.mxu0 %v1974_v54  ;;  %3262 = vmatprep.subr.bf16.mxu1 %v1791_v42  ;;  %v1833_v54 = vunpack.c.l.s8.bf16 %v933_v30  ;;  %v2022_v42 = vunpack.c.l.s8.bf16 %v1026_v37 }
 0x32b   : > { %2832 = vmatprep.subr.bf16.mxu0 %v1981_v41  ;;  %v932_v41 = vld [vmem:[%s8425_s11 + $0xa30] sm:$0xff] }
 0x32c   : > { %v1832_v43 = vunpack.c.l.s8.bf16 %v932_v41  ;;  %v1838_v49 = vunpack.c.h.s8.bf16 %v932_v41 }
 0x32d   : > { %3263 = vmatpush1.bf16.msra.mxu1 %v1790_v46  ;;  %v1033_v46 = vld [vmem:[%s8425_s11 + $0xd58] sm:$0xff] }
 0x32e   : > { %2833 = vmatpush1.bf16.msra.mxu0 %v1980_v45  ;;  %3264 = vmatprep.subr.bf16.mxu1 %v1797_v48  ;;  %v1839_v45 = vunpack.c.h.s8.bf16 %v933_v30  ;;  %v2028_v48 = vunpack.c.h.s8.bf16 %v1026_v37  ;;  %v2035_v50 = vunpack.c.l.s8.bf16 %v1033_v46  ;;  %v2041_v34 = vunpack.c.h.s8.bf16 %v1033_v46  ;;  %v957_v37 = vld [vmem:[%s8425_s11 + $0xaf8] sm:$0xff]  ;;  %v956_v46 = vld [vmem:[%s8425_s11 + $0xaf0] sm:$0xff] }
 0x32f   : > { %2834 = vmatprep.subr.bf16.mxu0 %v1987_v47  ;;  %v939_v47 = vld [vmem:[%s8425_s11 + $0xa68] sm:$0xff] }
 0x331   : > { %3265 = vmatpush1.bf16.msra.mxu1 %v1796_v56  ;;  %v1032_v56 = vld [vmem:[%s8425_s11 + $0xd50] sm:$0xff] }
 0x332   : > { %2835 = vmatpush1.bf16.msra.mxu0 %v1986_v55  ;;  %3266 = vmatprep.subr.bf16.mxu1 %v1803_v32  ;;  %v1845_v55 = vunpack.c.l.s8.bf16 %v939_v47  ;;  %v2034_v32 = vunpack.c.l.s8.bf16 %v1032_v56 }
 0x333   : > { %2836 = vmatprep.subr.bf16.mxu0 %v1993_v31  ;;  %v938_v31 = vld [vmem:[%s8425_s11 + $0xa60] sm:$0xff] }
 0x334   : > { %v1844_v33 = vunpack.c.l.s8.bf16 %v938_v31  ;;  %v1850_v8 = vunpack.c.h.s8.bf16 %v938_v31 }
 0x335   : > { %3267 = vmatpush1.bf16.msra.mxu1 %v1802_v1  ;;  %v1039_v1 = vld [vmem:[%s8425_s11 + $0xd88] sm:$0xff] }
 0x336   : > { %2837 = vmatpush1.bf16.msra.mxu0 %v1992_v58  ;;  %3268 = vmatprep.subr.bf16.mxu1 %v1809_v5  ;;  %v1851_v58 = vunpack.c.h.s8.bf16 %v939_v47  ;;  %v2040_v5 = vunpack.c.h.s8.bf16 %v1032_v56  ;;  %v2047_v14 = vunpack.c.l.s8.bf16 %v1039_v1  ;;  %v963_v56 = vld [vmem:[%s8425_s11 + $0xb28] sm:$0xff] }
 0x337   : > { %2838 = vmatprep.subr.bf16.mxu0 %v1999_v2  ;;  %v945_v2 = vld [vmem:[%s8425_s11 + $0xa98] sm:$0xff] }
 0x339   : > { %3269 = vmatpush1.bf16.msra.mxu1 %v1808_v0  ;;  %v1038_v0 = vld [vmem:[%s8425_s11 + $0xd80] sm:$0xff] }
 0x33a   : > { %2839 = vmatpush1.bf16.msra.mxu0 %v1998_v60  ;;  %3270 = vmatprep.subr.bf16.mxu1 %v1815_v11  ;;  %v1857_v60 = vunpack.c.l.s8.bf16 %v945_v2  ;;  %v8914_v11 = vcombine.low %v8865_v62, %v8870_v63  ;;  %v1863_v62 = vunpack.c.h.s8.bf16 %v945_v2  ;;  %v1045_v63 = vld [vmem:[%s8425_s11 + $0xdb8] sm:$0xff]  ;;  %v2052_v21 = vunpack.c.h.s8.bf16 %v1038_v0 }
 0x33b   : > { %2840 = vmatprep.subr.bf16.mxu0 %v2005_v15  ;;  %v944_v15 = vld [vmem:[%s8425_s11 + $0xa90] sm:$0xff] }
 0x33d   : > { %3271 = vmatpush1.bf16.msra.mxu1 %v1814_v18  ;;  %v1856_v18 = vunpack.c.l.s8.bf16 %v944_v15 }
 0x33e   : > { %2841 = vmatpush1.bf16.msra.mxu0 %v2004_v17  ;;  %3272 = vmatprep.subr.bf16.mxu1 %v1821_v29  ;;  %v2046_v17 = vunpack.c.l.s8.bf16 %v1038_v0  ;;  %v951_v29 = vld [vmem:[%s8425_s11 + $0xac8] sm:$0xff]  ;;  %v969_v0 = vld [vmem:[%s8425_s11 + $0xb58] sm:$0xff] }
 0x33f   : > { %2842 = vmatprep.subr.bf16.mxu0 %v2011_v28  ;;  %v2053_v28 = vunpack.c.h.s8.bf16 %v1039_v1  ;;  %v962_v1 = vld [vmem:[%s8425_s11 + $0xb20] sm:$0xff] }
 0x341   : > { %3273 = vmatpush1.bf16.msra.mxu1 %v1820_v23  ;;  %v2059_v23 = vunpack.c.l.s8.bf16 %v1045_v63 }
 0x342   : > { %2843 = vmatpush1.bf16.msra.mxu0 %v2010_v22  ;;  %3274 = vmatprep.subr.bf16.mxu1 %v1827_v25  ;;  %v1862_v22 = vunpack.c.h.s8.bf16 %v944_v15  ;;  %v1044_v25 = vld [vmem:[%s8425_s11 + $0xdb0] sm:$0xff] }
 0x343   : > { %2844 = vmatprep.subr.bf16.mxu0 %v2017_v24  ;;  %v1869_v24 = vunpack.c.l.s8.bf16 %v951_v29  ;;  %v2058_v30 = vunpack.c.l.s8.bf16 %v1044_v25  ;;  %v2064_v41 = vunpack.c.h.s8.bf16 %v1044_v25  ;;  %v975_v25 = vld [vmem:[%s8425_s11 + $0xb88] sm:$0xff] }
 0x345   : > { %3275 = vmatpush1.bf16.msra.mxu1 %v1826_v36  ;;  %v2065_v36 = vunpack.c.h.s8.bf16 %v1045_v63  ;;  %v968_v63 = vld [vmem:[%s8425_s11 + $0xb50] sm:$0xff] }
 0x346   : > { %2845 = vmatpush1.bf16.msra.mxu0 %v2016_v35  ;;  %3276 = vmatprep.subr.bf16.mxu1 %v1833_v54  ;;  %v1868_v35 = vunpack.c.l.s8.bf16 %v950_v26  ;;  %v1051_v54 = vld [vmem:[%s8425_s11 + $0xde8] sm:$0xff] }
 0x347   : > { %2846 = vmatprep.subr.bf16.mxu0 %v2023_v53  ;;  %v1875_v53 = vunpack.c.h.s8.bf16 %v951_v29 }
 0x349   : > { %3277 = vmatpush1.bf16.msra.mxu1 %v1832_v43  ;;  %v2071_v43 = vunpack.c.l.s8.bf16 %v1051_v54 }
 0x34a   : > { %2847 = vmatpush1.bf16.msra.mxu0 %v2022_v42  ;;  %3278 = vmatprep.subr.bf16.mxu1 %v1839_v45  ;;  %v1874_v42 = vunpack.c.h.s8.bf16 %v950_v26  ;;  %v1050_v45 = vld [vmem:[%s8425_s11 + $0xde0] sm:$0xff] }
 0x34b   : > { %2848 = vmatprep.subr.bf16.mxu0 %v2029_v44  ;;  %v1881_v44 = vunpack.c.l.s8.bf16 %v957_v37  ;;  %v2070_v47 = vunpack.c.l.s8.bf16 %v1050_v45  ;;  %v2076_v31 = vunpack.c.h.s8.bf16 %v1050_v45  ;;  %v981_v45 = vld [vmem:[%s8425_s11 + $0xbb8] sm:$0xff] }
 0x34d   : > { %3279 = vmatpush1.bf16.msra.mxu1 %v1838_v49  ;;  %v2077_v49 = vunpack.c.h.s8.bf16 %v1051_v54  ;;  %v974_v54 = vld [vmem:[%s8425_s11 + $0xb80] sm:$0xff] }
 0x34e   : > { %2849 = vmatpush1.bf16.msra.mxu0 %v2028_v48  ;;  %3280 = vmatprep.subr.bf16.mxu1 %v1845_v55  ;;  %v1880_v48 = vunpack.c.l.s8.bf16 %v956_v46  ;;  %v1057_v55 = vld [vmem:[%s8425_s11 + $0xe18] sm:$0xff] }
 0x34f   : > { %2850 = vmatprep.subr.bf16.mxu0 %v2035_v50  ;;  %v1887_v50 = vunpack.c.h.s8.bf16 %v957_v37 }
 0x351   : > { %3281 = vmatpush1.bf16.msra.mxu1 %v1844_v33  ;;  %v2083_v33 = vunpack.c.l.s8.bf16 %v1057_v55 }
 0x352   : > { %2851 = vmatpush1.bf16.msra.mxu0 %v2034_v32  ;;  %3282 = vmatprep.subr.bf16.mxu1 %v1851_v58  ;;  %v1886_v32 = vunpack.c.h.s8.bf16 %v956_v46  ;;  %v1056_v58 = vld [vmem:[%s8425_s11 + $0xe10] sm:$0xff] }
 0x353   : > { %2852 = vmatprep.subr.bf16.mxu0 %v2041_v34  ;;  %v1893_v34 = vunpack.c.l.s8.bf16 %v963_v56  ;;  %v2082_v2 = vunpack.c.l.s8.bf16 %v1056_v58  ;;  %v2088_v15 = vunpack.c.h.s8.bf16 %v1056_v58  ;;  %v987_v58 = vld [vmem:[%s8425_s11 + $0xbe8] sm:$0xff] }
 0x355   : > { %3283 = vmatpush1.bf16.msra.mxu1 %v1850_v8  ;;  %v2089_v8 = vunpack.c.h.s8.bf16 %v1057_v55  ;;  %v980_v55 = vld [vmem:[%s8425_s11 + $0xbb0] sm:$0xff] }
 0x356   : > { %2853 = vmatpush1.bf16.msra.mxu0 %v2040_v5  ;;  %3295 = vmatprep.subr.bf16.mxu1 %v1857_v60  ;;  %v1892_v5 = vunpack.c.l.s8.bf16 %v962_v1  ;;  %v1063_v60 = vld [vmem:[%s8425_s11 + $0xe48] sm:$0xff] }
 0x357   : > { %2865 = vmatprep.subr.bf16.mxu0 %v2047_v14  ;;  %v1899_v14 = vunpack.c.h.s8.bf16 %v963_v56 }
 0x358   : > { %3285 = vmatmul.mubr.bf16.vlgmr.msra.gmra.mrb[4].mxu1 %v8806_v59 }
 0x359   : > { %2855 = vmatmul.mubr.bf16.vlgmr.msra.gmra.mrb[0].mxu0 %v8914_v11  ;;  %3296 = vmatpush1.bf16.msra.mxu1 %v1856_v18  ;;  %v2095_v18 = vunpack.c.l.s8.bf16 %v1063_v60 }
 0x35a   : > { %2866 = vmatpush1.bf16.msra.mxu0 %v2046_v17  ;;  %3297 = vmatprep.subr.bf16.mxu1 %v1863_v62  ;;  %v1898_v17 = vunpack.c.h.s8.bf16 %v962_v1  ;;  %v1062_v62 = vld [vmem:[%s8425_s11 + $0xe40] sm:$0xff] }
 0x35b   : > { %2867 = vmatprep.subr.bf16.mxu0 %v2053_v28  ;;  %2897 = vmatprep.mubr.bf16.mxu0 %v8930_v19  ;;  %v1905_v28 = vunpack.c.l.s8.bf16 %v969_v0  ;;  %v2094_v29 = vunpack.c.l.s8.bf16 %v1062_v62  ;;  %v2100_v26 = vunpack.c.h.s8.bf16 %v1062_v62  ;;  %v993_v62 = vld [vmem:[%s8425_s11 + $0xc18] sm:$0xff] }
 0x35c   : > { %3327 = vmatprep.mubr.bf16.mxu1 %v8822_v6 }
 0x35d   : > { %3298 = vmatpush1.bf16.msra.mxu1 %v1862_v22  ;;  %v2101_v22 = vunpack.c.h.s8.bf16 %v1063_v60  ;;  %v986_v60 = vld [vmem:[%s8425_s11 + $0xbe0] sm:$0xff] }
 0x35e   : > { %2868 = vmatpush1.bf16.msra.mxu0 %v2052_v21  ;;  %3299 = vmatprep.subr.bf16.mxu1 %v1869_v24  ;;  %v1904_v21 = vunpack.c.l.s8.bf16 %v968_v63  ;;  %v1069_v24 = vld [vmem:[%s8425_s11 + $0xe78] sm:$0xff] }
 0x35f   : > { %2869 = vmatprep.subr.bf16.mxu0 %v2059_v23  ;;  %v1911_v23 = vunpack.c.h.s8.bf16 %v969_v0 }
 0x361   : > { %3300 = vmatpush1.bf16.msra.mxu1 %v1868_v35  ;;  %v2107_v35 = vunpack.c.l.s8.bf16 %v1069_v24 }
 0x362   : > { %2870 = vmatpush1.bf16.msra.mxu0 %v2058_v30  ;;  %3301 = vmatprep.subr.bf16.mxu1 %v1875_v53  ;;  %v1910_v30 = vunpack.c.h.s8.bf16 %v968_v63  ;;  %v1068_v53 = vld [vmem:[%s8425_s11 + $0xe70] sm:$0xff] }
 0x363   : > { %2871 = vmatprep.subr.bf16.mxu0 %v2065_v36  ;;  %v1917_v36 = vunpack.c.l.s8.bf16 %v975_v25  ;;  %v2106_v37 = vunpack.c.l.s8.bf16 %v1068_v53  ;;  %v2112_v46 = vunpack.c.h.s8.bf16 %v1068_v53 }
 0x365   : > { %3302 = vmatpush1.bf16.msra.mxu1 %v1874_v42  ;;  %v2113_v42 = vunpack.c.h.s8.bf16 %v1069_v24  ;;  %v992_v24 = vld [vmem:[%s8425_s11 + $0xc10] sm:$0xff] }
 0x366   : > { %2872 = vmatpush1.bf16.msra.mxu0 %v2064_v41  ;;  %3303 = vmatprep.subr.bf16.mxu1 %v1881_v44  ;;  %v1916_v41 = vunpack.c.l.s8.bf16 %v974_v54  ;;  %v1075_v44 = vld [vmem:[%s8425_s11 + $0xea8] sm:$0xff] }
 0x367   : > { %2873 = vmatprep.subr.bf16.mxu0 %v2071_v43  ;;  %v1923_v43 = vunpack.c.h.s8.bf16 %v975_v25  ;;  %v8968_v25 = vcombine.low %v8919_v12, %v8924_v16  ;;  %v1959_v12 = vunpack.c.h.s8.bf16 %v993_v62  ;;  %v1093_v16 = vld [vmem:[%s8425_s11 + $0xf38] sm:$0xff] }
 0x369   : > { %3304 = vmatpush1.bf16.msra.mxu1 %v1880_v48  ;;  %v2119_v48 = vunpack.c.l.s8.bf16 %v1075_v44 }
 0x36a   : > { %2874 = vmatpush1.bf16.msra.mxu0 %v2070_v47  ;;  %3305 = vmatprep.subr.bf16.mxu1 %v1887_v50  ;;  %v1922_v47 = vunpack.c.h.s8.bf16 %v974_v54  ;;  %v1074_v50 = vld [vmem:[%s8425_s11 + $0xea0] sm:$0xff]  ;;  %v999_v54 = vld [vmem:[%s8425_s11 + $0xc48] sm:$0xff] }
 0x36b   : > { %2875 = vmatprep.subr.bf16.mxu0 %v2077_v49  ;;  %v1929_v49 = vunpack.c.l.s8.bf16 %v981_v45  ;;  %v2118_v56 = vunpack.c.l.s8.bf16 %v1074_v50  ;;  %v2124_v1 = vunpack.c.h.s8.bf16 %v1074_v50  ;;  %v1971_v50 = vunpack.c.h.s8.bf16 %v999_v54 }
 0x36d   : > { %3306 = vmatpush1.bf16.msra.mxu1 %v1886_v32  ;;  %v2125_v32 = vunpack.c.h.s8.bf16 %v1075_v44  ;;  %v1965_v44 = vunpack.c.l.s8.bf16 %v999_v54  ;;  %v1110_v54 = vld [vmem:[%s8425_s11 + $0xfc0] sm:$0xff] }
 0x36e   : > { %2876 = vmatpush1.bf16.msra.mxu0 %v2076_v31  ;;  %3307 = vmatprep.subr.bf16.mxu1 %v1893_v34  ;;  %v1928_v31 = vunpack.c.l.s8.bf16 %v980_v55  ;;  %v1081_v34 = vld [vmem:[%s8425_s11 + $0xed8] sm:$0xff] }
 0x36f   : > { %2877 = vmatprep.subr.bf16.mxu0 %v2083_v33  ;;  %v1935_v33 = vunpack.c.h.s8.bf16 %v981_v45  ;;  %v1092_v45 = vld [vmem:[%s8425_s11 + $0xf30] sm:$0xff] }
 0x371   : > { %3308 = vmatpush1.bf16.msra.mxu1 %v1892_v5  ;;  %v2131_v5 = vunpack.c.l.s8.bf16 %v1081_v34 }
 0x372   : > { %2878 = vmatpush1.bf16.msra.mxu0 %v2082_v2  ;;  %3309 = vmatprep.subr.bf16.mxu1 %v1899_v14  ;;  %v1934_v2 = vunpack.c.h.s8.bf16 %v980_v55  ;;  %v1080_v14 = vld [vmem:[%s8425_s11 + $0xed0] sm:$0xff]  ;;  %v1099_v55 = vld [vmem:[%s8425_s11 + $0xf68] sm:$0xff] }
 0x373   : > { %2879 = vmatprep.subr.bf16.mxu0 %v2089_v8  ;;  %v1941_v8 = vunpack.c.l.s8.bf16 %v987_v58  ;;  %v2130_v0 = vunpack.c.l.s8.bf16 %v1080_v14  ;;  %v2136_v63 = vunpack.c.h.s8.bf16 %v1080_v14 }
 0x375   : > { %3310 = vmatpush1.bf16.msra.mxu1 %v1898_v17  ;;  %v2137_v17 = vunpack.c.h.s8.bf16 %v1081_v34 }
 0x376   : > { %2880 = vmatpush1.bf16.msra.mxu0 %v2088_v15  ;;  %3311 = vmatprep.subr.bf16.mxu1 %v1905_v28  ;;  %v1940_v15 = vunpack.c.l.s8.bf16 %v986_v60  ;;  %v1087_v28 = vld [vmem:[%s8425_s11 + $0xf08] sm:$0xff] }
 0x377   : > { %2881 = vmatprep.subr.bf16.mxu0 %v2095_v18  ;;  %v1947_v18 = vunpack.c.h.s8.bf16 %v987_v58  ;;  %v2149_v53 = vunpack.c.h.s8.bf16 %v1087_v28  ;;  %v1098_v58 = vld [vmem:[%s8425_s11 + $0xf60] sm:$0xff] }
 0x379   : > { %3312 = vmatpush1.bf16.msra.mxu1 %v1904_v21  ;;  %v2143_v21 = vunpack.c.l.s8.bf16 %v1087_v28 }
 0x37a   : > { %2882 = vmatpush1.bf16.msra.mxu0 %v2094_v29  ;;  %3313 = vmatprep.subr.bf16.mxu1 %v1911_v23  ;;  %v1946_v29 = vunpack.c.h.s8.bf16 %v986_v60  ;;  %v1086_v23 = vld [vmem:[%s8425_s11 + $0xf00] sm:$0xff]  ;;  %v1105_v60 = vld [vmem:[%s8425_s11 + $0xf98] sm:$0xff] }
 0x37b   : > { %2883 = vmatprep.subr.bf16.mxu0 %v2101_v22  ;;  %v1953_v22 = vunpack.c.l.s8.bf16 %v993_v62  ;;  %v1104_v62 = vld [vmem:[%s8425_s11 + $0xf90] sm:$0xff] }
 0x37d   : > { %3314 = vmatpush1.bf16.msra.mxu1 %v1910_v30  ;;  %v8978_v30 = vld [vmem:[%s9718_s5 + $0xb0] sm:$0xff] }
 0x37e   : > { %2884 = vmatpush1.bf16.msra.mxu0 %v2100_v26  ;;  %3315 = vmatprep.subr.bf16.mxu1 %v1917_v36  ;;  %v8973_v26 = vld [vmem:[%s9718_s5 + $0x50] sm:$0xff]  ;;  %v1952_v36 = vunpack.c.l.s8.bf16 %v992_v24 }
 0x37f   : > { %2885 = vmatprep.subr.bf16.mxu0 %v2107_v35  ;;  %v2142_v35 = vunpack.c.l.s8.bf16 %v1086_v23 }
 0x381   : > { %3316 = vmatpush1.bf16.msra.mxu1 %v1916_v41  ;;  %v2148_v41 = vunpack.c.h.s8.bf16 %v1086_v23 }
 0x382   : > { %2886 = vmatpush1.bf16.msra.mxu0 %v2106_v37  ;;  %3317 = vmatprep.subr.bf16.mxu1 %v1923_v43  ;;  %v8984_v37 = vcombine.high %v8973_v26, %v8978_v30  ;;  %v2155_v43 = vunpack.c.l.s8.bf16 %v1093_v16 }
 0x383   : > { %2887 = vmatprep.subr.bf16.mxu0 %v2113_v42  ;;  %v1958_v42 = vunpack.c.h.s8.bf16 %v992_v24  ;;  %v1111_v24 = vld [vmem:[%s8425_s11 + $0xfc8] sm:$0xff] }
 0x385   : > { %3318 = vmatpush1.bf16.msra.mxu1 %v1922_v47  ;;  %v2154_v47 = vunpack.c.l.s8.bf16 %v1092_v45 }
 0x386   : > { %2888 = vmatpush1.bf16.msra.mxu0 %v2112_v46  ;;  %3319 = vmatprep.subr.bf16.mxu1 %v1929_v49  ;;  %v998_v46 = vld [vmem:[%s8425_s11 + $0xc40] sm:$0xff]  ;;  %v2161_v49 = vunpack.c.h.s8.bf16 %v1093_v16 }
 0x387   : > { %2889 = vmatprep.subr.bf16.mxu0 %v2119_v48  ;;  %v1964_v48 = vunpack.c.l.s8.bf16 %v998_v46 }
 0x389   : > { %3320 = vmatpush1.bf16.msra.mxu1 %v1928_v31  ;;  %v2160_v31 = vunpack.c.h.s8.bf16 %v1092_v45 }
 0x38a   : > { %2890 = vmatpush1.bf16.msra.mxu0 %v2118_v56  ;;  %3321 = vmatprep.subr.bf16.mxu1 %v1935_v33  ;;  %v1005_v56 = vld [vmem:[%s8425_s11 + $0xc78] sm:$0xff]  ;;  %v2167_v33 = vunpack.c.l.s8.bf16 %v1099_v55 }
 0x38b   : > { %2891 = vmatprep.subr.bf16.mxu0 %v2125_v32  ;;  %v1970_v32 = vunpack.c.h.s8.bf16 %v998_v46  ;;  %v1977_v34 = vunpack.c.l.s8.bf16 %v1005_v56  ;;  %v1983_v14 = vunpack.c.h.s8.bf16 %v1005_v56  ;;  %v1117_v46 = vld [vmem:[%s8425_s11 + $0xff8] sm:$0xff]  ;;  %v1116_v56 = vld [vmem:[%s8425_s11 + $0xff0] sm:$0xff] }
 0x38d   : > { %3322 = vmatpush1.bf16.msra.mxu1 %v1934_v2  ;;  %v2166_v2 = vunpack.c.l.s8.bf16 %v1098_v58 }
 0x38e   : > { %2892 = vmatpush1.bf16.msra.mxu0 %v2124_v1  ;;  %3323 = vmatprep.subr.bf16.mxu1 %v1941_v8  ;;  %v1004_v1 = vld [vmem:[%s8425_s11 + $0xc70] sm:$0xff]  ;;  %v2173_v8 = vunpack.c.h.s8.bf16 %v1099_v55 }
 0x38f   : > { %2893 = vmatprep.subr.bf16.mxu0 %v2131_v5  ;;  %v1976_v5 = vunpack.c.l.s8.bf16 %v1004_v1 }
 0x391   : > { %3324 = vmatpush1.bf16.msra.mxu1 %v1940_v15  ;;  %v2172_v15 = vunpack.c.h.s8.bf16 %v1098_v58 }
 0x392   : > { %2894 = vmatpush1.bf16.msra.mxu0 %v2130_v0  ;;  %3325 = vmatprep.subr.bf16.mxu1 %v1947_v18  ;;  %v1011_v0 = vld [vmem:[%s8425_s11 + $0xca8] sm:$0xff]  ;;  %v2179_v18 = vunpack.c.l.s8.bf16 %v1105_v60 }
 0x393   : > { %2895 = vmatprep.subr.bf16.mxu0 %v2137_v17  ;;  %v1982_v17 = vunpack.c.h.s8.bf16 %v1004_v1  ;;  %v1989_v28 = vunpack.c.l.s8.bf16 %v1011_v0  ;;  %v1995_v23 = vunpack.c.h.s8.bf16 %v1011_v0  ;;  %v1123_v1 = vld [vmem:[%s8425_s11 + $0x1028] sm:$0xff]  ;;  %v1122_v0 = vld [vmem:[%s8425_s11 + $0x1020] sm:$0xff] }
 0x395   : > { %3326 = vmatpush1.bf16.msra.mxu1 %v1946_v29  ;;  %v2178_v29 = vunpack.c.l.s8.bf16 %v1104_v62 }
 0x396   : > { %2896 = vmatpush1.bf16.msra.mxu0 %v2136_v63  ;;  %3338 = vmatprep.subr.bf16.mxu1 %v1953_v22  ;;  %v1010_v63 = vld [vmem:[%s8425_s11 + $0xca0] sm:$0xff]  ;;  %v2185_v22 = vunpack.c.h.s8.bf16 %v1105_v60 }
 0x397   : > { %2908 = vmatprep.subr.bf16.mxu0 %v2143_v21  ;;  %v1988_v21 = vunpack.c.l.s8.bf16 %v1010_v63 }
 0x398   : > { %3328 = vmatmul.mubr.bf16.vlgmr.msra.gmra.mrb[4].mxu1 %v8860_v4 }
 0x399   : > { %2898 = vmatmul.mubr.bf16.vlgmr.msra.gmra.mrb[0].mxu0 %v8968_v25  ;;  %3339 = vmatpush1.bf16.msra.mxu1 %v1952_v36  ;;  %v2184_v36 = vunpack.c.h.s8.bf16 %v1104_v62 }
 0x39a   : > { %2909 = vmatpush1.bf16.msra.mxu0 %v2142_v35  ;;  %3340 = vmatprep.subr.bf16.mxu1 %v1959_v12  ;;  %v1017_v35 = vld [vmem:[%s8425_s11 + $0xcd8] sm:$0xff]  ;;  %v2191_v12 = vunpack.c.l.s8.bf16 %v1111_v24 }
 0x39b   : > { %2910 = vmatprep.subr.bf16.mxu0 %v2149_v53  ;;  %2940 = vmatprep.mubr.bf16.mxu0 %v8984_v37  ;;  %v1994_v53 = vunpack.c.h.s8.bf16 %v1010_v63  ;;  %v2001_v16 = vunpack.c.l.s8.bf16 %v1017_v35  ;;  %v2007_v45 = vunpack.c.h.s8.bf16 %v1017_v35  ;;  %v1129_v63 = vld [vmem:[%s8425_s11 + $0x1058] sm:$0xff]  ;;  %v1128_v35 = vld [vmem:[%s8425_s11 + $0x1050] sm:$0xff] }
 0x39c   : > { %3370 = vmatprep.mubr.bf16.mxu1 %v8876_v9 }
 0x39d   : > { %3341 = vmatpush1.bf16.msra.mxu1 %v1958_v42  ;;  %v2190_v42 = vunpack.c.l.s8.bf16 %v1110_v54 }
 0x39e   : > { %2911 = vmatpush1.bf16.msra.mxu0 %v2148_v41  ;;  %3342 = vmatprep.subr.bf16.mxu1 %v1965_v44  ;;  %v1016_v41 = vld [vmem:[%s8425_s11 + $0xcd0] sm:$0xff]  ;;  %v2197_v44 = vunpack.c.h.s8.bf16 %v1111_v24 }
 0x39f   : > { %2912 = vmatprep.subr.bf16.mxu0 %v2155_v43  ;;  %v2000_v43 = vunpack.c.l.s8.bf16 %v1016_v41 }
 0x3a1   : > { %3343 = vmatpush1.bf16.msra.mxu1 %v1964_v48  ;;  %v2196_v48 = vunpack.c.h.s8.bf16 %v1110_v54 }
 0x3a2   : > { %2913 = vmatpush1.bf16.msra.mxu0 %v2154_v47  ;;  %3344 = vmatprep.subr.bf16.mxu1 %v1971_v50  ;;  %v1023_v47 = vld [vmem:[%s8425_s11 + $0xd08] sm:$0xff]  ;;  %v2203_v50 = vunpack.c.l.s8.bf16 %v1117_v46 }
 0x3a3   : > { %2914 = vmatprep.subr.bf16.mxu0 %v2161_v49  ;;  %v2006_v49 = vunpack.c.h.s8.bf16 %v1016_v41  ;;  %v2013_v55 = vunpack.c.l.s8.bf16 %v1023_v47  ;;  %v2019_v58 = vunpack.c.h.s8.bf16 %v1023_v47  ;;  %v1135_v41 = vld [vmem:[%s8425_s11 + $0x1088] sm:$0xff]  ;;  %v1134_v47 = vld [vmem:[%s8425_s11 + $0x1080] sm:$0xff] }
 0x3a5   : > { %3345 = vmatpush1.bf16.msra.mxu1 %v1970_v32  ;;  %v2202_v32 = vunpack.c.l.s8.bf16 %v1116_v56 }
 0x3a6   : > { %2915 = vmatpush1.bf16.msra.mxu0 %v2160_v31  ;;  %3346 = vmatprep.subr.bf16.mxu1 %v1977_v34  ;;  %v1022_v31 = vld [vmem:[%s8425_s11 + $0xd00] sm:$0xff]  ;;  %v2209_v34 = vunpack.c.h.s8.bf16 %v1117_v46 }
 0x3a7   : > { %2916 = vmatprep.subr.bf16.mxu0 %v2167_v33  ;;  %v2012_v33 = vunpack.c.l.s8.bf16 %v1022_v31 }
 0x3a9   : > { %3347 = vmatpush1.bf16.msra.mxu1 %v1976_v5  ;;  %v2208_v5 = vunpack.c.h.s8.bf16 %v1116_v56  ;;  %v2238_v56 = vunpack.c.l.s8.bf16 %v1134_v47 }
 0x3aa   : > { %2917 = vmatpush1.bf16.msra.mxu0 %v2166_v2  ;;  %3348 = vmatprep.subr.bf16.mxu1 %v1983_v14  ;;  %v1029_v2 = vld [vmem:[%s8425_s11 + $0xd38] sm:$0xff]  ;;  %v2215_v14 = vunpack.c.l.s8.bf16 %v1123_v1 }
 0x3ab   : > { %2918 = vmatprep.subr.bf16.mxu0 %v2173_v8  ;;  %v2018_v8 = vunpack.c.h.s8.bf16 %v1022_v31  ;;  %v2025_v60 = vunpack.c.l.s8.bf16 %v1029_v2  ;;  %v2031_v62 = vunpack.c.h.s8.bf16 %v1029_v2 }
 0x3ad   : > { %3349 = vmatpush1.bf16.msra.mxu1 %v1982_v17  ;;  %v2214_v17 = vunpack.c.l.s8.bf16 %v1122_v0 }
 0x3ae   : > { %2919 = vmatpush1.bf16.msra.mxu0 %v2172_v15  ;;  %3350 = vmatprep.subr.bf16.mxu1 %v1989_v28  ;;  %v1028_v15 = vld [vmem:[%s8425_s11 + $0xd30] sm:$0xff]  ;;  %v2221_v28 = vunpack.c.h.s8.bf16 %v1123_v1 }
 0x3af   : > { %2920 = vmatprep.subr.bf16.mxu0 %v2179_v18  ;;  %v2024_v18 = vunpack.c.l.s8.bf16 %v1028_v15 }
 0x3b1   : > { %3351 = vmatpush1.bf16.msra.mxu1 %v1988_v21  ;;  %v2220_v21 = vunpack.c.h.s8.bf16 %v1122_v0 }
 0x3b2   : > { %2921 = vmatpush1.bf16.msra.mxu0 %v2178_v29  ;;  %3352 = vmatprep.subr.bf16.mxu1 %v1995_v23  ;;  %v1035_v29 = vld [vmem:[%s8425_s11 + $0xd68] sm:$0xff]  ;;  %v2227_v23 = vunpack.c.l.s8.bf16 %v1129_v63 }
 0x3b3   : > { %2922 = vmatprep.subr.bf16.mxu0 %v2185_v22  ;;  %v2030_v22 = vunpack.c.h.s8.bf16 %v1028_v15  ;;  %v2037_v24 = vunpack.c.l.s8.bf16 %v1035_v29  ;;  %v2043_v54 = vunpack.c.h.s8.bf16 %v1035_v29 }
 0x3b5   : > { %3353 = vmatpush1.bf16.msra.mxu1 %v1994_v53  ;;  %v2226_v53 = vunpack.c.l.s8.bf16 %v1128_v35 }
 0x3b6   : > { %2923 = vmatpush1.bf16.msra.mxu0 %v2184_v36  ;;  %3354 = vmatprep.subr.bf16.mxu1 %v2001_v16  ;;  %v1034_v36 = vld [vmem:[%s8425_s11 + $0xd60] sm:$0xff]  ;;  %v2233_v16 = vunpack.c.h.s8.bf16 %v1129_v63 }
 0x3b7   : > { %2924 = vmatprep.subr.bf16.mxu0 %v2191_v12  ;;  %v2036_v12 = vunpack.c.l.s8.bf16 %v1034_v36 }
 0x3b9   : > { %3355 = vmatpush1.bf16.msra.mxu1 %v2000_v43  ;;  %v2232_v43 = vunpack.c.h.s8.bf16 %v1128_v35 }
 0x3ba   : > { %2925 = vmatpush1.bf16.msra.mxu0 %v2190_v42  ;;  %3356 = vmatprep.subr.bf16.mxu1 %v2007_v45  ;;  %v1041_v42 = vld [vmem:[%s8425_s11 + $0xd98] sm:$0xff]  ;;  %v2239_v45 = vunpack.c.l.s8.bf16 %v1135_v41 }
 0x3bb   : > { %2926 = vmatprep.subr.bf16.mxu0 %v2197_v44  ;;  %v2042_v44 = vunpack.c.h.s8.bf16 %v1034_v36  ;;  %v2049_v46 = vunpack.c.l.s8.bf16 %v1041_v42 }
 0x3bd   : > { %3357 = vmatpush1.bf16.msra.mxu1 %v2006_v49  ;;  %v9022_v49 = vcombine.low %v8973_v26, %v8978_v30  ;;  %v2055_v26 = vunpack.c.h.s8.bf16 %v1041_v42  ;;  %v1141_v30 = vld [vmem:[%s8425_s11 + $0x10b8] sm:$0xff] }
 0x3be   : > { %2927 = vmatpush1.bf16.msra.mxu0 %v2196_v48  ;;  %3358 = vmatprep.subr.bf16.mxu1 %v2013_v55  ;;  %v1040_v48 = vld [vmem:[%s8425_s11 + $0xd90] sm:$0xff]  ;;  %v9032_v55 = vld [vmem:[%s9718_s5 + $0xb8] sm:$0xff]  ;;  %v2251_v2 = vunpack.c.l.s8.bf16 %v1141_v30  ;;  %v2257_v15 = vunpack.c.h.s8.bf16 %v1141_v30 }
 0x3bf   : > { %2928 = vmatprep.subr.bf16.mxu0 %v2203_v50  ;;  %v9027_v50 = vld [vmem:[%s9718_s5 + $0x58] sm:$0xff]  ;;  %v2048_v31 = vunpack.c.l.s8.bf16 %v1040_v48  ;;  %v2054_v1 = vunpack.c.h.s8.bf16 %v1040_v48 }
 0x3c1   : > { %3359 = vmatpush1.bf16.msra.mxu1 %v2012_v33  ;;  %v1047_v33 = vld [vmem:[%s8425_s11 + $0xdc8] sm:$0xff] }
 0x3c2   : > { %2929 = vmatpush1.bf16.msra.mxu0 %v2202_v32  ;;  %3360 = vmatprep.subr.bf16.mxu1 %v2019_v58  ;;  %v2245_v32 = vunpack.c.h.s8.bf16 %v1135_v41  ;;  %v2244_v58 = vunpack.c.h.s8.bf16 %v1134_v47 }
 0x3c3   : > { %2930 = vmatprep.subr.bf16.mxu0 %v2209_v34  ;;  %v9038_v34 = vcombine.high %v9027_v50, %v9032_v55 }
 0x3c5   : > { %3361 = vmatpush1.bf16.msra.mxu1 %v2018_v8  ;;  %v1140_v8 = vld [vmem:[%s8425_s11 + $0x10b0] sm:$0xff] }
 0x3c6   : > { %2931 = vmatpush1.bf16.msra.mxu0 %v2208_v5  ;;  %3362 = vmatprep.subr.bf16.mxu1 %v2025_v60  ;;  %v2061_v5 = vunpack.c.l.s8.bf16 %v1047_v33  ;;  %v2250_v60 = vunpack.c.l.s8.bf16 %v1140_v8 }
 0x3c7   : > { %2932 = vmatprep.subr.bf16.mxu0 %v2215_v14  ;;  %v1046_v14 = vld [vmem:[%s8425_s11 + $0xdc0] sm:$0xff] }
 0x3c8   : > { %v2060_v0 = vunpack.c.l.s8.bf16 %v1046_v14  ;;  %v2066_v63 = vunpack.c.h.s8.bf16 %v1046_v14 }
 0x3c9   : > { %3363 = vmatpush1.bf16.msra.mxu1 %v2024_v18  ;;  %v1147_v18 = vld [vmem:[%s8425_s11 + $0x10e8] sm:$0xff] }
 0x3ca   : > { %2933 = vmatpush1.bf16.msra.mxu0 %v2214_v17  ;;  %3364 = vmatprep.subr.bf16.mxu1 %v2031_v62  ;;  %v2067_v17 = vunpack.c.h.s8.bf16 %v1047_v33  ;;  %v2256_v62 = vunpack.c.h.s8.bf16 %v1140_v8  ;;  %v2263_v29 = vunpack.c.l.s8.bf16 %v1147_v18  ;;  %v2269_v36 = vunpack.c.h.s8.bf16 %v1147_v18 }
 0x3cb   : > { %2934 = vmatprep.subr.bf16.mxu0 %v2221_v28  ;;  %v1053_v28 = vld [vmem:[%s8425_s11 + $0xdf8] sm:$0xff] }
 0x3cd   : > { %3365 = vmatpush1.bf16.msra.mxu1 %v2030_v22  ;;  %v1146_v22 = vld [vmem:[%s8425_s11 + $0x10e0] sm:$0xff] }
 0x3ce   : > { %2935 = vmatpush1.bf16.msra.mxu0 %v2220_v21  ;;  %3366 = vmatprep.subr.bf16.mxu1 %v2037_v24  ;;  %v2073_v21 = vunpack.c.l.s8.bf16 %v1053_v28  ;;  %v2262_v24 = vunpack.c.l.s8.bf16 %v1146_v22 }
 0x3cf   : > { %2936 = vmatprep.subr.bf16.mxu0 %v2227_v23  ;;  %v1052_v23 = vld [vmem:[%s8425_s11 + $0xdf0] sm:$0xff] }
 0x3d0   : > { %v2072_v35 = vunpack.c.l.s8.bf16 %v1052_v23  ;;  %v2078_v41 = vunpack.c.h.s8.bf16 %v1052_v23 }
 0x3d1   : > { %3367 = vmatpush1.bf16.msra.mxu1 %v2036_v12  ;;  %v1153_v12 = vld [vmem:[%s8425_s11 + $0x1118] sm:$0xff] }
 0x3d2   : > { %2937 = vmatpush1.bf16.msra.mxu0 %v2226_v53  ;;  %3368 = vmatprep.subr.bf16.mxu1 %v2043_v54  ;;  %v2079_v53 = vunpack.c.h.s8.bf16 %v1053_v28  ;;  %v2268_v54 = vunpack.c.h.s8.bf16 %v1146_v22  ;;  %v2275_v42 = vunpack.c.l.s8.bf16 %v1153_v12  ;;  %v2281_v48 = vunpack.c.h.s8.bf16 %v1153_v12 }
 0x3d3   : > { %2938 = vmatprep.subr.bf16.mxu0 %v2233_v16  ;;  %v1059_v16 = vld [vmem:[%s8425_s11 + $0xe28] sm:$0xff] }
 0x3d5   : > { %3369 = vmatpush1.bf16.msra.mxu1 %v2042_v44  ;;  %v1152_v44 = vld [vmem:[%s8425_s11 + $0x1110] sm:$0xff] }
 0x3d6   : > { %2939 = vmatpush1.bf16.msra.mxu0 %v2232_v43  ;;  %3381 = vmatprep.subr.bf16.mxu1 %v2049_v46  ;;  %v2085_v43 = vunpack.c.l.s8.bf16 %v1059_v16  ;;  %v2274_v46 = vunpack.c.l.s8.bf16 %v1152_v44 }
 0x3d7   : > { %2951 = vmatprep.subr.bf16.mxu0 %v2239_v45  ;;  %v1058_v45 = vld [vmem:[%s8425_s11 + $0xe20] sm:$0xff] }
 0x3d8   : > { %3371 = vmatmul.mubr.bf16.vlgmr.msra.gmra.mrb[4].mxu1 %v8914_v11  ;;  %v2084_v47 = vunpack.c.l.s8.bf16 %v1058_v45  ;;  %v2090_v30 = vunpack.c.h.s8.bf16 %v1058_v45 }
 0x3d9   : > { %2941 = vmatmul.mubr.bf16.vlgmr.msra.gmra.mrb[0].mxu0 %v9022_v49  ;;  %3382 = vmatpush1.bf16.msra.mxu1 %v2048_v31  ;;  %v1159_v31 = vld [vmem:[%s8425_s11 + $0x1148] sm:$0xff] }
 0x3da   : > { %2952 = vmatpush1.bf16.msra.mxu0 %v2238_v56  ;;  %3383 = vmatprep.subr.bf16.mxu1 %v2055_v26  ;;  %v2091_v56 = vunpack.c.h.s8.bf16 %v1059_v16  ;;  %v2280_v26 = vunpack.c.h.s8.bf16 %v1152_v44  ;;  %v2287_v33 = vunpack.c.l.s8.bf16 %v1159_v31  ;;  %v2293_v14 = vunpack.c.h.s8.bf16 %v1159_v31 }
 0x3db   : > { %2953 = vmatprep.subr.bf16.mxu0 %v2245_v32  ;;  %2983 = vmatprep.mubr.bf16.mxu0 %v9038_v34  ;;  %v1065_v32 = vld [vmem:[%s8425_s11 + $0xe58] sm:$0xff] }
 0x3dc   : > { %3413 = vmatprep.mubr.bf16.mxu1 %v8930_v19 }
 0x3dd   : > { %3384 = vmatpush1.bf16.msra.mxu1 %v2054_v1  ;;  %v1158_v1 = vld [vmem:[%s8425_s11 + $0x1140] sm:$0xff] }
 0x3de   : > { %2954 = vmatpush1.bf16.msra.mxu0 %v2244_v58  ;;  %3385 = vmatprep.subr.bf16.mxu1 %v2061_v5  ;;  %v2097_v58 = vunpack.c.l.s8.bf16 %v1065_v32  ;;  %v2286_v5 = vunpack.c.l.s8.bf16 %v1158_v1 }
 0x3df   : > { %2955 = vmatprep.subr.bf16.mxu0 %v2251_v2  ;;  %v1064_v2 = vld [vmem:[%s8425_s11 + $0xe50] sm:$0xff] }
 0x3e0   : > { %v2096_v8 = vunpack.c.l.s8.bf16 %v1064_v2  ;;  %v2102_v18 = vunpack.c.h.s8.bf16 %v1064_v2 }
 0x3e1   : > { %3386 = vmatpush1.bf16.msra.mxu1 %v2060_v0  ;;  %v1165_v0 = vld [vmem:[%s8425_s11 + $0x1178] sm:$0xff] }
 0x3e2   : > { %2956 = vmatpush1.bf16.msra.mxu0 %v2250_v60  ;;  %3387 = vmatprep.subr.bf16.mxu1 %v2067_v17  ;;  %v2103_v60 = vunpack.c.h.s8.bf16 %v1065_v32  ;;  %v2292_v17 = vunpack.c.h.s8.bf16 %v1158_v1  ;;  %v2299_v28 = vunpack.c.l.s8.bf16 %v1165_v0  ;;  %v2305_v23 = vunpack.c.h.s8.bf16 %v1165_v0 }
 0x3e3   : > { %2957 = vmatprep.subr.bf16.mxu0 %v2257_v15  ;;  %v1071_v15 = vld [vmem:[%s8425_s11 + $0xe88] sm:$0xff] }
 0x3e5   : > { %3388 = vmatpush1.bf16.msra.mxu1 %v2066_v63  ;;  %v1164_v63 = vld [vmem:[%s8425_s11 + $0x1170] sm:$0xff] }
 0x3e6   : > { %2958 = vmatpush1.bf16.msra.mxu0 %v2256_v62  ;;  %3389 = vmatprep.subr.bf16.mxu1 %v2073_v21  ;;  %v2109_v62 = vunpack.c.l.s8.bf16 %v1071_v15  ;;  %v2298_v21 = vunpack.c.l.s8.bf16 %v1164_v63 }
 0x3e7   : > { %2959 = vmatprep.subr.bf16.mxu0 %v2263_v29  ;;  %v1070_v29 = vld [vmem:[%s8425_s11 + $0xe80] sm:$0xff] }
 0x3e8   : > { %v2108_v22 = vunpack.c.l.s8.bf16 %v1070_v29  ;;  %v2114_v12 = vunpack.c.h.s8.bf16 %v1070_v29 }
 0x3e9   : > { %3390 = vmatpush1.bf16.msra.mxu1 %v2072_v35  ;;  %v1171_v35 = vld [vmem:[%s8425_s11 + $0x11a8] sm:$0xff] }
 0x3ea   : > { %2960 = vmatpush1.bf16.msra.mxu0 %v2262_v24  ;;  %3391 = vmatprep.subr.bf16.mxu1 %v2079_v53  ;;  %v2115_v24 = vunpack.c.h.s8.bf16 %v1071_v15  ;;  %v2304_v53 = vunpack.c.h.s8.bf16 %v1164_v63  ;;  %v2311_v16 = vunpack.c.l.s8.bf16 %v1171_v35  ;;  %v2317_v45 = vunpack.c.h.s8.bf16 %v1171_v35 }
 0x3eb   : > { %2961 = vmatprep.subr.bf16.mxu0 %v2269_v36  ;;  %v1077_v36 = vld [vmem:[%s8425_s11 + $0xeb8] sm:$0xff] }
 0x3ed   : > { %3392 = vmatpush1.bf16.msra.mxu1 %v2078_v41  ;;  %v1170_v41 = vld [vmem:[%s8425_s11 + $0x11a0] sm:$0xff] }
 0x3ee   : > { %2962 = vmatpush1.bf16.msra.mxu0 %v2268_v54  ;;  %3393 = vmatprep.subr.bf16.mxu1 %v2085_v43  ;;  %v2121_v54 = vunpack.c.l.s8.bf16 %v1077_v36  ;;  %v2310_v43 = vunpack.c.l.s8.bf16 %v1170_v41 }
 0x3ef   : > { %2963 = vmatprep.subr.bf16.mxu0 %v2275_v42  ;;  %v1076_v42 = vld [vmem:[%s8425_s11 + $0xeb0] sm:$0xff] }
 0x3f0   : > { %v2120_v44 = vunpack.c.l.s8.bf16 %v1076_v42  ;;  %v2126_v31 = vunpack.c.h.s8.bf16 %v1076_v42 }
 0x3f1   : > { %3394 = vmatpush1.bf16.msra.mxu1 %v2084_v47  ;;  %v1177_v47 = vld [vmem:[%s8425_s11 + $0x11d8] sm:$0xff] }
 0x3f2   : > { %2964 = vmatpush1.bf16.msra.mxu0 %v2274_v46  ;;  %3395 = vmatprep.subr.bf16.mxu1 %v2091_v56  ;;  %v2127_v46 = vunpack.c.h.s8.bf16 %v1077_v36  ;;  %v2316_v56 = vunpack.c.h.s8.bf16 %v1170_v41  ;;  %v2323_v32 = vunpack.c.l.s8.bf16 %v1177_v47  ;;  %v2329_v2 = vunpack.c.h.s8.bf16 %v1177_v47 }
 0x3f3   : > { %2965 = vmatprep.subr.bf16.mxu0 %v2281_v48  ;;  %v1083_v48 = vld [vmem:[%s8425_s11 + $0xee8] sm:$0xff] }
 0x3f5   : > { %3396 = vmatpush1.bf16.msra.mxu1 %v2090_v30  ;;  %v1176_v30 = vld [vmem:[%s8425_s11 + $0x11d0] sm:$0xff] }
 0x3f6   : > { %2966 = vmatpush1.bf16.msra.mxu0 %v2280_v26  ;;  %3397 = vmatprep.subr.bf16.mxu1 %v2097_v58  ;;  %v2133_v26 = vunpack.c.l.s8.bf16 %v1083_v48  ;;  %v2322_v58 = vunpack.c.l.s8.bf16 %v1176_v30 }
 0x3f7   : > { %2967 = vmatprep.subr.bf16.mxu0 %v2287_v33  ;;  %v1082_v33 = vld [vmem:[%s8425_s11 + $0xee0] sm:$0xff] }
 0x3f8   : > { %v2132_v1 = vunpack.c.l.s8.bf16 %v1082_v33  ;;  %v2138_v0 = vunpack.c.h.s8.bf16 %v1082_v33  ;;  %v9090_v33 = vpop.f32.mrb[0].mxu1 }
 0x3f9   : > { %3398 = vmatpush1.bf16.msra.mxu1 %v2096_v8  ;;  %v1089_v8 = vld [vmem:[%s8425_s11 + $0xf18] sm:$0xff] }
 0x3fa   : > { %2968 = vmatpush1.bf16.msra.mxu0 %v2286_v5  ;;  %3399 = vmatprep.subr.bf16.mxu1 %v2103_v60  ;;  %v2139_v5 = vunpack.c.h.s8.bf16 %v1083_v48  ;;  %v2328_v60 = vunpack.c.h.s8.bf16 %v1176_v30  ;;  %v2145_v15 = vunpack.c.l.s8.bf16 %v1089_v8  ;;  %v1100_v48 = vld [vmem:[%s8425_s11 + $0xf70] sm:$0xff] }
 0x3fb   : > { %2969 = vmatprep.subr.bf16.mxu0 %v2293_v14  ;;  %v611_v14 = vld [vmem:[%s8425_s11 + $0x28] sm:$0xff] }
 0x3fd   : > { %3400 = vmatpush1.bf16.msra.mxu1 %v2102_v18  ;;  %v1088_v18 = vld [vmem:[%s8425_s11 + $0xf10] sm:$0xff] }
 0x3fe   : > { %2970 = vmatpush1.bf16.msra.mxu0 %v2292_v17  ;;  %3401 = vmatprep.subr.bf16.mxu1 %v2109_v62  ;;  %v1187_v17 = vunpack.c.l.s8.bf16 %v611_v14  ;;  %v9076_v62 = vcombine.low %v9027_v50, %v9032_v55  ;;  %v2144_v63 = vunpack.c.l.s8.bf16 %v1088_v18  ;;  %v2150_v50 = vunpack.c.h.s8.bf16 %v1088_v18 }
 0x3ff   : > { %2971 = vmatprep.subr.bf16.mxu0 %v2299_v28  ;;  %v610_v28 = vld [vmem:[%s8425_s11 + $0x20] sm:$0xff] }
 0x400   : > { %v1186_v29 = vunpack.c.l.s8.bf16 %v610_v28  ;;  %v1192_v55 = vunpack.c.h.s8.bf16 %v610_v28 }
 0x401   : > { %3402 = vmatpush1.bf16.msra.mxu1 %v2108_v22  ;;  %v1193_v22 = vunpack.c.h.s8.bf16 %v611_v14 }
 0x402   : > { %2972 = vmatpush1.bf16.msra.mxu0 %v2298_v21  ;;  %3403 = vmatprep.subr.bf16.mxu1 %v2115_v24  ;;  %v2151_v21 = vunpack.c.h.s8.bf16 %v1089_v8  ;;  %v617_v24 = vld [vmem:[%s8425_s11 + $0x58] sm:$0xff]  ;;  %v9094_v8 = vpop.f32.mrb[1].mxu1 }
 0x403   : > { %2973 = vmatprep.subr.bf16.mxu0 %v2305_v23  ;;  %v1095_v23 = vld [vmem:[%s8425_s11 + $0xf48] sm:$0xff]  ;;  %v1199_v36 = vunpack.c.l.s8.bf16 %v617_v24  ;;  %v1205_v42 = vunpack.c.h.s8.bf16 %v617_v24 }
 0x404   : > { %v2157_v35 = vunpack.c.l.s8.bf16 %v1095_v23  ;;  %v2163_v41 = vunpack.c.h.s8.bf16 %v1095_v23  ;;  %v635_v23 = vld [vmem:[%s8425_s11 + $0xe8] sm:$0xff] }
 0x405   : > { %3404 = vmatpush1.bf16.msra.mxu1 %v2114_v12  ;;  %v616_v12 = vld [vmem:[%s8425_s11 + $0x50] sm:$0xff] }
 0x406   : > { %2974 = vmatpush1.bf16.msra.mxu0 %v2304_v53  ;;  %3405 = vmatprep.subr.bf16.mxu1 %v2121_v54  ;;  %v1094_v53 = vld [vmem:[%s8425_s11 + $0xf40] sm:$0xff]  ;;  %v1198_v54 = vunpack.c.l.s8.bf16 %v616_v12 }
 0x407   : > { %2975 = vmatprep.subr.bf16.mxu0 %v2311_v16  ;;  %v2156_v16 = vunpack.c.l.s8.bf16 %v1094_v53 }
 0x409   : > { %3406 = vmatpush1.bf16.msra.mxu1 %v2120_v44  ;;  %v623_v44 = vld [vmem:[%s8425_s11 + $0x88] sm:$0xff] }
 0x40a   : > { %2976 = vmatpush1.bf16.msra.mxu0 %v2310_v43  ;;  %3407 = vmatprep.subr.bf16.mxu1 %v2127_v46  ;;  %v1101_v43 = vld [vmem:[%s8425_s11 + $0xf78] sm:$0xff]  ;;  %v1204_v46 = vunpack.c.h.s8.bf16 %v616_v12  ;;  %v1211_v47 = vunpack.c.l.s8.bf16 %v623_v44  ;;  %v1217_v30 = vunpack.c.h.s8.bf16 %v623_v44 }
 0x40b   : > { %2977 = vmatprep.subr.bf16.mxu0 %v2317_v45  ;;  %v2162_v45 = vunpack.c.h.s8.bf16 %v1094_v53  ;;  %v634_v53 = vld [vmem:[%s8425_s11 + $0xe0] sm:$0xff] }
 0x40d   : > { %3408 = vmatpush1.bf16.msra.mxu1 %v2126_v31  ;;  %v2168_v31 = vunpack.c.l.s8.bf16 %v1100_v48 }
 0x40e   : > { %2978 = vmatpush1.bf16.msra.mxu0 %v2316_v56  ;;  %3409 = vmatprep.subr.bf16.mxu1 %v2133_v26  ;;  %v622_v56 = vld [vmem:[%s8425_s11 + $0x80] sm:$0xff]  ;;  %v2175_v26 = vunpack.c.h.s8.bf16 %v1101_v43 }
 0x40f   : > { %2979 = vmatprep.subr.bf16.mxu0 %v2323_v32  ;;  %v1210_v32 = vunpack.c.l.s8.bf16 %v622_v56 }
 0x411   : > { %3410 = vmatpush1.bf16.msra.mxu1 %v2132_v1  ;;  %v629_v1 = vld [vmem:[%s8425_s11 + $0xb8] sm:$0xff] }
 0x412   : > { %2980 = vmatpush1.bf16.msra.mxu0 %v2322_v58  ;;  %3411 = vmatprep.subr.bf16.mxu1 %v2139_v5  ;;  %v1107_v58 = vld [vmem:[%s8425_s11 + $0xfa8] sm:$0xff]  ;;  %v1216_v5 = vunpack.c.h.s8.bf16 %v622_v56 }
 0x413   : > { %2981 = vmatprep.subr.bf16.mxu0 %v2329_v2  ;;  %v2174_v2 = vunpack.c.h.s8.bf16 %v1100_v48  ;;  %v2181_v14 = vunpack.c.l.s8.bf16 %v1107_v58  ;;  %v640_v48 = vld [vmem:[%s8425_s11 + $0x110] sm:$0xff] }
 0x415   : > { %3412 = vmatpush1.bf16.msra.mxu1 %v2138_v0  ;;  %v1106_v0 = vld [vmem:[%s8425_s11 + $0xfa0] sm:$0xff] }
 0x416   : > { %2982 = vmatpush1.bf16.msra.mxu0 %v2328_v60  ;;  %3424 = vmatprep.subr.bf16.mxu1 %v2145_v15  ;;  %v1223_v60 = vunpack.c.l.s8.bf16 %v629_v1  ;;  %v628_v15 = vld [vmem:[%s8425_s11 + $0xb0] sm:$0xff]  ;;  %v2180_v28 = vunpack.c.l.s8.bf16 %v1106_v0  ;;  %v2186_v24 = vunpack.c.h.s8.bf16 %v1106_v0  ;;  %v646_v0 = vld [vmem:[%s8425_s11 + $0x140] sm:$0xff] }
 0x417   : > { %3510 = vmatprep.subr.bf16.mxu0 %v1187_v17  ;;  %v9098_v17 = vpop.f32.mrb[2].mxu1 }
 0x418   : > { %3414 = vmatmul.mubr.bf16.vlgmr.msra.gmra.mrb[4].mxu1 %v8968_v25  ;;  %v9100_v18 = vpop.f32.mrb[3].mxu1 }
 0x419   : > { %2984 = vmatmul.mubr.bf16.vlgmr.msra.gmra.mrb[0].mxu0 %v9076_v62  ;;  %3425 = vmatpush1.bf16.msra.mxu1 %v2144_v63  ;;  %v1222_v63 = vunpack.c.l.s8.bf16 %v628_v15 }
 0x41a   : > { %3511 = vmatpush1.bf16.msra.mxu0 %v1186_v29  ;;  %3426 = vmatprep.subr.bf16.mxu1 %v2151_v21  ;;  %v2187_v29 = vunpack.c.h.s8.bf16 %v1107_v58  ;;  %v1229_v21 = vunpack.c.h.s8.bf16 %v629_v1  ;;  %v647_v58 = vld [vmem:[%s8425_s11 + $0x148] sm:$0xff] }
 0x41b   : > { %3512 = vmatprep.subr.bf16.mxu0 %v1193_v22  ;;  %3456 = vmatprep.mubr.bf16.mxu1 %v8984_v37  ;;  %v1113_v22 = vld [vmem:[%s8425_s11 + $0xfd8] sm:$0xff] }
 0x41c   : > { %3542 = vmatprep.mubr.bf16.mxu0 %v8498_v39  ;;  %v2169_v39 = vunpack.c.l.s8.bf16 %v1101_v43  ;;  %v641_v43 = vld [vmem:[%s8425_s11 + $0x118] sm:$0xff] }
 0x41d   : > { %3427 = vmatpush1.bf16.msra.mxu1 %v2150_v50  ;;  %v1228_v50 = vunpack.c.h.s8.bf16 %v628_v15 }
 0x41e   : > { %3513 = vmatpush1.bf16.msra.mxu0 %v1192_v55  ;;  %3428 = vmatprep.subr.bf16.mxu1 %v2157_v35  ;;  %v2193_v55 = vunpack.c.l.s8.bf16 %v1113_v22  ;;  %v1235_v35 = vunpack.c.l.s8.bf16 %v635_v23 }
 0x41f   : > { %3514 = vmatprep.subr.bf16.mxu0 %v1199_v36  ;;  %v1112_v36 = vld [vmem:[%s8425_s11 + $0xfd0] sm:$0xff] }
 0x420   : > { %v2192_v12 = vunpack.c.l.s8.bf16 %v1112_v36  ;;  %v2198_v44 = vunpack.c.h.s8.bf16 %v1112_v36  ;;  %v652_v36 = vld [vmem:[%s8425_s11 + $0x170] sm:$0xff] }
 0x421   : > { %3429 = vmatpush1.bf16.msra.mxu1 %v2156_v16  ;;  %v1234_v16 = vunpack.c.l.s8.bf16 %v634_v53 }
 0x422   : > { %3515 = vmatpush1.bf16.msra.mxu0 %v1198_v54  ;;  %3430 = vmatprep.subr.bf16.mxu1 %v2163_v41  ;;  %v2199_v54 = vunpack.c.h.s8.bf16 %v1113_v22  ;;  %v1241_v41 = vunpack.c.h.s8.bf16 %v635_v23  ;;  %v653_v22 = vld [vmem:[%s8425_s11 + $0x178] sm:$0xff] }
 0x423   : > { %3516 = vmatprep.subr.bf16.mxu0 %v1205_v42  ;;  %v1119_v42 = vld [vmem:[%s8425_s11 + $0x1008] sm:$0xff] }
 0x425   : > { %3431 = vmatpush1.bf16.msra.mxu1 %v2162_v45  ;;  %v1240_v45 = vunpack.c.h.s8.bf16 %v634_v53 }
 0x426   : > { %3517 = vmatpush1.bf16.msra.mxu0 %v1204_v46  ;;  %3432 = vmatprep.subr.bf16.mxu1 %v2169_v39  ;;  %v2205_v46 = vunpack.c.l.s8.bf16 %v1119_v42  ;;  %v1247_v39 = vunpack.c.l.s8.bf16 %v641_v43 }
 0x427   : > { %3518 = vmatprep.subr.bf16.mxu0 %v1211_v47  ;;  %v1118_v47 = vld [vmem:[%s8425_s11 + $0x1000] sm:$0xff] }
 0x428   : > { %v2204_v56 = vunpack.c.l.s8.bf16 %v1118_v47  ;;  %v2210_v1 = vunpack.c.h.s8.bf16 %v1118_v47  ;;  %v658_v47 = vld [vmem:[%s8425_s11 + $0x1a0] sm:$0xff] }
 0x429   : > { %3433 = vmatpush1.bf16.msra.mxu1 %v2168_v31  ;;  %v1246_v31 = vunpack.c.l.s8.bf16 %v640_v48 }
 0x42a   : > { %3519 = vmatpush1.bf16.msra.mxu0 %v1210_v32  ;;  %3434 = vmatprep.subr.bf16.mxu1 %v2175_v26  ;;  %v2211_v32 = vunpack.c.h.s8.bf16 %v1119_v42  ;;  %v1253_v26 = vunpack.c.h.s8.bf16 %v641_v43  ;;  %v659_v42 = vld [vmem:[%s8425_s11 + $0x1a8] sm:$0xff] }
 0x42b   : > { %3520 = vmatprep.subr.bf16.mxu0 %v1217_v30  ;;  %v1125_v30 = vld [vmem:[%s8425_s11 + $0x1038] sm:$0xff] }
 0x42d   : > { %3435 = vmatpush1.bf16.msra.mxu1 %v2174_v2  ;;  %v1252_v2 = vunpack.c.h.s8.bf16 %v640_v48 }
 0x42e   : > { %3521 = vmatpush1.bf16.msra.mxu0 %v1216_v5  ;;  %3436 = vmatprep.subr.bf16.mxu1 %v2181_v14  ;;  %v2217_v5 = vunpack.c.l.s8.bf16 %v1125_v30  ;;  %v1259_v14 = vunpack.c.l.s8.bf16 %v647_v58 }
 0x42f   : > { %3522 = vmatprep.subr.bf16.mxu0 %v1223_v60  ;;  %v1124_v60 = vld [vmem:[%s8425_s11 + $0x1030] sm:$0xff] }
 0x430   : > { %v2216_v15 = vunpack.c.l.s8.bf16 %v1124_v60  ;;  %v2222_v23 = vunpack.c.h.s8.bf16 %v1124_v60  ;;  %v664_v60 = vld [vmem:[%s8425_s11 + $0x1d0] sm:$0xff] }
 0x431   : > { %3437 = vmatpush1.bf16.msra.mxu1 %v2180_v28  ;;  %v1258_v28 = vunpack.c.l.s8.bf16 %v646_v0 }
 0x432   : > { %3523 = vmatpush1.bf16.msra.mxu0 %v1222_v63  ;;  %3438 = vmatprep.subr.bf16.mxu1 %v2187_v29  ;;  %v2223_v63 = vunpack.c.h.s8.bf16 %v1125_v30  ;;  %v1265_v29 = vunpack.c.h.s8.bf16 %v647_v58  ;;  %v665_v30 = vld [vmem:[%s8425_s11 + $0x1d8] sm:$0xff] }
 0x433   : > { %3524 = vmatprep.subr.bf16.mxu0 %v1229_v21  ;;  %v1131_v21 = vld [vmem:[%s8425_s11 + $0x1068] sm:$0xff] }
 0x435   : > { %3439 = vmatpush1.bf16.msra.mxu1 %v2186_v24  ;;  %v1264_v24 = vunpack.c.h.s8.bf16 %v646_v0 }
 0x436   : > { %3525 = vmatpush1.bf16.msra.mxu0 %v1228_v50  ;;  %3440 = vmatprep.subr.bf16.mxu1 %v2193_v55  ;;  %v2229_v50 = vunpack.c.l.s8.bf16 %v1131_v21  ;;  %v1271_v55 = vunpack.c.l.s8.bf16 %v653_v22 }
 0x437   : > { %3526 = vmatprep.subr.bf16.mxu0 %v1235_v35  ;;  %v1130_v35 = vld [vmem:[%s8425_s11 + $0x1060] sm:$0xff] }
 0x438   : > { %v2228_v53 = vunpack.c.l.s8.bf16 %v1130_v35  ;;  %v2234_v43 = vunpack.c.h.s8.bf16 %v1130_v35 }
 0x439   : > { %3441 = vmatpush1.bf16.msra.mxu1 %v2192_v12  ;;  %v1270_v12 = vunpack.c.l.s8.bf16 %v652_v36 }
 0x43a   : > { %3527 = vmatpush1.bf16.msra.mxu0 %v1234_v16  ;;  %3442 = vmatprep.subr.bf16.mxu1 %v2199_v54  ;;  %v2235_v16 = vunpack.c.h.s8.bf16 %v1131_v21  ;;  %v1277_v54 = vunpack.c.h.s8.bf16 %v653_v22  ;;  %v1300_v22 = vunpack.c.h.s8.bf16 %v664_v60 }
 0x43b   : > { %3528 = vmatprep.subr.bf16.mxu0 %v1241_v41  ;;  %v1137_v41 = vld [vmem:[%s8425_s11 + $0x1098] sm:$0xff] }
 0x43d   : > { %3443 = vmatpush1.bf16.msra.mxu1 %v2198_v44  ;;  %v1276_v44 = vunpack.c.h.s8.bf16 %v652_v36 }
 0x43e   : > { %3529 = vmatpush1.bf16.msra.mxu0 %v1240_v45  ;;  %3444 = vmatprep.subr.bf16.mxu1 %v2205_v46  ;;  %v2241_v45 = vunpack.c.l.s8.bf16 %v1137_v41  ;;  %v1283_v46 = vunpack.c.l.s8.bf16 %v659_v42 }
 0x43f   : > { %3530 = vmatprep.subr.bf16.mxu0 %v1247_v39  ;;  %v1136_v39 = vld [vmem:[%s8425_s11 + $0x1090] sm:$0xff] }
 0x440   : > { %v2240_v48 = vunpack.c.l.s8.bf16 %v1136_v39  ;;  %v2246_v58 = vunpack.c.h.s8.bf16 %v1136_v39 }
 0x441   : > { %3445 = vmatpush1.bf16.msra.mxu1 %v2204_v56  ;;  %v1282_v56 = vunpack.c.l.s8.bf16 %v658_v47 }
 0x442   : > { %3531 = vmatpush1.bf16.msra.mxu0 %v1246_v31  ;;  %3446 = vmatprep.subr.bf16.mxu1 %v2211_v32  ;;  %v2247_v31 = vunpack.c.h.s8.bf16 %v1137_v41  ;;  %v1289_v32 = vunpack.c.h.s8.bf16 %v659_v42 }
 0x443   : > { %3532 = vmatprep.subr.bf16.mxu0 %v1253_v26  ;;  %v1143_v26 = vld [vmem:[%s8425_s11 + $0x10c8] sm:$0xff] }
 0x445   : > { %3447 = vmatpush1.bf16.msra.mxu1 %v2210_v1  ;;  %v1288_v1 = vunpack.c.h.s8.bf16 %v658_v47 }
 0x446   : > { %3533 = vmatpush1.bf16.msra.mxu0 %v1252_v2  ;;  %3448 = vmatprep.subr.bf16.mxu1 %v2217_v5  ;;  %v2253_v2 = vunpack.c.l.s8.bf16 %v1143_v26  ;;  %v1295_v5 = vunpack.c.l.s8.bf16 %v665_v30 }
 0x447   : > { %3534 = vmatprep.subr.bf16.mxu0 %v1259_v14  ;;  %v1142_v14 = vld [vmem:[%s8425_s11 + $0x10c0] sm:$0xff] }
 0x448   : > { %v2252_v0 = vunpack.c.l.s8.bf16 %v1142_v14  ;;  %v2258_v21 = vunpack.c.h.s8.bf16 %v1142_v14 }
 0x449   : > { %3449 = vmatpush1.bf16.msra.mxu1 %v2216_v15  ;;  %v2259_v15 = vunpack.c.h.s8.bf16 %v1143_v26 }
 0x44a   : > { %3535 = vmatpush1.bf16.msra.mxu0 %v1258_v28  ;;  %3450 = vmatprep.subr.bf16.mxu1 %v2223_v63  ;;  %v1301_v28 = vunpack.c.h.s8.bf16 %v665_v30  ;;  %v1149_v63 = vld [vmem:[%s8425_s11 + $0x10f8] sm:$0xff] }
 0x44b   : > { %3536 = vmatprep.subr.bf16.mxu0 %v1265_v29  ;;  %v671_v29 = vld [vmem:[%s8425_s11 + $0x208] sm:$0xff]  ;;  %v2271_v36 = vunpack.c.h.s8.bf16 %v1149_v63 }
 0x44d   : > { %3451 = vmatpush1.bf16.msra.mxu1 %v2222_v23  ;;  %v1307_v23 = vunpack.c.l.s8.bf16 %v671_v29 }
 0x44e   : > { %3537 = vmatpush1.bf16.msra.mxu0 %v1264_v24  ;;  %3452 = vmatprep.subr.bf16.mxu1 %v2229_v50  ;;  %v1148_v24 = vld [vmem:[%s8425_s11 + $0x10f0] sm:$0xff]  ;;  %v670_v50 = vld [vmem:[%s8425_s11 + $0x200] sm:$0xff] }
 0x44f   : > { %3538 = vmatprep.subr.bf16.mxu0 %v1271_v55  ;;  %v2264_v55 = vunpack.c.l.s8.bf16 %v1148_v24  ;;  %v1306_v35 = vunpack.c.l.s8.bf16 %v670_v50  ;;  %v1312_v41 = vunpack.c.h.s8.bf16 %v670_v50 }
 0x451   : > { %3453 = vmatpush1.bf16.msra.mxu1 %v2228_v53  ;;  %v1313_v53 = vunpack.c.h.s8.bf16 %v671_v29 }
 0x452   : > { %3539 = vmatpush1.bf16.msra.mxu0 %v1270_v12  ;;  %3454 = vmatprep.subr.bf16.mxu1 %v2235_v16  ;;  %v1155_v12 = vld [vmem:[%s8425_s11 + $0x1128] sm:$0xff]  ;;  %v677_v16 = vld [vmem:[%s8425_s11 + $0x238] sm:$0xff] }
 0x453   : > { %3540 = vmatprep.subr.bf16.mxu0 %v1277_v54  ;;  %v2270_v54 = vunpack.c.h.s8.bf16 %v1148_v24  ;;  %v2277_v42 = vunpack.c.l.s8.bf16 %v1155_v12  ;;  %v2283_v47 = vunpack.c.h.s8.bf16 %v1155_v12 }
 0x455   : > { %3455 = vmatpush1.bf16.msra.mxu1 %v2234_v43  ;;  %v1319_v43 = vunpack.c.l.s8.bf16 %v677_v16 }
 0x456   : > { %3541 = vmatpush1.bf16.msra.mxu0 %v1276_v44  ;;  %3467 = vmatprep.subr.bf16.mxu1 %v2241_v45  ;;  %v1154_v44 = vld [vmem:[%s8425_s11 + $0x1120] sm:$0xff]  ;;  %v676_v45 = vld [vmem:[%s8425_s11 + $0x230] sm:$0xff] }
 0x457   : > { %3553 = vmatprep.subr.bf16.mxu0 %v1283_v46  ;;  %v2276_v46 = vunpack.c.l.s8.bf16 %v1154_v44  ;;  %v1318_v39 = vunpack.c.l.s8.bf16 %v676_v45  ;;  %v1324_v26 = vunpack.c.h.s8.bf16 %v676_v45 }
 0x458   : > { %3457 = vmatmul.mubr.bf16.vlgmr.msra.gmra.mrb[4].mxu1 %v9022_v49 }
 0x459   : > { %3543 = vmatmul.mubr.bf16.vlgmr.msra.gmra.mrb[4].mxu0 %v8532_v51  ;;  %3468 = vmatpush1.bf16.msra.mxu1 %v2240_v48  ;;  %v1294_v51 = vunpack.c.l.s8.bf16 %v664_v60  ;;  %v1325_v48 = vunpack.c.h.s8.bf16 %v677_v16 }
 0x45a   : > { %3554 = vmatpush1.bf16.msra.mxu0 %v1282_v56  ;;  %3469 = vmatprep.subr.bf16.mxu1 %v2247_v31  ;;  %v1161_v56 = vld [vmem:[%s8425_s11 + $0x1158] sm:$0xff]  ;;  %v683_v31 = vld [vmem:[%s8425_s11 + $0x268] sm:$0xff] }
 0x45b   : > { %3555 = vmatprep.subr.bf16.mxu0 %v1289_v32  ;;  %3499 = vmatprep.mubr.bf16.mxu1 %v9038_v34  ;;  %v2282_v32 = vunpack.c.h.s8.bf16 %v1154_v44  ;;  %v2289_v30 = vunpack.c.l.s8.bf16 %v1161_v56  ;;  %v2295_v60 = vunpack.c.h.s8.bf16 %v1161_v56 }
 0x45c   : > { %3585 = vmatprep.mubr.bf16.mxu0 %v8502_v40  ;;  %v2265_v40 = vunpack.c.l.s8.bf16 %v1149_v63 }
 0x45d   : > { %3470 = vmatpush1.bf16.msra.mxu1 %v2246_v58  ;;  %v1331_v58 = vunpack.c.l.s8.bf16 %v683_v31 }
 0x45e   : > { %3556 = vmatpush1.bf16.msra.mxu0 %v1288_v1  ;;  %3471 = vmatprep.subr.bf16.mxu1 %v2253_v2  ;;  %v1160_v1 = vld [vmem:[%s8425_s11 + $0x1150] sm:$0xff]  ;;  %v682_v2 = vld [vmem:[%s8425_s11 + $0x260] sm:$0xff] }
 0x45f   : > { %3557 = vmatprep.subr.bf16.mxu0 %v1295_v5  ;;  %v2288_v5 = vunpack.c.l.s8.bf16 %v1160_v1  ;;  %v1330_v14 = vunpack.c.l.s8.bf16 %v682_v2  ;;  %v1336_v63 = vunpack.c.h.s8.bf16 %v682_v2 }
 0x461   : > { %3472 = vmatpush1.bf16.msra.mxu1 %v2252_v0  ;;  %v1337_v0 = vunpack.c.h.s8.bf16 %v683_v31 }
 0x462   : > { %3558 = vmatpush1.bf16.msra.mxu0 %v1294_v51  ;;  %3473 = vmatprep.subr.bf16.mxu1 %v2259_v15  ;;  %v1167_v51 = vld [vmem:[%s8425_s11 + $0x1188] sm:$0xff]  ;;  %v689_v15 = vld [vmem:[%s8425_s11 + $0x298] sm:$0xff] }
 0x463   : > { %3559 = vmatprep.subr.bf16.mxu0 %v1301_v28  ;;  %v2294_v28 = vunpack.c.h.s8.bf16 %v1160_v1  ;;  %v2301_v29 = vunpack.c.l.s8.bf16 %v1167_v51  ;;  %v2307_v50 = vunpack.c.h.s8.bf16 %v1167_v51 }
 0x465   : > { %3474 = vmatpush1.bf16.msra.mxu1 %v2258_v21  ;;  %v1343_v21 = vunpack.c.l.s8.bf16 %v689_v15 }
 0x466   : > { %3560 = vmatpush1.bf16.msra.mxu0 %v1300_v22  ;;  %3475 = vmatprep.subr.bf16.mxu1 %v2265_v40  ;;  %v1166_v22 = vld [vmem:[%s8425_s11 + $0x1180] sm:$0xff]  ;;  %v688_v40 = vld [vmem:[%s8425_s11 + $0x290] sm:$0xff] }
 0x467   : > { %3561 = vmatprep.subr.bf16.mxu0 %v1307_v23  ;;  %v2300_v23 = vunpack.c.l.s8.bf16 %v1166_v22  ;;  %v1342_v24 = vunpack.c.l.s8.bf16 %v688_v40  ;;  %v1348_v12 = vunpack.c.h.s8.bf16 %v688_v40 }
 0x469   : > { %3476 = vmatpush1.bf16.msra.mxu1 %v2264_v55  ;;  %v1349_v55 = vunpack.c.h.s8.bf16 %v689_v15 }
 0x46a   : > { %3562 = vmatpush1.bf16.msra.mxu0 %v1306_v35  ;;  %3477 = vmatprep.subr.bf16.mxu1 %v2271_v36  ;;  %v1173_v35 = vld [vmem:[%s8425_s11 + $0x11b8] sm:$0xff]  ;;  %v695_v36 = vld [vmem:[%s8425_s11 + $0x2c8] sm:$0xff] }
 0x46b   : > { %3563 = vmatprep.subr.bf16.mxu0 %v1313_v53  ;;  %v2306_v53 = vunpack.c.h.s8.bf16 %v1166_v22  ;;  %v2313_v16 = vunpack.c.l.s8.bf16 %v1173_v35  ;;  %v2319_v45 = vunpack.c.h.s8.bf16 %v1173_v35 }
 0x46d   : > { %3478 = vmatpush1.bf16.msra.mxu1 %v2270_v54  ;;  %v1355_v54 = vunpack.c.l.s8.bf16 %v695_v36 }
 0x46e   : > { %3564 = vmatpush1.bf16.msra.mxu0 %v1312_v41  ;;  %3479 = vmatprep.subr.bf16.mxu1 %v2277_v42  ;;  %v1172_v41 = vld [vmem:[%s8425_s11 + $0x11b0] sm:$0xff]  ;;  %v694_v42 = vld [vmem:[%s8425_s11 + $0x2c0] sm:$0xff] }
 0x46f   : > { %3565 = vmatprep.subr.bf16.mxu0 %v1319_v43  ;;  %v2312_v43 = vunpack.c.l.s8.bf16 %v1172_v41  ;;  %v1354_v44 = vunpack.c.l.s8.bf16 %v694_v42  ;;  %v1360_v56 = vunpack.c.h.s8.bf16 %v694_v42 }
 0x471   : > { %3480 = vmatpush1.bf16.msra.mxu1 %v2276_v46  ;;  %v1361_v46 = vunpack.c.h.s8.bf16 %v695_v36 }
 0x472   : > { %3566 = vmatpush1.bf16.msra.mxu0 %v1318_v39  ;;  %3481 = vmatprep.subr.bf16.mxu1 %v2283_v47  ;;  %v1179_v39 = vld [vmem:[%s8425_s11 + $0x11e8] sm:$0xff]  ;;  %v701_v47 = vld [vmem:[%s8425_s11 + $0x2f8] sm:$0xff] }
 0x473   : > { %3567 = vmatprep.subr.bf16.mxu0 %v1325_v48  ;;  %v2318_v48 = vunpack.c.h.s8.bf16 %v1172_v41  ;;  %v2325_v31 = vunpack.c.l.s8.bf16 %v1179_v39  ;;  %v2331_v2 = vunpack.c.h.s8.bf16 %v1179_v39  ;;  %v718_v39 = vld [vmem:[%s8425_s11 + $0x380] sm:$0xff] }
 0x475   : > { %3482 = vmatpush1.bf16.msra.mxu1 %v2282_v32  ;;  %v1367_v32 = vunpack.c.l.s8.bf16 %v701_v47 }
 0x476   : > { %3568 = vmatpush1.bf16.msra.mxu0 %v1324_v26  ;;  %3483 = vmatprep.subr.bf16.mxu1 %v2289_v30  ;;  %v1178_v26 = vld [vmem:[%s8425_s11 + $0x11e0] sm:$0xff]  ;;  %v700_v30 = vld [vmem:[%s8425_s11 + $0x2f0] sm:$0xff] }
 0x477   : > { %3569 = vmatprep.subr.bf16.mxu0 %v1331_v58  ;;  %v2324_v58 = vunpack.c.l.s8.bf16 %v1178_v26  ;;  %v1366_v1 = vunpack.c.l.s8.bf16 %v700_v30  ;;  %v1372_v51 = vunpack.c.h.s8.bf16 %v700_v30  ;;  %v725_v30 = vld [vmem:[%s8425_s11 + $0x3b8] sm:$0xff] }
 0x479   : > { %3484 = vmatpush1.bf16.msra.mxu1 %v2288_v5  ;;  %v1373_v5 = vunpack.c.h.s8.bf16 %v701_v47 }
 0x47a   : > { %3570 = vmatpush1.bf16.msra.mxu0 %v1330_v14  ;;  %3485 = vmatprep.subr.bf16.mxu1 %v2295_v60  ;;  %v707_v14 = vld [vmem:[%s8425_s11 + $0x328] sm:$0xff]  ;;  %v4133_v60 = vld [vmem:[%s8440_s30 + $0x8] sm:$0xff] }
 0x47b   : > { %3571 = vmatprep.subr.bf16.mxu0 %v1337_v0  ;;  %v2330_v0 = vunpack.c.h.s8.bf16 %v1178_v26  ;;  %v1379_v15 = vunpack.c.l.s8.bf16 %v707_v14  ;;  %v1385_v40 = vunpack.c.h.s8.bf16 %v707_v14  ;;  %v724_v14 = vld [vmem:[%s8425_s11 + $0x3b0] sm:$0xff] }
 0x47d   : > { %3486 = vmatpush1.bf16.msra.mxu1 %v2294_v28  ;;  %v706_v28 = vld [vmem:[%s8425_s11 + $0x320] sm:$0xff] }
 0x47e   : > { %3572 = vmatpush1.bf16.msra.mxu0 %v1336_v63  ;;  %3487 = vmatprep.subr.bf16.mxu1 %v2301_v29  ;;  %v4277_v63 = vunpack.c.l.s8.bf16 %v4133_v60  ;;  %v4132_v29 = vld [vmem:[%s8440_s30] sm:$0xff] }
 0x47f   : > { %3573 = vmatprep.subr.bf16.mxu0 %v1343_v21  ;;  %v1378_v21 = vunpack.c.l.s8.bf16 %v706_v28  ;;  %v4276_v22 = vunpack.c.l.s8.bf16 %v4132_v29  ;;  %v4282_v35 = vunpack.c.h.s8.bf16 %v4132_v29  ;;  %v731_v29 = vld [vmem:[%s8425_s11 + $0x3e8] sm:$0xff] }
 0x481   : > { %3488 = vmatpush1.bf16.msra.mxu1 %v2300_v23  ;;  %v4283_v23 = vunpack.c.h.s8.bf16 %v4133_v60 }
 0x482   : > { %3574 = vmatpush1.bf16.msra.mxu0 %v1342_v24  ;;  %3489 = vmatprep.subr.bf16.mxu1 %v2307_v50  ;;  %v713_v24 = vld [vmem:[%s8425_s11 + $0x358] sm:$0xff]  ;;  %v4139_v50 = vld [vmem:[%s8440_s30 + $0x38] sm:$0xff] }
 0x483   : > { %3575 = vmatprep.subr.bf16.mxu0 %v1349_v55  ;;  %v1384_v55 = vunpack.c.h.s8.bf16 %v706_v28  ;;  %v1391_v36 = vunpack.c.l.s8.bf16 %v713_v24  ;;  %v4295_v42 = vunpack.c.h.s8.bf16 %v4139_v50  ;;  %v1421_v28 = vunpack.c.h.s8.bf16 %v725_v30 }
 0x485   : > { %3490 = vmatpush1.bf16.msra.mxu1 %v2306_v53  ;;  %v712_v53 = vld [vmem:[%s8425_s11 + $0x350] sm:$0xff] }
 0x486   : > { %3576 = vmatpush1.bf16.msra.mxu0 %v1348_v12  ;;  %3491 = vmatprep.subr.bf16.mxu1 %v2313_v16  ;;  %v4289_v12 = vunpack.c.l.s8.bf16 %v4139_v50  ;;  %v4138_v16 = vld [vmem:[%s8440_s30 + $0x30] sm:$0xff] }
 0x487   : > { %3577 = vmatprep.subr.bf16.mxu0 %v1355_v54  ;;  %v1390_v54 = vunpack.c.l.s8.bf16 %v712_v53  ;;  %v4288_v41 = vunpack.c.l.s8.bf16 %v4138_v16 }
 0x489   : > { %3492 = vmatpush1.bf16.msra.mxu1 %v2312_v43  ;;  %v719_v43 = vld [vmem:[%s8425_s11 + $0x388] sm:$0xff] }
 0x48a   : > { %3578 = vmatpush1.bf16.msra.mxu0 %v1354_v44  ;;  %3493 = vmatprep.subr.bf16.mxu1 %v2319_v45  ;;  %v4145_v44 = vld [vmem:[%s8440_s30 + $0x68] sm:$0xff]  ;;  %v1396_v45 = vunpack.c.h.s8.bf16 %v712_v53  ;;  %v1433_v53 = vunpack.c.h.s8.bf16 %v731_v29 }
 0x48b   : > { %3579 = vmatprep.subr.bf16.mxu0 %v1361_v46  ;;  %v4294_v46 = vunpack.c.h.s8.bf16 %v4138_v16  ;;  %v4301_v47 = vunpack.c.l.s8.bf16 %v4145_v44  ;;  %v4307_v26 = vunpack.c.h.s8.bf16 %v4145_v44  ;;  %v737_v16 = vld [vmem:[%s8425_s11 + $0x418] sm:$0xff] }
 0x48d   : > { %3494 = vmatpush1.bf16.msra.mxu1 %v2318_v48  ;;  %v4144_v48 = vld [vmem:[%s8440_s30 + $0x60] sm:$0xff] }
 0x48e   : > { %3580 = vmatpush1.bf16.msra.mxu0 %v1360_v56  ;;  %3495 = vmatprep.subr.bf16.mxu1 %v2325_v31  ;;  %v1402_v56 = vunpack.c.l.s8.bf16 %v718_v39  ;;  %v4300_v31 = vunpack.c.l.s8.bf16 %v4144_v48 }
 0x48f   : > { %3581 = vmatprep.subr.bf16.mxu0 %v1367_v32  ;;  %v1409_v32 = vunpack.c.h.s8.bf16 %v719_v43 }
 0x491   : > { %3496 = vmatpush1.bf16.msra.mxu1 %v2324_v58  ;;  %v4151_v58 = vld [vmem:[%s8440_s30 + $0x98] sm:$0xff] }
 0x492   : > { %3582 = vmatpush1.bf16.msra.mxu0 %v1366_v1  ;;  %3497 = vmatprep.subr.bf16.mxu1 %v2331_v2  ;;  %v1408_v1 = vunpack.c.h.s8.bf16 %v718_v39  ;;  %v4306_v2 = vunpack.c.h.s8.bf16 %v4144_v48  ;;  %v4313_v60 = vunpack.c.l.s8.bf16 %v4151_v58  ;;  %v1445_v39 = vunpack.c.h.s8.bf16 %v737_v16  ;;  %v743_v48 = vld [vmem:[%s8425_s11 + $0x448] sm:$0xff] }
 0x493   : > { %3583 = vmatprep.subr.bf16.mxu0 %v1373_v5  ;;  %v1415_v5 = vunpack.c.l.s8.bf16 %v725_v30  ;;  %v742_v30 = vld [vmem:[%s8425_s11 + $0x440] sm:$0xff] }
 0x495   : > { %3498 = vmatpush1.bf16.msra.mxu1 %v2330_v0  ;;  %v4150_v0 = vld [vmem:[%s8440_s30 + $0x90] sm:$0xff] }
 0x496   : > { %3584 = vmatpush1.bf16.msra.mxu0 %v1372_v51  ;;  %4576 = vmatprep.subr.bf16.mxu1 %v4277_v63  ;;  %v1414_v51 = vunpack.c.l.s8.bf16 %v724_v14  ;;  %v4319_v63 = vunpack.c.h.s8.bf16 %v4151_v58 }
 0x497   : > { %3596 = vmatprep.subr.bf16.mxu0 %v1379_v15  ;;  %v4312_v15 = vunpack.c.l.s8.bf16 %v4150_v0 }
 0x498   : > { %3500 = vmatmul.mubr.bf16.vlgmr.msra.gmra.mrb[4].mxu1 %v9076_v62 }
 0x499   : > { %3586 = vmatmul.mubr.bf16.vlgmr.msra.gmra.mrb[4].mxu0 %v8536_v52  ;;  %4577 = vmatpush1.bf16.msra.mxu1 %v4276_v22  ;;  %v1397_v52 = vunpack.c.h.s8.bf16 %v713_v24  ;;  %v1420_v22 = vunpack.c.h.s8.bf16 %v724_v14  ;;  %v730_v24 = vld [vmem:[%s8425_s11 + $0x3e0] sm:$0xff]  ;;  %v1457_v14 = vunpack.c.h.s8.bf16 %v743_v48 }
 0x49a   : > { %3597 = vmatpush1.bf16.msra.mxu0 %v1378_v21  ;;  %4578 = vmatprep.subr.bf16.mxu1 %v4283_v23  ;;  %v4157_v21 = vld [vmem:[%s8440_s30 + $0xc8] sm:$0xff]  ;;  %v1427_v23 = vunpack.c.l.s8.bf16 %v731_v29  ;;  %v748_v29 = vld [vmem:[%s8425_s11 + $0x470] sm:$0xff] }
 0x49b   : > { %3598 = vmatprep.subr.bf16.mxu0 %v1385_v40  ;;  %3628 = vmatprep.mubr.bf16.mxu0 %v8552_v57  ;;  %v1403_v57 = vunpack.c.l.s8.bf16 %v719_v43  ;;  %v4318_v40 = vunpack.c.h.s8.bf16 %v4150_v0  ;;  %v4325_v50 = vunpack.c.l.s8.bf16 %v4157_v21  ;;  %v736_v43 = vld [vmem:[%s8425_s11 + $0x410] sm:$0xff]  ;;  %v749_v0 = vld [vmem:[%s8425_s11 + $0x478] sm:$0xff] }
 0x49d   : > { %4579 = vmatpush1.bf16.msra.mxu1 %v4282_v35  ;;  %v1426_v35 = vunpack.c.l.s8.bf16 %v730_v24 }
 0x49e   : > { %3599 = vmatpush1.bf16.msra.mxu0 %v1384_v55  ;;  %4580 = vmatprep.subr.bf16.mxu1 %v4289_v12  ;;  %v4156_v55 = vld [vmem:[%s8440_s30 + $0xc0] sm:$0xff]  ;;  %v4331_v12 = vunpack.c.h.s8.bf16 %v4157_v21 }
 0x49f   : > { %3600 = vmatprep.subr.bf16.mxu0 %v1391_v36  ;;  %v4324_v36 = vunpack.c.l.s8.bf16 %v4156_v55 }
 0x4a1   : > { %4581 = vmatpush1.bf16.msra.mxu1 %v4288_v41  ;;  %v1432_v41 = vunpack.c.h.s8.bf16 %v730_v24  ;;  %v1469_v24 = vunpack.c.h.s8.bf16 %v749_v0 }
 0x4a2   : > { %3601 = vmatpush1.bf16.msra.mxu0 %v1390_v54  ;;  %4582 = vmatprep.subr.bf16.mxu1 %v4295_v42  ;;  %v4163_v54 = vld [vmem:[%s8440_s30 + $0xf8] sm:$0xff]  ;;  %v1439_v42 = vunpack.c.l.s8.bf16 %v737_v16  ;;  %v754_v16 = vld [vmem:[%s8425_s11 + $0x4a0] sm:$0xff] }
 0x4a3   : > { %3602 = vmatprep.subr.bf16.mxu0 %v1397_v52  ;;  %v4330_v52 = vunpack.c.h.s8.bf16 %v4156_v55  ;;  %v4337_v44 = vunpack.c.l.s8.bf16 %v4163_v54  ;;  %v755_v55 = vld [vmem:[%s8425_s11 + $0x4a8] sm:$0xff] }
 0x4a5   : > { %4583 = vmatpush1.bf16.msra.mxu1 %v4294_v46  ;;  %v1438_v46 = vunpack.c.l.s8.bf16 %v736_v43 }
 0x4a6   : > { %3603 = vmatpush1.bf16.msra.mxu0 %v1396_v45  ;;  %4584 = vmatprep.subr.bf16.mxu1 %v4301_v47  ;;  %v4162_v45 = vld [vmem:[%s8440_s30 + $0xf0] sm:$0xff]  ;;  %v4343_v47 = vunpack.c.h.s8.bf16 %v4163_v54 }
 0x4a7   : > { %3604 = vmatprep.subr.bf16.mxu0 %v1403_v57  ;;  %v4336_v57 = vunpack.c.l.s8.bf16 %v4162_v45 }
 0x4a9   : > { %4585 = vmatpush1.bf16.msra.mxu1 %v4300_v31  ;;  %v1444_v31 = vunpack.c.h.s8.bf16 %v736_v43  ;;  %v1480_v43 = vunpack.c.h.s8.bf16 %v754_v16 }
 0x4aa   : > { %3605 = vmatpush1.bf16.msra.mxu0 %v1402_v56  ;;  %4586 = vmatprep.subr.bf16.mxu1 %v4307_v26  ;;  %v4169_v56 = vld [vmem:[%s8440_s30 + $0x128] sm:$0xff]  ;;  %v1451_v26 = vunpack.c.l.s8.bf16 %v743_v48 }
 0x4ab   : > { %3606 = vmatprep.subr.bf16.mxu0 %v1409_v32  ;;  %v4342_v32 = vunpack.c.h.s8.bf16 %v4162_v45  ;;  %v4349_v58 = vunpack.c.l.s8.bf16 %v4169_v56  ;;  %v760_v45 = vld [vmem:[%s8425_s11 + $0x4d0] sm:$0xff] }
 0x4ac   : > { %v1492_v48 = vunpack.c.h.s8.bf16 %v760_v45 }
 0x4ad   : > { %4587 = vmatpush1.bf16.msra.mxu1 %v4306_v2  ;;  %v1450_v2 = vunpack.c.l.s8.bf16 %v742_v30 }
 0x4ae   : > { %3607 = vmatpush1.bf16.msra.mxu0 %v1408_v1  ;;  %4588 = vmatprep.subr.bf16.mxu1 %v4313_v60  ;;  %v4168_v1 = vld [vmem:[%s8440_s30 + $0x120] sm:$0xff]  ;;  %v4355_v60 = vunpack.c.h.s8.bf16 %v4169_v56  ;;  %v766_v56 = vld [vmem:[%s8425_s11 + $0x500] sm:$0xff] }
 0x4af   : > { %3608 = vmatprep.subr.bf16.mxu0 %v1415_v5  ;;  %v4348_v5 = vunpack.c.l.s8.bf16 %v4168_v1 }
 0x4b1   : > { %4589 = vmatpush1.bf16.msra.mxu1 %v4312_v15  ;;  %v1456_v15 = vunpack.c.h.s8.bf16 %v742_v30  ;;  %v9207_v30 = vld [vmem:[%s8432_s7] sm:$0x3f] }
 0x4b2   : > { %3609 = vmatpush1.bf16.msra.mxu0 %v1414_v51  ;;  %4590 = vmatprep.subr.bf16.mxu1 %v4319_v63  ;;  %v4175_v51 = vld [vmem:[%s8440_s30 + $0x158] sm:$0xff]  ;;  %v1463_v63 = vunpack.c.l.s8.bf16 %v749_v0 }
 0x4b3   : > { %3610 = vmatprep.subr.bf16.mxu0 %v1421_v28  ;;  %v4354_v28 = vunpack.c.h.s8.bf16 %v4168_v1  ;;  %v4361_v21 = vunpack.c.l.s8.bf16 %v4175_v51  ;;  %v773_v1 = vld [vmem:[%s8425_s11 + $0x538] sm:$0xff]  ;;  %v772_v0 = vld [vmem:[%s8425_s11 + $0x530] sm:$0xff] }
 0x4b5   : > { %4591 = vmatpush1.bf16.msra.mxu1 %v4318_v40  ;;  %v1462_v40 = vunpack.c.l.s8.bf16 %v748_v29 }
 0x4b6   : > { %3611 = vmatpush1.bf16.msra.mxu0 %v1420_v22  ;;  %4592 = vmatprep.subr.bf16.mxu1 %v4325_v50  ;;  %v4174_v22 = vld [vmem:[%s8440_s30 + $0x150] sm:$0xff]  ;;  %v4367_v50 = vunpack.c.h.s8.bf16 %v4175_v51 }
 0x4b7   : > { %3612 = vmatprep.subr.bf16.mxu0 %v1427_v23  ;;  %v4360_v23 = vunpack.c.l.s8.bf16 %v4174_v22 }
 0x4b9   : > { %4593 = vmatpush1.bf16.msra.mxu1 %v4324_v36  ;;  %v1468_v36 = vunpack.c.h.s8.bf16 %v748_v29 }
 0x4ba   : > { %3613 = vmatpush1.bf16.msra.mxu0 %v1426_v35  ;;  %4594 = vmatprep.subr.bf16.mxu1 %v4331_v12  ;;  %v9191_v35 = vld [vmem:[%s8440_s30 + $0x188] sm:$0xff]  ;;  %v1475_v12 = vunpack.c.l.s8.bf16 %v755_v55 }
 0x4bb   : > { %3614 = vmatprep.subr.bf16.mxu0 %v1433_v53  ;;  %v4366_v53 = vunpack.c.h.s8.bf16 %v4174_v22  ;;  %v4373_v54 = vunpack.c.l.s8.bf16 %v9191_v35 }
 0x4bd   : > { %4595 = vmatpush1.bf16.msra.mxu1 %v4330_v52  ;;  %v1481_v52 = vunpack.c.h.s8.bf16 %v755_v55 }
 0x4be   : > { %3615 = vmatpush1.bf16.msra.mxu0 %v1432_v41  ;;  %4596 = vmatprep.subr.bf16.mxu1 %v4337_v44  ;;  %v1474_v41 = vunpack.c.l.s8.bf16 %v754_v16 }
 0x4bf   : > { %3616 = vmatprep.subr.bf16.mxu0 %v1439_v42  ;;  %v761_v42 = vld [vmem:[%s8425_s11 + $0x4d8] sm:$0xff] }
 0x4c0   : > { %v1487_v44 = vunpack.c.l.s8.bf16 %v761_v42 }
 0x4c1   : > { %4597 = vmatpush1.bf16.msra.mxu1 %v4336_v57  ;;  %v1493_v57 = vunpack.c.h.s8.bf16 %v761_v42 }
 0x4c2   : > { %3617 = vmatpush1.bf16.msra.mxu0 %v1438_v46  ;;  %4598 = vmatprep.subr.bf16.mxu1 %v4343_v47  ;;  %v1486_v46 = vunpack.c.l.s8.bf16 %v760_v45  ;;  %v767_v47 = vld [vmem:[%s8425_s11 + $0x508] sm:$0xff] }
 0x4c3   : > { %3618 = vmatprep.subr.bf16.mxu0 %v1445_v39  ;;  %v4028_v39 = vlaneseq }
 0x4c5   : > { %4599 = vmatpush1.bf16.msra.mxu1 %v4342_v32 }
 0x4c6   : > { %3619 = vmatpush1.bf16.msra.mxu0 %v1444_v31  ;;  %4600 = vmatprep.subr.bf16.mxu1 %v4349_v58  ;;  %v9201_v31 = vshrl.u32 %v4028_v39, 7 }
 0x4c7   : > { %3620 = vmatprep.subr.bf16.mxu0 %v1451_v26  ;;  %v1505_v26 = vunpack.c.h.s8.bf16 %v767_v47 }
 0x4c8   : > { %v9204_v32 = vsub.s32 0, %v9201_v31  ;;  %v9210_v58 = vsub.s32 1, %v9201_v31 }
 0x4c9   : > { %4601 = vmatpush1.bf16.msra.mxu1 %v4348_v5  ;;  %v1504_v5 = vunpack.c.h.s8.bf16 %v766_v56 }
 0x4ca   : > { %3621 = vmatpush1.bf16.msra.mxu0 %v1450_v2  ;;  %4602 = vmatprep.subr.bf16.mxu1 %v4355_v60  ;;  %v9214_v2 = vld [vmem:[%s8438_s6] sm:$0x3f]  ;;  %v1511_v60 = vunpack.c.l.s8.bf16 %v773_v1 }
 0x4cb   : > { %3622 = vmatprep.subr.bf16.mxu0 %v1457_v14  ;;  %v4031_v14 = vrot.slane %v9207_v30, %v9204_v32  ;;  %v4079_v22 = vrot.slane %v9214_v2, %v9210_v58 }
 0x4cd   : > { %4603 = vmatpush1.bf16.msra.mxu1 %v4354_v28 }
 0x4ce   : > { %3623 = vmatpush1.bf16.msra.mxu0 %v1456_v15  ;;  %4604 = vmatprep.subr.bf16.mxu1 %v4361_v21  ;;  %v4035_v15 = vrot.slane %v9207_v30, %v9210_v58 }
 0x4cf   : > { %3624 = vmatprep.subr.bf16.mxu0 %v1463_v63  ;;  %v4075_v63 = vrot.slane %v9214_v2, %v9204_v32 }
 0x4d1   : > { %4605 = vmatpush1.bf16.msra.mxu1 %v4360_v23  ;;  %v1510_v23 = vunpack.c.l.s8.bf16 %v772_v0 }
 0x4d2   : > { %3625 = vmatpush1.bf16.msra.mxu0 %v1462_v40  ;;  %4606 = vmatprep.subr.bf16.mxu1 %v4367_v50 }
 0x4d3   : > { %3626 = vmatprep.subr.bf16.mxu0 %v1469_v24 }
 0x4d5   : > { %4607 = vmatpush1.bf16.msra.mxu1 %v4366_v53 }
 0x4d6   : > { %3627 = vmatpush1.bf16.msra.mxu0 %v1468_v36  ;;  %4619 = vmatprep.subr.bf16.mxu1 %v4373_v54  ;;  %v1517_v36 = vunpack.c.h.s8.bf16 %v773_v1  ;;  %v4379_v1 = vunpack.c.h.s8.bf16 %v9191_v35 }
 0x4d7   : > { %3639 = vmatprep.subr.bf16.mxu0 %v1475_v12  ;;  %v779_v12 = vld [vmem:[%s8425_s11 + $0x568] sm:$0xff] }
 0x4d9   : > { %3629 = vmatmul.mubr.bf16.vlgmr.msra.gmra.mrb[4].mxu0 %v8590_v27  ;;  %v1499_v27 = vunpack.c.l.s8.bf16 %v767_v47 }
 0x4da   : > { %3640 = vmatpush1.bf16.msra.mxu0 %v1474_v41  ;;  %3671 = vmatprep.mubr.bf16.mxu0 %v8606_v38  ;;  %v1498_v38 = vunpack.c.l.s8.bf16 %v766_v56 }
 0x4db   : > { %3641 = vmatprep.subr.bf16.mxu0 %v1481_v52  ;;  %v1516_v52 = vunpack.c.h.s8.bf16 %v772_v0  ;;  %v784_v0 = vld [vmem:[%s8425_s11 + $0x590] sm:$0xff] }
 0x4dc   : > { %v1534_v35 = vunpack.c.l.s8.bf16 %v784_v0 }
 0x4de   : > { %3642 = vmatpush1.bf16.msra.mxu0 %v1480_v43  ;;  %v1523_v43 = vunpack.c.l.s8.bf16 %v779_v12 }
 0x4df   : > { %3643 = vmatprep.subr.bf16.mxu0 %v1487_v44 }
 0x4e2   : > { %3644 = vmatpush1.bf16.msra.mxu0 %v1486_v46 }
 0x4e3   : > { %3645 = vmatprep.subr.bf16.mxu0 %v1493_v57  ;;  %v4180_v57 = vld [vmem:[%s8440_s30 + $0x180] sm:$0xff] }
 0x4e6   : > { %3646 = vmatpush1.bf16.msra.mxu0 %v1492_v48 }
 0x4e7   : > { %3647 = vmatprep.subr.bf16.mxu0 %v1499_v27  ;;  %v1529_v27 = vunpack.c.h.s8.bf16 %v779_v12 }
 0x4ea   : > { %3648 = vmatpush1.bf16.msra.mxu0 %v1498_v38  ;;  %v785_v38 = vld [vmem:[%s8425_s11 + $0x598] sm:$0xff] }
 0x4eb   : > { %3649 = vmatprep.subr.bf16.mxu0 %v1505_v26  ;;  %v4372_v26 = vunpack.c.l.s8.bf16 %v4180_v57 }
 0x4ec   : > { %v2985_v51 = vpop.f32.mrb[0].mxu0 }
 0x4ed   : > { %v7129_v28 = vadd.f32 %v2985_v51, %v9090_v33  ;;  %v2987_v29 = vpop.f32.mrb[1].mxu0  ;;  %v4378_v51 = vunpack.c.h.s8.bf16 %v4180_v57 }
 0x4ee   : > { %v7130_v21 = vadd.f32 %v2987_v29, %v9094_v8  ;;  %v2989_v40 = vpop.f32.mrb[2].mxu0  ;;  %3650 = vmatpush1.bf16.msra.mxu0 %v1504_v5  ;;  %v791_v29 = vld [vmem:[%s8425_s11 + $0x5c8] sm:$0xff] }
 0x4ef   : > { %v4058_v24 = vmul.f32 %v7129_v28, %v4031_v14  ;;  %v7131_v50 = vadd.f32 %v2989_v40, %v9098_v17  ;;  %v2991_v55 = vpop.f32.mrb[3].mxu0  ;;  %3651 = vmatprep.subr.bf16.mxu0 %v1511_v60  ;;  %v778_v17 = vld [vmem:[%s8425_s11 + $0x560] sm:$0xff]  ;;  %v1535_v60 = vunpack.c.l.s8.bf16 %v785_v38  ;;  %v4186_v28 = vld [vmem:[%s8440_s30 + $0x1b0] sm:$0xff]  ;;  %v1540_v40 = vunpack.c.h.s8.bf16 %v784_v0 }
 0x4f0   : > { %v4059_v33 = vmul.f32 %v7130_v21, %v4035_v15  ;;  %v7132_v53 = vadd.f32 %v2991_v55, %v9100_v18  ;;  %v1522_v18 = vunpack.c.l.s8.bf16 %v778_v17  ;;  %v1528_v5 = vunpack.c.h.s8.bf16 %v778_v17 }
 0x4f1   : > { %v4102_v16 = vadd.f32 %v4075_v63, %v4058_v24  ;;  %v4064_v8 = vmul.f32 %v7131_v50, %v4031_v14  ;;  %v4187_v14 = vld [vmem:[%s8440_s30 + $0x1b8] sm:$0xff]  ;;  %v4384_v21 = vunpack.c.l.s8.bf16 %v4186_v28  ;;  %v1547_v24 = vunpack.c.l.s8.bf16 %v791_v29  ;;  %v790_v50 = vld [vmem:[%s8425_s11 + $0x5c0] sm:$0xff] }
 0x4f2   : > { %v4103_v54 = vadd.f32 %v4079_v22, %v4059_v33  ;;  %v4065_v41 = vmul.f32 %v7132_v53, %v4035_v15  ;;  %3652 = vmatpush1.bf16.msra.mxu0 %v1510_v23  ;;  %v4385_v15 = vunpack.c.l.s8.bf16 %v4187_v14  ;;  %v4193_v23 = vld [vmem:[%s8440_s30 + $0x1e8] sm:$0xff]  ;;  %v4390_v55 = vunpack.c.h.s8.bf16 %v4186_v28  ;;  %v4192_v33 = vld [vmem:[%s8440_s30 + $0x1e0] sm:$0xff] }
 0x4f3   : > { %v4108_v42 = vadd.f32 %v4075_v63, %v4064_v8  ;;  %3653 = vmatprep.subr.bf16.mxu0 %v1517_v36  ;;  %v4114_v45 = vmax.f32 %v4102_v16, 0.0  ;;  %v1541_v63 = vunpack.c.h.s8.bf16 %v785_v38  ;;  %v4397_v36 = vunpack.c.l.s8.bf16 %v4193_v23  ;;  %v797_v16 = vld [vmem:[%s8425_s11 + $0x5f8] sm:$0xff]  ;;  %v4205_v38 = vld [vmem:[%s8440_s30 + $0x248] sm:$0xff] }
 0x4f4   : > { %v4109_v44 = vadd.f32 %v4079_v22, %v4065_v41  ;;  %v4115_v39 = vmax.f32 %v4103_v54, 0.0  ;;  %v4391_v22 = vunpack.c.h.s8.bf16 %v4187_v14  ;;  %v1546_v53 = vunpack.c.l.s8.bf16 %v790_v50 }
 0x4f5   : > { %v4120_v46 = vmax.f32 %v4108_v42, 0.0  ;;  %v1553_v12 = vunpack.c.h.s8.bf16 %v791_v29  ;;  %v4396_v8 = vunpack.c.l.s8.bf16 %v4192_v33  ;;  %v4403_v54 = vunpack.c.h.s8.bf16 %v4193_v23  ;;  %v4211_v29 = vld [vmem:[%s8440_s30 + $0x278] sm:$0xff] }
 0x4f6   : > { %v4121_v47 = vmax.f32 %v4109_v44, 0.0  ;;  %3654 = vmatpush1.bf16.msra.mxu0 %v1516_v52  ;;  %v1552_v41 = vunpack.c.h.s8.bf16 %v790_v50  ;;  %v4199_v52 = vld [vmem:[%s8440_s30 + $0x218] sm:$0xff]  ;;  %v1559_v42 = vunpack.c.l.s8.bf16 %v797_v16  ;;  %v4402_v17 = vunpack.c.h.s8.bf16 %v4192_v33 }
 0x4f7   : > { %v9232_v48 = vpack.c.bf16 %v4120_v46, %v4114_v45  ;;  %3655 = vmatprep.subr.bf16.mxu0 %v1523_v43  ;;  %v796_v43 = vld [vmem:[%s8425_s11 + $0x5f0] sm:$0xff]  ;;  %v4409_v44 = vunpack.c.l.s8.bf16 %v4199_v52  ;;  %v4198_v45 = vld [vmem:[%s8440_s30 + $0x210] sm:$0xff]  ;;  %v1565_v57 = vunpack.c.h.s8.bf16 %v797_v16  ;;  %v4421_v14 = vunpack.c.l.s8.bf16 %v4205_v38  ;;  %v814_v16 = vld [vmem:[%s8425_s11 + $0x680] sm:$0xff] }
 0x4f8   : > { %v9234_v56 = vpack.c.bf16 %v4121_v47, %v4115_v39  ;;  %v1558_v46 = vunpack.c.l.s8.bf16 %v796_v43  ;;  %v803_v39 = vld [vmem:[%s8425_s11 + $0x628] sm:$0xff]  ;;  %v4408_v47 = vunpack.c.l.s8.bf16 %v4198_v45  ;;  %v4433_v23 = vunpack.c.l.s8.bf16 %v4211_v29 }
 0x4fa   : > { %3656 = vmatpush1.bf16.msra.mxu0 %v1522_v18  ;;  %4608 = vmatprep.mubr.bf16.mxu1 %v9234_v56  ;;  %v4415_v18 = vunpack.c.h.s8.bf16 %v4199_v52  ;;  %v1594_v52 = vunpack.c.l.s8.bf16 %v814_v16 }
 0x4fb   : > { %4609 = vmatmul.mubr.bf16.vlgmr.msra.gmra.mrb[8].mxu1 %v9232_v48  ;;  %3657 = vmatprep.subr.bf16.mxu0 %v1529_v27  ;;  %v1564_v27 = vunpack.c.h.s8.bf16 %v796_v43  ;;  %v821_v43 = vld [vmem:[%s8425_s11 + $0x6b8] sm:$0xff] }
 0x4fc   : > { %4620 = vmatpush1.bf16.msra.mxu1 %v4372_v26  ;;  %v1571_v26 = vunpack.c.l.s8.bf16 %v803_v39 }
 0x4fd   : > { %4621 = vmatprep.subr.bf16.mxu1 %v4379_v1  ;;  %v802_v1 = vld [vmem:[%s8425_s11 + $0x620] sm:$0xff] }
 0x4fe   : > { %3658 = vmatpush1.bf16.msra.mxu0 %v1528_v5  ;;  %v4414_v5 = vunpack.c.h.s8.bf16 %v4198_v45  ;;  %v1570_v0 = vunpack.c.l.s8.bf16 %v802_v1  ;;  %v1600_v45 = vunpack.c.h.s8.bf16 %v814_v16  ;;  %v844_v16 = vld [vmem:[%s8425_s11 + $0x770] sm:$0xff] }
 0x4ff   : > { %3659 = vmatprep.subr.bf16.mxu0 %v1535_v60  ;;  %v4204_v60 = vld [vmem:[%s8440_s30 + $0x240] sm:$0xff] }
 0x500   : > { %4622 = vmatpush1.bf16.msra.mxu1 %v4378_v51  ;;  %v1577_v51 = vunpack.c.h.s8.bf16 %v803_v39  ;;  %v4420_v28 = vunpack.c.l.s8.bf16 %v4204_v60  ;;  %v820_v39 = vld [vmem:[%s8425_s11 + $0x6b0] sm:$0xff] }
 0x501   : > { %4623 = vmatprep.subr.bf16.mxu1 %v4385_v15  ;;  %v809_v15 = vld [vmem:[%s8425_s11 + $0x658] sm:$0xff] }
 0x502   : > { %3660 = vmatpush1.bf16.msra.mxu0 %v1534_v35  ;;  %v4427_v35 = vunpack.c.h.s8.bf16 %v4205_v38  ;;  %v1589_v50 = vunpack.c.h.s8.bf16 %v809_v15  ;;  %v1606_v38 = vunpack.c.l.s8.bf16 %v820_v39 }
 0x503   : > { %3661 = vmatprep.subr.bf16.mxu0 %v1541_v63  ;;  %v1576_v63 = vunpack.c.h.s8.bf16 %v802_v1  ;;  %v827_v1 = vld [vmem:[%s8425_s11 + $0x6e8] sm:$0xff] }
 0x504   : > { %4624 = vmatpush1.bf16.msra.mxu1 %v4384_v21  ;;  %v1583_v21 = vunpack.c.l.s8.bf16 %v809_v15 }
 0x505   : > { %4625 = vmatprep.subr.bf16.mxu1 %v4391_v22  ;;  %v808_v22 = vld [vmem:[%s8425_s11 + $0x650] sm:$0xff] }
 0x506   : > { %3662 = vmatpush1.bf16.msra.mxu0 %v1540_v40  ;;  %v4426_v40 = vunpack.c.h.s8.bf16 %v4204_v60  ;;  %v1588_v33 = vunpack.c.h.s8.bf16 %v808_v22  ;;  %v1612_v60 = vunpack.c.h.s8.bf16 %v820_v39  ;;  %v856_v39 = vld [vmem:[%s8425_s11 + $0x7d0] sm:$0xff] }
 0x507   : > { %3663 = vmatprep.subr.bf16.mxu0 %v1547_v24  ;;  %v4210_v24 = vld [vmem:[%s8440_s30 + $0x270] sm:$0xff] }
 0x508   : > { %4626 = vmatpush1.bf16.msra.mxu1 %v4390_v55  ;;  %v815_v55 = vld [vmem:[%s8425_s11 + $0x688] sm:$0xff] }
 0x509   : > { %4627 = vmatprep.subr.bf16.mxu1 %v4397_v36  ;;  %v4432_v36 = vunpack.c.l.s8.bf16 %v4210_v24 }
 0x50a   : > { %3664 = vmatpush1.bf16.msra.mxu0 %v1546_v53  ;;  %v4217_v53 = vld [vmem:[%s8440_s30 + $0x2a8] sm:$0xff] }
 0x50b   : > { %3665 = vmatprep.subr.bf16.mxu0 %v1553_v12  ;;  %v1595_v12 = vunpack.c.l.s8.bf16 %v815_v55 }
 0x50c   : > { %4628 = vmatpush1.bf16.msra.mxu1 %v4396_v8  ;;  %v4438_v8 = vunpack.c.h.s8.bf16 %v4210_v24  ;;  %v839_v24 = vld [vmem:[%s8425_s11 + $0x748] sm:$0xff] }
 0x50d   : > { %4629 = vmatprep.subr.bf16.mxu1 %v4403_v54  ;;  %v4445_v54 = vunpack.c.l.s8.bf16 %v4217_v53 }
 0x50e   : > { %3666 = vmatpush1.bf16.msra.mxu0 %v1552_v41  ;;  %v4216_v41 = vld [vmem:[%s8440_s30 + $0x2a0] sm:$0xff] }
 0x50f   : > { %3667 = vmatprep.subr.bf16.mxu0 %v1559_v42  ;;  %v1601_v42 = vunpack.c.h.s8.bf16 %v815_v55  ;;  %v838_v55 = vld [vmem:[%s8425_s11 + $0x740] sm:$0xff] }
 0x510   : > { %4630 = vmatpush1.bf16.msra.mxu1 %v4402_v17  ;;  %v4444_v17 = vunpack.c.l.s8.bf16 %v4216_v41 }
 0x511   : > { %4631 = vmatprep.subr.bf16.mxu1 %v4409_v44  ;;  %v4451_v44 = vunpack.c.h.s8.bf16 %v4217_v53  ;;  %v1648_v53 = vunpack.c.h.s8.bf16 %v838_v55 }
 0x512   : > { %3668 = vmatpush1.bf16.msra.mxu0 %v1558_v46  ;;  %v4223_v46 = vld [vmem:[%s8440_s30 + $0x2d8] sm:$0xff] }
 0x513   : > { %3669 = vmatprep.subr.bf16.mxu0 %v1565_v57  ;;  %v1607_v57 = vunpack.c.l.s8.bf16 %v821_v43 }
 0x514   : > { %4632 = vmatpush1.bf16.msra.mxu1 %v4408_v47  ;;  %v4450_v47 = vunpack.c.h.s8.bf16 %v4216_v41  ;;  %v851_v41 = vld [vmem:[%s8425_s11 + $0x7a8] sm:$0xff] }
 0x515   : > { %4633 = vmatprep.subr.bf16.mxu1 %v4415_v18  ;;  %v4457_v18 = vunpack.c.l.s8.bf16 %v4223_v46 }
 0x516   : > { %3670 = vmatpush1.bf16.msra.mxu0 %v1564_v27  ;;  %v4222_v27 = vld [vmem:[%s8440_s30 + $0x2d0] sm:$0xff] }
 0x517   : > { %3682 = vmatprep.subr.bf16.mxu0 %v1571_v26  ;;  %v1613_v26 = vunpack.c.h.s8.bf16 %v821_v43  ;;  %v4462_v15 = vunpack.c.h.s8.bf16 %v4222_v27  ;;  %v850_v43 = vld [vmem:[%s8425_s11 + $0x7a0] sm:$0xff] }
 0x518   : > { %4634 = vmatpush1.bf16.msra.mxu1 %v4414_v5  ;;  %v4456_v5 = vunpack.c.l.s8.bf16 %v4222_v27  ;;  %v863_v27 = vld [vmem:[%s8425_s11 + $0x808] sm:$0xff] }
 0x519   : > { %3672 = vmatmul.mubr.bf16.vlgmr.msra.gmra.mrb[4].mxu0 %v8644_v13  ;;  %4635 = vmatprep.subr.bf16.mxu1 %v4421_v14  ;;  %v1582_v13 = vunpack.c.l.s8.bf16 %v808_v22  ;;  %v4463_v14 = vunpack.c.h.s8.bf16 %v4223_v46  ;;  %v832_v22 = vld [vmem:[%s8425_s11 + $0x710] sm:$0xff]  ;;  %v1672_v46 = vunpack.c.h.s8.bf16 %v850_v43 }
 0x51a   : > { %3683 = vmatpush1.bf16.msra.mxu0 %v1570_v0  ;;  %3714 = vmatprep.mubr.bf16.mxu0 %v8660_v20  ;;  %v4439_v20 = vunpack.c.h.s8.bf16 %v4211_v29  ;;  %v1619_v0 = vunpack.c.l.s8.bf16 %v827_v1 }
 0x51b   : > { %3684 = vmatprep.subr.bf16.mxu0 %v1577_v51  ;;  %v826_v51 = vld [vmem:[%s8425_s11 + $0x6e0] sm:$0xff] }
 0x51c   : > { %4636 = vmatpush1.bf16.msra.mxu1 %v4420_v28  ;;  %v1618_v28 = vunpack.c.l.s8.bf16 %v826_v51  ;;  %v1624_v29 = vunpack.c.h.s8.bf16 %v826_v51 }
 0x51d   : > { %4637 = vmatprep.subr.bf16.mxu1 %v4427_v35  ;;  %v1625_v35 = vunpack.c.h.s8.bf16 %v827_v1  ;;  %v9286_v1 = vsub.s32 2, %v9201_v31 }
 0x51e   : > { %3685 = vmatpush1.bf16.msra.mxu0 %v1576_v63  ;;  %v833_v63 = vld [vmem:[%s8425_s11 + $0x718] sm:$0xff] }
 0x51f   : > { %3686 = vmatprep.subr.bf16.mxu0 %v1583_v21  ;;  %v1631_v21 = vunpack.c.l.s8.bf16 %v833_v63 }
 0x520   : > { %4638 = vmatpush1.bf16.msra.mxu1 %v4426_v40  ;;  %v1630_v40 = vunpack.c.l.s8.bf16 %v832_v22 }
 0x521   : > { %4639 = vmatprep.subr.bf16.mxu1 %v4433_v23  ;;  %v1637_v23 = vunpack.c.h.s8.bf16 %v833_v63  ;;  %v868_v63 = vld [vmem:[%s8425_s11 + $0x830] sm:$0xff] }
 0x522   : > { %3687 = vmatpush1.bf16.msra.mxu0 %v1582_v13  ;;  %v1636_v13 = vunpack.c.h.s8.bf16 %v832_v22 }
 0x523   : > { %3688 = vmatprep.subr.bf16.mxu0 %v1589_v50  ;;  %v1643_v50 = vunpack.c.l.s8.bf16 %v839_v24 }
 0x524   : > { %4640 = vmatpush1.bf16.msra.mxu1 %v4432_v36  ;;  %v1642_v36 = vunpack.c.l.s8.bf16 %v838_v55 }
 0x525   : > { %4641 = vmatprep.subr.bf16.mxu1 %v4439_v20  ;;  %v1649_v20 = vunpack.c.h.s8.bf16 %v839_v24 }
 0x526   : > { %3689 = vmatpush1.bf16.msra.mxu0 %v1588_v33  ;;  %v845_v33 = vld [vmem:[%s8425_s11 + $0x778] sm:$0xff] }
 0x527   : > { %3690 = vmatprep.subr.bf16.mxu0 %v1595_v12  ;;  %v1655_v12 = vunpack.c.l.s8.bf16 %v845_v33 }
 0x528   : > { %4642 = vmatpush1.bf16.msra.mxu1 %v4438_v8  ;;  %v1654_v8 = vunpack.c.l.s8.bf16 %v844_v16 }
 0x529   : > { %4643 = vmatprep.subr.bf16.mxu1 %v4445_v54  ;;  %v1661_v54 = vunpack.c.h.s8.bf16 %v845_v33 }
 0x52a   : > { %3691 = vmatpush1.bf16.msra.mxu0 %v1594_v52  ;;  %v1660_v52 = vunpack.c.h.s8.bf16 %v844_v16 }
 0x52b   : > { %3692 = vmatprep.subr.bf16.mxu0 %v1601_v42  ;;  %v1667_v42 = vunpack.c.l.s8.bf16 %v851_v41 }
 0x52c   : > { %4644 = vmatpush1.bf16.msra.mxu1 %v4444_v17  ;;  %v1666_v17 = vunpack.c.l.s8.bf16 %v850_v43 }
 0x52d   : > { %4645 = vmatprep.subr.bf16.mxu1 %v4451_v44  ;;  %v1673_v44 = vunpack.c.h.s8.bf16 %v851_v41 }
 0x52e   : > { %3693 = vmatpush1.bf16.msra.mxu0 %v1600_v45  ;;  %v857_v45 = vld [vmem:[%s8425_s11 + $0x7d8] sm:$0xff] }
 0x52f   : > { %3694 = vmatprep.subr.bf16.mxu0 %v1607_v57  ;;  %v1679_v57 = vunpack.c.l.s8.bf16 %v857_v45 }
 0x530   : > { %4646 = vmatpush1.bf16.msra.mxu1 %v4450_v47  ;;  %v1678_v47 = vunpack.c.l.s8.bf16 %v856_v39 }
 0x531   : > { %4647 = vmatprep.subr.bf16.mxu1 %v4457_v18  ;;  %v1685_v18 = vunpack.c.h.s8.bf16 %v857_v45 }
 0x532   : > { %3695 = vmatpush1.bf16.msra.mxu0 %v1606_v38  ;;  %v1684_v38 = vunpack.c.h.s8.bf16 %v856_v39 }
 0x533   : > { %3696 = vmatprep.subr.bf16.mxu0 %v1613_v26  ;;  %v1691_v26 = vunpack.c.l.s8.bf16 %v863_v27 }
 0x534   : > { %4648 = vmatpush1.bf16.msra.mxu1 %v4456_v5  ;;  %v9289_v5 = vsub.s32 3, %v9201_v31 }
 0x535   : > { %4649 = vmatprep.subr.bf16.mxu1 %v4463_v14  ;;  %v1697_v14 = vunpack.c.h.s8.bf16 %v863_v27 }
 0x536   : > { %3697 = vmatpush1.bf16.msra.mxu0 %v1612_v60  ;;  %v869_v60 = vld [vmem:[%s8425_s11 + $0x838] sm:$0xff]  ;;  %v4043_v51 = vrot.slane %v9207_v30, %v9289_v5 }
 0x537   : > { %3698 = vmatprep.subr.bf16.mxu0 %v1619_v0  ;;  %v4039_v0 = vrot.slane %v9207_v30, %v9286_v1 }
 0x538   : > { %4650 = vmatpush1.bf16.msra.mxu1 %v4462_v15 }
 0x53a   : > { %3699 = vmatpush1.bf16.msra.mxu0 %v1618_v28  ;;  %v4083_v28 = vrot.slane %v9214_v2, %v9286_v1 }
 0x53b   : > { %3700 = vmatprep.subr.bf16.mxu0 %v1625_v35  ;;  %v1703_v35 = vunpack.c.l.s8.bf16 %v869_v60 }
 0x53e   : > { %3701 = vmatpush1.bf16.msra.mxu0 %v1624_v29 }
 0x53f   : > { %3702 = vmatprep.subr.bf16.mxu0 %v1631_v21  ;;  %v4087_v21 = vrot.slane %v9214_v2, %v9289_v5  ;;  %v1708_v2 = vunpack.c.h.s8.bf16 %v868_v63 }
 0x542   : > { %3703 = vmatpush1.bf16.msra.mxu0 %v1630_v40 }
 0x543   : > { %3704 = vmatprep.subr.bf16.mxu0 %v1637_v23 }
 0x546   : > { %3705 = vmatpush1.bf16.msra.mxu0 %v1636_v13  ;;  %v1702_v13 = vunpack.c.l.s8.bf16 %v868_v63 }
 0x547   : > { %3706 = vmatprep.subr.bf16.mxu0 %v1643_v50 }
 0x54a   : > { %3707 = vmatpush1.bf16.msra.mxu0 %v1642_v36  ;;  %v1709_v36 = vunpack.c.h.s8.bf16 %v869_v60 }
 0x54b   : > { %3708 = vmatprep.subr.bf16.mxu0 %v1649_v20 }
 0x54e   : > { %3709 = vmatpush1.bf16.msra.mxu0 %v1648_v53  ;;  %v875_v53 = vld [vmem:[%s8425_s11 + $0x868] sm:$0xff] }
 0x54f   : > { %3710 = vmatprep.subr.bf16.mxu0 %v1655_v12  ;;  %v1715_v41 = vunpack.c.l.s8.bf16 %v875_v53 }
 0x552   : > { %3711 = vmatpush1.bf16.msra.mxu0 %v1654_v8 }
 0x553   : > { %3712 = vmatprep.subr.bf16.mxu0 %v1661_v54 }
 0x556   : > { %3713 = vmatpush1.bf16.msra.mxu0 %v1660_v52  ;;  %v874_v52 = vld [vmem:[%s8425_s11 + $0x860] sm:$0xff] }
 0x557   : > { %3725 = vmatprep.subr.bf16.mxu0 %v1667_v42  ;;  %v1714_v45 = vunpack.c.l.s8.bf16 %v874_v52  ;;  %v1720_v39 = vunpack.c.h.s8.bf16 %v874_v52  ;;  %v916_v52 = vld [vmem:[%s8425_s11 + $0x9b0] sm:$0xff] }
 0x559   : > { %3715 = vmatmul.mubr.bf16.vlgmr.msra.gmra.mrb[4].mxu0 %v8698_v3  ;;  %v862_v3 = vld [vmem:[%s8425_s11 + $0x800] sm:$0xff] }
 0x55a   : > { %3726 = vmatpush1.bf16.msra.mxu0 %v1666_v17  ;;  %3757 = vmatprep.mubr.bf16.mxu0 %v8714_v10  ;;  %v1690_v10 = vunpack.c.l.s8.bf16 %v862_v3  ;;  %v1696_v15 = vunpack.c.h.s8.bf16 %v862_v3 }
 0x55b   : > { %3727 = vmatprep.subr.bf16.mxu0 %v1673_v44 }
 0x55e   : > { %3728 = vmatpush1.bf16.msra.mxu0 %v1672_v46  ;;  %v1721_v46 = vunpack.c.h.s8.bf16 %v875_v53  ;;  %v911_v53 = vld [vmem:[%s8425_s11 + $0x988] sm:$0xff] }
 0x55f   : > { %3729 = vmatprep.subr.bf16.mxu0 %v1679_v57  ;;  %v881_v57 = vld [vmem:[%s8425_s11 + $0x898] sm:$0xff] }
 0x562   : > { %3730 = vmatpush1.bf16.msra.mxu0 %v1678_v47  ;;  %v1727_v47 = vunpack.c.l.s8.bf16 %v881_v57 }
 0x563   : > { %3731 = vmatprep.subr.bf16.mxu0 %v1685_v18  ;;  %v880_v18 = vld [vmem:[%s8425_s11 + $0x890] sm:$0xff] }
 0x564   : > { %v1726_v27 = vunpack.c.l.s8.bf16 %v880_v18  ;;  %v1732_v3 = vunpack.c.h.s8.bf16 %v880_v18 }
 0x566   : > { %3732 = vmatpush1.bf16.msra.mxu0 %v1684_v38  ;;  %v1733_v38 = vunpack.c.h.s8.bf16 %v881_v57 }
 0x567   : > { %3733 = vmatprep.subr.bf16.mxu0 %v1691_v26  ;;  %v887_v26 = vld [vmem:[%s8425_s11 + $0x8c8] sm:$0xff] }
 0x56a   : > { %3734 = vmatpush1.bf16.msra.mxu0 %v1690_v10  ;;  %v1739_v10 = vunpack.c.l.s8.bf16 %v887_v26 }
 0x56b   : > { %3735 = vmatprep.subr.bf16.mxu0 %v1697_v14  ;;  %v3501_v29 = vpop.f32.mrb[4].mxu1  ;;  %v886_v14 = vld [vmem:[%s8425_s11 + $0x8c0] sm:$0xff] }
 0x56c   : > { %v4060_v22 = vmul.f32 %v4039_v0, %v3501_v29  ;;  %v3503_v40 = vpop.f32.mrb[5].mxu1  ;;  %v1738_v60 = vunpack.c.l.s8.bf16 %v886_v14 }
 0x56d   : > { %v4061_v23 = vmul.f32 %v4043_v51, %v3503_v40  ;;  %v3505_v24 = vpop.f32.mrb[6].mxu1 }
 0x56e   : > { %3736 = vmatpush1.bf16.msra.mxu0 %v1696_v15  ;;  %v4104_v50 = vadd.f32 %v4083_v28, %v4060_v22  ;;  %v4066_v30 = vmul.f32 %v4039_v0, %v3505_v24  ;;  %v3507_v55 = vpop.f32.mrb[7].mxu1  ;;  %v1745_v0 = vunpack.c.h.s8.bf16 %v887_v26  ;;  %v1744_v15 = vunpack.c.h.s8.bf16 %v886_v14 }
 0x56f   : > { %3737 = vmatprep.subr.bf16.mxu0 %v1703_v35  ;;  %v4105_v20 = vadd.f32 %v4087_v21, %v4061_v23  ;;  %v4067_v33 = vmul.f32 %v4043_v51, %v3507_v55  ;;  %v893_v51 = vld [vmem:[%s8425_s11 + $0x8f8] sm:$0xff]  ;;  %v892_v35 = vld [vmem:[%s8425_s11 + $0x8f0] sm:$0xff]  ;;  %v898_v23 = vld [vmem:[%s8425_s11 + $0x920] sm:$0xff] }
 0x570   : > { %v4110_v12 = vadd.f32 %v4083_v28, %v4066_v30  ;;  %v4116_v8 = vmax.f32 %v4104_v50, 0.0  ;;  %v1751_v28 = vunpack.c.l.s8.bf16 %v893_v51  ;;  %v1750_v63 = vunpack.c.l.s8.bf16 %v892_v35  ;;  %v905_v50 = vld [vmem:[%s8425_s11 + $0x958] sm:$0xff] }
 0x571   : > { %v4111_v16 = vadd.f32 %v4087_v21, %v4067_v33  ;;  %v4117_v42 = vmax.f32 %v4105_v20, 0.0  ;;  %v1757_v29 = vunpack.c.h.s8.bf16 %v893_v51  ;;  %v899_v21 = vld [vmem:[%s8425_s11 + $0x928] sm:$0xff]  ;;  %v1756_v22 = vunpack.c.h.s8.bf16 %v892_v35 }
 0x572   : > { %3738 = vmatpush1.bf16.msra.mxu0 %v1702_v13  ;;  %v4122_v54 = vmax.f32 %v4110_v12, 0.0  ;;  %v1763_v40 = vunpack.c.l.s8.bf16 %v899_v21  ;;  %v1762_v24 = vunpack.c.l.s8.bf16 %v898_v23  ;;  %v1769_v13 = vunpack.c.h.s8.bf16 %v899_v21 }
 0x573   : > { %3739 = vmatprep.subr.bf16.mxu0 %v1709_v36  ;;  %v4123_v43 = vmax.f32 %v4111_v16, 0.0  ;;  %v1768_v30 = vunpack.c.h.s8.bf16 %v898_v23  ;;  %v1775_v55 = vunpack.c.l.s8.bf16 %v905_v50  ;;  %v904_v36 = vld [vmem:[%s8425_s11 + $0x950] sm:$0xff]  ;;  %v1781_v33 = vunpack.c.h.s8.bf16 %v905_v50 }
 0x574   : > { %v9303_v17 = vpack.c.bf16 %v4122_v54, %v4116_v8  ;;  %v1774_v20 = vunpack.c.l.s8.bf16 %v904_v36  ;;  %v1780_v12 = vunpack.c.h.s8.bf16 %v904_v36  ;;  %v1787_v16 = vunpack.c.l.s8.bf16 %v911_v53  ;;  %v917_v8 = vld [vmem:[%s8425_s11 + $0x9b8] sm:$0xff] }
 0x575   : > { %v9305_v44 = vpack.c.bf16 %v4123_v43, %v4117_v42  ;;  %v1798_v42 = vunpack.c.l.s8.bf16 %v916_v52  ;;  %v1805_v43 = vunpack.c.h.s8.bf16 %v917_v8 }
 0x576   : > { %3740 = vmatpush1.bf16.msra.mxu0 %v1708_v2 }
 0x577   : > { %3741 = vmatprep.subr.bf16.mxu0 %v1715_v41  ;;  %4651 = vmatprep.mubr.bf16.mxu1 %v9305_v44  ;;  %v1799_v41 = vunpack.c.l.s8.bf16 %v917_v8 }
 0x578   : > { %4652 = vmatmul.mubr.bf16.vlgmr.msra.gmra.mrb[8].mxu1 %v9303_v17 }
 0x57a   : > { %3742 = vmatpush1.bf16.msra.mxu0 %v1714_v45  ;;  %v923_v45 = vld [vmem:[%s8425_s11 + $0x9e8] sm:$0xff] }
 0x57b   : > { %3743 = vmatprep.subr.bf16.mxu0 %v1721_v46  ;;  %v1804_v46 = vunpack.c.h.s8.bf16 %v916_v52  ;;  %v1811_v57 = vunpack.c.l.s8.bf16 %v923_v45  ;;  %v1817_v18 = vunpack.c.h.s8.bf16 %v923_v45 }
 0x57e   : > { %3744 = vmatpush1.bf16.msra.mxu0 %v1720_v39  ;;  %v922_v39 = vld [vmem:[%s8425_s11 + $0x9e0] sm:$0xff] }
 0x57f   : > { %3745 = vmatprep.subr.bf16.mxu0 %v1727_v47  ;;  %v1810_v47 = vunpack.c.l.s8.bf16 %v922_v39 }
 0x582   : > { %3746 = vmatpush1.bf16.msra.mxu0 %v1726_v27  ;;  %v929_v27 = vld [vmem:[%s8425_s11 + $0xa18] sm:$0xff] }
 0x583   : > { %3747 = vmatprep.subr.bf16.mxu0 %v1733_v38  ;;  %v1816_v38 = vunpack.c.h.s8.bf16 %v922_v39  ;;  %v1823_v26 = vunpack.c.l.s8.bf16 %v929_v27  ;;  %v1829_v14 = vunpack.c.h.s8.bf16 %v929_v27 }
 0x586   : > { %3748 = vmatpush1.bf16.msra.mxu0 %v1732_v3  ;;  %v928_v3 = vld [vmem:[%s8425_s11 + $0xa10] sm:$0xff] }
 0x587   : > { %3749 = vmatprep.subr.bf16.mxu0 %v1739_v10  ;;  %v1822_v10 = vunpack.c.l.s8.bf16 %v928_v3 }
 0x58a   : > { %3750 = vmatpush1.bf16.msra.mxu0 %v1738_v60  ;;  %v935_v60 = vld [vmem:[%s8425_s11 + $0xa48] sm:$0xff] }
 0x58b   : > { %3751 = vmatprep.subr.bf16.mxu0 %v1745_v0  ;;  %v1828_v0 = vunpack.c.h.s8.bf16 %v928_v3  ;;  %v1835_v51 = vunpack.c.l.s8.bf16 %v935_v60  ;;  %v1841_v35 = vunpack.c.h.s8.bf16 %v935_v60 }
 0x58e   : > { %3752 = vmatpush1.bf16.msra.mxu0 %v1744_v15  ;;  %v934_v15 = vld [vmem:[%s8425_s11 + $0xa40] sm:$0xff] }
 0x58f   : > { %3753 = vmatprep.subr.bf16.mxu0 %v1751_v28  ;;  %v1834_v28 = vunpack.c.l.s8.bf16 %v934_v15 }
 0x592   : > { %3754 = vmatpush1.bf16.msra.mxu0 %v1750_v63  ;;  %v941_v63 = vld [vmem:[%s8425_s11 + $0xa78] sm:$0xff] }
 0x593   : > { %3755 = vmatprep.subr.bf16.mxu0 %v1757_v29  ;;  %v1840_v29 = vunpack.c.h.s8.bf16 %v934_v15  ;;  %v1847_v21 = vunpack.c.l.s8.bf16 %v941_v63  ;;  %v1853_v23 = vunpack.c.h.s8.bf16 %v941_v63 }
 0x596   : > { %3756 = vmatpush1.bf16.msra.mxu0 %v1756_v22  ;;  %v940_v22 = vld [vmem:[%s8425_s11 + $0xa70] sm:$0xff] }
 0x597   : > { %3768 = vmatprep.subr.bf16.mxu0 %v1763_v40  ;;  %v1846_v40 = vunpack.c.l.s8.bf16 %v940_v22 }
 0x599   : > { %3758 = vmatmul.mubr.bf16.vlgmr.msra.gmra.mrb[4].mxu0 %v8752_v61  ;;  %v910_v61 = vld [vmem:[%s8425_s11 + $0x980] sm:$0xff] }
 0x59a   : > { %3769 = vmatpush1.bf16.msra.mxu0 %v1762_v24  ;;  %3800 = vmatprep.mubr.bf16.mxu0 %v8768_v7  ;;  %v1786_v2 = vunpack.c.l.s8.bf16 %v910_v61  ;;  %v1793_v7 = vunpack.c.h.s8.bf16 %v911_v53  ;;  %v1792_v54 = vunpack.c.h.s8.bf16 %v910_v61  ;;  %v947_v24 = vld [vmem:[%s8425_s11 + $0xaa8] sm:$0xff] }
 0x59b   : > { %3770 = vmatprep.subr.bf16.mxu0 %v1769_v13  ;;  %v1852_v13 = vunpack.c.h.s8.bf16 %v940_v22  ;;  %v1859_v50 = vunpack.c.l.s8.bf16 %v947_v24  ;;  %v1865_v36 = vunpack.c.h.s8.bf16 %v947_v24 }
 0x59e   : > { %3771 = vmatpush1.bf16.msra.mxu0 %v1768_v30  ;;  %v946_v30 = vld [vmem:[%s8425_s11 + $0xaa0] sm:$0xff] }
 0x59f   : > { %3772 = vmatprep.subr.bf16.mxu0 %v1775_v55  ;;  %v1858_v55 = vunpack.c.l.s8.bf16 %v946_v30 }
 0x5a2   : > { %3773 = vmatpush1.bf16.msra.mxu0 %v1774_v20  ;;  %v953_v20 = vld [vmem:[%s8425_s11 + $0xad8] sm:$0xff] }
 0x5a3   : > { %3774 = vmatprep.subr.bf16.mxu0 %v1781_v33  ;;  %v1864_v33 = vunpack.c.h.s8.bf16 %v946_v30  ;;  %v1871_v53 = vunpack.c.l.s8.bf16 %v953_v20  ;;  %v1877_v61 = vunpack.c.h.s8.bf16 %v953_v20 }
 0x5a6   : > { %3775 = vmatpush1.bf16.msra.mxu0 %v1780_v12  ;;  %v952_v12 = vld [vmem:[%s8425_s11 + $0xad0] sm:$0xff] }
 0x5a7   : > { %3776 = vmatprep.subr.bf16.mxu0 %v1787_v16  ;;  %v1870_v16 = vunpack.c.l.s8.bf16 %v952_v12 }
 0x5aa   : > { %3777 = vmatpush1.bf16.msra.mxu0 %v1786_v2  ;;  %v959_v2 = vld [vmem:[%s8425_s11 + $0xb08] sm:$0xff] }
 0x5ab   : > { %3778 = vmatprep.subr.bf16.mxu0 %v1793_v7  ;;  %v1876_v7 = vunpack.c.h.s8.bf16 %v952_v12  ;;  %v1883_v8 = vunpack.c.l.s8.bf16 %v959_v2 }
 0x5ae   : > { %3779 = vmatpush1.bf16.msra.mxu0 %v1792_v54 }
 0x5af   : > { %3780 = vmatprep.subr.bf16.mxu0 %v1799_v41  ;;  %v965_v41 = vld [vmem:[%s8425_s11 + $0xb38] sm:$0xff] }
 0x5b2   : > { %3781 = vmatpush1.bf16.msra.mxu0 %v1798_v42  ;;  %v1895_v42 = vunpack.c.l.s8.bf16 %v965_v41 }
 0x5b3   : > { %3782 = vmatprep.subr.bf16.mxu0 %v1805_v43  ;;  %v964_v43 = vld [vmem:[%s8425_s11 + $0xb30] sm:$0xff] }
 0x5b4   : > { %v1894_v45 = vunpack.c.l.s8.bf16 %v964_v43  ;;  %v1900_v39 = vunpack.c.h.s8.bf16 %v964_v43  ;;  %v1012_v43 = vld [vmem:[%s8425_s11 + $0xcb0] sm:$0xff] }
 0x5b6   : > { %3783 = vmatpush1.bf16.msra.mxu0 %v1804_v46  ;;  %v1901_v46 = vunpack.c.h.s8.bf16 %v965_v41  ;;  %v1013_v41 = vld [vmem:[%s8425_s11 + $0xcb8] sm:$0xff] }
 0x5b7   : > { %3784 = vmatprep.subr.bf16.mxu0 %v1811_v57  ;;  %v971_v57 = vld [vmem:[%s8425_s11 + $0xb68] sm:$0xff] }
 0x5ba   : > { %3785 = vmatpush1.bf16.msra.mxu0 %v1810_v47  ;;  %v1907_v47 = vunpack.c.l.s8.bf16 %v971_v57 }
 0x5bb   : > { %3786 = vmatprep.subr.bf16.mxu0 %v1817_v18  ;;  %v970_v18 = vld [vmem:[%s8425_s11 + $0xb60] sm:$0xff] }
 0x5bc   : > { %v1906_v27 = vunpack.c.l.s8.bf16 %v970_v18  ;;  %v1912_v3 = vunpack.c.h.s8.bf16 %v970_v18  ;;  %v1018_v18 = vld [vmem:[%s8425_s11 + $0xce0] sm:$0xff] }
 0x5be   : > { %3787 = vmatpush1.bf16.msra.mxu0 %v1816_v38  ;;  %v1913_v38 = vunpack.c.h.s8.bf16 %v971_v57  ;;  %v1019_v57 = vld [vmem:[%s8425_s11 + $0xce8] sm:$0xff] }
 0x5bf   : > { %3788 = vmatprep.subr.bf16.mxu0 %v1823_v26  ;;  %v977_v26 = vld [vmem:[%s8425_s11 + $0xb98] sm:$0xff] }
 0x5c2   : > { %3789 = vmatpush1.bf16.msra.mxu0 %v1822_v10  ;;  %v1919_v10 = vunpack.c.l.s8.bf16 %v977_v26 }
 0x5c3   : > { %3790 = vmatprep.subr.bf16.mxu0 %v1829_v14  ;;  %v976_v14 = vld [vmem:[%s8425_s11 + $0xb90] sm:$0xff] }
 0x5c4   : > { %v1918_v60 = vunpack.c.l.s8.bf16 %v976_v14  ;;  %v1924_v15 = vunpack.c.h.s8.bf16 %v976_v14  ;;  %v1024_v14 = vld [vmem:[%s8425_s11 + $0xd10] sm:$0xff] }
 0x5c6   : > { %3791 = vmatpush1.bf16.msra.mxu0 %v1828_v0  ;;  %v1925_v0 = vunpack.c.h.s8.bf16 %v977_v26  ;;  %v1025_v26 = vld [vmem:[%s8425_s11 + $0xd18] sm:$0xff] }
 0x5c7   : > { %3792 = vmatprep.subr.bf16.mxu0 %v1835_v51  ;;  %v983_v51 = vld [vmem:[%s8425_s11 + $0xbc8] sm:$0xff] }
 0x5ca   : > { %3793 = vmatpush1.bf16.msra.mxu0 %v1834_v28  ;;  %v1931_v28 = vunpack.c.l.s8.bf16 %v983_v51 }
 0x5cb   : > { %3794 = vmatprep.subr.bf16.mxu0 %v1841_v35  ;;  %v982_v35 = vld [vmem:[%s8425_s11 + $0xbc0] sm:$0xff] }
 0x5cc   : > { %v1930_v63 = vunpack.c.l.s8.bf16 %v982_v35  ;;  %v1936_v22 = vunpack.c.h.s8.bf16 %v982_v35  ;;  %v1030_v35 = vld [vmem:[%s8425_s11 + $0xd40] sm:$0xff] }
 0x5ce   : > { %3795 = vmatpush1.bf16.msra.mxu0 %v1840_v29  ;;  %v1937_v29 = vunpack.c.h.s8.bf16 %v983_v51  ;;  %v1031_v51 = vld [vmem:[%s8425_s11 + $0xd48] sm:$0xff] }
 0x5cf   : > { %3796 = vmatprep.subr.bf16.mxu0 %v1847_v21  ;;  %v989_v21 = vld [vmem:[%s8425_s11 + $0xbf8] sm:$0xff] }
 0x5d2   : > { %3797 = vmatpush1.bf16.msra.mxu0 %v1846_v40  ;;  %v1943_v40 = vunpack.c.l.s8.bf16 %v989_v21 }
 0x5d3   : > { %3798 = vmatprep.subr.bf16.mxu0 %v1853_v23  ;;  %v988_v23 = vld [vmem:[%s8425_s11 + $0xbf0] sm:$0xff] }
 0x5d4   : > { %v1942_v24 = vunpack.c.l.s8.bf16 %v988_v23  ;;  %v1948_v30 = vunpack.c.h.s8.bf16 %v988_v23  ;;  %v1036_v23 = vld [vmem:[%s8425_s11 + $0xd70] sm:$0xff] }
 0x5d6   : > { %3799 = vmatpush1.bf16.msra.mxu0 %v1852_v13  ;;  %v1949_v13 = vunpack.c.h.s8.bf16 %v989_v21  ;;  %v1037_v21 = vld [vmem:[%s8425_s11 + $0xd78] sm:$0xff] }
 0x5d7   : > { %3811 = vmatprep.subr.bf16.mxu0 %v1859_v50  ;;  %v995_v50 = vld [vmem:[%s8425_s11 + $0xc28] sm:$0xff] }
 0x5d9   : > { %3801 = vmatmul.mubr.bf16.vlgmr.msra.gmra.mrb[4].mxu0 %v8806_v59  ;;  %v958_v59 = vld [vmem:[%s8425_s11 + $0xb00] sm:$0xff] }
 0x5da   : > { %3812 = vmatpush1.bf16.msra.mxu0 %v1858_v55  ;;  %3843 = vmatprep.mubr.bf16.mxu0 %v8822_v6  ;;  %v1882_v54 = vunpack.c.l.s8.bf16 %v958_v59  ;;  %v1889_v6 = vunpack.c.h.s8.bf16 %v959_v2  ;;  %v1888_v52 = vunpack.c.h.s8.bf16 %v958_v59  ;;  %v1955_v55 = vunpack.c.l.s8.bf16 %v995_v50 }
 0x5db   : > { %3813 = vmatprep.subr.bf16.mxu0 %v1865_v36  ;;  %v994_v36 = vld [vmem:[%s8425_s11 + $0xc20] sm:$0xff] }
 0x5dc   : > { %v1954_v20 = vunpack.c.l.s8.bf16 %v994_v36  ;;  %v1960_v12 = vunpack.c.h.s8.bf16 %v994_v36  ;;  %v1042_v36 = vld [vmem:[%s8425_s11 + $0xda0] sm:$0xff] }
 0x5de   : > { %3814 = vmatpush1.bf16.msra.mxu0 %v1864_v33  ;;  %v1961_v33 = vunpack.c.h.s8.bf16 %v995_v50  ;;  %v1043_v50 = vld [vmem:[%s8425_s11 + $0xda8] sm:$0xff] }
 0x5df   : > { %3815 = vmatprep.subr.bf16.mxu0 %v1871_v53  ;;  %v1001_v53 = vld [vmem:[%s8425_s11 + $0xc58] sm:$0xff] }
 0x5e2   : > { %3816 = vmatpush1.bf16.msra.mxu0 %v1870_v16  ;;  %v1967_v16 = vunpack.c.l.s8.bf16 %v1001_v53 }
 0x5e3   : > { %3817 = vmatprep.subr.bf16.mxu0 %v1877_v61  ;;  %v1000_v61 = vld [vmem:[%s8425_s11 + $0xc50] sm:$0xff] }
 0x5e4   : > { %v1966_v2 = vunpack.c.l.s8.bf16 %v1000_v61  ;;  %v1972_v59 = vunpack.c.h.s8.bf16 %v1000_v61  ;;  %v1048_v61 = vld [vmem:[%s8425_s11 + $0xdd0] sm:$0xff] }
 0x5e6   : > { %3818 = vmatpush1.bf16.msra.mxu0 %v1876_v7  ;;  %v1973_v7 = vunpack.c.h.s8.bf16 %v1001_v53  ;;  %v1049_v53 = vld [vmem:[%s8425_s11 + $0xdd8] sm:$0xff] }
 0x5e7   : > { %3819 = vmatprep.subr.bf16.mxu0 %v1883_v8  ;;  %v1007_v8 = vld [vmem:[%s8425_s11 + $0xc88] sm:$0xff] }
 0x5ea   : > { %3820 = vmatpush1.bf16.msra.mxu0 %v1882_v54  ;;  %v1979_v54 = vunpack.c.l.s8.bf16 %v1007_v8 }
 0x5eb   : > { %3821 = vmatprep.subr.bf16.mxu0 %v1889_v6 }
 0x5ee   : > { %3822 = vmatpush1.bf16.msra.mxu0 %v1888_v52 }
 0x5ef   : > { %3823 = vmatprep.subr.bf16.mxu0 %v1895_v42  ;;  %v1991_v42 = vunpack.c.l.s8.bf16 %v1013_v41 }
 0x5f2   : > { %3824 = vmatpush1.bf16.msra.mxu0 %v1894_v45  ;;  %v1990_v45 = vunpack.c.l.s8.bf16 %v1012_v43 }
 0x5f3   : > { %3825 = vmatprep.subr.bf16.mxu0 %v1901_v46  ;;  %v1997_v46 = vunpack.c.h.s8.bf16 %v1013_v41 }
 0x5f6   : > { %3826 = vmatpush1.bf16.msra.mxu0 %v1900_v39  ;;  %v1996_v39 = vunpack.c.h.s8.bf16 %v1012_v43 }
 0x5f7   : > { %3827 = vmatprep.subr.bf16.mxu0 %v1907_v47  ;;  %v2003_v47 = vunpack.c.l.s8.bf16 %v1019_v57 }
 0x5fa   : > { %3828 = vmatpush1.bf16.msra.mxu0 %v1906_v27  ;;  %v2002_v27 = vunpack.c.l.s8.bf16 %v1018_v18 }
 0x5fb   : > { %3829 = vmatprep.subr.bf16.mxu0 %v1913_v38  ;;  %v2009_v38 = vunpack.c.h.s8.bf16 %v1019_v57 }
 0x5fe   : > { %3830 = vmatpush1.bf16.msra.mxu0 %v1912_v3  ;;  %v2008_v3 = vunpack.c.h.s8.bf16 %v1018_v18 }
 0x5ff   : > { %3831 = vmatprep.subr.bf16.mxu0 %v1919_v10  ;;  %v2015_v10 = vunpack.c.l.s8.bf16 %v1025_v26 }
 0x602   : > { %3832 = vmatpush1.bf16.msra.mxu0 %v1918_v60  ;;  %v2014_v60 = vunpack.c.l.s8.bf16 %v1024_v14 }
 0x603   : > { %3833 = vmatprep.subr.bf16.mxu0 %v1925_v0  ;;  %v2021_v0 = vunpack.c.h.s8.bf16 %v1025_v26 }
 0x606   : > { %3834 = vmatpush1.bf16.msra.mxu0 %v1924_v15  ;;  %v2020_v15 = vunpack.c.h.s8.bf16 %v1024_v14 }
 0x607   : > { %3835 = vmatprep.subr.bf16.mxu0 %v1931_v28  ;;  %v2027_v28 = vunpack.c.l.s8.bf16 %v1031_v51 }
 0x60a   : > { %3836 = vmatpush1.bf16.msra.mxu0 %v1930_v63  ;;  %v2026_v63 = vunpack.c.l.s8.bf16 %v1030_v35 }
 0x60b   : > { %3837 = vmatprep.subr.bf16.mxu0 %v1937_v29  ;;  %v2033_v29 = vunpack.c.h.s8.bf16 %v1031_v51 }
 0x60e   : > { %3838 = vmatpush1.bf16.msra.mxu0 %v1936_v22  ;;  %v2032_v22 = vunpack.c.h.s8.bf16 %v1030_v35 }
 0x60f   : > { %3839 = vmatprep.subr.bf16.mxu0 %v1943_v40  ;;  %v2039_v40 = vunpack.c.l.s8.bf16 %v1037_v21 }
 0x612   : > { %3840 = vmatpush1.bf16.msra.mxu0 %v1942_v24  ;;  %v2038_v24 = vunpack.c.l.s8.bf16 %v1036_v23 }
 0x613   : > { %3841 = vmatprep.subr.bf16.mxu0 %v1949_v13  ;;  %v2045_v13 = vunpack.c.h.s8.bf16 %v1037_v21 }
 0x616   : > { %3842 = vmatpush1.bf16.msra.mxu0 %v1948_v30  ;;  %v2044_v30 = vunpack.c.h.s8.bf16 %v1036_v23 }
 0x617   : > { %3854 = vmatprep.subr.bf16.mxu0 %v1955_v55  ;;  %v2051_v55 = vunpack.c.l.s8.bf16 %v1043_v50 }
 0x619   : > { %3844 = vmatmul.mubr.bf16.vlgmr.msra.gmra.mrb[4].mxu0 %v8860_v4  ;;  %v1006_v4 = vld [vmem:[%s8425_s11 + $0xc80] sm:$0xff] }
 0x61a   : > { %3855 = vmatpush1.bf16.msra.mxu0 %v1954_v20  ;;  %3886 = vmatprep.mubr.bf16.mxu0 %v8876_v9  ;;  %v1978_v6 = vunpack.c.l.s8.bf16 %v1006_v4  ;;  %v1985_v9 = vunpack.c.h.s8.bf16 %v1007_v8  ;;  %v1984_v52 = vunpack.c.h.s8.bf16 %v1006_v4  ;;  %v2050_v20 = vunpack.c.l.s8.bf16 %v1042_v36  ;;  %v1055_v8 = vld [vmem:[%s8425_s11 + $0xe08] sm:$0xff] }
 0x61b   : > { %3856 = vmatprep.subr.bf16.mxu0 %v1961_v33  ;;  %v2057_v33 = vunpack.c.h.s8.bf16 %v1043_v50 }
 0x61e   : > { %3857 = vmatpush1.bf16.msra.mxu0 %v1960_v12  ;;  %v2056_v12 = vunpack.c.h.s8.bf16 %v1042_v36 }
 0x61f   : > { %3858 = vmatprep.subr.bf16.mxu0 %v1967_v16  ;;  %v2063_v16 = vunpack.c.l.s8.bf16 %v1049_v53 }
 0x622   : > { %3859 = vmatpush1.bf16.msra.mxu0 %v1966_v2  ;;  %v2062_v2 = vunpack.c.l.s8.bf16 %v1048_v61 }
 0x623   : > { %3860 = vmatprep.subr.bf16.mxu0 %v1973_v7  ;;  %v2069_v7 = vunpack.c.h.s8.bf16 %v1049_v53  ;;  %v4228_v53 = vld [vmem:[%s8440_s30 + $0x300] sm:$0xff] }
 0x626   : > { %3861 = vmatpush1.bf16.msra.mxu0 %v1972_v59  ;;  %v2068_v59 = vunpack.c.h.s8.bf16 %v1048_v61  ;;  %v4468_v61 = vunpack.c.l.s8.bf16 %v4228_v53 }
 0x627   : > { %3862 = vmatprep.subr.bf16.mxu0 %v1979_v54  ;;  %v2075_v54 = vunpack.c.l.s8.bf16 %v1055_v8 }
 0x62a   : > { %3863 = vmatpush1.bf16.msra.mxu0 %v1978_v6  ;;  %v1061_v6 = vld [vmem:[%s8425_s11 + $0xe38] sm:$0xff] }
 0x62b   : > { %3864 = vmatprep.subr.bf16.mxu0 %v1985_v9  ;;  %v2087_v41 = vunpack.c.l.s8.bf16 %v1061_v6  ;;  %v2093_v43 = vunpack.c.h.s8.bf16 %v1061_v6 }
 0x62e   : > { %3865 = vmatpush1.bf16.msra.mxu0 %v1984_v52  ;;  %v1060_v52 = vld [vmem:[%s8425_s11 + $0xe30] sm:$0xff] }
 0x62f   : > { %3866 = vmatprep.subr.bf16.mxu0 %v1991_v42  ;;  %v2086_v42 = vunpack.c.l.s8.bf16 %v1060_v52 }
 0x632   : > { %3867 = vmatpush1.bf16.msra.mxu0 %v1990_v45  ;;  %v1067_v45 = vld [vmem:[%s8425_s11 + $0xe68] sm:$0xff] }
 0x633   : > { %3868 = vmatprep.subr.bf16.mxu0 %v1997_v46  ;;  %v2092_v46 = vunpack.c.h.s8.bf16 %v1060_v52  ;;  %v2099_v57 = vunpack.c.l.s8.bf16 %v1067_v45  ;;  %v2105_v18 = vunpack.c.h.s8.bf16 %v1067_v45 }
 0x636   : > { %3869 = vmatpush1.bf16.msra.mxu0 %v1996_v39  ;;  %v1066_v39 = vld [vmem:[%s8425_s11 + $0xe60] sm:$0xff] }
 0x637   : > { %3870 = vmatprep.subr.bf16.mxu0 %v2003_v47  ;;  %v2098_v47 = vunpack.c.l.s8.bf16 %v1066_v39 }
 0x63a   : > { %3871 = vmatpush1.bf16.msra.mxu0 %v2002_v27  ;;  %v1073_v27 = vld [vmem:[%s8425_s11 + $0xe98] sm:$0xff] }
 0x63b   : > { %3872 = vmatprep.subr.bf16.mxu0 %v2009_v38  ;;  %v2104_v38 = vunpack.c.h.s8.bf16 %v1066_v39  ;;  %v2111_v26 = vunpack.c.l.s8.bf16 %v1073_v27  ;;  %v2117_v14 = vunpack.c.h.s8.bf16 %v1073_v27  ;;  %v4240_v39 = vld [vmem:[%s8440_s30 + $0x360] sm:$0xff] }
 0x63c   : > { %v4492_v27 = vunpack.c.l.s8.bf16 %v4240_v39 }
 0x63e   : > { %3873 = vmatpush1.bf16.msra.mxu0 %v2008_v3  ;;  %v1072_v3 = vld [vmem:[%s8425_s11 + $0xe90] sm:$0xff] }
 0x63f   : > { %3874 = vmatprep.subr.bf16.mxu0 %v2015_v10  ;;  %v2110_v10 = vunpack.c.l.s8.bf16 %v1072_v3 }
 0x642   : > { %3875 = vmatpush1.bf16.msra.mxu0 %v2014_v60  ;;  %v1079_v60 = vld [vmem:[%s8425_s11 + $0xec8] sm:$0xff] }
 0x643   : > { %3876 = vmatprep.subr.bf16.mxu0 %v2021_v0  ;;  %v2116_v0 = vunpack.c.h.s8.bf16 %v1072_v3  ;;  %v2123_v51 = vunpack.c.l.s8.bf16 %v1079_v60  ;;  %v2129_v35 = vunpack.c.h.s8.bf16 %v1079_v60  ;;  %v4498_v60 = vunpack.c.h.s8.bf16 %v4240_v39 }
 0x646   : > { %3877 = vmatpush1.bf16.msra.mxu0 %v2020_v15  ;;  %v1078_v15 = vld [vmem:[%s8425_s11 + $0xec0] sm:$0xff] }
 0x647   : > { %3878 = vmatprep.subr.bf16.mxu0 %v2027_v28  ;;  %v2122_v28 = vunpack.c.l.s8.bf16 %v1078_v15 }
 0x64a   : > { %3879 = vmatpush1.bf16.msra.mxu0 %v2026_v63  ;;  %v1085_v63 = vld [vmem:[%s8425_s11 + $0xef8] sm:$0xff] }
 0x64b   : > { %3880 = vmatprep.subr.bf16.mxu0 %v2033_v29  ;;  %v2128_v29 = vunpack.c.h.s8.bf16 %v1078_v15  ;;  %v2135_v21 = vunpack.c.l.s8.bf16 %v1085_v63  ;;  %v2141_v23 = vunpack.c.h.s8.bf16 %v1085_v63  ;;  %v4246_v15 = vld [vmem:[%s8440_s30 + $0x390] sm:$0xff] }
 0x64c   : > { %v4504_v63 = vunpack.c.l.s8.bf16 %v4246_v15 }
 0x64e   : > { %3881 = vmatpush1.bf16.msra.mxu0 %v2032_v22  ;;  %v1084_v22 = vld [vmem:[%s8425_s11 + $0xef0] sm:$0xff] }
 0x64f   : > { %3882 = vmatprep.subr.bf16.mxu0 %v2039_v40  ;;  %v2134_v40 = vunpack.c.l.s8.bf16 %v1084_v22 }
 0x652   : > { %3883 = vmatpush1.bf16.msra.mxu0 %v2038_v24  ;;  %v1091_v24 = vld [vmem:[%s8425_s11 + $0xf28] sm:$0xff] }
 0x653   : > { %3884 = vmatprep.subr.bf16.mxu0 %v2045_v13  ;;  %v2140_v13 = vunpack.c.h.s8.bf16 %v1084_v22  ;;  %v2147_v50 = vunpack.c.l.s8.bf16 %v1091_v24  ;;  %v2153_v36 = vunpack.c.h.s8.bf16 %v1091_v24  ;;  %v4510_v24 = vunpack.c.h.s8.bf16 %v4246_v15 }
 0x656   : > { %3885 = vmatpush1.bf16.msra.mxu0 %v2044_v30  ;;  %v1090_v30 = vld [vmem:[%s8425_s11 + $0xf20] sm:$0xff] }
 0x657   : > { %3897 = vmatprep.subr.bf16.mxu0 %v2051_v55  ;;  %v2146_v55 = vunpack.c.l.s8.bf16 %v1090_v30 }
 0x659   : > { %3887 = vmatmul.mubr.bf16.vlgmr.msra.gmra.mrb[4].mxu0 %v8914_v11  ;;  %v1054_v11 = vld [vmem:[%s8425_s11 + $0xe00] sm:$0xff] }
 0x65a   : > { %3898 = vmatpush1.bf16.msra.mxu0 %v2050_v20  ;;  %3929 = vmatprep.mubr.bf16.mxu0 %v8930_v19  ;;  %v2074_v4 = vunpack.c.l.s8.bf16 %v1054_v11  ;;  %v2081_v19 = vunpack.c.h.s8.bf16 %v1055_v8  ;;  %v2080_v9 = vunpack.c.h.s8.bf16 %v1054_v11  ;;  %v1097_v20 = vld [vmem:[%s8425_s11 + $0xf58] sm:$0xff]  ;;  %v1096_v8 = vld [vmem:[%s8425_s11 + $0xf50] sm:$0xff] }
 0x65b   : > { %3899 = vmatprep.subr.bf16.mxu0 %v2057_v33  ;;  %v4229_v33 = vld [vmem:[%s8440_s30 + $0x308] sm:$0xff] }
 0x65e   : > { %3900 = vmatpush1.bf16.msra.mxu0 %v2056_v12  ;;  %v2152_v12 = vunpack.c.h.s8.bf16 %v1090_v30  ;;  %v4252_v30 = vld [vmem:[%s8440_s30 + $0x3c0] sm:$0xff] }
 0x65f   : > { %3901 = vmatprep.subr.bf16.mxu0 %v2063_v16  ;;  %v4469_v16 = vunpack.c.l.s8.bf16 %v4229_v33 }
 0x661   : > { %4662 = vmatprep.subr.bf16.mxu1 %v4469_v16  ;;  %v1120_v16 = vld [vmem:[%s8425_s11 + $0x1010] sm:$0xff] }
 0x662   : > { %3902 = vmatpush1.bf16.msra.mxu0 %v2062_v2  ;;  %v4475_v2 = vunpack.c.h.s8.bf16 %v4229_v33  ;;  %4663 = vmatpush1.bf16.msra.mxu1 %v4468_v61  ;;  %v4259_v61 = vld [vmem:[%s8440_s30 + $0x3f8] sm:$0xff] }
 0x663   : > { %3903 = vmatprep.subr.bf16.mxu0 %v2069_v7  ;;  %v2159_v7 = vunpack.c.l.s8.bf16 %v1097_v20 }
 0x664   : > { %4664 = vmatprep.subr.bf16.mxu1 %v4475_v2  ;;  %v4522_v2 = vunpack.c.h.s8.bf16 %v4252_v30 }
 0x666   : > { %3904 = vmatpush1.bf16.msra.mxu0 %v2068_v59  ;;  %v4235_v59 = vld [vmem:[%s8440_s30 + $0x338] sm:$0xff] }
 0x667   : > { %3905 = vmatprep.subr.bf16.mxu0 %v2075_v54  ;;  %v4474_v54 = vunpack.c.h.s8.bf16 %v4228_v53  ;;  %v4481_v11 = vunpack.c.l.s8.bf16 %v4235_v59 }
 0x669   : > { %4665 = vmatpush1.bf16.msra.mxu1 %v4474_v54 }
 0x66a   : > { %3906 = vmatpush1.bf16.msra.mxu0 %v2074_v4  ;;  %v4234_v4 = vld [vmem:[%s8440_s30 + $0x330] sm:$0xff]  ;;  %4666 = vmatprep.subr.bf16.mxu1 %v4481_v11 }
 0x66b   : > { %3907 = vmatprep.subr.bf16.mxu0 %v2081_v19  ;;  %v1103_v19 = vld [vmem:[%s8425_s11 + $0xf88] sm:$0xff]  ;;  %v4480_v6 = vunpack.c.l.s8.bf16 %v4234_v4  ;;  %v4486_v45 = vunpack.c.h.s8.bf16 %v4234_v4  ;;  %v2212_v4 = vunpack.c.h.s8.bf16 %v1120_v16 }
 0x66c   : > { %v2171_v52 = vunpack.c.l.s8.bf16 %v1103_v19 }
 0x66d   : > { %4667 = vmatpush1.bf16.msra.mxu1 %v4480_v6  ;;  %v1126_v6 = vld [vmem:[%s8425_s11 + $0x1040] sm:$0xff] }
 0x66e   : > { %3908 = vmatpush1.bf16.msra.mxu0 %v2080_v9  ;;  %v2164_v9 = vunpack.c.h.s8.bf16 %v1096_v8  ;;  %v2224_v39 = vunpack.c.h.s8.bf16 %v1126_v6 }
 0x66f   : > { %3909 = vmatprep.subr.bf16.mxu0 %v2087_v41  ;;  %v4487_v41 = vunpack.c.h.s8.bf16 %v4235_v59  ;;  %v4258_v59 = vld [vmem:[%s8440_s30 + $0x3f0] sm:$0xff] }
 0x670   : > { %v4528_v11 = vunpack.c.l.s8.bf16 %v4258_v59 }
 0x671   : > { %4668 = vmatprep.subr.bf16.mxu1 %v4487_v41  ;;  %v4534_v41 = vunpack.c.h.s8.bf16 %v4258_v59  ;;  %v1168_v59 = vld [vmem:[%s8425_s11 + $0x1190] sm:$0xff] }
 0x672   : > { %3910 = vmatpush1.bf16.msra.mxu0 %v2086_v42  ;;  %v1102_v42 = vld [vmem:[%s8425_s11 + $0xf80] sm:$0xff]  ;;  %4669 = vmatpush1.bf16.msra.mxu1 %v4486_v45 }
 0x673   : > { %3911 = vmatprep.subr.bf16.mxu0 %v2093_v43  ;;  %v4241_v43 = vld [vmem:[%s8440_s30 + $0x368] sm:$0xff] }
 0x676   : > { %3912 = vmatpush1.bf16.msra.mxu0 %v2092_v46  ;;  %v2170_v46 = vunpack.c.l.s8.bf16 %v1102_v42 }
 0x677   : > { %3913 = vmatprep.subr.bf16.mxu0 %v2099_v57  ;;  %v4493_v57 = vunpack.c.l.s8.bf16 %v4241_v43 }
 0x679   : > { %4670 = vmatprep.subr.bf16.mxu1 %v4493_v57 }
 0x67a   : > { %3914 = vmatpush1.bf16.msra.mxu0 %v2098_v47  ;;  %v2177_v47 = vunpack.c.h.s8.bf16 %v1103_v19  ;;  %4671 = vmatpush1.bf16.msra.mxu1 %v4492_v27 }
 0x67b   : > { %3915 = vmatprep.subr.bf16.mxu0 %v2105_v18  ;;  %v1109_v18 = vld [vmem:[%s8425_s11 + $0xfb8] sm:$0xff] }
 0x67c   : > { %v2183_v3 = vunpack.c.l.s8.bf16 %v1109_v18 }
 0x67e   : > { %3916 = vmatpush1.bf16.msra.mxu0 %v2104_v38  ;;  %v2176_v38 = vunpack.c.h.s8.bf16 %v1102_v42 }
 0x67f   : > { %3917 = vmatprep.subr.bf16.mxu0 %v2111_v26  ;;  %v4499_v26 = vunpack.c.h.s8.bf16 %v4241_v43  ;;  %v9420_v43 = vld [vmem:[%s8440_s30 + $0x420] sm:$0xff] }
 0x680   : > { %v4540_v57 = vunpack.c.l.s8.bf16 %v9420_v43 }
 0x681   : > { %4672 = vmatprep.subr.bf16.mxu1 %v4499_v26  ;;  %v1139_v26 = vld [vmem:[%s8425_s11 + $0x10a8] sm:$0xff] }
 0x682   : > { %3918 = vmatpush1.bf16.msra.mxu0 %v2110_v10  ;;  %v1108_v10 = vld [vmem:[%s8425_s11 + $0xfb0] sm:$0xff]  ;;  %4673 = vmatpush1.bf16.msra.mxu1 %v4498_v60 }
 0x683   : > { %3919 = vmatprep.subr.bf16.mxu0 %v2117_v14  ;;  %v4247_v14 = vld [vmem:[%s8440_s30 + $0x398] sm:$0xff] }
 0x686   : > { %3920 = vmatpush1.bf16.msra.mxu0 %v2116_v0  ;;  %v2182_v0 = vunpack.c.l.s8.bf16 %v1108_v10 }
 0x687   : > { %3921 = vmatprep.subr.bf16.mxu0 %v2123_v51  ;;  %v4505_v51 = vunpack.c.l.s8.bf16 %v4247_v14 }
 0x689   : > { %4674 = vmatprep.subr.bf16.mxu1 %v4505_v51  ;;  %v1145_v51 = vld [vmem:[%s8425_s11 + $0x10d8] sm:$0xff] }
 0x68a   : > { %3922 = vmatpush1.bf16.msra.mxu0 %v2122_v28  ;;  %v2189_v28 = vunpack.c.h.s8.bf16 %v1109_v18  ;;  %4675 = vmatpush1.bf16.msra.mxu1 %v4504_v63  ;;  %v1132_v18 = vld [vmem:[%s8425_s11 + $0x1070] sm:$0xff] }
 0x68b   : > { %3923 = vmatprep.subr.bf16.mxu0 %v2129_v35  ;;  %v1115_v35 = vld [vmem:[%s8425_s11 + $0xfe8] sm:$0xff]  ;;  %v2230_v27 = vunpack.c.l.s8.bf16 %v1132_v18 }
 0x68c   : > { %v2195_v22 = vunpack.c.l.s8.bf16 %v1115_v35 }
 0x68e   : > { %3924 = vmatpush1.bf16.msra.mxu0 %v2128_v29  ;;  %v2188_v29 = vunpack.c.h.s8.bf16 %v1108_v10  ;;  %v2243_v10 = vunpack.c.l.s8.bf16 %v1139_v26 }
 0x68f   : > { %3925 = vmatprep.subr.bf16.mxu0 %v2135_v21  ;;  %v4511_v21 = vunpack.c.h.s8.bf16 %v4247_v14  ;;  %v1138_v14 = vld [vmem:[%s8425_s11 + $0x10a0] sm:$0xff] }
 0x690   : > { %v2242_v60 = vunpack.c.l.s8.bf16 %v1138_v14  ;;  %v2248_v15 = vunpack.c.h.s8.bf16 %v1138_v14 }
 0x691   : > { %4676 = vmatprep.subr.bf16.mxu1 %v4511_v21  ;;  %v1151_v21 = vld [vmem:[%s8425_s11 + $0x1108] sm:$0xff] }
 0x692   : > { %3926 = vmatpush1.bf16.msra.mxu0 %v2134_v40  ;;  %v1114_v40 = vld [vmem:[%s8425_s11 + $0xfe0] sm:$0xff]  ;;  %4677 = vmatpush1.bf16.msra.mxu1 %v4510_v24  ;;  %v1157_v24 = vld [vmem:[%s8425_s11 + $0x1138] sm:$0xff] }
 0x693   : > { %3927 = vmatprep.subr.bf16.mxu0 %v2141_v23  ;;  %v4253_v23 = vld [vmem:[%s8440_s30 + $0x3c8] sm:$0xff]  ;;  %v2200_v33 = vunpack.c.h.s8.bf16 %v1114_v40 }
 0x694   : > { %v4523_v53 = vunpack.c.h.s8.bf16 %v4253_v23 }
 0x696   : > { %3928 = vmatpush1.bf16.msra.mxu0 %v2140_v13  ;;  %v2194_v13 = vunpack.c.l.s8.bf16 %v1114_v40  ;;  %v2267_v40 = vunpack.c.l.s8.bf16 %v1151_v21 }
 0x697   : > { %3940 = vmatprep.subr.bf16.mxu0 %v2147_v50  ;;  %v4517_v50 = vunpack.c.l.s8.bf16 %v4253_v23 }
 0x699   : > { %3930 = vmatmul.mubr.bf16.vlgmr.msra.gmra.mrb[4].mxu0 %v8968_v25  ;;  %v2158_v25 = vunpack.c.l.s8.bf16 %v1096_v8  ;;  %4678 = vmatprep.subr.bf16.mxu1 %v4517_v50  ;;  %v4529_v8 = vunpack.c.l.s8.bf16 %v4259_v61  ;;  %v2279_v50 = vunpack.c.l.s8.bf16 %v1157_v24 }
 0x69a   : > { %3941 = vmatpush1.bf16.msra.mxu0 %v2146_v55  ;;  %3972 = vmatprep.mubr.bf16.mxu0 %v8984_v37  ;;  %v2165_v37 = vunpack.c.h.s8.bf16 %v1097_v20  ;;  %v2201_v55 = vunpack.c.h.s8.bf16 %v1115_v35  ;;  %v4516_v20 = vunpack.c.l.s8.bf16 %v4252_v30  ;;  %v1144_v35 = vld [vmem:[%s8425_s11 + $0x10d0] sm:$0xff] }
 0x69b   : > { %3942 = vmatprep.subr.bf16.mxu0 %v2153_v36  ;;  %v1121_v36 = vld [vmem:[%s8425_s11 + $0x1018] sm:$0xff]  ;;  %v2254_v63 = vunpack.c.l.s8.bf16 %v1144_v35  ;;  %v1156_v30 = vld [vmem:[%s8425_s11 + $0x1130] sm:$0xff] }
 0x69c   : > { %4679 = vmatpush1.bf16.msra.mxu1 %v4516_v20  ;;  %v2213_v54 = vunpack.c.h.s8.bf16 %v1121_v36  ;;  %v1163_v20 = vld [vmem:[%s8425_s11 + $0x1168] sm:$0xff] }
 0x69d   : > { %4680 = vmatprep.subr.bf16.mxu1 %v4523_v53  ;;  %v2291_v53 = vunpack.c.l.s8.bf16 %v1163_v20 }
 0x69e   : > { %3943 = vmatpush1.bf16.msra.mxu0 %v2152_v12  ;;  %v2207_v12 = vunpack.c.l.s8.bf16 %v1121_v36  ;;  %v2285_v36 = vunpack.c.h.s8.bf16 %v1157_v24 }
 0x69f   : > { %3944 = vmatprep.subr.bf16.mxu0 %v2159_v7  ;;  %v2206_v7 = vunpack.c.l.s8.bf16 %v1120_v16 }
 0x6a0   : > { %4681 = vmatpush1.bf16.msra.mxu1 %v4522_v2  ;;  %v1169_v2 = vld [vmem:[%s8425_s11 + $0x1198] sm:$0xff] }
 0x6a1   : > { %4682 = vmatprep.subr.bf16.mxu1 %v4529_v8  ;;  %v2303_v8 = vunpack.c.l.s8.bf16 %v1169_v2 }
 0x6a2   : > { %3945 = vmatpush1.bf16.msra.mxu0 %v2158_v25  ;;  %v1127_v25 = vld [vmem:[%s8425_s11 + $0x1048] sm:$0xff] }
 0x6a3   : > { %3946 = vmatprep.subr.bf16.mxu0 %v2165_v37  ;;  %v4535_v37 = vunpack.c.h.s8.bf16 %v4259_v61  ;;  %v2219_v19 = vunpack.c.l.s8.bf16 %v1127_v25  ;;  %v2225_v45 = vunpack.c.h.s8.bf16 %v1127_v25  ;;  %v2297_v61 = vunpack.c.h.s8.bf16 %v1163_v20 }
 0x6a4   : > { %4683 = vmatpush1.bf16.msra.mxu1 %v4528_v11  ;;  %v2309_v25 = vunpack.c.h.s8.bf16 %v1169_v2  ;;  %v1175_v11 = vld [vmem:[%s8425_s11 + $0x11c8] sm:$0xff] }
 0x6a5   : > { %4684 = vmatprep.subr.bf16.mxu1 %v4535_v37  ;;  %v2315_v37 = vunpack.c.l.s8.bf16 %v1175_v11 }
 0x6a6   : > { %3947 = vmatpush1.bf16.msra.mxu0 %v2164_v9  ;;  %v9416_v9 = vld [vmem:[%s8440_s30 + $0x428] sm:$0xff] }
 0x6a7   : > { %3948 = vmatprep.subr.bf16.mxu0 %v2171_v52  ;;  %v2218_v52 = vunpack.c.l.s8.bf16 %v1126_v6  ;;  %v4541_v42 = vunpack.c.l.s8.bf16 %v9416_v9 }
 0x6a8   : > { %4685 = vmatpush1.bf16.msra.mxu1 %v4534_v41  ;;  %v2321_v41 = vunpack.c.h.s8.bf16 %v1175_v11 }
 0x6a9   : > { %4686 = vmatprep.subr.bf16.mxu1 %v4541_v42 }
 0x6aa   : > { %3949 = vmatpush1.bf16.msra.mxu0 %v2170_v46  ;;  %v1133_v46 = vld [vmem:[%s8425_s11 + $0x1078] sm:$0xff] }
 0x6ab   : > { %3950 = vmatprep.subr.bf16.mxu0 %v2177_v47  ;;  %v2231_v47 = vunpack.c.l.s8.bf16 %v1133_v46 }
 0x6ac   : > { %4687 = vmatpush1.bf16.msra.mxu1 %v4540_v57 }
 0x6ae   : > { %3951 = vmatpush1.bf16.msra.mxu0 %v2176_v38  ;;  %v2237_v38 = vunpack.c.h.s8.bf16 %v1133_v46  ;;  %v1180_v46 = vld [vmem:[%s8425_s11 + $0x11f0] sm:$0xff] }
 0x6af   : > { %3952 = vmatprep.subr.bf16.mxu0 %v2183_v3  ;;  %v2236_v3 = vunpack.c.h.s8.bf16 %v1132_v18  ;;  %v2326_v57 = vunpack.c.l.s8.bf16 %v1180_v46  ;;  %v4547_v18 = vunpack.c.h.s8.bf16 %v9416_v9  ;;  %v9450_v9 = vsub.s32 4, %v9201_v31 }
 0x6b1   : > { %4688 = vmatprep.subr.bf16.mxu1 %v4547_v18 }
 0x6b2   : > { %3953 = vmatpush1.bf16.msra.mxu0 %v2182_v0  ;;  %v2249_v0 = vunpack.c.h.s8.bf16 %v1139_v26 }
 0x6b3   : > { %3954 = vmatprep.subr.bf16.mxu0 %v2189_v28  ;;  %v2255_v28 = vunpack.c.l.s8.bf16 %v1145_v51 }
 0x6b6   : > { %3955 = vmatpush1.bf16.msra.mxu0 %v2188_v29  ;;  %v2261_v29 = vunpack.c.h.s8.bf16 %v1145_v51  ;;  %v7431_v51 = vld [vmem:[%s8432_s7] sm:$0x3f] }
 0x6b7   : > { %3956 = vmatprep.subr.bf16.mxu0 %v2195_v22  ;;  %v2260_v22 = vunpack.c.h.s8.bf16 %v1144_v35  ;;  %v7432_v35 = vld [vmem:[%s8438_s6] sm:$0x3f] }
 0x6ba   : > { %3957 = vmatpush1.bf16.msra.mxu0 %v2194_v13 }
 0x6bb   : > { %3958 = vmatprep.subr.bf16.mxu0 %v2201_v55  ;;  %v2278_v55 = vunpack.c.l.s8.bf16 %v1156_v30 }
 0x6be   : > { %3959 = vmatpush1.bf16.msra.mxu0 %v2200_v33  ;;  %v2284_v33 = vunpack.c.h.s8.bf16 %v1156_v30 }
 0x6bf   : > { %3960 = vmatprep.subr.bf16.mxu0 %v2207_v12  ;;  %v1162_v12 = vld [vmem:[%s8425_s11 + $0x1160] sm:$0xff] }
 0x6c0   : > { %v2290_v16 = vunpack.c.l.s8.bf16 %v1162_v12 }
 0x6c2   : > { %3961 = vmatpush1.bf16.msra.mxu0 %v2206_v7  ;;  %v2296_v7 = vunpack.c.h.s8.bf16 %v1162_v12 }
 0x6c3   : > { %3962 = vmatprep.subr.bf16.mxu0 %v2213_v54  ;;  %v2302_v54 = vunpack.c.l.s8.bf16 %v1168_v59 }
 0x6c6   : > { %3963 = vmatpush1.bf16.msra.mxu0 %v2212_v4  ;;  %v2308_v4 = vunpack.c.h.s8.bf16 %v1168_v59 }
 0x6c7   : > { %3964 = vmatprep.subr.bf16.mxu0 %v2219_v19  ;;  %v1174_v19 = vld [vmem:[%s8425_s11 + $0x11c0] sm:$0xff] }
 0x6c8   : > { %v2314_v6 = vunpack.c.l.s8.bf16 %v1174_v19  ;;  %v2320_v42 = vunpack.c.h.s8.bf16 %v1174_v19 }
 0x6ca   : > { %3965 = vmatpush1.bf16.msra.mxu0 %v2218_v52  ;;  %v1181_v52 = vld [vmem:[%s8425_s11 + $0x11f8] sm:$0xff] }
 0x6cb   : > { %3966 = vmatprep.subr.bf16.mxu0 %v2225_v45  ;;  %v2327_v45 = vunpack.c.l.s8.bf16 %v1181_v52 }
 0x6ce   : > { %3967 = vmatpush1.bf16.msra.mxu0 %v2224_v39  ;;  %v2333_v39 = vunpack.c.h.s8.bf16 %v1181_v52 }
 0x6cf   : > { %3968 = vmatprep.subr.bf16.mxu0 %v2231_v47  ;;  %v2332_v47 = vunpack.c.h.s8.bf16 %v1180_v46 }
 0x6d2   : > { %3969 = vmatpush1.bf16.msra.mxu0 %v2230_v27  ;;  %v4546_v27 = vunpack.c.h.s8.bf16 %v9420_v43  ;;  %v9453_v43 = vsub.s32 5, %v9201_v31 }
 0x6d3   : > { %3970 = vmatprep.subr.bf16.mxu0 %v2237_v38  ;;  %v4271_v38 = vld [vmem:[%s8440_s30 + $0x458] sm:$0xff] }
 0x6d4   : > { %4689 = vmatpush1.bf16.msra.mxu1 %v4546_v27  ;;  %v4553_v26 = vunpack.c.l.s8.bf16 %v4271_v38  ;;  %v4559_v14 = vunpack.c.h.s8.bf16 %v4271_v38  ;;  %v4159_v27 = vld [vmem:[%s8440_s30 + $0xd8] sm:$0xff] }
 0x6d6   : > { %3971 = vmatpush1.bf16.msra.mxu0 %v2236_v3  ;;  %v4270_v3 = vld [vmem:[%s8440_s30 + $0x450] sm:$0xff]  ;;  %4690 = vmatprep.subr.bf16.mxu1 %v4553_v26  ;;  %v4327_v26 = vunpack.c.l.s8.bf16 %v4159_v27 }
 0x6d7   : > { %3983 = vmatprep.subr.bf16.mxu0 %v2243_v10  ;;  %v4552_v10 = vunpack.c.l.s8.bf16 %v4270_v3 }
 0x6d9   : > { %3973 = vmatmul.mubr.bf16.vlgmr.msra.gmra.mrb[4].mxu0 %v9022_v49  ;;  %v1150_v49 = vld [vmem:[%s8425_s11 + $0x1100] sm:$0xff]  ;;  %4691 = vmatpush1.bf16.msra.mxu1 %v4552_v10  ;;  %s9719_s11 = sld [smem:[#allocation27_spill]] }
 0x6da   : > { %3984 = vmatpush1.bf16.msra.mxu0 %v2242_v60  ;;  %4015 = vmatprep.mubr.bf16.mxu0 %v9038_v34  ;;  %v2266_v23 = vunpack.c.l.s8.bf16 %v1150_v49  ;;  %v2273_v34 = vunpack.c.h.s8.bf16 %v1151_v21  ;;  %v2272_v13 = vunpack.c.h.s8.bf16 %v1150_v49  ;;  %v4558_v60 = vunpack.c.h.s8.bf16 %v4270_v3  ;;  %v4158_v3 = vld [vmem:[%s8440_s30 + $0xd0] sm:$0xff] }
 0x6db   : > { %3985 = vmatprep.subr.bf16.mxu0 %v2249_v0  ;;  %4692 = vmatprep.subr.bf16.mxu1 %v4559_v14  ;;  %v4135_v0 = vld [vmem:[%s8440_s30 + $0x18] sm:$0xff]  ;;  %v4095_v21 = vrot.slane %v7432_v35, %v9453_v43  ;;  %v4326_v10 = vunpack.c.l.s8.bf16 %v4158_v3  ;;  %v4333_v14 = vunpack.c.h.s8.bf16 %v4159_v27 }
 0x6dd   : > { %4693 = vmatpush1.bf16.msra.mxu1 %v4558_v60  ;;  %v4165_v60 = vld [vmem:[%s8440_s30 + $0x108] sm:$0xff] }
 0x6de   : > { %3986 = vmatpush1.bf16.msra.mxu0 %v2248_v15  ;;  %v4047_v15 = vrot.slane %v7431_v51, %v9450_v9 }
 0x6df   : > { %3987 = vmatprep.subr.bf16.mxu0 %v2255_v28  ;;  %v4051_v28 = vrot.slane %v7431_v51, %v9453_v43  ;;  %v4164_v51 = vld [vmem:[%s8440_s30 + $0x100] sm:$0xff]  ;;  %p6837_p4 = scmp.ne.s32.totalorder %s9719_s11, 1 }
 0x6e0   : > { %vm8016_vm0 = vmmov (!%p6837_p4), 0  }
 0x6e2   : > { %3988 = vmatpush1.bf16.msra.mxu0 %v2254_v63  ;;  %v4091_v63 = vrot.slane %v7432_v35, %v9450_v9  ;;  %v4171_v35 = vld [vmem:[%s8440_s30 + $0x138] sm:$0xff] }
 0x6e3   : > { %3989 = vmatprep.subr.bf16.mxu0 %v2261_v29 }
 0x6e6   : > { %3990 = vmatpush1.bf16.msra.mxu0 %v2260_v22 }
 0x6e7   : > { %3991 = vmatprep.subr.bf16.mxu0 %v2267_v40 }
 0x6ea   : > { %3992 = vmatpush1.bf16.msra.mxu0 %v2266_v23 }
 0x6eb   : > { %3993 = vmatprep.subr.bf16.mxu0 %v2273_v34 }
 0x6ee   : > { %3994 = vmatpush1.bf16.msra.mxu0 %v2272_v13 }
 0x6ef   : > { %3995 = vmatprep.subr.bf16.mxu0 %v2279_v50 }
 0x6f2   : > { %3996 = vmatpush1.bf16.msra.mxu0 %v2278_v55 }
 0x6f3   : > { %3997 = vmatprep.subr.bf16.mxu0 %v2285_v36 }
 0x6f6   : > { %3998 = vmatpush1.bf16.msra.mxu0 %v2284_v33  ;;  %v4134_v33 = vld [vmem:[%s8440_s30 + $0x10] sm:$0xff] }
 0x6f7   : > { %3999 = vmatprep.subr.bf16.mxu0 %v2291_v53  ;;  %v4278_v2 = vunpack.c.l.s8.bf16 %v4134_v33  ;;  %v4284_v59 = vunpack.c.h.s8.bf16 %v4134_v33 }
 0x6fa   : > { %4000 = vmatpush1.bf16.msra.mxu0 %v2290_v16 }
 0x6fb   : > { %4001 = vmatprep.subr.bf16.mxu0 %v2297_v61 }
 0x6fe   : > { %4002 = vmatpush1.bf16.msra.mxu0 %v2296_v7  ;;  %v4285_v7 = vunpack.c.h.s8.bf16 %v4135_v0 }
 0x6ff   : > { %4003 = vmatprep.subr.bf16.mxu0 %v2303_v8  ;;  %v4141_v8 = vld [vmem:[%s8440_s30 + $0x48] sm:$0xff] }
 0x702   : > { %4004 = vmatpush1.bf16.msra.mxu0 %v2302_v54  ;;  %v4291_v54 = vunpack.c.l.s8.bf16 %v4141_v8 }
 0x703   : > { %4005 = vmatprep.subr.bf16.mxu0 %v2309_v25  ;;  %v4140_v25 = vld [vmem:[%s8440_s30 + $0x40] sm:$0xff] }
 0x704   : > { %v4290_v11 = vunpack.c.l.s8.bf16 %v4140_v25  ;;  %v4296_v19 = vunpack.c.h.s8.bf16 %v4140_v25 }
 0x706   : > { %4006 = vmatpush1.bf16.msra.mxu0 %v2308_v4  ;;  %v4297_v4 = vunpack.c.h.s8.bf16 %v4141_v8 }
 0x707   : > { %4007 = vmatprep.subr.bf16.mxu0 %v2315_v37  ;;  %v4147_v37 = vld [vmem:[%s8440_s30 + $0x78] sm:$0xff] }
 0x70a   : > { %4008 = vmatpush1.bf16.msra.mxu0 %v2314_v6  ;;  %v4303_v6 = vunpack.c.l.s8.bf16 %v4147_v37 }
 0x70b   : > { %4009 = vmatprep.subr.bf16.mxu0 %v2321_v41  ;;  %v4146_v41 = vld [vmem:[%s8440_s30 + $0x70] sm:$0xff] }
 0x70c   : > { %v4302_v52 = vunpack.c.l.s8.bf16 %v4146_v41  ;;  %v4308_v46 = vunpack.c.h.s8.bf16 %v4146_v41 }
 0x70e   : > { %4010 = vmatpush1.bf16.msra.mxu0 %v2320_v42  ;;  %v4309_v42 = vunpack.c.h.s8.bf16 %v4147_v37 }
 0x70f   : > { %4011 = vmatprep.subr.bf16.mxu0 %v2327_v45  ;;  %v4153_v45 = vld [vmem:[%s8440_s30 + $0xa8] sm:$0xff] }
 0x710   : > { %v4321_v18 = vunpack.c.h.s8.bf16 %v4153_v45 }
 0x712   : > { %4012 = vmatpush1.bf16.msra.mxu0 %v2326_v57  ;;  %v4315_v57 = vunpack.c.l.s8.bf16 %v4153_v45 }
 0x713   : > { %4013 = vmatprep.subr.bf16.mxu0 %v2333_v39  ;;  %v4152_v39 = vld [vmem:[%s8440_s30 + $0xa0] sm:$0xff] }
 0x714   : > { %v4320_v38 = vunpack.c.h.s8.bf16 %v4152_v39 }
 0x716   : > { %4014 = vmatpush1.bf16.msra.mxu0 %v2332_v47  ;;  %v4314_v47 = vunpack.c.l.s8.bf16 %v4152_v39 }
 0x719   : > { %4016 = vmatmul.mubr.bf16.vlgmr.msra.gmra.mrb[4].mxu0 %v9076_v62  ;;  %v4279_v62 = vunpack.c.l.s8.bf16 %v4135_v0  ;;  %v4332_v0 = vunpack.c.h.s8.bf16 %v4158_v3 }
 0x71b   : > { %4705 = vmatprep.subr.bf16.mxu1 %v4279_v62  ;;  %v4339_v62 = vunpack.c.l.s8.bf16 %v4165_v60 }
 0x7ec   : > { %v4017_v29 = vpop.f32.mrb[4].mxu0 }
 0x7ed   : > { %v4062_v22 = vmul.f32 %v4047_v15, %v4017_v29  ;;  %v4019_v40 = vpop.f32.mrb[5].mxu0  ;;  %v4351_v29 = vunpack.c.l.s8.bf16 %v4171_v35 }
 0x7ee   : > { %v4063_v49 = vmul.f32 %v4051_v28, %v4019_v40  ;;  %v4021_v23 = vpop.f32.mrb[6].mxu0  ;;  %v4357_v40 = vunpack.c.h.s8.bf16 %v4171_v35 }
 0x7ef   : > { %v4106_v34 = vadd.f32 %v4091_v63, %v4062_v22  ;;  %v4068_v24 = vmul.f32 %v4047_v15, %v4021_v23  ;;  %v4023_v31 = vpop.f32.mrb[7].mxu0  ;;  %v4338_v15 = vunpack.c.l.s8.bf16 %v4164_v51 }
 0x7f0   : > { %v4107_v13 = vadd.f32 %v4095_v21, %v4063_v49  ;;  %v4069_v50 = vmul.f32 %v4051_v28, %v4023_v31  ;;  %v4345_v28 = vunpack.c.h.s8.bf16 %v4165_v60  ;;  %v4177_v49 = vld [vmem:[%s8440_s30 + $0x168] sm:$0xff] }
 0x7f1   : > { %v4112_v30 = vadd.f32 %v4091_v63, %v4068_v24  ;;  %v4118_v36 = vmax.f32 %v4106_v34, 0.0  ;;  %v4344_v63 = vunpack.c.h.s8.bf16 %v4164_v51  ;;  %v4363_v34 = vunpack.c.l.s8.bf16 %v4177_v49  ;;  %v4176_v24 = vld [vmem:[%s8440_s30 + $0x160] sm:$0xff] }
 0x7f2   : > { %v4113_v55 = vadd.f32 %v4095_v21, %v4069_v50  ;;  %v4119_v53 = vmax.f32 %v4107_v13, 0.0  ;;  %v4170_v21 = vld [vmem:[%s8440_s30 + $0x130] sm:$0xff]  ;;  %v4362_v31 = vunpack.c.l.s8.bf16 %v4176_v24  ;;  %v4369_v13 = vunpack.c.h.s8.bf16 %v4177_v49  ;;  %v4183_v50 = vld [vmem:[%s8440_s30 + $0x198] sm:$0xff] }
 0x7f3   : > { %v4124_v20 = vmax.f32 %v4112_v30, 0.0  ;;  %v4350_v22 = vunpack.c.l.s8.bf16 %v4170_v21  ;;  %v4356_v23 = vunpack.c.h.s8.bf16 %v4170_v21  ;;  %v4368_v30 = vunpack.c.h.s8.bf16 %v4176_v24 }
 0x7f4   : > { %v4125_v12 = vmax.f32 %v4113_v55, 0.0  ;;  %v4375_v55 = vunpack.c.l.s8.bf16 %v4183_v50  ;;  %v4381_v33 = vunpack.c.h.s8.bf16 %v4183_v50 }
 0x7f5   : > { %v9462_v16 = vpack.c.bf16 %v4124_v20, %v4118_v36  ;;  %v4182_v36 = vld [vmem:[%s8440_s30 + $0x190] sm:$0xff] }
 0x7f6   : > { %v9464_v61 = vpack.c.bf16 %v4125_v12, %v4119_v53  ;;  %v4374_v20 = vunpack.c.l.s8.bf16 %v4182_v36  ;;  %v4189_v53 = vld [vmem:[%s8440_s30 + $0x1c8] sm:$0xff]  ;;  %v4380_v12 = vunpack.c.h.s8.bf16 %v4182_v36 }
 0x7f8   : > { %4694 = vmatprep.mubr.bf16.mxu1 %v9464_v61 }
 0x7f9   : > { %4695 = vmatmul.mubr.bf16.vlgmr.msra.gmra.mrb[8].mxu1 %v9462_v16 }
 0x7fa   : > { %4706 = vmatpush1.bf16.msra.mxu1 %v4278_v2  ;;  %4737 = vmatprep.mubr.bf16.mxu1 %v9234_v56  ;;  %v4387_v2 = vunpack.c.l.s8.bf16 %v4189_v53 }
 0x7fb   : > { %4707 = vmatprep.subr.bf16.mxu1 %v4285_v7  ;;  %v4188_v7 = vld [vmem:[%s8440_s30 + $0x1c0] sm:$0xff] }
 0x7fc   : > { %v4386_v8 = vunpack.c.l.s8.bf16 %v4188_v7  ;;  %v4392_v25 = vunpack.c.h.s8.bf16 %v4188_v7 }
 0x7fe   : > { %4708 = vmatpush1.bf16.msra.mxu1 %v4284_v59  ;;  %v4393_v59 = vunpack.c.h.s8.bf16 %v4189_v53 }
 0x7ff   : > { %4709 = vmatprep.subr.bf16.mxu1 %v4291_v54  ;;  %v4195_v54 = vld [vmem:[%s8440_s30 + $0x1f8] sm:$0xff] }
 0x802   : > { %4710 = vmatpush1.bf16.msra.mxu1 %v4290_v11  ;;  %v4399_v11 = vunpack.c.l.s8.bf16 %v4195_v54 }
 0x803   : > { %4711 = vmatprep.subr.bf16.mxu1 %v4297_v4  ;;  %v4194_v4 = vld [vmem:[%s8440_s30 + $0x1f0] sm:$0xff] }
 0x804   : > { %v4398_v37 = vunpack.c.l.s8.bf16 %v4194_v4  ;;  %v4404_v41 = vunpack.c.h.s8.bf16 %v4194_v4 }
 0x806   : > { %4712 = vmatpush1.bf16.msra.mxu1 %v4296_v19  ;;  %v4405_v19 = vunpack.c.h.s8.bf16 %v4195_v54 }
 0x807   : > { %4713 = vmatprep.subr.bf16.mxu1 %v4303_v6  ;;  %v4201_v6 = vld [vmem:[%s8440_s30 + $0x228] sm:$0xff] }
 0x80a   : > { %4714 = vmatpush1.bf16.msra.mxu1 %v4302_v52  ;;  %v4411_v52 = vunpack.c.l.s8.bf16 %v4201_v6 }
 0x80b   : > { %4715 = vmatprep.subr.bf16.mxu1 %v4309_v42  ;;  %v4200_v42 = vld [vmem:[%s8440_s30 + $0x220] sm:$0xff] }
 0x80c   : > { %v4410_v45 = vunpack.c.l.s8.bf16 %v4200_v42  ;;  %v4416_v39 = vunpack.c.h.s8.bf16 %v4200_v42 }
 0x80e   : > { %4716 = vmatpush1.bf16.msra.mxu1 %v4308_v46  ;;  %v4417_v46 = vunpack.c.h.s8.bf16 %v4201_v6 }
 0x80f   : > { %4717 = vmatprep.subr.bf16.mxu1 %v4315_v57  ;;  %v4207_v57 = vld [vmem:[%s8440_s30 + $0x258] sm:$0xff] }
 0x812   : > { %4718 = vmatpush1.bf16.msra.mxu1 %v4314_v47  ;;  %v4423_v47 = vunpack.c.l.s8.bf16 %v4207_v57 }
 0x813   : > { %4719 = vmatprep.subr.bf16.mxu1 %v4321_v18  ;;  %v4206_v18 = vld [vmem:[%s8440_s30 + $0x250] sm:$0xff] }
 0x814   : > { %v4422_v27 = vunpack.c.l.s8.bf16 %v4206_v18  ;;  %v4428_v3 = vunpack.c.h.s8.bf16 %v4206_v18 }
 0x816   : > { %4720 = vmatpush1.bf16.msra.mxu1 %v4320_v38  ;;  %v4429_v38 = vunpack.c.h.s8.bf16 %v4207_v57 }
 0x817   : > { %4721 = vmatprep.subr.bf16.mxu1 %v4327_v26  ;;  %v4213_v26 = vld [vmem:[%s8440_s30 + $0x288] sm:$0xff] }
 0x81a   : > { %4722 = vmatpush1.bf16.msra.mxu1 %v4326_v10  ;;  %v4435_v10 = vunpack.c.l.s8.bf16 %v4213_v26 }
 0x81b   : > { %4723 = vmatprep.subr.bf16.mxu1 %v4333_v14  ;;  %v4212_v14 = vld [vmem:[%s8440_s30 + $0x280] sm:$0xff] }
 0x81c   : > { %v4434_v60 = vunpack.c.l.s8.bf16 %v4212_v14  ;;  %v4440_v51 = vunpack.c.h.s8.bf16 %v4212_v14 }
 0x81e   : > { %4724 = vmatpush1.bf16.msra.mxu1 %v4332_v0  ;;  %v4441_v0 = vunpack.c.h.s8.bf16 %v4213_v26 }
 0x81f   : > { %4725 = vmatprep.subr.bf16.mxu1 %v4339_v62  ;;  %v4219_v62 = vld [vmem:[%s8440_s30 + $0x2b8] sm:$0xff] }
 0x822   : > { %4726 = vmatpush1.bf16.msra.mxu1 %v4338_v15  ;;  %v4447_v15 = vunpack.c.l.s8.bf16 %v4219_v62 }
 0x823   : > { %4727 = vmatprep.subr.bf16.mxu1 %v4345_v28  ;;  %v4218_v28 = vld [vmem:[%s8440_s30 + $0x2b0] sm:$0xff] }
 0x824   : > { %v4446_v35 = vunpack.c.l.s8.bf16 %v4218_v28  ;;  %v4452_v21 = vunpack.c.h.s8.bf16 %v4218_v28 }
 0x826   : > { %4728 = vmatpush1.bf16.msra.mxu1 %v4344_v63  ;;  %v4453_v63 = vunpack.c.h.s8.bf16 %v4219_v62 }
 0x827   : > { %4729 = vmatprep.subr.bf16.mxu1 %v4351_v29  ;;  %v4225_v29 = vld [vmem:[%s8440_s30 + $0x2e8] sm:$0xff] }
 0x82a   : > { %4730 = vmatpush1.bf16.msra.mxu1 %v4350_v22  ;;  %v4459_v22 = vunpack.c.l.s8.bf16 %v4225_v29 }
 0x82b   : > { %4731 = vmatprep.subr.bf16.mxu1 %v4357_v40  ;;  %v4224_v40 = vld [vmem:[%s8440_s30 + $0x2e0] sm:$0xff] }
 0x82c   : > { %v4458_v49 = vunpack.c.l.s8.bf16 %v4224_v40  ;;  %v4464_v24 = vunpack.c.h.s8.bf16 %v4224_v40 }
 0x82e   : > { %4732 = vmatpush1.bf16.msra.mxu1 %v4356_v23  ;;  %v4465_v23 = vunpack.c.h.s8.bf16 %v4225_v29 }
 0x82f   : > { %4733 = vmatprep.subr.bf16.mxu1 %v4363_v34  ;;  %v4231_v34 = vld [vmem:[%s8440_s30 + $0x318] sm:$0xff] }
 0x832   : > { %4734 = vmatpush1.bf16.msra.mxu1 %v4362_v31  ;;  %v4471_v31 = vunpack.c.l.s8.bf16 %v4231_v34 }
 0x833   : > { %4735 = vmatprep.subr.bf16.mxu1 %v4369_v13  ;;  %v4230_v13 = vld [vmem:[%s8440_s30 + $0x310] sm:$0xff] }
 0x834   : > { %v4470_v50 = vunpack.c.l.s8.bf16 %v4230_v13  ;;  %v4476_v36 = vunpack.c.h.s8.bf16 %v4230_v13 }
 0x836   : > { %4736 = vmatpush1.bf16.msra.mxu1 %v4368_v30  ;;  %v4477_v30 = vunpack.c.h.s8.bf16 %v4231_v34 }
 0x837   : > { %4748 = vmatprep.subr.bf16.mxu1 %v4375_v55  ;;  %v4237_v55 = vld [vmem:[%s8440_s30 + $0x348] sm:$0xff] }
 0x839   : > { %4738 = vmatmul.mubr.bf16.vlgmr.msra.gmra.mrb[12].mxu1 %v9232_v48 }
 0x83a   : > { %4749 = vmatpush1.bf16.msra.mxu1 %v4374_v20  ;;  %4780 = vmatprep.mubr.bf16.mxu1 %v9305_v44  ;;  %v4483_v20 = vunpack.c.l.s8.bf16 %v4237_v55 }
 0x83b   : > { %4750 = vmatprep.subr.bf16.mxu1 %v4381_v33  ;;  %v4236_v33 = vld [vmem:[%s8440_s30 + $0x340] sm:$0xff] }
 0x83c   : > { %v4482_v53 = vunpack.c.l.s8.bf16 %v4236_v33  ;;  %v4488_v7 = vunpack.c.h.s8.bf16 %v4236_v33 }
 0x83e   : > { %4751 = vmatpush1.bf16.msra.mxu1 %v4380_v12  ;;  %v4489_v12 = vunpack.c.h.s8.bf16 %v4237_v55 }
 0x83f   : > { %4752 = vmatprep.subr.bf16.mxu1 %v4387_v2  ;;  %v4243_v2 = vld [vmem:[%s8440_s30 + $0x378] sm:$0xff] }
 0x842   : > { %4753 = vmatpush1.bf16.msra.mxu1 %v4386_v8  ;;  %v4495_v8 = vunpack.c.l.s8.bf16 %v4243_v2 }
 0x843   : > { %4754 = vmatprep.subr.bf16.mxu1 %v4393_v59  ;;  %v4242_v59 = vld [vmem:[%s8440_s30 + $0x370] sm:$0xff] }
 0x844   : > { %v4494_v54 = vunpack.c.l.s8.bf16 %v4242_v59  ;;  %v4500_v4 = vunpack.c.h.s8.bf16 %v4242_v59 }
 0x846   : > { %4755 = vmatpush1.bf16.msra.mxu1 %v4392_v25  ;;  %v4501_v25 = vunpack.c.h.s8.bf16 %v4243_v2 }
 0x847   : > { %4756 = vmatprep.subr.bf16.mxu1 %v4399_v11  ;;  %v4249_v11 = vld [vmem:[%s8440_s30 + $0x3a8] sm:$0xff] }
 0x84a   : > { %4757 = vmatpush1.bf16.msra.mxu1 %v4398_v37  ;;  %v4507_v37 = vunpack.c.l.s8.bf16 %v4249_v11 }
 0x84b   : > { %4758 = vmatprep.subr.bf16.mxu1 %v4405_v19  ;;  %v4248_v19 = vld [vmem:[%s8440_s30 + $0x3a0] sm:$0xff] }
 0x84c   : > { %v4506_v6 = vunpack.c.l.s8.bf16 %v4248_v19  ;;  %v4512_v42 = vunpack.c.h.s8.bf16 %v4248_v19 }
 0x84e   : > { %4759 = vmatpush1.bf16.msra.mxu1 %v4404_v41  ;;  %v4513_v41 = vunpack.c.h.s8.bf16 %v4249_v11  ;;  %v4154_v11 = vld [vmem:[%s8440_s30 + $0xb0] sm:$0xff] }
 0x84f   : > { %4760 = vmatprep.subr.bf16.mxu1 %v4411_v52  ;;  %v4255_v52 = vld [vmem:[%s8440_s30 + $0x3d8] sm:$0xff] }
 0x852   : > { %4761 = vmatpush1.bf16.msra.mxu1 %v4410_v45  ;;  %v4519_v45 = vunpack.c.l.s8.bf16 %v4255_v52 }
 0x853   : > { %4762 = vmatprep.subr.bf16.mxu1 %v4417_v46  ;;  %v4254_v46 = vld [vmem:[%s8440_s30 + $0x3d0] sm:$0xff] }
 0x854   : > { %v4518_v57 = vunpack.c.l.s8.bf16 %v4254_v46  ;;  %v4524_v18 = vunpack.c.h.s8.bf16 %v4254_v46 }
 0x856   : > { %4763 = vmatpush1.bf16.msra.mxu1 %v4416_v39  ;;  %v4525_v39 = vunpack.c.h.s8.bf16 %v4255_v52 }
 0x857   : > { %4764 = vmatprep.subr.bf16.mxu1 %v4423_v47  ;;  %v4261_v47 = vld [vmem:[%s8440_s30 + $0x408] sm:$0xff] }
 0x85a   : > { %4765 = vmatpush1.bf16.msra.mxu1 %v4422_v27  ;;  %v4531_v27 = vunpack.c.l.s8.bf16 %v4261_v47 }
 0x85b   : > { %4766 = vmatprep.subr.bf16.mxu1 %v4429_v38  ;;  %v4260_v38 = vld [vmem:[%s8440_s30 + $0x400] sm:$0xff] }
 0x85c   : > { %v4530_v26 = vunpack.c.l.s8.bf16 %v4260_v38  ;;  %v4536_v14 = vunpack.c.h.s8.bf16 %v4260_v38 }
 0x85e   : > { %4767 = vmatpush1.bf16.msra.mxu1 %v4428_v3  ;;  %v4537_v3 = vunpack.c.h.s8.bf16 %v4261_v47 }
 0x85f   : > { %4768 = vmatprep.subr.bf16.mxu1 %v4435_v10  ;;  %v4267_v10 = vld [vmem:[%s8440_s30 + $0x438] sm:$0xff] }
 0x862   : > { %4769 = vmatpush1.bf16.msra.mxu1 %v4434_v60  ;;  %v4543_v60 = vunpack.c.l.s8.bf16 %v4267_v10 }
 0x863   : > { %4770 = vmatprep.subr.bf16.mxu1 %v4441_v0  ;;  %v4266_v0 = vld [vmem:[%s8440_s30 + $0x430] sm:$0xff] }
 0x864   : > { %v4542_v62 = vunpack.c.l.s8.bf16 %v4266_v0  ;;  %v4548_v28 = vunpack.c.h.s8.bf16 %v4266_v0 }
 0x866   : > { %4771 = vmatpush1.bf16.msra.mxu1 %v4440_v51  ;;  %v4549_v51 = vunpack.c.h.s8.bf16 %v4267_v10 }
 0x867   : > { %4772 = vmatprep.subr.bf16.mxu1 %v4447_v15  ;;  %v4273_v15 = vld [vmem:[%s8440_s30 + $0x468] sm:$0xff] }
 0x86a   : > { %4773 = vmatpush1.bf16.msra.mxu1 %v4446_v35  ;;  %v4555_v35 = vunpack.c.l.s8.bf16 %v4273_v15 }
 0x86b   : > { %4774 = vmatprep.subr.bf16.mxu1 %v4453_v63  ;;  %v4272_v63 = vld [vmem:[%s8440_s30 + $0x460] sm:$0xff] }
 0x86c   : > { %v4554_v29 = vunpack.c.l.s8.bf16 %v4272_v63  ;;  %v4560_v40 = vunpack.c.h.s8.bf16 %v4272_v63 }
 0x86e   : > { %4775 = vmatpush1.bf16.msra.mxu1 %v4452_v21  ;;  %v4561_v21 = vunpack.c.h.s8.bf16 %v4273_v15 }
 0x86f   : > { %4776 = vmatprep.subr.bf16.mxu1 %v4459_v22  ;;  %v4137_v22 = vld [vmem:[%s8440_s30 + $0x28] sm:$0xff] }
 0x872   : > { %4777 = vmatpush1.bf16.msra.mxu1 %v4458_v49  ;;  %v4281_v49 = vunpack.c.l.s8.bf16 %v4137_v22 }
 0x873   : > { %4778 = vmatprep.subr.bf16.mxu1 %v4465_v23  ;;  %v4136_v23 = vld [vmem:[%s8440_s30 + $0x20] sm:$0xff] }
 0x874   : > { %v4280_v34 = vunpack.c.l.s8.bf16 %v4136_v23  ;;  %v4286_v13 = vunpack.c.h.s8.bf16 %v4136_v23 }
 0x876   : > { %4779 = vmatpush1.bf16.msra.mxu1 %v4464_v24  ;;  %v4287_v24 = vunpack.c.h.s8.bf16 %v4137_v22 }
 0x877   : > { %4791 = vmatprep.subr.bf16.mxu1 %v4471_v31  ;;  %v4143_v31 = vld [vmem:[%s8440_s30 + $0x58] sm:$0xff] }
 0x879   : > { %4781 = vmatmul.mubr.bf16.vlgmr.msra.gmra.mrb[12].mxu1 %v9303_v17 }
 0x87a   : > { %4792 = vmatpush1.bf16.msra.mxu1 %v4470_v50  ;;  %4823 = vmatprep.mubr.bf16.mxu1 %v9464_v61  ;;  %v4293_v50 = vunpack.c.l.s8.bf16 %v4143_v31 }
 0x87b   : > { %4793 = vmatprep.subr.bf16.mxu1 %v4477_v30  ;;  %v4142_v30 = vld [vmem:[%s8440_s30 + $0x50] sm:$0xff] }
 0x87c   : > { %v4292_v55 = vunpack.c.l.s8.bf16 %v4142_v30  ;;  %v4298_v33 = vunpack.c.h.s8.bf16 %v4142_v30 }
 0x87e   : > { %4794 = vmatpush1.bf16.msra.mxu1 %v4476_v36  ;;  %v4299_v36 = vunpack.c.h.s8.bf16 %v4143_v31 }
 0x87f   : > { %4795 = vmatprep.subr.bf16.mxu1 %v4483_v20  ;;  %v4149_v20 = vld [vmem:[%s8440_s30 + $0x88] sm:$0xff] }
 0x882   : > { %4796 = vmatpush1.bf16.msra.mxu1 %v4482_v53  ;;  %v4305_v53 = vunpack.c.l.s8.bf16 %v4149_v20 }
 0x883   : > { %4797 = vmatprep.subr.bf16.mxu1 %v4489_v12  ;;  %v4148_v12 = vld [vmem:[%s8440_s30 + $0x80] sm:$0xff] }
 0x884   : > { %v4304_v2 = vunpack.c.l.s8.bf16 %v4148_v12  ;;  %v4310_v59 = vunpack.c.h.s8.bf16 %v4148_v12 }
 0x886   : > { %4798 = vmatpush1.bf16.msra.mxu1 %v4488_v7  ;;  %v4155_v7 = vld [vmem:[%s8440_s30 + $0xb8] sm:$0xff] }
 0x887   : > { %4799 = vmatprep.subr.bf16.mxu1 %v4495_v8  ;;  %v4564_v8 = vld [vmem:[#allocation2] sm:$0xff] }
 0x88a   : > { %4800 = vmatpush1.bf16.msra.mxu1 %v4494_v54  ;;  %v4565_v54 = vld [vmem:[#allocation2 + $0x8] sm:$0xff] }
 0x88b   : > { %4801 = vmatprep.subr.bf16.mxu1 %v4501_v25  ;;  %v4317_v25 = vunpack.c.l.s8.bf16 %v4155_v7 }
 0x88e   : > { %4802 = vmatpush1.bf16.msra.mxu1 %v4500_v4 }
 0x88f   : > { %4803 = vmatprep.subr.bf16.mxu1 %v4507_v37  ;;  %v4570_v37 = vld [vmem:[#allocation2 + $0x30] sm:$0xff] }
 0x892   : > { %4804 = vmatpush1.bf16.msra.mxu1 %v4506_v6 }
 0x893   : > { %4805 = vmatprep.subr.bf16.mxu1 %v4513_v41  ;;  %v4571_v41 = vld [vmem:[#allocation2 + $0x38] sm:$0xff] }
 0x896   : > { %4806 = vmatpush1.bf16.msra.mxu1 %v4512_v42 }
 0x897   : > { %4807 = vmatprep.subr.bf16.mxu1 %v4519_v45  ;;  %v4316_v45 = vunpack.c.l.s8.bf16 %v4154_v11 }
 0x89a   : > { %4808 = vmatpush1.bf16.msra.mxu1 %v4518_v57 }
 0x89b   : > { %4809 = vmatprep.subr.bf16.mxu1 %v4525_v39  ;;  %v4323_v39 = vunpack.c.h.s8.bf16 %v4155_v7 }
 0x89e   : > { %4810 = vmatpush1.bf16.msra.mxu1 %v4524_v18  ;;  %v4161_v18 = vld [vmem:[%s8440_s30 + $0xe8] sm:$0xff] }
 0x89f   : > { %4811 = vmatprep.subr.bf16.mxu1 %v4531_v27  ;;  %v4322_v27 = vunpack.c.h.s8.bf16 %v4154_v11  ;;  %v4329_v38 = vunpack.c.l.s8.bf16 %v4161_v18  ;;  %v4335_v10 = vunpack.c.h.s8.bf16 %v4161_v18  ;;  %v4203_v11 = vld [vmem:[%s8440_s30 + $0x238] sm:$0xff] }
 0x8a2   : > { %4812 = vmatpush1.bf16.msra.mxu1 %v4530_v26  ;;  %v4160_v26 = vld [vmem:[%s8440_s30 + $0xe0] sm:$0xff] }
 0x8a3   : > { %4813 = vmatprep.subr.bf16.mxu1 %v4537_v3  ;;  %v4328_v3 = vunpack.c.l.s8.bf16 %v4160_v26 }
 0x8a6   : > { %4814 = vmatpush1.bf16.msra.mxu1 %v4536_v14  ;;  %v4167_v14 = vld [vmem:[%s8440_s30 + $0x118] sm:$0xff] }
 0x8a7   : > { %4815 = vmatprep.subr.bf16.mxu1 %v4543_v60  ;;  %v4334_v60 = vunpack.c.h.s8.bf16 %v4160_v26  ;;  %v4341_v0 = vunpack.c.l.s8.bf16 %v4167_v14  ;;  %v4347_v15 = vunpack.c.h.s8.bf16 %v4167_v14 }
 0x8aa   : > { %4816 = vmatpush1.bf16.msra.mxu1 %v4542_v62  ;;  %v4166_v62 = vld [vmem:[%s8440_s30 + $0x110] sm:$0xff] }
 0x8ab   : > { %4817 = vmatprep.subr.bf16.mxu1 %v4549_v51  ;;  %v4340_v51 = vunpack.c.l.s8.bf16 %v4166_v62 }
 0x8ae   : > { %4818 = vmatpush1.bf16.msra.mxu1 %v4548_v28  ;;  %v4173_v28 = vld [vmem:[%s8440_s30 + $0x148] sm:$0xff] }
 0x8af   : > { %4819 = vmatprep.subr.bf16.mxu1 %v4555_v35  ;;  %v4346_v35 = vunpack.c.h.s8.bf16 %v4166_v62  ;;  %v4353_v63 = vunpack.c.l.s8.bf16 %v4173_v28  ;;  %v4359_v22 = vunpack.c.h.s8.bf16 %v4173_v28 }
 0x8b2   : > { %4820 = vmatpush1.bf16.msra.mxu1 %v4554_v29  ;;  %v4172_v29 = vld [vmem:[%s8440_s30 + $0x140] sm:$0xff] }
 0x8b3   : > { %4821 = vmatprep.subr.bf16.mxu1 %v4561_v21  ;;  %v4352_v21 = vunpack.c.l.s8.bf16 %v4172_v29 }
 0x8b6   : > { %4822 = vmatpush1.bf16.msra.mxu1 %v4560_v40  ;;  %v4179_v40 = vld [vmem:[%s8440_s30 + $0x178] sm:$0xff] }
 0x8b7   : > { %4834 = vmatprep.subr.bf16.mxu1 %v4281_v49  ;;  %v4358_v49 = vunpack.c.h.s8.bf16 %v4172_v29  ;;  %v4365_v23 = vunpack.c.l.s8.bf16 %v4179_v40  ;;  %v4371_v31 = vunpack.c.h.s8.bf16 %v4179_v40 }
 0x8b9   : > { %4824 = vmatmul.mubr.bf16.vlgmr.msra.gmra.mrb[12].mxu1 %v9462_v16 }
 0x8ba   : > { %4835 = vmatpush1.bf16.msra.mxu1 %v4280_v34  ;;  %4866 = vmatprep.mubr.bf16.mxu1 %v9234_v56  ;;  %v4311_v56 = vunpack.c.h.s8.bf16 %v4149_v20  ;;  %v4178_v34 = vld [vmem:[%s8440_s30 + $0x170] sm:$0xff] }
 0x8bb   : > { %4836 = vmatprep.subr.bf16.mxu1 %v4287_v24  ;;  %v4364_v24 = vunpack.c.l.s8.bf16 %v4178_v34 }
 0x8be   : > { %4837 = vmatpush1.bf16.msra.mxu1 %v4286_v13  ;;  %v4185_v13 = vld [vmem:[%s8440_s30 + $0x1a8] sm:$0xff] }
 0x8bf   : > { %4838 = vmatprep.subr.bf16.mxu1 %v4293_v50  ;;  %v4370_v50 = vunpack.c.h.s8.bf16 %v4178_v34  ;;  %v4377_v30 = vunpack.c.l.s8.bf16 %v4185_v13  ;;  %v4383_v20 = vunpack.c.h.s8.bf16 %v4185_v13 }
 0x8c2   : > { %4839 = vmatpush1.bf16.msra.mxu1 %v4292_v55  ;;  %v4184_v55 = vld [vmem:[%s8440_s30 + $0x1a0] sm:$0xff] }
 0x8c3   : > { %4840 = vmatprep.subr.bf16.mxu1 %v4299_v36  ;;  %v4376_v36 = vunpack.c.l.s8.bf16 %v4184_v55 }
 0x8c6   : > { %4841 = vmatpush1.bf16.msra.mxu1 %v4298_v33  ;;  %v4191_v33 = vld [vmem:[%s8440_s30 + $0x1d8] sm:$0xff] }
 0x8c7   : > { %4842 = vmatprep.subr.bf16.mxu1 %v4305_v53  ;;  %v4382_v53 = vunpack.c.h.s8.bf16 %v4184_v55  ;;  %v4389_v12 = vunpack.c.l.s8.bf16 %v4191_v33  ;;  %v4395_v7 = vunpack.c.h.s8.bf16 %v4191_v33 }
 0x8ca   : > { %4843 = vmatpush1.bf16.msra.mxu1 %v4304_v2  ;;  %v4190_v2 = vld [vmem:[%s8440_s30 + $0x1d0] sm:$0xff] }
 0x8cb   : > { %4844 = vmatprep.subr.bf16.mxu1 %v4311_v56  ;;  %v4388_v56 = vunpack.c.l.s8.bf16 %v4190_v2 }
 0x8cc   : > { %v4696_v4 = vpop.f32.mrb[8].mxu1 }
 0x8cd   : > { %v4963_v19 = vadd.f32 %v4696_v4, %v4564_v8  ;;  %v4698_v6 = vpop.f32.mrb[9].mxu1  ;;  %v4197_v8 = vld [vmem:[%s8440_s30 + $0x208] sm:$0xff] }
 0x8ce   : > { %v4964_v52 = vadd.f32 %v4698_v6, %v4565_v54  ;;  %4845 = vmatpush1.bf16.msra.mxu1 %v4310_v59  ;;  %v4700_v42 = vpop.f32.mrb[10].mxu1  ;;  %v4394_v59 = vunpack.c.h.s8.bf16 %v4190_v2  ;;  %v4401_v54 = vunpack.c.l.s8.bf16 %v4197_v8  ;;  %v4251_v2 = vld [vmem:[%s8440_s30 + $0x3b8] sm:$0xff] }
 0x8cf   : > { %4975 = vst [vmem:[#allocation2] sm:$0xff] %v4963_v19  ;;  %v4969_v46 = vadd.f32 %v4700_v42, %v4570_v37  ;;  %v4702_v57 = vpop.f32.mrb[11].mxu1  ;;  %4846 = vmatprep.subr.bf16.mxu1 %v4317_v25  ;;  %v4413_v37 = vunpack.c.l.s8.bf16 %v4203_v11  ;;  %v4202_v19 = vld [vmem:[%s8440_s30 + $0x230] sm:$0xff] }
 0x8d0   : > { %4976 = vst [vmem:[#allocation2 + $0x8] sm:$0xff] %v4964_v52  ;;  %v4970_v47 = vadd.f32 %v4702_v57, %v4571_v41  ;;  %v4412_v6 = vunpack.c.l.s8.bf16 %v4202_v19  ;;  %v4419_v41 = vunpack.c.h.s8.bf16 %v4203_v11  ;;  %v4209_v52 = vld [vmem:[%s8440_s30 + $0x268] sm:$0xff]  ;;  %v4418_v42 = vunpack.c.h.s8.bf16 %v4202_v19  ;;  %v4256_v11 = vld [vmem:[%s8440_s30 + $0x3e0] sm:$0xff]  ;;  %v4263_v19 = vld [vmem:[%s8440_s30 + $0x418] sm:$0xff] }
 0x8d1   : > { %4981 = vst [vmem:[#allocation2 + $0x30] sm:$0xff] %v4969_v46  ;;  %v4208_v46 = vld [vmem:[%s8440_s30 + $0x260] sm:$0xff] }
 0x8d2   : > { %4982 = vst [vmem:[#allocation2 + $0x38] sm:$0xff] %v4970_v47  ;;  %4847 = vmatpush1.bf16.msra.mxu1 %v4316_v45  ;;  %v4425_v45 = vunpack.c.l.s8.bf16 %v4209_v52  ;;  %v4424_v57 = vunpack.c.l.s8.bf16 %v4208_v46  ;;  %v4215_v47 = vld [vmem:[%s8440_s30 + $0x298] sm:$0xff]  ;;  %v4430_v18 = vunpack.c.h.s8.bf16 %v4208_v46  ;;  %v4269_v46 = vld [vmem:[%s8440_s30 + $0x448] sm:$0xff] }
 0x8d3   : > { %4848 = vmatprep.subr.bf16.mxu1 %v4323_v39  ;;  %v4431_v39 = vunpack.c.h.s8.bf16 %v4209_v52  ;;  %v4262_v52 = vld [vmem:[%s8440_s30 + $0x410] sm:$0xff] }
 0x8d6   : > { %4849 = vmatpush1.bf16.msra.mxu1 %v4322_v27  ;;  %v4437_v27 = vunpack.c.l.s8.bf16 %v4215_v47 }
 0x8d7   : > { %4850 = vmatprep.subr.bf16.mxu1 %v4329_v38  ;;  %v4214_v38 = vld [vmem:[%s8440_s30 + $0x290] sm:$0xff] }
 0x8d8   : > { %v4436_v26 = vunpack.c.l.s8.bf16 %v4214_v38  ;;  %v4442_v14 = vunpack.c.h.s8.bf16 %v4214_v38  ;;  %v4275_v38 = vld [vmem:[%s8440_s30 + $0x478] sm:$0xff] }
 0x8da   : > { %4851 = vmatpush1.bf16.msra.mxu1 %v4328_v3  ;;  %v4443_v3 = vunpack.c.h.s8.bf16 %v4215_v47  ;;  %v4268_v47 = vld [vmem:[%s8440_s30 + $0x440] sm:$0xff] }
 0x8db   : > { %4852 = vmatprep.subr.bf16.mxu1 %v4335_v10  ;;  %v4221_v10 = vld [vmem:[%s8440_s30 + $0x2c8] sm:$0xff] }
 0x8de   : > { %4853 = vmatpush1.bf16.msra.mxu1 %v4334_v60  ;;  %v4449_v60 = vunpack.c.l.s8.bf16 %v4221_v10 }
 0x8df   : > { %4854 = vmatprep.subr.bf16.mxu1 %v4341_v0  ;;  %v4220_v0 = vld [vmem:[%s8440_s30 + $0x2c0] sm:$0xff] }
 0x8e0   : > { %v4448_v62 = vunpack.c.l.s8.bf16 %v4220_v0  ;;  %v4454_v28 = vunpack.c.h.s8.bf16 %v4220_v0 }
 0x8e2   : > { %4855 = vmatpush1.bf16.msra.mxu1 %v4340_v51  ;;  %v4455_v51 = vunpack.c.h.s8.bf16 %v4221_v10  ;;  %v4274_v10 = vld [vmem:[%s8440_s30 + $0x470] sm:$0xff] }
 0x8e3   : > { %4856 = vmatprep.subr.bf16.mxu1 %v4347_v15  ;;  %v4227_v15 = vld [vmem:[%s8440_s30 + $0x2f8] sm:$0xff]  ;;  %v4562_v0 = vunpack.c.h.s8.bf16 %v4274_v10 }
 0x8e6   : > { %4857 = vmatpush1.bf16.msra.mxu1 %v4346_v35  ;;  %v4461_v35 = vunpack.c.l.s8.bf16 %v4227_v15 }
 0x8e7   : > { %4858 = vmatprep.subr.bf16.mxu1 %v4353_v63  ;;  %v4226_v63 = vld [vmem:[%s8440_s30 + $0x2f0] sm:$0xff] }
 0x8e8   : > { %v4460_v29 = vunpack.c.l.s8.bf16 %v4226_v63  ;;  %v4466_v40 = vunpack.c.h.s8.bf16 %v4226_v63 }
 0x8ea   : > { %4859 = vmatpush1.bf16.msra.mxu1 %v4352_v21  ;;  %v4467_v21 = vunpack.c.h.s8.bf16 %v4227_v15 }
 0x8eb   : > { %4860 = vmatprep.subr.bf16.mxu1 %v4359_v22  ;;  %v4233_v22 = vld [vmem:[%s8440_s30 + $0x328] sm:$0xff] }
 0x8ee   : > { %4861 = vmatpush1.bf16.msra.mxu1 %v4358_v49  ;;  %v4473_v49 = vunpack.c.l.s8.bf16 %v4233_v22 }
 0x8ef   : > { %4862 = vmatprep.subr.bf16.mxu1 %v4365_v23  ;;  %v4232_v23 = vld [vmem:[%s8440_s30 + $0x320] sm:$0xff] }
 0x8f0   : > { %v4472_v34 = vunpack.c.l.s8.bf16 %v4232_v23  ;;  %v4478_v13 = vunpack.c.h.s8.bf16 %v4232_v23 }
 0x8f2   : > { %4863 = vmatpush1.bf16.msra.mxu1 %v4364_v24  ;;  %v4479_v24 = vunpack.c.h.s8.bf16 %v4233_v22 }
 0x8f3   : > { %4864 = vmatprep.subr.bf16.mxu1 %v4371_v31  ;;  %v4239_v31 = vld [vmem:[%s8440_s30 + $0x358] sm:$0xff] }
 0x8f6   : > { %4865 = vmatpush1.bf16.msra.mxu1 %v4370_v50  ;;  %v4485_v50 = vunpack.c.l.s8.bf16 %v4239_v31 }
 0x8f7   : > { %4877 = vmatprep.subr.bf16.mxu1 %v4377_v30  ;;  %v4238_v30 = vld [vmem:[%s8440_s30 + $0x350] sm:$0xff] }
 0x8f8   : > { %v4484_v55 = vunpack.c.l.s8.bf16 %v4238_v30  ;;  %v4490_v33 = vunpack.c.h.s8.bf16 %v4238_v30  ;;  %v4575_v30 = vld [vmem:[#allocation2 + $0x58] sm:$0xff] }
 0x8f9   : > { %4867 = vmatmul.mubr.bf16.vlgmr.msra.gmra.mrb[16].mxu1 %v9232_v48  ;;  %v4196_v48 = vld [vmem:[%s8440_s30 + $0x200] sm:$0xff] }
 0x8fa   : > { %4878 = vmatpush1.bf16.msra.mxu1 %v4376_v36  ;;  %4909 = vmatprep.mubr.bf16.mxu1 %v9305_v44  ;;  %v4400_v25 = vunpack.c.l.s8.bf16 %v4196_v48  ;;  %v4407_v44 = vunpack.c.h.s8.bf16 %v4197_v8  ;;  %v4406_v4 = vunpack.c.h.s8.bf16 %v4196_v48  ;;  %v4491_v36 = vunpack.c.h.s8.bf16 %v4239_v31  ;;  %v4250_v8 = vld [vmem:[%s8440_s30 + $0x3b0] sm:$0xff]  ;;  %v4257_v48 = vld [vmem:[%s8440_s30 + $0x3e8] sm:$0xff] }
 0x8fb   : > { %4879 = vmatprep.subr.bf16.mxu1 %v4383_v20  ;;  %v4245_v20 = vld [vmem:[%s8440_s30 + $0x388] sm:$0xff] }
 0x8fe   : > { %4880 = vmatpush1.bf16.msra.mxu1 %v4382_v53  ;;  %v4497_v53 = vunpack.c.l.s8.bf16 %v4245_v20 }
 0x8ff   : > { %4881 = vmatprep.subr.bf16.mxu1 %v4389_v12 }
 0x902   : > { %4882 = vmatpush1.bf16.msra.mxu1 %v4388_v56 }
 0x903   : > { %4883 = vmatprep.subr.bf16.mxu1 %v4395_v7  ;;  %v4509_v7 = vunpack.c.l.s8.bf16 %v4251_v2 }
 0x906   : > { %4884 = vmatpush1.bf16.msra.mxu1 %v4394_v59  ;;  %v4508_v59 = vunpack.c.l.s8.bf16 %v4250_v8 }
 0x907   : > { %4885 = vmatprep.subr.bf16.mxu1 %v4401_v54  ;;  %v4515_v54 = vunpack.c.h.s8.bf16 %v4251_v2  ;;  %v7438_v2 = vld [vmem:[#allocation13 + $0x18] ss:$12 sps:$4 sm:$0xff] (!%p6837_p4)  }
 0x90a   : > { %4886 = vmatpush1.bf16.msra.mxu1 %v4400_v25  ;;  %v4514_v25 = vunpack.c.h.s8.bf16 %v4250_v8  ;;  %v7442_v8 = vld [vmem:[#allocation13 + $0x4c] ss:$12 sps:$4 sm:$0xff] (!%p6837_p4)  }
 0x90b   : > { %4887 = vmatprep.subr.bf16.mxu1 %v4407_v44  ;;  %v4521_v44 = vunpack.c.l.s8.bf16 %v4257_v48 }
 0x90e   : > { %4888 = vmatpush1.bf16.msra.mxu1 %v4406_v4  ;;  %v4520_v4 = vunpack.c.l.s8.bf16 %v4256_v11 }
 0x90f   : > { %4889 = vmatprep.subr.bf16.mxu1 %v4413_v37  ;;  %v4527_v37 = vunpack.c.h.s8.bf16 %v4257_v48  ;;  %v7447_v48 = vld [vmem:[#allocation13 + $0x60] ss:$12 sps:$4 sm:$0xff] (!%p6837_p4)  }
 0x912   : > { %4890 = vmatpush1.bf16.msra.mxu1 %v4412_v6  ;;  %v4526_v6 = vunpack.c.h.s8.bf16 %v4256_v11  ;;  %v7451_v11 = vld [vmem:[#allocation13 + $0x94] ss:$12 sps:$4 sm:$0xff] (!%p6837_p4)  }
 0x913   : > { %4891 = vmatprep.subr.bf16.mxu1 %v4419_v41  ;;  %v4533_v41 = vunpack.c.l.s8.bf16 %v4263_v19 }
 0x916   : > { %4892 = vmatpush1.bf16.msra.mxu1 %v4418_v42  ;;  %v4532_v42 = vunpack.c.l.s8.bf16 %v4262_v52 }
 0x917   : > { %4893 = vmatprep.subr.bf16.mxu1 %v4425_v45  ;;  %v4539_v45 = vunpack.c.h.s8.bf16 %v4263_v19  ;;  %v9575_v19 = vld [vmem:[#allocation10] sm:$0x3f] (!%p6837_p4) }
 0x91a   : > { %4894 = vmatpush1.bf16.msra.mxu1 %v4424_v57  ;;  %v4538_v57 = vunpack.c.h.s8.bf16 %v4262_v52  ;;  %v7454_v52 = vld [vmem:[#allocation13 + $0xac] ss:$12 sps:$4 sm:$0xff] (!%p6837_p4)  }
 0x91b   : > { %4895 = vmatprep.subr.bf16.mxu1 %v4431_v39  ;;  %v4545_v39 = vunpack.c.l.s8.bf16 %v4269_v46 }
 0x91e   : > { %4896 = vmatpush1.bf16.msra.mxu1 %v4430_v18  ;;  %v4544_v18 = vunpack.c.l.s8.bf16 %v4268_v47 }
 0x91f   : > { %4897 = vmatprep.subr.bf16.mxu1 %v4437_v27  ;;  %v4551_v27 = vunpack.c.h.s8.bf16 %v4269_v46  ;;  %v7484_v46 = vld [vmem:[#allocation13 + $0xc8] ss:$12 sps:$4 sm:$0xff] (!%p6837_p4)  }
 0x922   : > { %4898 = vmatpush1.bf16.msra.mxu1 %v4436_v26  ;;  %v4550_v26 = vunpack.c.h.s8.bf16 %v4268_v47  ;;  %v7485_v47 = vld [vmem:[#allocation13 + $0x8] ss:$12 sps:$4 sm:$0xff] (!%p6837_p4)  }
 0x923   : > { %4899 = vmatprep.subr.bf16.mxu1 %v4443_v3  ;;  %v4557_v3 = vunpack.c.l.s8.bf16 %v4275_v38 }
 0x926   : > { %4900 = vmatpush1.bf16.msra.mxu1 %v4442_v14  ;;  %v4556_v14 = vunpack.c.l.s8.bf16 %v4274_v10 }
 0x927   : > { %4901 = vmatprep.subr.bf16.mxu1 %v4449_v60  ;;  %v4563_v60 = vunpack.c.h.s8.bf16 %v4275_v38 }
 0x92a   : > { %4902 = vmatpush1.bf16.msra.mxu1 %v4448_v62  ;;  %v4566_v62 = vld [vmem:[#allocation2 + $0x10] sm:$0xff] }
 0x92b   : > { %4903 = vmatprep.subr.bf16.mxu1 %v4455_v51  ;;  %v4567_v51 = vld [vmem:[#allocation2 + $0x18] sm:$0xff] }
 0x92e   : > { %4904 = vmatpush1.bf16.msra.mxu1 %v4454_v28  ;;  %v4572_v28 = vld [vmem:[#allocation2 + $0x40] sm:$0xff] }
 0x92f   : > { %4905 = vmatprep.subr.bf16.mxu1 %v4461_v35 }
 0x932   : > { %4906 = vmatpush1.bf16.msra.mxu1 %v4460_v29  ;;  %v4573_v29 = vld [vmem:[#allocation2 + $0x48] sm:$0xff] }
 0x933   : > { %4907 = vmatprep.subr.bf16.mxu1 %v4467_v21 }
 0x936   : > { %4908 = vmatpush1.bf16.msra.mxu1 %v4466_v40 }
 0x937   : > { %4920 = vmatprep.subr.bf16.mxu1 %v4473_v49 }
 0x939   : > { %4910 = vmatmul.mubr.bf16.vlgmr.msra.gmra.mrb[16].mxu1 %v9303_v17  ;;  %v4244_v17 = vld [vmem:[%s8440_s30 + $0x380] sm:$0xff]  ;;  %s9720_s30 = sld [smem:[#allocation36_spill]] (!%p6837_p4) }
 0x93a   : > { %4921 = vmatpush1.bf16.msra.mxu1 %v4472_v34  ;;  %4952 = vmatprep.mubr.bf16.mxu1 %v9464_v61  ;;  %v4496_v12 = vunpack.c.l.s8.bf16 %v4244_v17  ;;  %v4503_v61 = vunpack.c.h.s8.bf16 %v4245_v20  ;;  %v4502_v56 = vunpack.c.h.s8.bf16 %v4244_v17  ;;  %v4568_v34 = vld [vmem:[#allocation2 + $0x20] sm:$0xff]  ;;  %v7433_v17 = vld [vmem:[#allocation13 + $0x4] ss:$12 sps:$4 sm:$0xff] (!%p6837_p4)  }
 0x93b   : > { %4922 = vmatprep.subr.bf16.mxu1 %v4479_v24  ;;  %v4569_v24 = vld [vmem:[#allocation2 + $0x28] sm:$0xff]  ;;  %6086 = vmatprep.subr.bf16.mxu0 (!%p6837_p4), %v7433_v17 }
 0x93c   : > { %v7472_v17 = vld [vmem:[#allocation13 + $0x13c] ss:$12 sps:$4 sm:$0xff] (!%p6837_p4)  }
 0x93e   : > { %4923 = vmatpush1.bf16.msra.mxu1 %v4478_v13 }
 0x93f   : > { %4924 = vmatprep.subr.bf16.mxu1 %v4485_v50 }
 0x942   : > { %4925 = vmatpush1.bf16.msra.mxu1 %v4484_v55 }
 0x943   : > { %4926 = vmatprep.subr.bf16.mxu1 %v4491_v36 }
 0x946   : > { %4927 = vmatpush1.bf16.msra.mxu1 %v4490_v33 }
 0x947   : > { %4928 = vmatprep.subr.bf16.mxu1 %v4497_v53 }
 0x94a   : > { %4929 = vmatpush1.bf16.msra.mxu1 %v4496_v12  ;;  %v7435_v12 = vld [vmem:[#allocation13] ss:$12 sps:$4 sm:$0xff] (!%p6837_p4)  }
 0x94b   : > { %4930 = vmatprep.subr.bf16.mxu1 %v4503_v61  ;;  %v7436_v61 = vld [vmem:[#allocation13 + $0x1c] ss:$12 sps:$4 sm:$0xff] (!%p6837_p4)   ;;  %6087 = vmatpush1.bf16.msra.mxu0 (!%p6837_p4), %v7435_v12 }
 0x94c   : > { %6088 = vmatprep.subr.bf16.mxu0 (!%p6837_p4), %v7436_v61  ;;  %v7515_v61 = vld [vmem:[#allocation13 + $0x98] ss:$12 sps:$4 sm:$0xff] (!%p6837_p4)  }
 0x94e   : > { %4931 = vmatpush1.bf16.msra.mxu1 %v4502_v56  ;;  %v7439_v56 = vld [vmem:[#allocation13 + $0x34] ss:$12 sps:$4 sm:$0xff] (!%p6837_p4)  }
 0x94f   : > { %4932 = vmatprep.subr.bf16.mxu1 %v4509_v7  ;;  %6089 = vmatpush1.bf16.msra.mxu0 (!%p6837_p4), %v7438_v2  ;;  %v7441_v7 = vld [vmem:[#allocation13 + $0x30] ss:$12 sps:$4 sm:$0xff] (!%p6837_p4)  }
 0x950   : > { %6090 = vmatprep.subr.bf16.mxu0 (!%p6837_p4), %v7439_v56  ;;  %v7519_v56 = vld [vmem:[#allocation13 + $0x170] ss:$12 sps:$4 sm:$0xff] (!%p6837_p4)  }
 0x952   : > { %4933 = vmatpush1.bf16.msra.mxu1 %v4508_v59  ;;  %v7444_v59 = vld [vmem:[#allocation13 + $0x48] ss:$12 sps:$4 sm:$0xff] (!%p6837_p4)  }
 0x953   : > { %4934 = vmatprep.subr.bf16.mxu1 %v4515_v54  ;;  %6091 = vmatpush1.bf16.msra.mxu0 (!%p6837_p4), %v7441_v7  ;;  %v7445_v54 = vld [vmem:[#allocation13 + $0x64] ss:$12 sps:$4 sm:$0xff] (!%p6837_p4)  }
 0x954   : > { %6092 = vmatprep.subr.bf16.mxu0 (!%p6837_p4), %v7442_v8  ;;  %v7474_v7 = vld [vmem:[#allocation13 + $0x138] ss:$12 sps:$4 sm:$0xff] (!%p6837_p4)   ;;  %v7475_v8 = vld [vmem:[#allocation13 + $0x154] ss:$12 sps:$4 sm:$0xff] (!%p6837_p4)  }
 0x956   : > { %4935 = vmatpush1.bf16.msra.mxu1 %v4514_v25  ;;  %v7448_v25 = vld [vmem:[#allocation13 + $0x7c] ss:$12 sps:$4 sm:$0xff] (!%p6837_p4)  }
 0x957   : > { %4936 = vmatprep.subr.bf16.mxu1 %v4521_v44  ;;  %6093 = vmatpush1.bf16.msra.mxu0 (!%p6837_p4), %v7444_v59  ;;  %v7450_v44 = vld [vmem:[#allocation13 + $0x78] ss:$12 sps:$4 sm:$0xff] (!%p6837_p4)  }
 0x958   : > { %6094 = vmatprep.subr.bf16.mxu0 (!%p6837_p4), %v7445_v54  ;;  %v7520_v54 = vld [vmem:[#allocation13 + $0xb0] ss:$12 sps:$4 sm:$0xff] (!%p6837_p4)  }
 0x95a   : > { %4937 = vmatpush1.bf16.msra.mxu1 %v4520_v4  ;;  %v4992_v4 = vld [vmem:[#allocation2 + $0x8] sm:$0xff] (!%p6837_p4) }
 0x95b   : > { %4938 = vmatprep.subr.bf16.mxu1 %v4527_v37  ;;  %6095 = vmatpush1.bf16.msra.mxu0 (!%p6837_p4), %v7447_v48  ;;  %v4998_v37 = vld [vmem:[#allocation2 + $0x38] sm:$0xff] (!%p6837_p4) }
 0x95c   : > { %6096 = vmatprep.subr.bf16.mxu0 (!%p6837_p4), %v7448_v25  ;;  %v7524_v25 = vld [vmem:[#allocation13 + $0x248] ss:$12 sps:$4 sm:$0xff] (!%p6837_p4)  }
 0x95e   : > { %4939 = vmatpush1.bf16.msra.mxu1 %v4526_v6  ;;  %v9577_v6 = vld [vmem:[#allocation11] sm:$0x3f] (!%p6837_p4) }
 0x95f   : > { %4940 = vmatprep.subr.bf16.mxu1 %v4533_v41  ;;  %6097 = vmatpush1.bf16.msra.mxu0 (!%p6837_p4), %v7450_v44  ;;  %v7453_v41 = vld [vmem:[#allocation13 + $0x90] ss:$12 sps:$4 sm:$0xff] (!%p6837_p4)  }
 0x960   : > { %6098 = vmatprep.subr.bf16.mxu0 (!%p6837_p4), %v7451_v11  ;;  %v7477_v44 = vld [vmem:[#allocation13 + $0x150] ss:$12 sps:$4 sm:$0xff] (!%p6837_p4)   ;;  %v7478_v11 = vld [vmem:[#allocation13 + $0x16c] ss:$12 sps:$4 sm:$0xff] (!%p6837_p4)  }
 0x962   : > { %4941 = vmatpush1.bf16.msra.mxu1 %v4532_v42  ;;  %v5012_v42 = vrot.slane (!%p6837_p4), %v9575_v19, %v9210_v58 }
 0x963   : > { %4942 = vmatprep.subr.bf16.mxu1 %v4539_v45  ;;  %v5056_v45 = vrot.slane (!%p6837_p4), %v9577_v6, %v9210_v58  ;;  %6099 = vmatpush1.bf16.msra.mxu0 (!%p6837_p4), %v7453_v41  ;;  %v7529_v41 = vld [vmem:[#allocation13 + $0x260] ss:$12 sps:$4 sm:$0xff] (!%p6837_p4)  }
 0x964   : > { %6100 = vmatprep.subr.bf16.mxu0 (!%p6837_p4), %v7454_v52  ;;  %v7480_v52 = vld [vmem:[#allocation13 + $0x168] ss:$12 sps:$4 sm:$0xff] (!%p6837_p4)  }
 0x966   : > { %4943 = vmatpush1.bf16.msra.mxu1 %v4538_v57  ;;  %v5036_v57 = vmul.f32 (!%p6837_p4), %v5012_v42, %v4992_v4  ;;  %v7525_v4 = vld [vmem:[#allocation13 + $0x188] ss:$12 sps:$4 sm:$0xff] (!%p6837_p4)  }
 0x967   : > { %4944 = vmatprep.subr.bf16.mxu1 %v4545_v39  ;;  %v5042_v39 = vmul.f32 (!%p6837_p4), %v5012_v42, %v4998_v37  ;;  %v7483_v42 = vld [vmem:[#allocation13 + $0x184] ss:$12 sps:$4 sm:$0xff] (!%p6837_p4)  }
 0x968   : > { %v5080_v38 = vadd.f32 (!%p6837_p4), %v5056_v45, %v5036_v57  ;;  %v7481_v57 = vld [vmem:[#allocation13 + $0x180] ss:$12 sps:$4 sm:$0xff] (!%p6837_p4)  }
 0x96a   : > { %4945 = vmatpush1.bf16.msra.mxu1 %v4544_v18  ;;  %v7456_v18 = vld [vmem:[#allocation13 + $0xa8] ss:$12 sps:$4 sm:$0xff] (!%p6837_p4)   ;;  %v5092_v10 = vmax.f32 (!%p6837_p4), %v5080_v38, 0.0 }
 0x96b   : > { %4946 = vmatprep.subr.bf16.mxu1 %v4551_v27  ;;  %v7457_v27 = vld [vmem:[#allocation13 + $0xc4] ss:$12 sps:$4 sm:$0xff] (!%p6837_p4)   ;;  %6101 = vmatpush1.bf16.msra.mxu0 (!%p6837_p4), %v7456_v18  ;;  %v7493_v38 = vld [vmem:[#allocation13 + $0x1b4] ss:$12 sps:$4 sm:$0xff] (!%p6837_p4)  }
 0x96c   : > { %6102 = vmatprep.subr.bf16.mxu0 (!%p6837_p4), %v7457_v27  ;;  %v7539_v18 = vld [vmem:[#allocation13 + $0x290] ss:$12 sps:$4 sm:$0xff] (!%p6837_p4)   ;;  %v7486_v27 = vld [vmem:[#allocation13 + $0x198] ss:$12 sps:$4 sm:$0xff] (!%p6837_p4)  }
 0x96e   : > { %4947 = vmatpush1.bf16.msra.mxu1 %v4550_v26  ;;  %v5086_v26 = vadd.f32 (!%p6837_p4), %v5056_v45, %v5042_v39  ;;  %v7530_v45 = vld [vmem:[#allocation13 + $0x1a0] ss:$12 sps:$4 sm:$0xff] (!%p6837_p4)   ;;  %v7488_v39 = vld [vmem:[#allocation13 + $0x19c] ss:$12 sps:$4 sm:$0xff] (!%p6837_p4)  }
 0x96f   : > { %4948 = vmatprep.subr.bf16.mxu1 %v4557_v3  ;;  %v7489_v3 = vld [vmem:[#allocation13 + $0xe0] ss:$12 sps:$4 sm:$0xff] (!%p6837_p4)  }
 0x972   : > { %4949 = vmatpush1.bf16.msra.mxu1 %v4556_v14  ;;  %v5098_v14 = vmax.f32 (!%p6837_p4), %v5086_v26, 0.0  ;;  %v7540_v26 = vld [vmem:[#allocation13 + $0x1d0] ss:$12 sps:$4 sm:$0xff] (!%p6837_p4)  }
 0x973   : > { %4950 = vmatprep.subr.bf16.mxu1 %v4563_v60  ;;  %v7490_v60 = vld [vmem:[#allocation13 + $0x20] ss:$12 sps:$4 sm:$0xff] (!%p6837_p4)  }
 0x976   : > { %4951 = vmatpush1.bf16.msra.mxu1 %v4562_v0  ;;  %v7459_v0 = vld [vmem:[#allocation13 + $0xc0] ss:$12 sps:$4 sm:$0xff] (!%p6837_p4)  }
 0x977   : > { %7012 = vmatprep.subr.bf16.mxu1 (!%p6837_p4), %v7484_v46  ;;  %6103 = vmatpush1.bf16.msra.mxu0 (!%p6837_p4), %v7459_v0  ;;  %v7534_v46 = vld [vmem:[#allocation13 + $0x278] ss:$12 sps:$4 sm:$0xff] (!%p6837_p4)   ;;  %v7549_v0 = vld [vmem:[#allocation13 + $0x2c0] ss:$12 sps:$4 sm:$0xff] (!%p6837_p4)  }
 0x979   : > { %4953 = vmatmul.mubr.bf16.vlgmr.msra.gmra.mrb[16].mxu1 %v9462_v16  ;;  %v4574_v16 = vld [vmem:[#allocation2 + $0x50] sm:$0xff] }
 0x97a   : > { %7013 = vmatpush3.bf16.msra.mxu1 (!%p6837_p4), %v7485_v47  ;;  %v7535_v47 = vld [vmem:[#allocation13 + $0x1b8] ss:$12 sps:$4 sm:$0xff] (!%p6837_p4)  }
 0x97b   : > { %7014 = vmatprep.subr.bf16.mxu1 (!%p6837_p4), %v7489_v3  ;;  %v7544_v3 = vld [vmem:[#allocation13 + $0x2a8] ss:$12 sps:$4 sm:$0xff] (!%p6837_p4)  }
 0x97e   : > { %7015 = vmatpush3.bf16.msra.mxu1 (!%p6837_p4), %v7490_v60  ;;  %v7545_v60 = vld [vmem:[#allocation13 + $0x1e8] ss:$12 sps:$4 sm:$0xff] (!%p6837_p4)  }
 0x98c   : > { %v4825_v15 = vpop.f32.mrb[12].mxu1 }
 0x98d   : > { %v4965_v35 = vadd.f32 %v4825_v15, %v4566_v62  ;;  %v4827_v63 = vpop.f32.mrb[13].mxu1  ;;  %v7460_v62 = vld [vmem:[#allocation13 + $0xdc] ss:$12 sps:$4 sm:$0xff] (!%p6837_p4)   ;;  %v7494_v15 = vld [vmem:[#allocation13 + $0xf8] ss:$12 sps:$4 sm:$0xff] (!%p6837_p4)  }
 0x98e   : > { %v4966_v21 = vadd.f32 %v4827_v63, %v4567_v51  ;;  %v4829_v22 = vpop.f32.mrb[14].mxu1  ;;  %v5104_v51 = vpack.c.bf16 (!%p6837_p4), %v5098_v14, %v5092_v10  ;;  %v7463_v63 = vld [vmem:[#allocation13 + $0xf4] ss:$12 sps:$4 sm:$0xff] (!%p6837_p4)   ;;  %7016 = vmatprep.subr.bf16.mxu1 (!%p6837_p4), %v7494_v15  ;;  %6104 = vmatprep.subr.bf16.mxu0 (!%p6837_p4), %v7460_v62  ;;  %v7491_v10 = vld [vmem:[#allocation13 + $0x1b0] ss:$12 sps:$4 sm:$0xff] (!%p6837_p4)   ;;  %v5020_v15 = vrot.slane (!%p6837_p4), %v9575_v19, %v9289_v5 }
 0x98f   : > { %4977 = vst [vmem:[#allocation2 + $0x10] sm:$0xff] %v4965_v35  ;;  %v4971_v40 = vadd.f32 %v4829_v22, %v4572_v28  ;;  %v4831_v49 = vpop.f32.mrb[15].mxu1  ;;  %v7495_v28 = vld [vmem:[#allocation13 + $0x38] ss:$12 sps:$4 sm:$0xff] (!%p6837_p4)   ;;  %v7465_v22 = vld [vmem:[#allocation13 + $0xf0] ss:$12 sps:$4 sm:$0xff] (!%p6837_p4)  }
 0x990   : > { %4978 = vst [vmem:[#allocation2 + $0x18] sm:$0xff] %v4966_v21  ;;  %v4972_v23 = vadd.f32 %v4831_v49, %v4573_v29  ;;  %6118 = vmatprep.mubr.bf16.mxu0 (!%p6837_p4), %v5104_v51  ;;  %6247 = vmatprep.mubr.bf16.mxu1 (!%p6837_p4), %v5104_v51  ;;  %v7462_v35 = vld [vmem:[#allocation13 + $0xd8] ss:$12 sps:$4 sm:$0xff] (!%p6837_p4)   ;;  %v7499_v29 = vld [vmem:[#allocation13 + $0x110] ss:$12 sps:$4 sm:$0xff] (!%p6837_p4)  }
 0x991   : > { %4983 = vst [vmem:[#allocation2 + $0x40] sm:$0xff] %v4971_v40  ;;  %7017 = vmatpush3.bf16.msra.mxu1 (!%p6837_p4), %v7495_v28  ;;  %v7500_v21 = vld [vmem:[#allocation13 + $0x50] ss:$12 sps:$4 sm:$0xff] (!%p6837_p4)   ;;  %v7466_v40 = vld [vmem:[#allocation13 + $0x10c] ss:$12 sps:$4 sm:$0xff] (!%p6837_p4)   ;;  %6105 = vmatpush1.bf16.msra.mxu0 (!%p6837_p4), %v7462_v35 }
 0x992   : > { %4984 = vst [vmem:[#allocation2 + $0x48] sm:$0xff] %v4972_v23  ;;  %7018 = vmatprep.subr.bf16.mxu1 (!%p6837_p4), %v7499_v29  ;;  %v4991_v49 = vld [vmem:[#allocation2] sm:$0xff] (!%p6837_p4)  ;;  %v5008_v23 = vrot.slane (!%p6837_p4), %v9575_v19, %v9204_v32  ;;  %6106 = vmatprep.subr.bf16.mxu0 (!%p6837_p4), %v7463_v63  ;;  %v7498_v14 = vld [vmem:[#allocation13 + $0x1cc] ss:$12 sps:$4 sm:$0xff] (!%p6837_p4)   ;;  %v7496_v62 = vld [vmem:[#allocation13 + $0x1c8] ss:$12 sps:$4 sm:$0xff] (!%p6837_p4)   ;;  %v5064_v63 = vrot.slane (!%p6837_p4), %v9577_v6, %v9289_v5 }
 0x993   : > { %v7503_v51 = vld [vmem:[#allocation13 + $0x1e4] ss:$12 sps:$4 sm:$0xff] (!%p6837_p4)   ;;  %v7550_v28 = vld [vmem:[#allocation13 + $0x200] ss:$12 sps:$4 sm:$0xff] (!%p6837_p4)  }
 0x994   : > { %v7554_v35 = vld [vmem:[#allocation13 + $0x2d8] ss:$12 sps:$4 sm:$0xff] (!%p6837_p4)  }
 0x995   : > { %7019 = vmatpush3.bf16.msra.mxu1 (!%p6837_p4), %v7500_v21  ;;  %6107 = vmatpush1.bf16.msra.mxu0 (!%p6837_p4), %v7465_v22  ;;  %v5016_v22 = vrot.slane (!%p6837_p4), %v9575_v19, %v9286_v1 }
 0x996   : > { %6108 = vmatprep.subr.bf16.mxu0 (!%p6837_p4), %v7466_v40  ;;  %v7501_v40 = vld [vmem:[#allocation13 + $0x1e0] ss:$12 sps:$4 sm:$0xff] (!%p6837_p4)  }
 0x997   : > { %v4994_v29 = vld [vmem:[#allocation2 + $0x18] sm:$0xff] (!%p6837_p4)  ;;  %v4993_v5 = vld [vmem:[#allocation2 + $0x10] sm:$0xff] (!%p6837_p4) }
 0x999   : > { %v5000_v21 = vld [vmem:[#allocation2 + $0x48] sm:$0xff] (!%p6837_p4) }
 0xa4c   : > { %v4954_v31 = vpop.f32.mrb[16].mxu1  ;;  %4990 = sbr.rel (%p6837_p4) target bundleno = 3258 (0xcba), region = 112 }
 0xa4d   : > { %v4967_v13 = vadd.f32 %v4954_v31, %v4568_v34  ;;  %v4956_v50 = vpop.f32.mrb[17].mxu1  ;;  %v7504_v34 = vld [vmem:[#allocation13 + $0x128] ss:$12 sps:$4 sm:$0xff] (!%p6837_p4)   ;;  %v4997_v31 = vld [vmem:[#allocation2 + $0x30] sm:$0xff] (!%p6837_p4) }
 0xa4e   : > { %v4968_v55 = vadd.f32 %v4956_v50, %v4569_v24  ;;  %v4958_v36 = vpop.f32.mrb[18].mxu1  ;;  %v7505_v24 = vld [vmem:[#allocation13 + $0x68] ss:$12 sps:$4 sm:$0xff] (!%p6837_p4)   ;;  %7020 = vmatprep.subr.bf16.mxu1 (!%p6837_p4), %v7504_v34  ;;  %v5035_v50 = vmul.f32 (!%p6837_p4), %v5008_v23, %v4991_v49  ;;  %v5044_v34 = vmul.f32 (!%p6837_p4), %v5020_v15, %v5000_v21 }
 0xa4f   : > { %4979 = vst [vmem:[#allocation2 + $0x20] sm:$0xff] %v4967_v13  ;;  %v4973_v20 = vadd.f32 %v4958_v36, %v4574_v16  ;;  %v4960_v33 = vpop.f32.mrb[19].mxu1  ;;  %v7509_v16 = vld [vmem:[#allocation13 + $0x140] ss:$12 sps:$4 sm:$0xff] (!%p6837_p4)   ;;  %v7468_v13 = vld [vmem:[#allocation13 + $0x108] ss:$12 sps:$4 sm:$0xff] (!%p6837_p4)   ;;  %7021 = vmatpush3.bf16.msra.mxu1 (!%p6837_p4), %v7505_v24 }
 0xa50   : > { %4980 = vst [vmem:[#allocation2 + $0x28] sm:$0xff] %v4968_v55  ;;  %v4974_v53 = vadd.f32 %v4960_v33, %v4575_v30  ;;  %v5052_v30 = vrot.slane (!%p6837_p4), %v9577_v6, %v9204_v32  ;;  %v7469_v55 = vld [vmem:[#allocation13 + $0x124] ss:$12 sps:$4 sm:$0xff] (!%p6837_p4)   ;;  %v7510_v36 = vld [vmem:[#allocation13 + $0x80] ss:$12 sps:$4 sm:$0xff] (!%p6837_p4)   ;;  %7022 = vmatprep.subr.bf16.mxu1 (!%p6837_p4), %v7509_v16  ;;  %6109 = vmatpush1.bf16.msra.mxu0 (!%p6837_p4), %v7468_v13 }
 0xa51   : > { %4985 = vst [vmem:[#allocation2 + $0x50] sm:$0xff] %v4973_v20  ;;  %v5041_v20 = vmul.f32 (!%p6837_p4), %v5008_v23, %v4997_v31  ;;  %v7514_v33 = vld [vmem:[#allocation13 + $0x158] ss:$12 sps:$4 sm:$0xff] (!%p6837_p4)   ;;  %6110 = vmatprep.subr.bf16.mxu0 (!%p6837_p4), %v7469_v55  ;;  %v7508_v49 = vld [vmem:[#allocation13 + $0x1fc] ss:$12 sps:$4 sm:$0xff] (!%p6837_p4)   ;;  %v5038_v23 = vmul.f32 (!%p6837_p4), %v5020_v15, %v4994_v29  ;;  %v5060_v31 = vrot.slane (!%p6837_p4), %v9577_v6, %v9286_v1 }
 0xa52   : > { %4986 = vst [vmem:[#allocation2 + $0x58] sm:$0xff] %v4974_v53  ;;  %v7471_v53 = vld [vmem:[#allocation13 + $0x120] ss:$12 sps:$4 sm:$0xff] (!%p6837_p4)   ;;  %v5079_v12 = vadd.f32 (!%p6837_p4), %v5052_v30, %v5035_v50  ;;  %v7555_v24 = vld [vmem:[#allocation13 + $0x218] ss:$12 sps:$4 sm:$0xff] (!%p6837_p4)   ;;  %v5088_v13 = vadd.f32 (!%p6837_p4), %v5064_v63, %v5044_v34  ;;  %v5037_v55 = vmul.f32 (!%p6837_p4), %v5016_v22, %v4993_v5 }
 0xa53   : > { %7023 = vmatpush3.bf16.msra.mxu1 %v7510_v36  ;;  %v5085_v2 = vadd.f32 %v5052_v30, %v5041_v20  ;;  %v5082_v16 = vadd.f32 %v5064_v63, %v5038_v23  ;;  %v4999_v50 = vld [vmem:[#allocation2 + $0x40] sm:$0xff]  ;;  %v7506_v20 = vld [vmem:[#allocation13 + $0x1f8] ss:$12 sps:$4 sm:$0xff]   ;;  %v7536_v15 = vld [vmem:[#allocation13 + $0x288] ss:$12 sps:$4 sm:$0xff]   ;;  %v5068_v63 = vrot.slane %v9577_v6, %v9450_v9 }
 0xa54   : > { %7024 = vmatprep.subr.bf16.mxu1 %v7514_v33  ;;  %6111 = vmatpush1.bf16.msra.mxu0 %v7471_v53  ;;  %v5091_v59 = vmax.f32 %v5079_v12, 0.0  ;;  %v7559_v30 = vld [vmem:[#allocation13 + $0x2f0] ss:$12 sps:$4 sm:$0xff]   ;;  %v5043_v36 = vmul.f32 %v5016_v22, %v4999_v50  ;;  %v5100_v53 = vmax.f32 %v5088_v13, 0.0  ;;  %v5081_v12 = vadd.f32 %v5060_v31, %v5037_v55  ;;  %v7541_v13 = vld [vmem:[#allocation13 + $0x2a0] ss:$12 sps:$4 sm:$0xff]  }
 0xa55   : > { %6112 = vmatprep.subr.bf16.mxu0 %v7472_v17  ;;  %v5097_v48 = vmax.f32 %v5085_v2, 0.0  ;;  %v5094_v33 = vmax.f32 %v5082_v16, 0.0  ;;  %v7513_v17 = vld [vmem:[#allocation13 + $0x214] ss:$12 sps:$4 sm:$0xff]   ;;  %v7560_v2 = vld [vmem:[#allocation13 + $0x230] ss:$12 sps:$4 sm:$0xff]  }
 0xa56   : > { %v4995_v29 = vld [vmem:[#allocation2 + $0x20] sm:$0xff]  ;;  %v7543_v22 = vld [vmem:[#allocation13 + $0x2a4] ss:$12 sps:$4 sm:$0xff]  }
 0xa57   : > { %7025 = vmatpush3.bf16.msra.mxu1 %v7515_v61  ;;  %v5103_v37 = vpack.c.bf16 %v5097_v48, %v5091_v59  ;;  %v5087_v61 = vadd.f32 %v5060_v31, %v5043_v36  ;;  %v7518_v48 = vld [vmem:[#allocation13 + $0x22c] ss:$12 sps:$4 sm:$0xff]   ;;  %v7599_v55 = vld [vmem:[#allocation13 + $0x470] ss:$12 sps:$4 sm:$0xff]  }
 0xa58   : > { %7026 = vmatprep.subr.bf16.mxu1 %v7519_v56  ;;  %6113 = vmatpush1.bf16.msra.mxu0 %v7474_v7  ;;  %v5106_v56 = vpack.c.bf16 %v5100_v53, %v5094_v33  ;;  %v7564_v7 = vld [vmem:[#allocation13 + $0x3c8] ss:$12 sps:$4 sm:$0xff]   ;;  %v5001_v21 = vld [vmem:[#allocation2 + $0x50] sm:$0xff] }
 0xa59   : > { %6114 = vmatprep.subr.bf16.mxu0 %v7475_v8  ;;  %v5093_v8 = vmax.f32 %v5081_v12, 0.0  ;;  %v5099_v59 = vmax.f32 %v5087_v61, 0.0  ;;  %v7553_v53 = vld [vmem:[#allocation13 + $0x2d4] ss:$12 sps:$4 sm:$0xff]   ;;  %v7551_v12 = vld [vmem:[#allocation13 + $0x2d0] ss:$12 sps:$4 sm:$0xff]  }
 0xa5a   : > { %v7558_v61 = vld [vmem:[#allocation13 + $0x2ec] ss:$12 sps:$4 sm:$0xff]  }
 0xa5b   : > { %7027 = vmatpush3.bf16.msra.mxu1 %v7520_v54  ;;  %v7511_v54 = vld [vmem:[#allocation13 + $0x210] ss:$12 sps:$4 sm:$0xff]  }
 0xa5c   : > { %7034 = vmatprep.subr.bf16.mxu1 %v7524_v25  ;;  %6115 = vmatpush1.bf16.msra.mxu0 %v7477_v44  ;;  %v9595_v25 = vpack.c.bf16 %v5099_v59, %v5093_v8  ;;  %v7565_v44 = vld [vmem:[#allocation13 + $0x308] ss:$12 sps:$4 sm:$0xff]   ;;  %v7566_v59 = vld [vmem:[#allocation13 + $0x318] ss:$12 sps:$4 sm:$0xff]  }
 0xa5d   : > { %6116 = vmatprep.subr.bf16.mxu0 %v7478_v11  ;;  %v7569_v11 = vld [vmem:[#allocation13 + $0x3e0] ss:$12 sps:$4 sm:$0xff]   ;;  %v7568_v8 = vld [vmem:[#allocation13 + $0x31c] ss:$12 sps:$4 sm:$0xff]  }
 0xa5e   : > { %6248 = vmatmul.mubr.bf16.vlgmr.msra.gmra.mrb[0].mxu1 %v5103_v37 }
 0xa5f   : > { %7035 = vmatpush3.bf16.msra.mxu1 %v7525_v4  ;;  %6288 = vmatprep.mubr.bf16.mxu1 %v5106_v56  ;;  %v7516_v4 = vld [vmem:[#allocation13 + $0x228] ss:$12 sps:$4 sm:$0xff]  }
 0xa60   : > { %7036 = vmatprep.subr.bf16.mxu1 %v7529_v41  ;;  %6117 = vmatpush1.bf16.msra.mxu0 %v7480_v52  ;;  %v7570_v41 = vld [vmem:[#allocation13 + $0x320] ss:$12 sps:$4 sm:$0xff]   ;;  %v7574_v52 = vld [vmem:[#allocation13 + $0x3f8] ss:$12 sps:$4 sm:$0xff]  }
 0xa61   : > { %6129 = vmatprep.subr.bf16.mxu0 %v7483_v42  ;;  %v7521_v42 = vld [vmem:[#allocation13 + $0x240] ss:$12 sps:$4 sm:$0xff]  }
 0xa63   : > { %7037 = vmatpush3.bf16.msra.mxu1 %v7530_v45  ;;  %6119 = vmatmul.mubr.bf16.vlgmr.msra.gmra.mrb[0].mxu0 %v5103_v37  ;;  %v7523_v37 = vld [vmem:[#allocation13 + $0x244] ss:$12 sps:$4 sm:$0xff]   ;;  %v7528_v45 = vld [vmem:[#allocation13 + $0x25c] ss:$12 sps:$4 sm:$0xff]  }
 0xa64   : > { %7038 = vmatprep.subr.bf16.mxu1 %v7534_v46  ;;  %6130 = vmatpush1.bf16.msra.mxu0 %v7481_v57  ;;  %v7575_v46 = vld [vmem:[#allocation13 + $0x338] ss:$12 sps:$4 sm:$0xff]   ;;  %v7579_v57 = vld [vmem:[#allocation13 + $0x410] ss:$12 sps:$4 sm:$0xff]  }
 0xa65   : > { %6131 = vmatprep.subr.bf16.mxu0 %v7488_v39  ;;  %6161 = vmatprep.mubr.bf16.mxu0 %v5106_v56  ;;  %v7526_v39 = vld [vmem:[#allocation13 + $0x258] ss:$12 sps:$4 sm:$0xff]  }
 0xa66   : > { %v7563_v56 = vld [vmem:[#allocation13 + $0x304] ss:$12 sps:$4 sm:$0xff]  }
 0xa67   : > { %7039 = vmatpush3.bf16.msra.mxu1 %v7535_v47  ;;  %v7533_v47 = vld [vmem:[#allocation13 + $0x274] ss:$12 sps:$4 sm:$0xff]  }
 0xa68   : > { %7040 = vmatprep.subr.bf16.mxu1 %v7539_v18  ;;  %6132 = vmatpush1.bf16.msra.mxu0 %v7486_v27  ;;  %v7580_v18 = vld [vmem:[#allocation13 + $0x350] ss:$12 sps:$4 sm:$0xff]   ;;  %v7584_v27 = vld [vmem:[#allocation13 + $0x428] ss:$12 sps:$4 sm:$0xff]  }
 0xa69   : > { %6133 = vmatprep.subr.bf16.mxu0 %v7493_v38  ;;  %v7531_v38 = vld [vmem:[#allocation13 + $0x270] ss:$12 sps:$4 sm:$0xff]  }
 0xa6b   : > { %7041 = vmatpush3.bf16.msra.mxu1 %v7540_v26  ;;  %v7538_v26 = vld [vmem:[#allocation13 + $0x28c] ss:$12 sps:$4 sm:$0xff]  }
 0xa6c   : > { %7042 = vmatprep.subr.bf16.mxu1 %v7544_v3  ;;  %6134 = vmatpush1.bf16.msra.mxu0 %v7491_v10  ;;  %v5028_v3 = vrot.slane %v9575_v19, %v9453_v43  ;;  %v7585_v10 = vld [vmem:[#allocation13 + $0x368] ss:$12 sps:$4 sm:$0xff]  }
 0xa6d   : > { %6135 = vmatprep.subr.bf16.mxu0 %v7498_v14  ;;  %v7589_v14 = vld [vmem:[#allocation13 + $0x440] ss:$12 sps:$4 sm:$0xff]  }
 0xa6f   : > { %7043 = vmatpush3.bf16.msra.mxu1 %v7545_v60  ;;  %v5072_v60 = vrot.slane %v9577_v6, %v9453_v43  ;;  %v7595_v6 = vld [vmem:[#allocation13 + $0x398] ss:$12 sps:$4 sm:$0xff]  }
 0xa70   : > { %7044 = vmatprep.subr.bf16.mxu1 %v7549_v0  ;;  %6136 = vmatpush1.bf16.msra.mxu0 %v7496_v62  ;;  %v5024_v0 = vrot.slane %v9575_v19, %v9450_v9  ;;  %v4996_v62 = vld [vmem:[#allocation2 + $0x28] sm:$0xff] }
 0xa71   : > { %6137 = vmatprep.subr.bf16.mxu0 %v7503_v51  ;;  %v5002_v51 = vld [vmem:[#allocation2 + $0x58] sm:$0xff]  ;;  %v7548_v9 = vld [vmem:[#allocation13 + $0x2bc] ss:$12 sps:$4 sm:$0xff]  }
 0xa72   : > { %v5039_v23 = vmul.f32 %v5024_v0, %v4995_v29  ;;  %v7594_v19 = vld [vmem:[#allocation13 + $0x458] ss:$12 sps:$4 sm:$0xff]   ;;  %v5045_v34 = vmul.f32 %v5024_v0, %v5001_v21  ;;  %v7627_v29 = vld [vmem:[#allocation16 + $0x48] sm:$0xff]  }
 0xa73   : > { %7045 = vmatpush3.bf16.msra.mxu1 %v7550_v28  ;;  %v5040_v28 = vmul.f32 %v5028_v3, %v4996_v62  ;;  %v7616_v0 = vld [vmem:[#allocation13 + $0x438] ss:$12 sps:$4 sm:$0xff]   ;;  %v7621_v62 = vld [vmem:[#allocation13 + $0x454] ss:$12 sps:$4 sm:$0xff]   ;;  %v7628_v21 = vld [vmem:[#allocation16 + $0x8] sm:$0xff]  }
 0xa74   : > { %7046 = vmatprep.subr.bf16.mxu1 %v7554_v35  ;;  %6138 = vmatpush1.bf16.msra.mxu0 %v7501_v40  ;;  %v5046_v35 = vmul.f32 %v5028_v3, %v5002_v51  ;;  %v7590_v40 = vld [vmem:[#allocation13 + $0x380] ss:$12 sps:$4 sm:$0xff]   ;;  %v5083_v16 = vadd.f32 %v5068_v63, %v5039_v23  ;;  %v5089_v5 = vadd.f32 %v5068_v63, %v5045_v34  ;;  %v7610_v3 = vld [vmem:[#allocation13 + $0x408] ss:$12 sps:$4 sm:$0xff]   ;;  %v7619_v51 = vld [vmem:[#allocation13 + $0x450] ss:$12 sps:$4 sm:$0xff]  }
 0xa75   : > { %6139 = vmatprep.subr.bf16.mxu0 %v7508_v49  ;;  %v5084_v43 = vadd.f32 %v5072_v60, %v5040_v28  ;;  %v7622_v28 = vld [vmem:[#allocation13 + $0x468] ss:$12 sps:$4 sm:$0xff]   ;;  %v7635_v34 = vld [vmem:[#allocation16 + $0x68] sm:$0xff]  }
 0xa76   : > { %v5090_v49 = vadd.f32 %v5072_v60, %v5046_v35  ;;  %v5101_v36 = vmax.f32 %v5089_v5, 0.0  ;;  %v7618_v60 = vld [vmem:[#allocation13 + $0x43c] ss:$12 sps:$4 sm:$0xff]  }
 0xa77   : > { %7047 = vmatpush3.bf16.msra.mxu1 %v7555_v24  ;;  %v5096_v24 = vmax.f32 %v5084_v43, 0.0  ;;  %v7625_v35 = vld [vmem:[#allocation16 + $0x40] sm:$0xff]   ;;  %v7631_v43 = vld [vmem:[#allocation16 + $0x58] sm:$0xff]  }
 0xa78   : > { %7048 = vmatprep.subr.bf16.mxu1 %v7559_v30  ;;  %6140 = vmatpush1.bf16.msra.mxu0 %v7506_v20  ;;  %v5102_v31 = vmax.f32 %v5090_v49, 0.0  ;;  %v5095_v30 = vmax.f32 %v5083_v16, 0.0  ;;  %v7546_v20 = vld [vmem:[#allocation13 + $0x2b8] ss:$12 sps:$4 sm:$0xff]   ;;  %v7632_v49 = vld [vmem:[#allocation16 + $0x18] sm:$0xff]  }
 0xa79   : > { %6141 = vmatprep.subr.bf16.mxu0 %v7513_v17  ;;  %v7600_v17 = vld [vmem:[#allocation13 + $0x3b0] ss:$12 sps:$4 sm:$0xff]   ;;  %v7626_v63 = vld [vmem:[#allocation16] sm:$0xff]  }
 0xa7a   : > { %v5108_v50 = vpack.c.bf16 %v5102_v31, %v5096_v24  ;;  %v9606_v33 = vpack.c.bf16 %v5101_v36, %v5095_v30  ;;  %v7633_v23 = vld [vmem:[#allocation16 + $0x60] sm:$0xff]   ;;  %v7636_v24 = vld [vmem:[#allocation16 + $0x28] sm:$0xff]   ;;  %v7638_v30 = vld [vmem:[#allocation16 + $0x30] sm:$0xff]  }
 0xa7b   : > { %7049 = vmatpush3.bf16.msra.mxu1 %v7560_v2  ;;  %v7556_v2 = vld [vmem:[#allocation13 + $0x2e8] ss:$12 sps:$4 sm:$0xff]   ;;  %v7640_v36 = vld [vmem:[#allocation16 + $0x38] sm:$0xff]  }
 0xa7c   : > { %7056 = vmatprep.subr.bf16.mxu1 %v7564_v7  ;;  %6142 = vmatpush1.bf16.msra.mxu0 %v7511_v54  ;;  %v7561_v7 = vld [vmem:[#allocation13 + $0x300] ss:$12 sps:$4 sm:$0xff]  }
 0xa7d   : > { %6143 = vmatprep.subr.bf16.mxu0 %v7518_v48  ;;  %v7573_v54 = vld [vmem:[#allocation13 + $0x334] ss:$12 sps:$4 sm:$0xff]   ;;  %v7571_v48 = vld [vmem:[#allocation13 + $0x330] ss:$12 sps:$4 sm:$0xff]  }
 0xa7e   : > { %6289 = vmatmul.mubr.bf16.vlgmr.msra.gmra.mrb[4].mxu1 %v9595_v25 }
 0xa7f   : > { %7057 = vmatpush3.bf16.msra.mxu1 %v7565_v44  ;;  %6329 = vmatprep.mubr.bf16.mxu1 %v5108_v50  ;;  %v7578_v44 = vld [vmem:[#allocation13 + $0x34c] ss:$12 sps:$4 sm:$0xff]  }
 0xa80   : > { %7058 = vmatprep.subr.bf16.mxu1 %v7569_v11  ;;  %6144 = vmatpush1.bf16.msra.mxu0 %v7516_v4  ;;  %v7576_v11 = vld [vmem:[#allocation13 + $0x348] ss:$12 sps:$4 sm:$0xff]   ;;  %v7583_v4 = vld [vmem:[#allocation13 + $0x364] ss:$12 sps:$4 sm:$0xff]  }
 0xa81   : > { %6145 = vmatprep.subr.bf16.mxu0 %v7523_v37  ;;  %v7581_v37 = vld [vmem:[#allocation13 + $0x360] ss:$12 sps:$4 sm:$0xff]  }
 0xa83   : > { %7059 = vmatpush3.bf16.msra.mxu1 %v7570_v41  ;;  %v7588_v41 = vld [vmem:[#allocation13 + $0x37c] ss:$12 sps:$4 sm:$0xff]  }
 0xa84   : > { %7060 = vmatprep.subr.bf16.mxu1 %v7574_v52  ;;  %6146 = vmatpush1.bf16.msra.mxu0 %v7521_v42  ;;  %v7586_v52 = vld [vmem:[#allocation13 + $0x378] ss:$12 sps:$4 sm:$0xff]   ;;  %v7591_v42 = vld [vmem:[#allocation13 + $0x390] ss:$12 sps:$4 sm:$0xff]  }
 0xa85   : > { %6147 = vmatprep.subr.bf16.mxu0 %v7528_v45  ;;  %v7598_v45 = vld [vmem:[#allocation13 + $0x3ac] ss:$12 sps:$4 sm:$0xff]  }
 0xa87   : > { %7061 = vmatpush3.bf16.msra.mxu1 %v7575_v46  ;;  %v7596_v46 = vld [vmem:[#allocation13 + $0x3a8] ss:$12 sps:$4 sm:$0xff]  }
 0xa88   : > { %7062 = vmatprep.subr.bf16.mxu1 %v7579_v57  ;;  %6148 = vmatpush1.bf16.msra.mxu0 %v7526_v39  ;;  %v7603_v57 = vld [vmem:[#allocation13 + $0x3c4] ss:$12 sps:$4 sm:$0xff]   ;;  %v7601_v39 = vld [vmem:[#allocation13 + $0x3c0] ss:$12 sps:$4 sm:$0xff]  }
 0xa89   : > { %6149 = vmatprep.subr.bf16.mxu0 %v7533_v47  ;;  %v7606_v47 = vld [vmem:[#allocation13 + $0x3dc] ss:$12 sps:$4 sm:$0xff]  }
 0xa8b   : > { %7063 = vmatpush3.bf16.msra.mxu1 %v7580_v18  ;;  %v7604_v18 = vld [vmem:[#allocation13 + $0x3d8] ss:$12 sps:$4 sm:$0xff]  }
 0xa8c   : > { %7064 = vmatprep.subr.bf16.mxu1 %v7584_v27  ;;  %6150 = vmatpush1.bf16.msra.mxu0 %v7531_v38  ;;  %v7609_v27 = vld [vmem:[#allocation13 + $0x3f4] ss:$12 sps:$4 sm:$0xff]   ;;  %v7607_v38 = vld [vmem:[#allocation13 + $0x3f0] ss:$12 sps:$4 sm:$0xff]  }
 0xa8d   : > { %6151 = vmatprep.subr.bf16.mxu0 %v7538_v26  ;;  %v7612_v26 = vld [vmem:[#allocation13 + $0x40c] ss:$12 sps:$4 sm:$0xff]  }
 0xa8f   : > { %7065 = vmatpush3.bf16.msra.mxu1 %v7585_v10  ;;  %v7615_v10 = vld [vmem:[#allocation13 + $0x424] ss:$12 sps:$4 sm:$0xff]  }
 0xa90   : > { %7066 = vmatprep.subr.bf16.mxu1 %v7589_v14  ;;  %6152 = vmatpush1.bf16.msra.mxu0 %v7536_v15  ;;  %v7613_v14 = vld [vmem:[#allocation13 + $0x420] ss:$12 sps:$4 sm:$0xff]  }
 0xa91   : > { %6153 = vmatprep.subr.bf16.mxu0 %v7543_v22  ;;  %v7624_v15 = vld [vmem:[#allocation13 + $0x46c] ss:$12 sps:$4 sm:$0xff]  }
 0xa92   : > { %v7629_v22 = vld [vmem:[#allocation16 + $0x50] sm:$0xff]  }
 0xa93   : > { %7067 = vmatpush3.bf16.msra.mxu1 %v7590_v40  ;;  %v7630_v40 = vld [vmem:[#allocation16 + $0x10] sm:$0xff]  }
 0xa94   : > { %7068 = vmatprep.subr.bf16.mxu1 %v7594_v19  ;;  %6154 = vmatpush1.bf16.msra.mxu0 %v7541_v13  ;;  %v7634_v19 = vld [vmem:[#allocation16 + $0x20] sm:$0xff]  }
 0xa95   : > { %6155 = vmatprep.subr.bf16.mxu0 %v7548_v9 }
 0xa97   : > { %7069 = vmatpush3.bf16.msra.mxu1 %v7595_v6 }
 0xa98   : > { %7070 = vmatprep.subr.bf16.mxu1 %v7599_v55  ;;  %6156 = vmatpush1.bf16.msra.mxu0 %v7546_v20  ;;  %v7639_v55 = vld [vmem:[#allocation16 + $0x78] sm:$0xff]   ;;  %v8015_v20 = vmov 0.0  }
 0xa99   : > { %6157 = vmatprep.subr.bf16.mxu0 %v7553_v53 }
 0xa9b   : > { %7071 = vmatpush3.bf16.msra.mxu1 %v7600_v17 }
 0xa9c   : > { %6158 = vmatpush1.bf16.msra.mxu0 %v7551_v12  ;;  %7078 = vmatprep.subr.bf16.mxu1 %v7625_v35  ;;  %v7641_v35 = vld [vmem:[#allocation16 + $0x80] sm:$0xff]  }
 0xa9d   : > { %6159 = vmatprep.subr.bf16.mxu0 %v7558_v61 }
 0xa9e   : > { %6330 = vmatmul.mubr.bf16.vlgmr.msra.gmra.mrb[8].mxu1 %v9606_v33 }
 0xa9f   : > { %7079 = vmatpush3.bf16.msra.mxu1 %v7626_v63  ;;  %v7644_v63 = vld [vmem:[#allocation16 + $0x98] sm:$0xff]  }
 0xaa0   : > { %6160 = vmatpush1.bf16.msra.mxu0 %v7556_v2  ;;  %7080 = vmatprep.subr.bf16.mxu1 %v7627_v29  ;;  %v7645_v29 = vld [vmem:[#allocation16 + $0xa0] sm:$0xff]  }
 0xaa1   : > { %6172 = vmatprep.subr.bf16.mxu0 %v7563_v56 }
 0xaa3   : > { %6162 = vmatmul.mubr.bf16.vlgmr.msra.gmra.mrb[0].mxu0 %v9595_v25  ;;  %v7593_v25 = vld [vmem:[#allocation13 + $0x394] ss:$12 sps:$4 sm:$0xff]   ;;  %7081 = vmatpush3.bf16.msra.mxu1 %v7628_v21  ;;  %v7646_v21 = vld [vmem:[#allocation16 + $0xa8] sm:$0xff]  }
 0xaa4   : > { %6173 = vmatpush1.bf16.msra.mxu0 %v7561_v7  ;;  %6204 = vmatprep.mubr.bf16.mxu0 %v5108_v50  ;;  %v7637_v50 = vld [vmem:[#allocation16 + $0x70] sm:$0xff]  }
 0xaa5   : > { %6174 = vmatprep.subr.bf16.mxu0 %v7568_v8  ;;  %7082 = vmatprep.subr.bf16.mxu1 %v7629_v22  ;;  %v7647_v22 = vld [vmem:[#allocation16 + $0xb0] sm:$0xff]  }
 0xaa7   : > { %7083 = vmatpush3.bf16.msra.mxu1 %v7630_v40  ;;  %v7648_v40 = vld [vmem:[#allocation16 + $0xb8] sm:$0xff]  }
 0xaa8   : > { %6175 = vmatpush1.bf16.msra.mxu0 %v7566_v59  ;;  %7084 = vmatprep.subr.bf16.mxu1 %v7631_v43 }
 0xaa9   : > { %6176 = vmatprep.subr.bf16.mxu0 %v7573_v54 }
 0xaab   : > { %7085 = vmatpush3.bf16.msra.mxu1 %v7632_v49 }
 0xaac   : > { %6177 = vmatpush1.bf16.msra.mxu0 %v7571_v48  ;;  %7086 = vmatprep.subr.bf16.mxu1 %v7633_v23 }
 0xaad   : > { %6178 = vmatprep.subr.bf16.mxu0 %v7578_v44 }
 0xaaf   : > { %7087 = vmatpush3.bf16.msra.mxu1 %v7634_v19 }
 0xab0   : > { %6179 = vmatpush1.bf16.msra.mxu0 %v7576_v11  ;;  %7088 = vmatprep.subr.bf16.mxu1 %v7635_v34 }
 0xab1   : > { %6180 = vmatprep.subr.bf16.mxu0 %v7583_v4 }
 0xab3   : > { %7089 = vmatpush3.bf16.msra.mxu1 %v7636_v24 }
 0xab4   : > { %6181 = vmatpush1.bf16.msra.mxu0 %v7581_v37  ;;  %7090 = vmatprep.subr.bf16.mxu1 %v7637_v50 }
 0xab5   : > { %6182 = vmatprep.subr.bf16.mxu0 %v7588_v41 }
 0xab7   : > { %7091 = vmatpush3.bf16.msra.mxu1 %v7638_v30 }
 0xab8   : > { %6183 = vmatpush1.bf16.msra.mxu0 %v7586_v52  ;;  %7092 = vmatprep.subr.bf16.mxu1 %v7639_v55 }
 0xab9   : > { %6184 = vmatprep.subr.bf16.mxu0 %v7593_v25 }
 0xabb   : > { %7093 = vmatpush3.bf16.msra.mxu1 %v7640_v36 }
 0xabc   : > { %6185 = vmatpush1.bf16.msra.mxu0 %v7591_v42  ;;  %7109 = vmatprep.subr.bf16.mxu1 %v8015_v20 }
 0xabd   : > { %6186 = vmatprep.subr.bf16.mxu0 %v7598_v45 }
 0xac0   : > { %6187 = vmatpush1.bf16.msra.mxu0 %v7596_v46 }
 0xac1   : > { %6188 = vmatprep.subr.bf16.mxu0 %v7603_v57 }
 0xac4   : > { %6189 = vmatpush1.bf16.msra.mxu0 %v7601_v39 }
 0xac5   : > { %6190 = vmatprep.subr.bf16.mxu0 %v7606_v47 }
 0xac8   : > { %6191 = vmatpush1.bf16.msra.mxu0 %v7604_v18 }
 0xac9   : > { %6192 = vmatprep.subr.bf16.mxu0 %v7609_v27 }
 0xacc   : > { %6193 = vmatpush1.bf16.msra.mxu0 %v7607_v38 }
 0xacd   : > { %6194 = vmatprep.subr.bf16.mxu0 %v7612_v26 }
 0xad0   : > { %6195 = vmatpush1.bf16.msra.mxu0 %v7610_v3 }
 0xad1   : > { %6196 = vmatprep.subr.bf16.mxu0 %v7615_v10 }
 0xad4   : > { %6197 = vmatpush1.bf16.msra.mxu0 %v7613_v14 }
 0xad5   : > { %6198 = vmatprep.subr.bf16.mxu0 %v7618_v60 }
 0xad8   : > { %6199 = vmatpush1.bf16.msra.mxu0 %v7616_v0 }
 0xad9   : > { %6200 = vmatprep.subr.bf16.mxu0 %v7621_v62 }
 0xadc   : > { %6201 = vmatpush1.bf16.msra.mxu0 %v7619_v51 }
 0xadd   : > { %6202 = vmatprep.subr.bf16.mxu0 %v7624_v15 }
 0xae0   : > { %6203 = vmatpush1.bf16.msra.mxu0 %v7622_v28 }
 0xae3   : > { %6205 = vmatmul.mubr.bf16.vlgmr.msra.gmra.mrb[0].mxu0 %v9606_v33  ;;  %v5301_v33 = vld [vmem:[#allocation14] sm:$0x7] }
 0xae4   : > { %v5314_v53 = vrot.slane %v5301_v33, %v9286_v1  ;;  %v5306_v57 = vrot.slane %v5301_v33, %v9204_v32  ;;  %v5310_v39 = vrot.slane %v5301_v33, %v9210_v58  ;;  %v7642_v32 = vld [vmem:[#allocation16 + $0x88] sm:$0xff]   ;;  %v7643_v58 = vld [vmem:[#allocation16 + $0x90] sm:$0xff]  }
 0xb31   : > { %v7028_v31 = vpop.f32.mrb[0].mxu1 }
 0xb32   : > { %v7029_v16 = vpop.f32.mrb[1].mxu1 }
 0xb33   : > { %v7030_v13 = vadd.f32 %v7029_v16, %v7028_v31  ;;  %v7031_v5 = vpop.f32.mrb[2].mxu1  ;;  %v6982_v31 = vld [vmem:[#allocation17] ss:$0 sm:$0xff] }
 0xb34   : > { %v7032_v9 = vpop.f32.mrb[3].mxu1 }
 0xb35   : > { %v7033_v6 = vadd.f32 %v7032_v9, %v7031_v5  ;;  %v6250_v17 = vadd.f32 %v7030_v13, %v5314_v53 }
 0xb37   : > { %v6253_v2 = vadd.f32 %v7033_v6, %v5314_v53 }
 0xb51   : > { %v7050_v12 = vpop.f32.mrb[4].mxu1 }
 0xb52   : > { %v7051_v61 = vpop.f32.mrb[5].mxu1 }
 0xb53   : > { %v7052_v56 = vadd.f32 %v7051_v61, %v7050_v12  ;;  %v7053_v7 = vpop.f32.mrb[6].mxu1 }
 0xb54   : > { %v7054_v8 = vpop.f32.mrb[7].mxu1 }
 0xb55   : > { %v6291_v59 = vadd.f32 %v7052_v56, %v6250_v17  ;;  %v7055_v54 = vadd.f32 %v7054_v8, %v7053_v7 }
 0xb57   : > { %v6294_v48 = vadd.f32 %v7055_v54, %v6253_v2 }
 0xb71   : > { %v7072_v44 = vpop.f32.mrb[8].mxu1 }
 0xb72   : > { %v7073_v11 = vpop.f32.mrb[9].mxu1 }
 0xb73   : > { %v7074_v4 = vadd.f32 %v7073_v11, %v7072_v44  ;;  %v7075_v37 = vpop.f32.mrb[10].mxu1 }
 0xb74   : > { %v7076_v41 = vpop.f32.mrb[11].mxu1 }
 0xb75   : > { %v6332_v52 = vadd.f32 %v7074_v4, %v6291_v59  ;;  %v7077_v25 = vadd.f32 %v7076_v41, %v7075_v37 }
 0xb77   : > { %v6340_v42 = vmax.f32 %v6332_v52, 0.0  ;;  %v6335_v45 = vadd.f32 %v7077_v25, %v6294_v48 }
 0xb79   : > { %v6343_v1 = vmax.f32 %v6335_v45, 0.0 }
 0xb7b   : > { %v6346_v46 = vpack.c.bf16 %v6343_v1, %v6340_v42 }
 0xbb6   : > { %v6206_v47 = vpop.f32.mrb[0].mxu0 }
 0xbb7   : > { %v7285_v18 = vadd.f32 %v6206_v47, %v5306_v57  ;;  %v6208_v27 = vpop.f32.mrb[1].mxu0 }
 0xbb8   : > { %v7286_v38 = vadd.f32 %v6208_v27, %v5310_v39  ;;  %v6210_v26 = vpop.f32.mrb[2].mxu0 }
 0xbb9   : > { %v7287_v3 = vadd.f32 %v6210_v26, %v5306_v57  ;;  %v6212_v10 = vpop.f32.mrb[3].mxu0  ;;  %v6338_v60 = vmax.f32 %v7285_v18, 0.0 }
 0xbba   : > { %v7288_v14 = vadd.f32 %v6212_v10, %v5310_v39  ;;  %v6339_v62 = vmax.f32 %v7286_v38, 0.0 }
 0xbbb   : > { %v6341_v0 = vmax.f32 %v7287_v3, 0.0 }
 0xbbc   : > { %v6342_v51 = vmax.f32 %v7288_v14, 0.0 }
 0xbbd   : > { %v6344_v15 = vpack.c.bf16 %v6341_v0, %v6338_v60 }
 0xbbe   : > { %v6345_v28 = vpack.c.bf16 %v6342_v51, %v6339_v62 }
 0xbc0   : > { %6578 = vmatprep.mubr.bf16.mxu1 %v6345_v28 }
 0xbc1   : > { %6579 = vmatmul.mubr.bf16.vlgmr.msra.gmra.mrb[12].mxu1 %v6344_v15 }
 0xbc2   : > { %7110 = vmatpush3.bf16.msra.mxu1 %v7641_v35  ;;  %7125 = vmatprep.mubr.msk.bf16.mxu1 %vm8016_vm0, %v8015_v20 }
 0xbc3   : > { %7111 = vmatprep.subr.bf16.mxu1 %v8015_v20 }
 0xbc6   : > { %7112 = vmatpush3.bf16.msra.mxu1 %v7642_v32 }
 0xbc7   : > { %7113 = vmatprep.subr.bf16.mxu1 %v8015_v20 }
 0xbca   : > { %7114 = vmatpush3.bf16.msra.mxu1 %v7643_v58 }
 0xbcb   : > { %7115 = vmatprep.subr.bf16.mxu1 %v8015_v20 }
 0xbce   : > { %7116 = vmatpush3.bf16.msra.mxu1 %v7644_v63 }
 0xbcf   : > { %7117 = vmatprep.subr.bf16.mxu1 %v8015_v20 }
 0xbd2   : > { %7118 = vmatpush3.bf16.msra.mxu1 %v7645_v29 }
 0xbd3   : > { %7119 = vmatprep.subr.bf16.mxu1 %v8015_v20 }
 0xbd6   : > { %7120 = vmatpush3.bf16.msra.mxu1 %v7646_v21 }
 0xbd7   : > { %7121 = vmatprep.subr.bf16.mxu1 %v8015_v20 }
 0xbda   : > { %7122 = vmatpush3.bf16.msra.mxu1 %v7647_v22 }
 0xbdb   : > { %7123 = vmatprep.subr.bf16.mxu1 %v8015_v20 }
 0xbde   : > { %7124 = vmatpush3.bf16.msra.mxu1 %v7648_v40 }
 0xbe1   : > { %7126 = vmatmul.mubr.bf16.vlgmr.msra.gmra.mrb[16].mxu1 %v6346_v46 }
 0xc94   : > { %v7094_v43 = vpop.f32.mrb[12].mxu1 }
 0xc95   : > { %v7095_v49 = vpop.f32.mrb[13].mxu1 }
 0xc96   : > { %v7096_v23 = vadd.f32 %v7095_v49, %v7094_v43  ;;  %v7097_v19 = vpop.f32.mrb[14].mxu1 }
 0xc97   : > { %v7098_v34 = vpop.f32.mrb[15].mxu1 }
 0xc98   : > { %v7099_v24 = vadd.f32 %v7098_v34, %v7097_v19  ;;  %v6581_v16 = vadd.f32 %v7096_v23, %v6982_v31 }
 0xc9a   : > { %v6584_v6 = vadd.f32 %v7099_v24, %v6982_v31 }
 0xcb4   : > { %v6621_v13 = vpop.f32.mrb[16].mxu1 }
 0xcb5   : > { %v6622_v5 = vadd.f32 %v6621_v13, %v6581_v16  ;;  %v7127_v9 = vpop.f32.mrb[17].mxu1 }
 0xcb6   : > { %v6624_v50 = vpop.f32.mrb[18].mxu1 }
 0xcb7   : > { %6628 = vst [vmem:[%s9720_s30] sm:$0xff] %v6622_v5  ;;  %v6625_v30 = vadd.f32 %v6624_v50, %v6584_v6  ;;  %v7128_v55 = vpop.f32.mrb[19].mxu1 }
 0xcb9   : > { %6629 = vst [vmem:[%s9720_s30 + $0x8] sm:$0xff] %v6625_v30 }
 0xcba PF: > { %s9721_s20 = sld [smem:[#allocation28_spill]]  ;;  %s9722_s0 = sld [smem:[#allocation26_spill]] }
 0xcbb   : > { %s9723_s19 = sld [smem:[#allocation29_spill]]  ;;  %s9724_s17 = smov %s7987_s18 }
 0xcc0   : > { %p30_p5 = scmp.ge.s32.totalorder %s9721_s20, 4   ;;  %s9725_s18 = smov %s9722_s0 }
 0xcc2   :  { %32 = sbr.rel (!%p30_p5) target bundleno = 18 (0x12), region = 169 }
 0xcc9   :  { %6641 = vsyncpa [#allocation4], 1 }
 0xcca   :  { %6643 = vsyncpa [#allocation4 + $0x1], 1 }
 0xccb   :  { %6644 = vsyncpa [#allocation6], 1 }
 0xccc   :  { %6646 = vsyncpa [#allocation6 + $0x1], 1 }
 0xccd   :  { %6647 = vsyncpa [#allocation9], 1 }
 0xcce   :  { %6649 = vsyncpa [#allocation9 + $0x1], 1 }
 0xccf   :  { %6650 = vsyncpa [#allocation12], 1 }
 0xcd0   :  { %6651 = vsyncpa [#allocation15], 1 }
 0xcd1   :  { %6652 = vsyncpa [#allocation18], 1 }

</bundles_post_ra>
